<compile_context>
chip_gen: v5e
topology: v5e:2x2
jax: 0.10.0
libtpu: 0.0.40
codegen_flags: <defaults>
</compile_context>

<pallas_src>
import math
import functools

import jax
import jax.numpy as jnp
from jax import lax
from jax.experimental import pallas as pl
from jax.experimental.pallas import tpu as pltpu


# ----------------------------------------------------------------------------- in-kernel math

_SQRT1_2 = 1.0 / math.sqrt(2.0)


def _erf(x):
    # TODO(synk): erf via the Abramowitz-Stegun 7.1.26 rational approximation (|err| < 1.5e-7,
    # i.e. within f32 precision) because lax.erf lowering inside Mosaic is not guaranteed.
    a1, a2, a3, a4, a5 = 0.254829592, -0.284496736, 1.421413741, -1.453152027, 1.061405429
    pp = 0.3275911
    ax = jnp.abs(x)
    t = 1.0 / (1.0 + pp * ax)
    poly = ((((a5 * t + a4) * t + a3) * t + a2) * t + a1) * t
    y = 1.0 - poly * jnp.exp(-ax * ax)
    return jnp.where(x < 0.0, -y, y)


def _gelu(x):
    return x * 0.5 * (1.0 + _erf(x * _SQRT1_2))


def _sigmoid(x):
    return 1.0 / (1.0 + jnp.exp(-x))


def _ln(x, w, b, eps):
    # TF-style LayerNorm (eps inside the sqrt); rsqrt -> EUP slot.
    mean = jnp.mean(x, axis=-1, keepdims=True)
    c = x - mean
    var = jnp.mean(c * c, axis=-1, keepdims=True)
    return c * lax.rsqrt(var + eps) * w + b


def _mha(hq, hkv, wq, bq, wk, bk, wv, bv, wo, *, base, heads, scale, addm, bias, lambd):
    """Multi-head attention with head-split weight refs; returns [Tq, D] (out-bias excluded)."""
    acc = jnp.zeros((hq.shape[0], wo.shape[-1]), jnp.float32)
    for hd in range(heads):                                # static unroll over heads
        i = base + hd
        # fold 1/sqrt(dk) into the projected query (incl. its bias), same as torch's scaling
        q = (jnp.dot(hq, wq[i], preferred_element_type=jnp.float32) + bq[i]) * scale
        k = jnp.dot(hkv, wk[i], preferred_element_type=jnp.float32) + bk[i]
        v = jnp.dot(hkv, wv[i], preferred_element_type=jnp.float32) + bv[i]
        s = lax.dot_general(q, k, (((1,), (1,)), ((), ())),
                            preferred_element_type=jnp.float32)       # [Tq, Tk]
        if bias is not None and lambd != 0.0:
            s = s + lambd * bias[hd]
        if addm is not None:
            s = s + addm                                    # additive -1e9 mask along keys
        m = jnp.max(s, axis=-1, keepdims=True)
        p = jnp.exp(s - m)
        p = p * pl.reciprocal(jnp.sum(p, axis=-1, keepdims=True), approx=True)
        ctx = jnp.dot(p, v, preferred_element_type=jnp.float32)       # [Tq, dk]
        acc = acc + jnp.dot(ctx, wo[i], preferred_element_type=jnp.float32)
    return acc


def _ffn(x, lnw, lnb, w1, b1, w2, b2, eps):
    h = _ln(x, lnw, lnb, eps)
    h = _gelu(jnp.dot(h, w1, preferred_element_type=jnp.float32) + b1)
    return x + jnp.dot(h, w2, preferred_element_type=jnp.float32) + b2


# ----------------------------------------------------------------------------- BlockSpec helpers

def _rep_spec(shape):
    """Full-array block, identical at every grid step (weights / shared tensors)."""
    shape = tuple(int(s) for s in shape)
    n = len(shape)
    return pl.BlockSpec(shape, lambda b: (0,) * n)


def _batch_spec(block_shape):
    """Per-batch block: leading grid axis selects the batch row."""
    block_shape = tuple(int(s) for s in block_shape)
    n = len(block_shape)
    return pl.BlockSpec(block_shape, lambda b: (b,) + (0,) * (n - 1))


_PARALLEL = pltpu.CompilerParams(dimension_semantics=("parallel",))


# ----------------------------------------------------------------------------- kernels

def _embed_encoder_kernel(*refs, hw_layers, num_layers, heads, scale, use_mask, eps):
    """Highway + fc + positional-emb + LN + N x (self-attn + FFN) encoder layers + final LN."""
    it = iter(refs)
    x_ref = next(it)
    mask_ref = next(it) if use_mask else None
    # highway + positional-LN weights
    lw, lb, gw, gb, fcw, fcb, pos, pnw, pnb = [next(it) for _ in range(9)]
    # stacked encoder-layer weights
    (liw, lib, wq, bq, wk, bk, wv, bv, wo, bo,
     low, lob, w1, b1, w2, b2, fnw, fnb) = [next(it) for _ in range(18)]
    o_ref = next(it)

    x = x_ref[0]                                            # [T, D]
    addm = mask_ref[0] if use_mask else None                # [1, T]

    # ---- Highway layers + fc ----
    for i in range(hw_layers):                              # static unroll
        hh = _gelu(jnp.dot(x, lw[i], preferred_element_type=jnp.float32) + lb[i])
        tt = _sigmoid(jnp.dot(x, gw[i], preferred_element_type=jnp.float32) + gb[i])
        x = tt * hh + (1.0 - tt) * x
    x = jnp.dot(x, fcw[...], preferred_element_type=jnp.float32) + fcb[...]

    # ---- positional embedding + LayerNorm ----
    x = _ln(x + pos[...], pnw[...], pnb[...], eps)

    # ---- encoder layers ----
    for l in range(num_layers):                             # static unroll
        h = _ln(x, liw[l], lib[l], eps)
        x = x + _mha(h, h, wq, bq, wk, bk, wv, bv, wo, base=l * heads, heads=heads,
                     scale=scale, addm=addm, bias=None, lambd=0.0) + bo[l]
        x = _ffn(x, low[l], lob[l], w1[l], b1[l], w2[l], b2[l], eps)

    o_ref[0] = _ln(x, fnw[...], fnb[...], eps)


def _cr_encoder_kernel(*refs, num_layers, heads, concepts, scale_s, scale_c,
                       lambds, use_bias, use_smask, use_cmask, eps):
    """N x (self-attn + concept cross-attn + FFN) CrEncoder layers + final LN."""
    it = iter(refs)
    x_ref = next(it)
    m_ref = next(it)
    bias_ref = next(it) if use_bias else None
    smask_ref = next(it) if use_smask else None
    cmask_ref = next(it) if use_cmask else None
    (liw, lib, swq, sbq, swk, sbk, swv, sbv, swo, sbo,
     lmw, lmb, cwq, cbq, cwk, cbk, cwv, cbv, cwo, cbo,
     low, lob, w1, b1, w2, b2, fnw, fnb) = [next(it) for _ in range(28)]
    o_ref = next(it)

    x = x_ref[0]                                            # [Tq, D]
    mem = m_ref[0]                                          # [Tk, D]
    bias = bias_ref[0] if use_bias else None                # [C, Tq, Tk]
    smask = smask_ref[0] if use_smask else None             # [1, Tq]
    cmask = cmask_ref[0] if use_cmask else None             # [1, Tk]

    for l in range(num_layers):                             # static unroll
        # self-attention sub-block
        h = _ln(x, liw[l], lib[l], eps)
        x = x + _mha(h, h, swq, sbq, swk, sbk, swv, sbv, swo, base=l * heads, heads=heads,
                     scale=scale_s, addm=smask, bias=None, lambd=0.0) + sbo[l]
        # concept cross-attention sub-block (K,V from memory, lambd * concept bias)
        h = _ln(x, lmw[l], lmb[l], eps)
        x = x + _mha(h, mem, cwq, cbq, cwk, cbk, cwv, cbv, cwo, base=l * concepts,
                     heads=concepts, scale=scale_c, addm=cmask,
                     bias=bias, lambd=lambds[l]) + cbo[l]
        # feed-forward sub-block
        x = _ffn(x, low[l], lob[l], w1[l], b1[l], w2[l], b2[l], eps)

    o_ref[0] = _ln(x, fnw[...], fnb[...], eps)


def _head_kernel(q_ref, a_ref, pw_ref, pb_ref, cw_ref, cb_ref, o_ref):
    # mean/max pooling + "concat" (split-matmul) + proj + classifier, per batch row.
    q = q_ref[0]                                            # [Tq, D]
    a = a_ref[0]                                            # [Ta, D]
    q_ave = jnp.mean(q, axis=0, keepdims=True)              # [1, D]
    q_max = jnp.max(q, axis=0, keepdims=True)
    a_ave = jnp.mean(a, axis=0, keepdims=True)
    a_max = jnp.max(a, axis=0, keepdims=True)
    # cat((q_ave,q_max,a_ave,a_max)) @ Wproj  ==  sum_i chunk_i @ Wproj[i*D:(i+1)*D]
    proj = (jnp.dot(q_ave, pw_ref[0], preferred_element_type=jnp.float32)
            + jnp.dot(q_max, pw_ref[1], preferred_element_type=jnp.float32)
            + jnp.dot(a_ave, pw_ref[2], preferred_element_type=jnp.float32)
            + jnp.dot(a_max, pw_ref[3], preferred_element_type=jnp.float32)
            + pb_ref[...])
    o_ref[0] = jnp.dot(proj, cw_ref[...], preferred_element_type=jnp.float32) + cb_ref[...]


# ----------------------------------------------------------------------------- wrappers

def fused_embed_encoder(x, addmask, p_hw, p_pos, p_enc, heads, eps=1e-12):
    B, T, D = x.shape
    N = int(p_enc['ff']['w1'].shape[0])
    hw_layers = int(p_hw['lin_w'].shape[0])
    use_mask = addmask is not None
    scale = 1.0 / math.sqrt(D // heads)

    inputs, in_specs = [x], [_batch_spec((1, T, D))]
    if use_mask:
        inputs.append(addmask)                              # [B, 1, T] additive mask
        in_specs.append(_batch_spec((1, 1, T)))
    a = p_enc['attn']
    weights = [p_hw['lin_w'], p_hw['lin_b'], p_hw['gate_w'], p_hw['gate_b'],
               p_hw['fc_w'], p_hw['fc_b'],
               p_pos['pos_emb'][:T], p_pos['norm']['w'], p_pos['norm']['b'],
               p_enc['lnin']['w'], p_enc['lnin']['b'],
               a['wq'], a['bq'], a['wk'], a['bk'], a['wv'], a['bv'], a['wo'], a['bo'],
               p_enc['lnout']['w'], p_enc['lnout']['b'],
               p_enc['ff']['w1'], p_enc['ff']['b1'], p_enc['ff']['w2'], p_enc['ff']['b2'],
               p_enc['fln']['w'], p_enc['fln']['b']]
    inputs += weights
    in_specs += [_rep_spec(w.shape) for w in weights]

    kernel = functools.partial(_embed_encoder_kernel, hw_layers=hw_layers, num_layers=N,
                               heads=heads, scale=scale, use_mask=use_mask, eps=eps)
    return pl.pallas_call(
        kernel,
        out_shape=jax.ShapeDtypeStruct((B, T, D), jnp.float32),
        grid=(B,),
        in_specs=in_specs,
        out_specs=_batch_spec((1, T, D)),
        compiler_params=_PARALLEL,
    )(*inputs)


def fused_cr_encoder(x, mem, concept, self_mask, cross_mask, lambd, heads, concepts,
                     concept_layers, p, eps=1e-12):
    B, Tq, D = x.shape
    Tk = mem.shape[1]
    N = int(p['ff']['w1'].shape[0])
    lambds = tuple(float(lambd) if i in concept_layers else 0.0 for i in range(N))
    use_bias = (concept is not None) and any(l != 0.0 for l in lambds)
    use_smask = self_mask is not None
    use_cmask = cross_mask is not None
    scale_s = 1.0 / math.sqrt(D // heads)
    scale_c = 1.0 / math.sqrt(D // concepts)

    inputs, in_specs = [x, mem], [_batch_spec((1, Tq, D)), _batch_spec((1, Tk, D))]
    if use_bias:
        bias = jnp.transpose(concept, (0, 3, 1, 2))         # [B, C, Tq, Tk]; lambd applied in-kernel
        inputs.append(bias)
        in_specs.append(_batch_spec((1, concepts, Tq, Tk)))
    if use_smask:
        inputs.append(self_mask)                            # [B, 1, Tq]
        in_specs.append(_batch_spec((1, 1, Tq)))
    if use_cmask:
        inputs.append(cross_mask)                           # [B, 1, Tk]
        in_specs.append(_batch_spec((1, 1, Tk)))
    sa, ca = p['self_attn'], p['cross_attn']
    weights = [p['lnin']['w'], p['lnin']['b'],
               sa['wq'], sa['bq'], sa['wk'], sa['bk'], sa['wv'], sa['bv'], sa['wo'], sa['bo'],
               p['lnmid']['w'], p['lnmid']['b'],
               ca['wq'], ca['bq'], ca['wk'], ca['bk'], ca['wv'], ca['bv'], ca['wo'], ca['bo'],
               p['lnout']['w'], p['lnout']['b'],
               p['ff']['w1'], p['ff']['b1'], p['ff']['w2'], p['ff']['b2'],
               p['fln']['w'], p['fln']['b']]
    inputs += weights
    in_specs += [_rep_spec(w.shape) for w in weights]

    kernel = functools.partial(_cr_encoder_kernel, num_layers=N, heads=heads,
                               concepts=concepts, scale_s=scale_s, scale_c=scale_c,
                               lambds=lambds, use_bias=use_bias,
                               use_smask=use_smask, use_cmask=use_cmask, eps=eps)
    return pl.pallas_call(
        kernel,
        out_shape=jax.ShapeDtypeStruct((B, Tq, D), jnp.float32),
        grid=(B,),
        in_specs=in_specs,
        out_specs=_batch_spec((1, Tq, D)),
        compiler_params=_PARALLEL,
    )(*inputs)


def fused_head(question, answer, p_proj, p_cls):
    B, Tq, D = question.shape
    Ta = answer.shape[1]
    weights = [p_proj['w'], p_proj['b'], p_cls['w'], p_cls['b']]
    out = pl.pallas_call(
        _head_kernel,
        out_shape=jax.ShapeDtypeStruct((B, 1, 3), jnp.float32),
        grid=(B,),
        in_specs=[_batch_spec((1, Tq, D)), _batch_spec((1, Ta, D))]
                 + [_rep_spec(w.shape) for w in weights],
        out_specs=_batch_spec((1, 1, 3)),
        compiler_params=_PARALLEL,
    )(question, answer, *weights)
    return out[:, 0, :]


# ----------------------------------------------------------------------------- model glue

def _additive_mask(mask):
    # masked_fill(mask == 0, -1e9) for a 0/1 mask, expressed as an additive bias.
    if mask is None:
        return None
    B, T = mask.shape
    return ((mask.astype(jnp.float32) - 1.0) * 1e9).reshape(B, 1, T)


def semh_forward(params, question, answer, qmask=None, amask=None,
                 qa_concept=None, aq_concept=None):
    cfg = params['cfg']
    heads, nc, clayers = cfg['heads'], cfg['num_concepts'], cfg['concept_layers']
    qam = _additive_mask(qmask)
    aam = _additive_mask(amask)

    question = fused_embed_encoder(question, qam, params['highway'], params['position'],
                                   params['encoder_q'], heads)
    answer = fused_embed_encoder(answer, aam, params['highway'], params['position'],
                                 params['encoder_a'], heads)
    # NOTE: encoder_aq consumes the *updated* question (same statement order as the PyTorch model).
    question = fused_cr_encoder(question, answer, qa_concept, qam, aam, 100.0,
                                heads, nc, clayers, params['encoder_qa'])
    answer = fused_cr_encoder(answer, question, aq_concept, aam, qam, 100.0,
                              heads, nc, clayers, params['encoder_aq'])
    score = fused_head(question, answer, params['proj'], params['classifier'])
    return score, None, None


# ----------------------------------------------------------------------------- deterministic init
# Weights are stored pre-transposed / pre-head-split / pre-stacked over layers so no per-forward
# weight reshapes are needed:
#   linear w: [in,out] (transpose of torch [out,in])
#   attention wq/wk/wv: [N*H, D, dk], wo: [N*H, dk, D], bo: [N, 1, D]
#   proj w: [4, D, 4D] (split over the concat dim)

def _normal(key, shape, std=0.02):
    return std * jax.random.normal(key, shape, jnp.float32)


def _ln_single(d):
    return {'w': jnp.ones((1, d), jnp.float32), 'b': jnp.zeros((1, d), jnp.float32)}


def _ln_stack(d, N):
    return {'w': jnp.ones((N, 1, d), jnp.float32), 'b': jnp.zeros((N, 1, d), jnp.float32)}


def _attn_stack(nk, d, heads, N):
    dk = d // heads
    def head_in():        # torch [out,in] -> [in=d,out=d] -> head-split [H, d, dk]
        return jnp.transpose(_normal(nk(), (d, d)).reshape(d, heads, dk), (1, 0, 2))
    def head_out():       # output projection split over heads: [H, dk, d]
        return _normal(nk(), (d, d)).reshape(heads, dk, d)
    return {'wq': jnp.concatenate([head_in() for _ in range(N)], axis=0),
            'bq': jnp.zeros((N * heads, 1, dk), jnp.float32),
            'wk': jnp.concatenate([head_in() for _ in range(N)], axis=0),
            'bk': jnp.zeros((N * heads, 1, dk), jnp.float32),
            'wv': jnp.concatenate([head_in() for _ in range(N)], axis=0),
            'bv': jnp.zeros((N * heads, 1, dk), jnp.float32),
            'wo': jnp.concatenate([head_out() for _ in range(N)], axis=0),
            'bo': jnp.zeros((N, 1, d), jnp.float32)}


def _ff_stack(nk, d, d_ff, N):
    return {'w1': jnp.stack([_normal(nk(), (d, d_ff)) for _ in range(N)]),
            'b1': jnp.zeros((N, 1, d_ff), jnp.float32),
            'w2': jnp.stack([_normal(nk(), (d_ff, d)) for _ in range(N)]),
            'b2': jnp.zeros((N, 1, d), jnp.float32)}


def init_highway(nk, d, num_layers=2):
    return {'lin_w': jnp.stack([_normal(nk(), (d, d)) for _ in range(num_layers)]),
            'lin_b': jnp.zeros((num_layers, 1, d), jnp.float32),
            'gate_w': jnp.stack([_normal(nk(), (d, d)) for _ in range(num_layers)]),
            'gate_b': jnp.zeros((num_layers, 1, d), jnp.float32),
            'fc_w': _normal(nk(), (d, d)),
            'fc_b': jnp.zeros((1, d), jnp.float32)}


def init_encoder(nk, d, d_ff, heads, N):
    return {'lnin': _ln_stack(d, N),
            'attn': _attn_stack(nk, d, heads, N),
            'lnout': _ln_stack(d, N),
            'ff': _ff_stack(nk, d, d_ff, N),
            'fln': _ln_single(d)}


def init_cr_encoder(nk, d, d_ff, heads, num_concepts, N):
    return {'lnin': _ln_stack(d, N),
            'self_attn': _attn_stack(nk, d, heads, N),
            'lnmid': _ln_stack(d, N),
            'cross_attn': _attn_stack(nk, d, num_concepts, N),
            'lnout': _ln_stack(d, N),
            'ff': _ff_stack(nk, d, d_ff, N),
            'fln': _ln_single(d)}


def init_semh(key, embd_dim=20, hidden_size=32, num_layers=2, num_layers_cross=1,
              heads=4, num_concepts=5, concept_layers=(0,), max_len=64):
    keys = iter(jax.random.split(key, 512))
    nk = lambda: next(keys)
    proj_w = jax.nn.initializers.orthogonal()(nk(), (4 * embd_dim, 4 * embd_dim), jnp.float32)
    return {
        'cfg': dict(heads=heads, num_concepts=num_concepts,
                    concept_layers=tuple(concept_layers)),
        'highway': init_highway(nk, embd_dim),
        'position': {'pos_emb': _normal(nk(), (max_len, embd_dim)),
                     'norm': _ln_single(embd_dim)},
        'encoder_q': init_encoder(nk, embd_dim, hidden_size, heads, num_layers),
        'encoder_a': init_encoder(nk, embd_dim, hidden_size, heads, num_layers),
        'encoder_qa': init_cr_encoder(nk, embd_dim, hidden_size, heads, num_concepts,
                                      num_layers_cross),
        'encoder_aq': init_cr_encoder(nk, embd_dim, hidden_size, heads, num_concepts,
                                      num_layers_cross),
        'proj': {'w': proj_w.reshape(4, embd_dim, 4 * embd_dim),
                 'b': jnp.zeros((1, 4 * embd_dim), jnp.float32)},
        'classifier': {'w': _normal(nk(), (4 * embd_dim, 3)),
                       'b': jnp.zeros((1, 3), jnp.float32)},
    }


# ----------------------------------------------------------------------------- demo

if __name__ == "__main__":
    key = jax.random.PRNGKey(0)
    pkey, dkey = jax.random.split(key)

    B, Tq, Ta = 2, 8, 8
    embd_dim, hidden_size, heads, num_concepts = 20, 32, 4, 5

    params = init_semh(pkey, embd_dim=embd_dim, hidden_size=hidden_size,
                       num_layers=2, num_layers_cross=1, heads=heads,
                       num_concepts=num_concepts, concept_layers=(0,), max_len=64)

    k1, k2, k3, k4 = jax.random.split(dkey, 4)
    question = jax.random.normal(k1, (B, Tq, embd_dim), jnp.float32)
    answer = jax.random.normal(k2, (B, Ta, embd_dim), jnp.float32)
    qa_concept = jax.random.normal(k3, (B, Tq, Ta, num_concepts), jnp.float32)
    aq_concept = jax.random.normal(k4, (B, Ta, Tq, num_concepts), jnp.float32)
    qmask = jnp.ones((B, Tq), jnp.float32)
    amask = jnp.ones((B, Ta), jnp.float32)

    fwd = jax.jit(lambda q, a, qm, am, qc, ac:
                  semh_forward(params, q, a, qm, am, qc, ac)[0])
    score = jax.block_until_ready(fwd(question, answer, qmask, amask,
                                      qa_concept, aq_concept))
    assert score.shape == (B, 3)
    assert bool(jnp.all(jnp.isfinite(score)))
    print("KERNEL_OK")
</pallas_src>

<mosaic_0001>
module attributes {stable_mosaic.version = 11 : i64} {
  func.func @_head_kernel(%arg0: i32, %arg1: memref<1x8x20xf32, #tpu.memory_space<vmem>>, %arg2: memref<1x8x20xf32, #tpu.memory_space<vmem>>, %arg3: memref<4x20x80xf32, #tpu.memory_space<vmem>>, %arg4: memref<1x80xf32, #tpu.memory_space<vmem>>, %arg5: memref<80x3xf32, #tpu.memory_space<vmem>>, %arg6: memref<1x3xf32, #tpu.memory_space<vmem>>, %arg7: memref<1x1x3xf32, #tpu.memory_space<vmem>>) attributes {dimension_semantics = [#tpu.dimension_semantics<parallel>], iteration_bounds = array<i64: 2>, scalar_prefetch = 0 : i64, scratch_operands = 0 : i64, tpu.core_type = #tpu.core_type<tc>, window_params = [{transform_indices = @transform_0, window_bounds = array<i64: 1, 8, 20>}, {transform_indices = @transform_1, window_bounds = array<i64: 1, 8, 20>}, {pipeline_mode = #tpu.pipeline_mode<synchronous>, transform_indices = @transform_2, window_bounds = array<i64: 4, 20, 80>}, {pipeline_mode = #tpu.pipeline_mode<synchronous>, transform_indices = @transform_3, window_bounds = array<i64: 1, 80>}, {pipeline_mode = #tpu.pipeline_mode<synchronous>, transform_indices = @transform_4, window_bounds = array<i64: 80, 3>}, {pipeline_mode = #tpu.pipeline_mode<synchronous>, transform_indices = @transform_5, window_bounds = array<i64: 1, 3>}, {transform_indices = @transform_6, window_bounds = array<i64: 1, 1, 3>}]} {
    %c0 = arith.constant 0 : index
    %c0_0 = arith.constant 0 : index
    %c0_1 = arith.constant 0 : index
    %0 = vector.load %arg1[%c0, %c0_0, %c0_1] : memref<1x8x20xf32, #tpu.memory_space<vmem>>, vector<1x8x20xf32>
    %1 = vector.shape_cast %0 : vector<1x8x20xf32> to vector<8x20xf32>
    %c0_2 = arith.constant 0 : index
    %c0_3 = arith.constant 0 : index
    %c0_4 = arith.constant 0 : index
    %2 = vector.load %arg2[%c0_2, %c0_3, %c0_4] : memref<1x8x20xf32, #tpu.memory_space<vmem>>, vector<1x8x20xf32>
    %3 = vector.shape_cast %2 : vector<1x8x20xf32> to vector<8x20xf32>
    %cst = arith.constant dense<0.000000e+00> : vector<20xf32>
    %4 = vector.multi_reduction <add>, %1, %cst [0] : vector<8x20xf32> to vector<20xf32>
    %5 = vector.shape_cast %4 : vector<20xf32> to vector<1x20xf32>
    %cst_5 = arith.constant 8.000000e+00 : f32
    %6 = vector.broadcast %cst_5 : f32 to vector<1x20xf32>
    %7 = arith.divf %5, %6 : vector<1x20xf32>
    %cst_6 = arith.constant dense<0xFF800000> : vector<20xf32>
    %8 = vector.multi_reduction <maximumf>, %1, %cst_6 [0] : vector<8x20xf32> to vector<20xf32>
    %9 = vector.shape_cast %8 : vector<20xf32> to vector<1x20xf32>
    %cst_7 = arith.constant dense<0.000000e+00> : vector<20xf32>
    %10 = vector.multi_reduction <add>, %3, %cst_7 [0] : vector<8x20xf32> to vector<20xf32>
    %11 = vector.shape_cast %10 : vector<20xf32> to vector<1x20xf32>
    %cst_8 = arith.constant 8.000000e+00 : f32
    %12 = vector.broadcast %cst_8 : f32 to vector<1x20xf32>
    %13 = arith.divf %11, %12 : vector<1x20xf32>
    %cst_9 = arith.constant dense<0xFF800000> : vector<20xf32>
    %14 = vector.multi_reduction <maximumf>, %3, %cst_9 [0] : vector<8x20xf32> to vector<20xf32>
    %15 = vector.shape_cast %14 : vector<20xf32> to vector<1x20xf32>
    %c0_10 = arith.constant 0 : index
    %c0_11 = arith.constant 0 : index
    %c0_12 = arith.constant 0 : index
    %16 = vector.load %arg3[%c0_10, %c0_11, %c0_12] : memref<4x20x80xf32, #tpu.memory_space<vmem>>, vector<1x20x80xf32>
    %17 = vector.shape_cast %16 : vector<1x20x80xf32> to vector<20x80xf32>
    %cst_13 = arith.constant dense<0.000000e+00> : vector<1x80xf32>
    %18 = tpu.matmul %7, %17, %cst_13 {dimension_numbers = #tpu.dot_dimension_numbers<[1], [0], [0], [1], [0, 0, 1, 1], [], []>} : vector<1x20xf32>, vector<20x80xf32>, vector<1x80xf32> -> vector<1x80xf32>
    %c1 = arith.constant 1 : index
    %c0_14 = arith.constant 0 : index
    %c0_15 = arith.constant 0 : index
    %19 = vector.load %arg3[%c1, %c0_14, %c0_15] : memref<4x20x80xf32, #tpu.memory_space<vmem>>, vector<1x20x80xf32>
    %20 = vector.shape_cast %19 : vector<1x20x80xf32> to vector<20x80xf32>
    %cst_16 = arith.constant dense<0.000000e+00> : vector<1x80xf32>
    %21 = tpu.matmul %9, %20, %cst_16 {dimension_numbers = #tpu.dot_dimension_numbers<[1], [0], [0], [1], [0, 0, 1, 1], [], []>} : vector<1x20xf32>, vector<20x80xf32>, vector<1x80xf32> -> vector<1x80xf32>
    %22 = arith.addf %18, %21 : vector<1x80xf32>
    %c2 = arith.constant 2 : index
    %c0_17 = arith.constant 0 : index
    %c0_18 = arith.constant 0 : index
    %23 = vector.load %arg3[%c2, %c0_17, %c0_18] : memref<4x20x80xf32, #tpu.memory_space<vmem>>, vector<1x20x80xf32>
    %24 = vector.shape_cast %23 : vector<1x20x80xf32> to vector<20x80xf32>
    %cst_19 = arith.constant dense<0.000000e+00> : vector<1x80xf32>
    %25 = tpu.matmul %13, %24, %cst_19 {dimension_numbers = #tpu.dot_dimension_numbers<[1], [0], [0], [1], [0, 0, 1, 1], [], []>} : vector<1x20xf32>, vector<20x80xf32>, vector<1x80xf32> -> vector<1x80xf32>
    %26 = arith.addf %22, %25 : vector<1x80xf32>
    %c3 = arith.constant 3 : index
    %c0_20 = arith.constant 0 : index
    %c0_21 = arith.constant 0 : index
    %27 = vector.load %arg3[%c3, %c0_20, %c0_21] : memref<4x20x80xf32, #tpu.memory_space<vmem>>, vector<1x20x80xf32>
    %28 = vector.shape_cast %27 : vector<1x20x80xf32> to vector<20x80xf32>
    %cst_22 = arith.constant dense<0.000000e+00> : vector<1x80xf32>
    %29 = tpu.matmul %15, %28, %cst_22 {dimension_numbers = #tpu.dot_dimension_numbers<[1], [0], [0], [1], [0, 0, 1, 1], [], []>} : vector<1x20xf32>, vector<20x80xf32>, vector<1x80xf32> -> vector<1x80xf32>
    %30 = arith.addf %26, %29 : vector<1x80xf32>
    %c0_23 = arith.constant 0 : index
    %c0_24 = arith.constant 0 : index
    %31 = vector.load %arg4[%c0_23, %c0_24] : memref<1x80xf32, #tpu.memory_space<vmem>>, vector<1x80xf32>
    %32 = arith.addf %30, %31 : vector<1x80xf32>
    %c0_25 = arith.constant 0 : index
    %c0_26 = arith.constant 0 : index
    %33 = vector.load %arg5[%c0_25, %c0_26] : memref<80x3xf32, #tpu.memory_space<vmem>>, vector<80x3xf32>
    %cst_27 = arith.constant dense<0.000000e+00> : vector<1x3xf32>
    %34 = tpu.matmul %32, %33, %cst_27 {dimension_numbers = #tpu.dot_dimension_numbers<[1], [0], [0], [1], [0, 0, 1, 1], [], []>} : vector<1x80xf32>, vector<80x3xf32>, vector<1x3xf32> -> vector<1x3xf32>
    %c0_28 = arith.constant 0 : index
    %c0_29 = arith.constant 0 : index
    %35 = vector.load %arg6[%c0_28, %c0_29] : memref<1x3xf32, #tpu.memory_space<vmem>>, vector<1x3xf32>
    %36 = arith.addf %34, %35 : vector<1x3xf32>
    %c0_30 = arith.constant 0 : index
    %c0_31 = arith.constant 0 : index
    %c0_32 = arith.constant 0 : index
    %37 = vector.load %arg7[%c0_30, %c0_31, %c0_32] : memref<1x1x3xf32, #tpu.memory_space<vmem>>, vector<1x1x3xf32>
    %38 = vector.shape_cast %37 : vector<1x1x3xf32> to vector<1x3xf32>
    %39 = vector.shape_cast %36 : vector<1x3xf32> to vector<1x1x3xf32>
    tpu.vector_store %arg7[%c0_30, %c0_31, %c0_32], %39 {strides = array<i32>} : memref<1x1x3xf32, #tpu.memory_space<vmem>>, vector<1x1x3xf32>,
    return
  }
  func.func @transform_0(%arg0: i32) -> (i32, i32, i32) {
    %c0_i32 = arith.constant 0 : i32
    %c0_i32_0 = arith.constant 0 : i32
    %c0_i32_1 = arith.constant 0 : i32
    return %arg0, %c0_i32, %c0_i32_0 : i32, i32, i32
  }
  func.func @transform_1(%arg0: i32) -> (i32, i32, i32) {
    %c0_i32 = arith.constant 0 : i32
    %c0_i32_0 = arith.constant 0 : i32
    %c0_i32_1 = arith.constant 0 : i32
    return %arg0, %c0_i32, %c0_i32_0 : i32, i32, i32
  }
  func.func @transform_2(%arg0: i32) -> (i32, i32, i32) {
    %c0_i32 = arith.constant 0 : i32
    %c0_i32_0 = arith.constant 0 : i32
    %c0_i32_1 = arith.constant 0 : i32
    %c0_i32_2 = arith.constant 0 : i32
    return %c0_i32, %c0_i32_0, %c0_i32_1 : i32, i32, i32
  }
  func.func @transform_3(%arg0: i32) -> (i32, i32) {
    %c0_i32 = arith.constant 0 : i32
    %c0_i32_0 = arith.constant 0 : i32
    %c0_i32_1 = arith.constant 0 : i32
    return %c0_i32, %c0_i32_0 : i32, i32
  }
  func.func @transform_4(%arg0: i32) -> (i32, i32) {
    %c0_i32 = arith.constant 0 : i32
    %c0_i32_0 = arith.constant 0 : i32
    %c0_i32_1 = arith.constant 0 : i32
    return %c0_i32, %c0_i32_0 : i32, i32
  }
  func.func @transform_5(%arg0: i32) -> (i32, i32) {
    %c0_i32 = arith.constant 0 : i32
    %c0_i32_0 = arith.constant 0 : i32
    %c0_i32_1 = arith.constant 0 : i32
    return %c0_i32, %c0_i32_0 : i32, i32
  }
  func.func @transform_6(%arg0: i32) -> (i32, i32, i32) {
    %c0_i32 = arith.constant 0 : i32
    %c0_i32_0 = arith.constant 0 : i32
    %c0_i32_1 = arith.constant 0 : i32
    return %arg0, %c0_i32, %c0_i32_0 : i32, i32, i32
  }
}

module attributes {stable_mosaic.version = 11 : i64} {
  func.func @_cr_encoder_kernel(%arg0: i32, %arg1: memref<1x8x20xf32, #tpu.memory_space<vmem>>, %arg2: memref<1x8x20xf32, #tpu.memory_space<vmem>>, %arg3: memref<1x5x8x8xf32, #tpu.memory_space<vmem>>, %arg4: memref<1x1x8xf32, #tpu.memory_space<vmem>>, %arg5: memref<1x1x8xf32, #tpu.memory_space<vmem>>, %arg6: memref<1x1x20xf32, #tpu.memory_space<vmem>>, %arg7: memref<1x1x20xf32, #tpu.memory_space<vmem>>, %arg8: memref<4x20x5xf32, #tpu.memory_space<vmem>>, %arg9: memref<4x1x5xf32, #tpu.memory_space<vmem>>, %arg10: memref<4x20x5xf32, #tpu.memory_space<vmem>>, %arg11: memref<4x1x5xf32, #tpu.memory_space<vmem>>, %arg12: memref<4x20x5xf32, #tpu.memory_space<vmem>>, %arg13: memref<4x1x5xf32, #tpu.memory_space<vmem>>, %arg14: memref<4x5x20xf32, #tpu.memory_space<vmem>>, %arg15: memref<1x1x20xf32, #tpu.memory_space<vmem>>, %arg16: memref<1x1x20xf32, #tpu.memory_space<vmem>>, %arg17: memref<1x1x20xf32, #tpu.memory_space<vmem>>, %arg18: memref<5x20x4xf32, #tpu.memory_space<vmem>>, %arg19: memref<5x1x4xf32, #tpu.memory_space<vmem>>, %arg20: memref<5x20x4xf32, #tpu.memory_space<vmem>>, %arg21: memref<5x1x4xf32, #tpu.memory_space<vmem>>, %arg22: memref<5x20x4xf32, #tpu.memory_space<vmem>>, %arg23: memref<5x1x4xf32, #tpu.memory_space<vmem>>, %arg24: memref<5x4x20xf32, #tpu.memory_space<vmem>>, %arg25: memref<1x1x20xf32, #tpu.memory_space<vmem>>, %arg26: memref<1x1x20xf32, #tpu.memory_space<vmem>>, %arg27: memref<1x1x20xf32, #tpu.memory_space<vmem>>, %arg28: memref<1x20x32xf32, #tpu.memory_space<vmem>>, %arg29: memref<1x1x32xf32, #tpu.memory_space<vmem>>, %arg30: memref<1x32x20xf32, #tpu.memory_space<vmem>>, %arg31: memref<1x1x20xf32, #tpu.memory_space<vmem>>, %arg32: memref<1x20xf32, #tpu.memory_space<vmem>>, %arg33: memref<1x20xf32, #tpu.memory_space<vmem>>, %arg34: memref<1x8x20xf32, #tpu.memory_space<vmem>>) attributes {dimension_semantics = [#tpu.dimension_semantics<parallel>], iteration_bounds = array<i64: 2>, scalar_prefetch = 0 : i64, scratch_operands = 0 : i64, tpu.core_type = #tpu.core_type<tc>, window_params = [{transform_indices = @transform_0, window_bounds = array<i64: 1, 8, 20>}, {transform_indices = @transform_1, window_bounds = array<i64: 1, 8, 20>}, {transform_indices = @transform_2, window_bounds = array<i64: 1, 5, 8, 8>}, {transform_indices = @transform_3, window_bounds = array<i64: 1, 1, 8>}, {transform_indices = @transform_4, window_bounds = array<i64: 1, 1, 8>}, {pipeline_mode = #tpu.pipeline_mode<synchronous>, transform_indices = @transform_5, window_bounds = array<i64: 1, 1, 20>}, {pipeline_mode = #tpu.pipeline_mode<synchronous>, transform_indices = @transform_6, window_bounds = array<i64: 1, 1, 20>}, {pipeline_mode = #tpu.pipeline_mode<synchronous>, transform_indices = @transform_7, window_bounds = array<i64: 4, 20, 5>}, {pipeline_mode = #tpu.pipeline_mode<synchronous>, transform_indices = @transform_8, window_bounds = array<i64: 4, 1, 5>}, {pipeline_mode = #tpu.pipeline_mode<synchronous>, transform_indices = @transform_9, window_bounds = array<i64: 4, 20, 5>}, {pipeline_mode = #tpu.pipeline_mode<synchronous>, transform_indices = @transform_10, window_bounds = array<i64: 4, 1, 5>}, {pipeline_mode = #tpu.pipeline_mode<synchronous>, transform_indices = @transform_11, window_bounds = array<i64: 4, 20, 5>}, {pipeline_mode = #tpu.pipeline_mode<synchronous>, transform_indices = @transform_12, window_bounds = array<i64: 4, 1, 5>}, {pipeline_mode = #tpu.pipeline_mode<synchronous>, transform_indices = @transform_13, window_bounds = array<i64: 4, 5, 20>}, {pipeline_mode = #tpu.pipeline_mode<synchronous>, transform_indices = @transform_14, window_bounds = array<i64: 1, 1, 20>}, {pipeline_mode = #tpu.pipeline_mode<synchronous>, transform_indices = @transform_15, window_bounds = array<i64: 1, 1, 20>}, {pipeline_mode = #tpu.pipeline_mode<synchronous>, transform_indices = @transform_16, window_bounds = array<i64: 1, 1, 20>}, {pipeline_mode = #tpu.pipeline_mode<synchronous>, transform_indices = @transform_17, window_bounds = array<i64: 5, 20, 4>}, {pipeline_mode = #tpu.pipeline_mode<synchronous>, transform_indices = @transform_18, window_bounds = array<i64: 5, 1, 4>}, {pipeline_mode = #tpu.pipeline_mode<synchronous>, transform_indices = @transform_19, window_bounds = array<i64: 5, 20, 4>}, {pipeline_mode = #tpu.pipeline_mode<synchronous>, transform_indices = @transform_20, window_bounds = array<i64: 5, 1, 4>}, {pipeline_mode = #tpu.pipeline_mode<synchronous>, transform_indices = @transform_21, window_bounds = array<i64: 5, 20, 4>}, {pipeline_mode = #tpu.pipeline_mode<synchronous>, transform_indices = @transform_22, window_bounds = array<i64: 5, 1, 4>}, {pipeline_mode = #tpu.pipeline_mode<synchronous>, transform_indices = @transform_23, window_bounds = array<i64: 5, 4, 20>}, {pipeline_mode = #tpu.pipeline_mode<synchronous>, transform_indices = @transform_24, window_bounds = array<i64: 1, 1, 20>}, {pipeline_mode = #tpu.pipeline_mode<synchronous>, transform_indices = @transform_25, window_bounds = array<i64: 1, 1, 20>}, {pipeline_mode = #tpu.pipeline_mode<synchronous>, transform_indices = @transform_26, window_bounds = array<i64: 1, 1, 20>}, {pipeline_mode = #tpu.pipeline_mode<synchronous>, transform_indices = @transform_27, window_bounds = array<i64: 1, 20, 32>}, {pipeline_mode = #tpu.pipeline_mode<synchronous>, transform_indices = @transform_28, window_bounds = array<i64: 1, 1, 32>}, {pipeline_mode = #tpu.pipeline_mode<synchronous>, transform_indices = @transform_29, window_bounds = array<i64: 1, 32, 20>}, {pipeline_mode = #tpu.pipeline_mode<synchronous>, transform_indices = @transform_30, window_bounds = array<i64: 1, 1, 20>}, {pipeline_mode = #tpu.pipeline_mode<synchronous>, transform_indices = @transform_31, window_bounds = array<i64: 1, 20>}, {pipeline_mode = #tpu.pipeline_mode<synchronous>, transform_indices = @transform_32, window_bounds = array<i64: 1, 20>}, {transform_indices = @transform_33, window_bounds = array<i64: 1, 8, 20>}]} {
    %c0 = arith.constant 0 : index
    %c0_0 = arith.constant 0 : index
    %c0_1 = arith.constant 0 : index
    %0 = vector.load %arg1[%c0, %c0_0, %c0_1] : memref<1x8x20xf32, #tpu.memory_space<vmem>>, vector<1x8x20xf32>
    %1 = vector.shape_cast %0 : vector<1x8x20xf32> to vector<8x20xf32>
    %c0_2 = arith.constant 0 : index
    %c0_3 = arith.constant 0 : index
    %c0_4 = arith.constant 0 : index
    %2 = vector.load %arg2[%c0_2, %c0_3, %c0_4] : memref<1x8x20xf32, #tpu.memory_space<vmem>>, vector<1x8x20xf32>
    %3 = vector.shape_cast %2 : vector<1x8x20xf32> to vector<8x20xf32>
    %c0_5 = arith.constant 0 : index
    %c0_6 = arith.constant 0 : index
    %c0_7 = arith.constant 0 : index
    %c0_8 = arith.constant 0 : index
    %4 = vector.load %arg3[%c0_5, %c0_6, %c0_7, %c0_8] : memref<1x5x8x8xf32, #tpu.memory_space<vmem>>, vector<1x5x8x8xf32>
    %5 = vector.shape_cast %4 : vector<1x5x8x8xf32> to vector<5x8x8xf32>
    %c0_9 = arith.constant 0 : index
    %c0_10 = arith.constant 0 : index
    %c0_11 = arith.constant 0 : index
    %6 = vector.load %arg4[%c0_9, %c0_10, %c0_11] : memref<1x1x8xf32, #tpu.memory_space<vmem>>, vector<1x1x8xf32>
    %7 = vector.shape_cast %6 : vector<1x1x8xf32> to vector<1x8xf32>
    %c0_12 = arith.constant 0 : index
    %c0_13 = arith.constant 0 : index
    %c0_14 = arith.constant 0 : index
    %8 = vector.load %arg5[%c0_12, %c0_13, %c0_14] : memref<1x1x8xf32, #tpu.memory_space<vmem>>, vector<1x1x8xf32>
    %9 = vector.shape_cast %8 : vector<1x1x8xf32> to vector<1x8xf32>
    %c0_15 = arith.constant 0 : index
    %c0_16 = arith.constant 0 : index
    %c0_17 = arith.constant 0 : index
    %10 = vector.load %arg6[%c0_15, %c0_16, %c0_17] : memref<1x1x20xf32, #tpu.memory_space<vmem>>, vector<1x1x20xf32>
    %11 = vector.shape_cast %10 : vector<1x1x20xf32> to vector<1x20xf32>
    %c0_18 = arith.constant 0 : index
    %c0_19 = arith.constant 0 : index
    %c0_20 = arith.constant 0 : index
    %12 = vector.load %arg7[%c0_18, %c0_19, %c0_20] : memref<1x1x20xf32, #tpu.memory_space<vmem>>, vector<1x1x20xf32>
    %13 = vector.shape_cast %12 : vector<1x1x20xf32> to vector<1x20xf32>
    %cst = arith.constant dense<0.000000e+00> : vector<8xf32>
    %14 = vector.multi_reduction <add>, %1, %cst [1] : vector<8x20xf32> to vector<8xf32>
    %15 = vector.shape_cast %14 : vector<8xf32> to vector<8x1xf32>
    %cst_21 = arith.constant 2.000000e+01 : f32
    %16 = vector.broadcast %cst_21 : f32 to vector<8x1xf32>
    %17 = arith.divf %15, %16 : vector<8x1xf32>
    %18 = vector.broadcast %17 : vector<8x1xf32> to vector<8x20xf32>
    %19 = arith.subf %1, %18 : vector<8x20xf32>
    %20 = arith.mulf %19, %19 : vector<8x20xf32>
    %cst_22 = arith.constant dense<0.000000e+00> : vector<8xf32>
    %21 = vector.multi_reduction <add>, %20, %cst_22 [1] : vector<8x20xf32> to vector<8xf32>
    %22 = vector.shape_cast %21 : vector<8xf32> to vector<8x1xf32>
    %cst_23 = arith.constant 2.000000e+01 : f32
    %23 = vector.broadcast %cst_23 : f32 to vector<8x1xf32>
    %24 = arith.divf %22, %23 : vector<8x1xf32>
    %cst_24 = arith.constant 9.99999996E-13 : f32
    %25 = vector.broadcast %cst_24 : f32 to vector<8x1xf32>
    %26 = arith.addf %24, %25 : vector<8x1xf32>
    %27 = math.rsqrt %26 : vector<8x1xf32>
    %28 = vector.broadcast %27 : vector<8x1xf32> to vector<8x20xf32>
    %29 = arith.mulf %19, %28 : vector<8x20xf32>
    %30 = vector.broadcast %11 : vector<1x20xf32> to vector<8x20xf32>
    %31 = arith.mulf %29, %30 : vector<8x20xf32>
    %32 = vector.broadcast %13 : vector<1x20xf32> to vector<8x20xf32>
    %33 = arith.addf %31, %32 : vector<8x20xf32>
    %cst_25 = arith.constant 0.000000e+00 : f32
    %34 = vector.broadcast %cst_25 : f32 to vector<8x20xf32>
    %c0_26 = arith.constant 0 : index
    %c0_27 = arith.constant 0 : index
    %c0_28 = arith.constant 0 : index
    %35 = vector.load %arg8[%c0_26, %c0_27, %c0_28] : memref<4x20x5xf32, #tpu.memory_space<vmem>>, vector<1x20x5xf32>
    %36 = vector.shape_cast %35 : vector<1x20x5xf32> to vector<20x5xf32>
    %cst_29 = arith.constant dense<0.000000e+00> : vector<8x5xf32>
    %37 = tpu.matmul %33, %36, %cst_29 {dimension_numbers = #tpu.dot_dimension_numbers<[1], [0], [0], [1], [0, 0, 1, 1], [], []>} : vector<8x20xf32>, vector<20x5xf32>, vector<8x5xf32> -> vector<8x5xf32>
    %c0_30 = arith.constant 0 : index
    %c0_31 = arith.constant 0 : index
    %c0_32 = arith.constant 0 : index
    %38 = vector.load %arg9[%c0_30, %c0_31, %c0_32] : memref<4x1x5xf32, #tpu.memory_space<vmem>>, vector<1x1x5xf32>
    %39 = vector.shape_cast %38 : vector<1x1x5xf32> to vector<1x5xf32>
    %40 = vector.broadcast %39 : vector<1x5xf32> to vector<8x5xf32>
    %41 = arith.addf %37, %40 : vector<8x5xf32>
    %cst_33 = arith.constant 0.44721359 : f32
    %42 = vector.broadcast %cst_33 : f32 to vector<8x5xf32>
    %43 = arith.mulf %41, %42 : vector<8x5xf32>
    %c0_34 = arith.constant 0 : index
    %c0_35 = arith.constant 0 : index
    %c0_36 = arith.constant 0 : index
    %44 = vector.load %arg10[%c0_34, %c0_35, %c0_36] : memref<4x20x5xf32, #tpu.memory_space<vmem>>, vector<1x20x5xf32>
    %45 = vector.shape_cast %44 : vector<1x20x5xf32> to vector<20x5xf32>
    %cst_37 = arith.constant dense<0.000000e+00> : vector<8x5xf32>
    %46 = tpu.matmul %33, %45, %cst_37 {dimension_numbers = #tpu.dot_dimension_numbers<[1], [0], [0], [1], [0, 0, 1, 1], [], []>} : vector<8x20xf32>, vector<20x5xf32>, vector<8x5xf32> -> vector<8x5xf32>
    %c0_38 = arith.constant 0 : index
    %c0_39 = arith.constant 0 : index
    %c0_40 = arith.constant 0 : index
    %47 = vector.load %arg11[%c0_38, %c0_39, %c0_40] : memref<4x1x5xf32, #tpu.memory_space<vmem>>, vector<1x1x5xf32>
    %48 = vector.shape_cast %47 : vector<1x1x5xf32> to vector<1x5xf32>
    %49 = vector.broadcast %48 : vector<1x5xf32> to vector<8x5xf32>
    %50 = arith.addf %46, %49 : vector<8x5xf32>
    %c0_41 = arith.constant 0 : index
    %c0_42 = arith.constant 0 : index
    %c0_43 = arith.constant 0 : index
    %51 = vector.load %arg12[%c0_41, %c0_42, %c0_43] : memref<4x20x5xf32, #tpu.memory_space<vmem>>, vector<1x20x5xf32>
    %52 = vector.shape_cast %51 : vector<1x20x5xf32> to vector<20x5xf32>
    %cst_44 = arith.constant dense<0.000000e+00> : vector<8x5xf32>
    %53 = tpu.matmul %33, %52, %cst_44 {dimension_numbers = #tpu.dot_dimension_numbers<[1], [0], [0], [1], [0, 0, 1, 1], [], []>} : vector<8x20xf32>, vector<20x5xf32>, vector<8x5xf32> -> vector<8x5xf32>
    %c0_45 = arith.constant 0 : index
    %c0_46 = arith.constant 0 : index
    %c0_47 = arith.constant 0 : index
    %54 = vector.load %arg13[%c0_45, %c0_46, %c0_47] : memref<4x1x5xf32, #tpu.memory_space<vmem>>, vector<1x1x5xf32>
    %55 = vector.shape_cast %54 : vector<1x1x5xf32> to vector<1x5xf32>
    %56 = vector.broadcast %55 : vector<1x5xf32> to vector<8x5xf32>
    %57 = arith.addf %53, %56 : vector<8x5xf32>
    %cst_48 = arith.constant dense<0.000000e+00> : vector<8x8xf32>
    %58 = tpu.matmul %43, %50, %cst_48 {dimension_numbers = #tpu.dot_dimension_numbers<[1], [1], [0], [0], [0, 0, 1, 0], [], []>} : vector<8x5xf32>, vector<8x5xf32>, vector<8x8xf32> -> vector<8x8xf32>
    %59 = vector.broadcast %7 : vector<1x8xf32> to vector<8x8xf32>
    %60 = arith.addf %58, %59 : vector<8x8xf32>
    %cst_49 = arith.constant dense<0xFF800000> : vector<8xf32>
    %61 = vector.multi_reduction <maximumf>, %60, %cst_49 [1] : vector<8x8xf32> to vector<8xf32>
    %62 = vector.shape_cast %61 : vector<8xf32> to vector<8x1xf32>
    %63 = vector.broadcast %62 : vector<8x1xf32> to vector<8x8xf32>
    %64 = arith.subf %60, %63 : vector<8x8xf32>
    %65 = math.exp %64 : vector<8x8xf32>
    %cst_50 = arith.constant dense<0.000000e+00> : vector<8xf32>
    %66 = vector.multi_reduction <add>, %65, %cst_50 [1] : vector<8x8xf32> to vector<8xf32>
    %67 = vector.shape_cast %66 : vector<8xf32> to vector<8x1xf32>
    %68 = tpu.reciprocal %67 {approx = true} : vector<8x1xf32> -> vector<8x1xf32>
    %69 = vector.broadcast %68 : vector<8x1xf32> to vector<8x8xf32>
    %70 = arith.mulf %65, %69 : vector<8x8xf32>
    %cst_51 = arith.constant dense<0.000000e+00> : vector<8x5xf32>
    %71 = tpu.matmul %70, %57, %cst_51 {dimension_numbers = #tpu.dot_dimension_numbers<[1], [0], [0], [1], [0, 0, 1, 1], [], []>} : vector<8x8xf32>, vector<8x5xf32>, vector<8x5xf32> -> vector<8x5xf32>
    %c0_52 = arith.constant 0 : index
    %c0_53 = arith.constant 0 : index
    %c0_54 = arith.constant 0 : index
    %72 = vector.load %arg14[%c0_52, %c0_53, %c0_54] : memref<4x5x20xf32, #tpu.memory_space<vmem>>, vector<1x5x20xf32>
    %73 = vector.shape_cast %72 : vector<1x5x20xf32> to vector<5x20xf32>
    %cst_55 = arith.constant dense<0.000000e+00> : vector<8x20xf32>
    %74 = tpu.matmul %71, %73, %cst_55 {dimension_numbers = #tpu.dot_dimension_numbers<[1], [0], [0], [1], [0, 0, 1, 1], [], []>} : vector<8x5xf32>, vector<5x20xf32>, vector<8x20xf32> -> vector<8x20xf32>
    %75 = arith.addf %34, %74 : vector<8x20xf32>
    %c1 = arith.constant 1 : index
    %c0_56 = arith.constant 0 : index
    %c0_57 = arith.constant 0 : index
    %76 = vector.load %arg8[%c1, %c0_56, %c0_57] : memref<4x20x5xf32, #tpu.memory_space<vmem>>, vector<1x20x5xf32>
    %77 = vector.shape_cast %76 : vector<1x20x5xf32> to vector<20x5xf32>
    %cst_58 = arith.constant dense<0.000000e+00> : vector<8x5xf32>
    %78 = tpu.matmul %33, %77, %cst_58 {dimension_numbers = #tpu.dot_dimension_numbers<[1], [0], [0], [1], [0, 0, 1, 1], [], []>} : vector<8x20xf32>, vector<20x5xf32>, vector<8x5xf32> -> vector<8x5xf32>
    %c1_59 = arith.constant 1 : index
    %c0_60 = arith.constant 0 : index
    %c0_61 = arith.constant 0 : index
    %79 = vector.load %arg9[%c1_59, %c0_60, %c0_61] : memref<4x1x5xf32, #tpu.memory_space<vmem>>, vector<1x1x5xf32>
    %80 = vector.shape_cast %79 : vector<1x1x5xf32> to vector<1x5xf32>
    %81 = vector.broadcast %80 : vector<1x5xf32> to vector<8x5xf32>
    %82 = arith.addf %78, %81 : vector<8x5xf32>
    %cst_62 = arith.constant 0.44721359 : f32
    %83 = vector.broadcast %cst_62 : f32 to vector<8x5xf32>
    %84 = arith.mulf %82, %83 : vector<8x5xf32>
    %c1_63 = arith.constant 1 : index
    %c0_64 = arith.constant 0 : index
    %c0_65 = arith.constant 0 : index
    %85 = vector.load %arg10[%c1_63, %c0_64, %c0_65] : memref<4x20x5xf32, #tpu.memory_space<vmem>>, vector<1x20x5xf32>
    %86 = vector.shape_cast %85 : vector<1x20x5xf32> to vector<20x5xf32>
    %cst_66 = arith.constant dense<0.000000e+00> : vector<8x5xf32>
    %87 = tpu.matmul %33, %86, %cst_66 {dimension_numbers = #tpu.dot_dimension_numbers<[1], [0], [0], [1], [0, 0, 1, 1], [], []>} : vector<8x20xf32>, vector<20x5xf32>, vector<8x5xf32> -> vector<8x5xf32>
    %c1_67 = arith.constant 1 : index
    %c0_68 = arith.constant 0 : index
    %c0_69 = arith.constant 0 : index
    %88 = vector.load %arg11[%c1_67, %c0_68, %c0_69] : memref<4x1x5xf32, #tpu.memory_space<vmem>>, vector<1x1x5xf32>
    %89 = vector.shape_cast %88 : vector<1x1x5xf32> to vector<1x5xf32>
    %90 = vector.broadcast %89 : vector<1x5xf32> to vector<8x5xf32>
    %91 = arith.addf %87, %90 : vector<8x5xf32>
    %c1_70 = arith.constant 1 : index
    %c0_71 = arith.constant 0 : index
    %c0_72 = arith.constant 0 : index
    %92 = vector.load %arg12[%c1_70, %c0_71, %c0_72] : memref<4x20x5xf32, #tpu.memory_space<vmem>>, vector<1x20x5xf32>
    %93 = vector.shape_cast %92 : vector<1x20x5xf32> to vector<20x5xf32>
    %cst_73 = arith.constant dense<0.000000e+00> : vector<8x5xf32>
    %94 = tpu.matmul %33, %93, %cst_73 {dimension_numbers = #tpu.dot_dimension_numbers<[1], [0], [0], [1], [0, 0, 1, 1], [], []>} : vector<8x20xf32>, vector<20x5xf32>, vector<8x5xf32> -> vector<8x5xf32>
    %c1_74 = arith.constant 1 : index
    %c0_75 = arith.constant 0 : index
    %c0_76 = arith.constant 0 : index
    %95 = vector.load %arg13[%c1_74, %c0_75, %c0_76] : memref<4x1x5xf32, #tpu.memory_space<vmem>>, vector<1x1x5xf32>
    %96 = vector.shape_cast %95 : vector<1x1x5xf32> to vector<1x5xf32>
    %97 = vector.broadcast %96 : vector<1x5xf32> to vector<8x5xf32>
    %98 = arith.addf %94, %97 : vector<8x5xf32>
    %cst_77 = arith.constant dense<0.000000e+00> : vector<8x8xf32>
    %99 = tpu.matmul %84, %91, %cst_77 {dimension_numbers = #tpu.dot_dimension_numbers<[1], [1], [0], [0], [0, 0, 1, 0], [], []>} : vector<8x5xf32>, vector<8x5xf32>, vector<8x8xf32> -> vector<8x8xf32>
    %100 = vector.broadcast %7 : vector<1x8xf32> to vector<8x8xf32>
    %101 = arith.addf %99, %100 : vector<8x8xf32>
    %cst_78 = arith.constant dense<0xFF800000> : vector<8xf32>
    %102 = vector.multi_reduction <maximumf>, %101, %cst_78 [1] : vector<8x8xf32> to vector<8xf32>
    %103 = vector.shape_cast %102 : vector<8xf32> to vector<8x1xf32>
    %104 = vector.broadcast %103 : vector<8x1xf32> to vector<8x8xf32>
    %105 = arith.subf %101, %104 : vector<8x8xf32>
    %106 = math.exp %105 : vector<8x8xf32>
    %cst_79 = arith.constant dense<0.000000e+00> : vector<8xf32>
    %107 = vector.multi_reduction <add>, %106, %cst_79 [1] : vector<8x8xf32> to vector<8xf32>
    %108 = vector.shape_cast %107 : vector<8xf32> to vector<8x1xf32>
    %109 = tpu.reciprocal %108 {approx = true} : vector<8x1xf32> -> vector<8x1xf32>
    %110 = vector.broadcast %109 : vector<8x1xf32> to vector<8x8xf32>
    %111 = arith.mulf %106, %110 : vector<8x8xf32>
    %cst_80 = arith.constant dense<0.000000e+00> : vector<8x5xf32>
    %112 = tpu.matmul %111, %98, %cst_80 {dimension_numbers = #tpu.dot_dimension_numbers<[1], [0], [0], [1], [0, 0, 1, 1], [], []>} : vector<8x8xf32>, vector<8x5xf32>, vector<8x5xf32> -> vector<8x5xf32>
    %c1_81 = arith.constant 1 : index
    %c0_82 = arith.constant 0 : index
    %c0_83 = arith.constant 0 : index
    %113 = vector.load %arg14[%c1_81, %c0_82, %c0_83] : memref<4x5x20xf32, #tpu.memory_space<vmem>>, vector<1x5x20xf32>
    %114 = vector.shape_cast %113 : vector<1x5x20xf32> to vector<5x20xf32>
    %cst_84 = arith.constant dense<0.000000e+00> : vector<8x20xf32>
    %115 = tpu.matmul %112, %114, %cst_84 {dimension_numbers = #tpu.dot_dimension_numbers<[1], [0], [0], [1], [0, 0, 1, 1], [], []>} : vector<8x5xf32>, vector<5x20xf32>, vector<8x20xf32> -> vector<8x20xf32>
    %116 = arith.addf %75, %115 : vector<8x20xf32>
    %c2 = arith.constant 2 : index
    %c0_85 = arith.constant 0 : index
    %c0_86 = arith.constant 0 : index
    %117 = vector.load %arg8[%c2, %c0_85, %c0_86] : memref<4x20x5xf32, #tpu.memory_space<vmem>>, vector<1x20x5xf32>
    %118 = vector.shape_cast %117 : vector<1x20x5xf32> to vector<20x5xf32>
    %cst_87 = arith.constant dense<0.000000e+00> : vector<8x5xf32>
    %119 = tpu.matmul %33, %118, %cst_87 {dimension_numbers = #tpu.dot_dimension_numbers<[1], [0], [0], [1], [0, 0, 1, 1], [], []>} : vector<8x20xf32>, vector<20x5xf32>, vector<8x5xf32> -> vector<8x5xf32>
    %c2_88 = arith.constant 2 : index
    %c0_89 = arith.constant 0 : index
    %c0_90 = arith.constant 0 : index
    %120 = vector.load %arg9[%c2_88, %c0_89, %c0_90] : memref<4x1x5xf32, #tpu.memory_space<vmem>>, vector<1x1x5xf32>
    %121 = vector.shape_cast %120 : vector<1x1x5xf32> to vector<1x5xf32>
    %122 = vector.broadcast %121 : vector<1x5xf32> to vector<8x5xf32>
    %123 = arith.addf %119, %122 : vector<8x5xf32>
    %cst_91 = arith.constant 0.44721359 : f32
    %124 = vector.broadcast %cst_91 : f32 to vector<8x5xf32>
    %125 = arith.mulf %123, %124 : vector<8x5xf32>
    %c2_92 = arith.constant 2 : index
    %c0_93 = arith.constant 0 : index
    %c0_94 = arith.constant 0 : index
    %126 = vector.load %arg10[%c2_92, %c0_93, %c0_94] : memref<4x20x5xf32, #tpu.memory_space<vmem>>, vector<1x20x5xf32>
    %127 = vector.shape_cast %126 : vector<1x20x5xf32> to vector<20x5xf32>
    %cst_95 = arith.constant dense<0.000000e+00> : vector<8x5xf32>
    %128 = tpu.matmul %33, %127, %cst_95 {dimension_numbers = #tpu.dot_dimension_numbers<[1], [0], [0], [1], [0, 0, 1, 1], [], []>} : vector<8x20xf32>, vector<20x5xf32>, vector<8x5xf32> -> vector<8x5xf32>
    %c2_96 = arith.constant 2 : index
    %c0_97 = arith.constant 0 : index
    %c0_98 = arith.constant 0 : index
    %129 = vector.load %arg11[%c2_96, %c0_97, %c0_98] : memref<4x1x5xf32, #tpu.memory_space<vmem>>, vector<1x1x5xf32>
    %130 = vector.shape_cast %129 : vector<1x1x5xf32> to vector<1x5xf32>
    %131 = vector.broadcast %130 : vector<1x5xf32> to vector<8x5xf32>
    %132 = arith.addf %128, %131 : vector<8x5xf32>
    %c2_99 = arith.constant 2 : index
    %c0_100 = arith.constant 0 : index
    %c0_101 = arith.constant 0 : index
    %133 = vector.load %arg12[%c2_99, %c0_100, %c0_101] : memref<4x20x5xf32, #tpu.memory_space<vmem>>, vector<1x20x5xf32>
    %134 = vector.shape_cast %133 : vector<1x20x5xf32> to vector<20x5xf32>
    %cst_102 = arith.constant dense<0.000000e+00> : vector<8x5xf32>
    %135 = tpu.matmul %33, %134, %cst_102 {dimension_numbers = #tpu.dot_dimension_numbers<[1], [0], [0], [1], [0, 0, 1, 1], [], []>} : vector<8x20xf32>, vector<20x5xf32>, vector<8x5xf32> -> vector<8x5xf32>
    %c2_103 = arith.constant 2 : index
    %c0_104 = arith.constant 0 : index
    %c0_105 = arith.constant 0 : index
    %136 = vector.load %arg13[%c2_103, %c0_104, %c0_105] : memref<4x1x5xf32, #tpu.memory_space<vmem>>, vector<1x1x5xf32>
    %137 = vector.shape_cast %136 : vector<1x1x5xf32> to vector<1x5xf32>
    %138 = vector.broadcast %137 : vector<1x5xf32> to vector<8x5xf32>
    %139 = arith.addf %135, %138 : vector<8x5xf32>
    %cst_106 = arith.constant dense<0.000000e+00> : vector<8x8xf32>
    %140 = tpu.matmul %125, %132, %cst_106 {dimension_numbers = #tpu.dot_dimension_numbers<[1], [1], [0], [0], [0, 0, 1, 0], [], []>} : vector<8x5xf32>, vector<8x5xf32>, vector<8x8xf32> -> vector<8x8xf32>
    %141 = vector.broadcast %7 : vector<1x8xf32> to vector<8x8xf32>
    %142 = arith.addf %140, %141 : vector<8x8xf32>
    %cst_107 = arith.constant dense<0xFF800000> : vector<8xf32>
    %143 = vector.multi_reduction <maximumf>, %142, %cst_107 [1] : vector<8x8xf32> to vector<8xf32>
    %144 = vector.shape_cast %143 : vector<8xf32> to vector<8x1xf32>
    %145 = vector.broadcast %144 : vector<8x1xf32> to vector<8x8xf32>
    %146 = arith.subf %142, %145 : vector<8x8xf32>
    %147 = math.exp %146 : vector<8x8xf32>
    %cst_108 = arith.constant dense<0.000000e+00> : vector<8xf32>
    %148 = vector.multi_reduction <add>, %147, %cst_108 [1] : vector<8x8xf32> to vector<8xf32>
    %149 = vector.shape_cast %148 : vector<8xf32> to vector<8x1xf32>
    %150 = tpu.reciprocal %149 {approx = true} : vector<8x1xf32> -> vector<8x1xf32>
    %151 = vector.broadcast %150 : vector<8x1xf32> to vector<8x8xf32>
    %152 = arith.mulf %147, %151 : vector<8x8xf32>
    %cst_109 = arith.constant dense<0.000000e+00> : vector<8x5xf32>
    %153 = tpu.matmul %152, %139, %cst_109 {dimension_numbers = #tpu.dot_dimension_numbers<[1], [0], [0], [1], [0, 0, 1, 1], [], []>} : vector<8x8xf32>, vector<8x5xf32>, vector<8x5xf32> -> vector<8x5xf32>
    %c2_110 = arith.constant 2 : index
    %c0_111 = arith.constant 0 : index
    %c0_112 = arith.constant 0 : index
    %154 = vector.load %arg14[%c2_110, %c0_111, %c0_112] : memref<4x5x20xf32, #tpu.memory_space<vmem>>, vector<1x5x20xf32>
    %155 = vector.shape_cast %154 : vector<1x5x20xf32> to vector<5x20xf32>
    %cst_113 = arith.constant dense<0.000000e+00> : vector<8x20xf32>
    %156 = tpu.matmul %153, %155, %cst_113 {dimension_numbers = #tpu.dot_dimension_numbers<[1], [0], [0], [1], [0, 0, 1, 1], [], []>} : vector<8x5xf32>, vector<5x20xf32>, vector<8x20xf32> -> vector<8x20xf32>
    %157 = arith.addf %116, %156 : vector<8x20xf32>
    %c3 = arith.constant 3 : index
    %c0_114 = arith.constant 0 : index
    %c0_115 = arith.constant 0 : index
    %158 = vector.load %arg8[%c3, %c0_114, %c0_115] : memref<4x20x5xf32, #tpu.memory_space<vmem>>, vector<1x20x5xf32>
    %159 = vector.shape_cast %158 : vector<1x20x5xf32> to vector<20x5xf32>
    %cst_116 = arith.constant dense<0.000000e+00> : vector<8x5xf32>
    %160 = tpu.matmul %33, %159, %cst_116 {dimension_numbers = #tpu.dot_dimension_numbers<[1], [0], [0], [1], [0, 0, 1, 1], [], []>} : vector<8x20xf32>, vector<20x5xf32>, vector<8x5xf32> -> vector<8x5xf32>
    %c3_117 = arith.constant 3 : index
    %c0_118 = arith.constant 0 : index
    %c0_119 = arith.constant 0 : index
    %161 = vector.load %arg9[%c3_117, %c0_118, %c0_119] : memref<4x1x5xf32, #tpu.memory_space<vmem>>, vector<1x1x5xf32>
    %162 = vector.shape_cast %161 : vector<1x1x5xf32> to vector<1x5xf32>
    %163 = vector.broadcast %162 : vector<1x5xf32> to vector<8x5xf32>
    %164 = arith.addf %160, %163 : vector<8x5xf32>
    %cst_120 = arith.constant 0.44721359 : f32
    %165 = vector.broadcast %cst_120 : f32 to vector<8x5xf32>
    %166 = arith.mulf %164, %165 : vector<8x5xf32>
    %c3_121 = arith.constant 3 : index
    %c0_122 = arith.constant 0 : index
    %c0_123 = arith.constant 0 : index
    %167 = vector.load %arg10[%c3_121, %c0_122, %c0_123] : memref<4x20x5xf32, #tpu.memory_space<vmem>>, vector<1x20x5xf32>
    %168 = vector.shape_cast %167 : vector<1x20x5xf32> to vector<20x5xf32>
    %cst_124 = arith.constant dense<0.000000e+00> : vector<8x5xf32>
    %169 = tpu.matmul %33, %168, %cst_124 {dimension_numbers = #tpu.dot_dimension_numbers<[1], [0], [0], [1], [0, 0, 1, 1], [], []>} : vector<8x20xf32>, vector<20x5xf32>, vector<8x5xf32> -> vector<8x5xf32>
    %c3_125 = arith.constant 3 : index
    %c0_126 = arith.constant 0 : index
    %c0_127 = arith.constant 0 : index
    %170 = vector.load %arg11[%c3_125, %c0_126, %c0_127] : memref<4x1x5xf32, #tpu.memory_space<vmem>>, vector<1x1x5xf32>
    %171 = vector.shape_cast %170 : vector<1x1x5xf32> to vector<1x5xf32>
    %172 = vector.broadcast %171 : vector<1x5xf32> to vector<8x5xf32>
    %173 = arith.addf %169, %172 : vector<8x5xf32>
    %c3_128 = arith.constant 3 : index
    %c0_129 = arith.constant 0 : index
    %c0_130 = arith.constant 0 : index
    %174 = vector.load %arg12[%c3_128, %c0_129, %c0_130] : memref<4x20x5xf32, #tpu.memory_space<vmem>>, vector<1x20x5xf32>
    %175 = vector.shape_cast %174 : vector<1x20x5xf32> to vector<20x5xf32>
    %cst_131 = arith.constant dense<0.000000e+00> : vector<8x5xf32>
    %176 = tpu.matmul %33, %175, %cst_131 {dimension_numbers = #tpu.dot_dimension_numbers<[1], [0], [0], [1], [0, 0, 1, 1], [], []>} : vector<8x20xf32>, vector<20x5xf32>, vector<8x5xf32> -> vector<8x5xf32>
    %c3_132 = arith.constant 3 : index
    %c0_133 = arith.constant 0 : index
    %c0_134 = arith.constant 0 : index
    %177 = vector.load %arg13[%c3_132, %c0_133, %c0_134] : memref<4x1x5xf32, #tpu.memory_space<vmem>>, vector<1x1x5xf32>
    %178 = vector.shape_cast %177 : vector<1x1x5xf32> to vector<1x5xf32>
    %179 = vector.broadcast %178 : vector<1x5xf32> to vector<8x5xf32>
    %180 = arith.addf %176, %179 : vector<8x5xf32>
    %cst_135 = arith.constant dense<0.000000e+00> : vector<8x8xf32>
    %181 = tpu.matmul %166, %173, %cst_135 {dimension_numbers = #tpu.dot_dimension_numbers<[1], [1], [0], [0], [0, 0, 1, 0], [], []>} : vector<8x5xf32>, vector<8x5xf32>, vector<8x8xf32> -> vector<8x8xf32>
    %182 = vector.broadcast %7 : vector<1x8xf32> to vector<8x8xf32>
    %183 = arith.addf %181, %182 : vector<8x8xf32>
    %cst_136 = arith.constant dense<0xFF800000> : vector<8xf32>
    %184 = vector.multi_reduction <maximumf>, %183, %cst_136 [1] : vector<8x8xf32> to vector<8xf32>
    %185 = vector.shape_cast %184 : vector<8xf32> to vector<8x1xf32>
    %186 = vector.broadcast %185 : vector<8x1xf32> to vector<8x8xf32>
    %187 = arith.subf %183, %186 : vector<8x8xf32>
    %188 = math.exp %187 : vector<8x8xf32>
    %cst_137 = arith.constant dense<0.000000e+00> : vector<8xf32>
    %189 = vector.multi_reduction <add>, %188, %cst_137 [1] : vector<8x8xf32> to vector<8xf32>
    %190 = vector.shape_cast %189 : vector<8xf32> to vector<8x1xf32>
    %191 = tpu.reciprocal %190 {approx = true} : vector<8x1xf32> -> vector<8x1xf32>
    %192 = vector.broadcast %191 : vector<8x1xf32> to vector<8x8xf32>
    %193 = arith.mulf %188, %192 : vector<8x8xf32>
    %cst_138 = arith.constant dense<0.000000e+00> : vector<8x5xf32>
    %194 = tpu.matmul %193, %180, %cst_138 {dimension_numbers = #tpu.dot_dimension_numbers<[1], [0], [0], [1], [0, 0, 1, 1], [], []>} : vector<8x8xf32>, vector<8x5xf32>, vector<8x5xf32> -> vector<8x5xf32>
    %c3_139 = arith.constant 3 : index
    %c0_140 = arith.constant 0 : index
    %c0_141 = arith.constant 0 : index
    %195 = vector.load %arg14[%c3_139, %c0_140, %c0_141] : memref<4x5x20xf32, #tpu.memory_space<vmem>>, vector<1x5x20xf32>
    %196 = vector.shape_cast %195 : vector<1x5x20xf32> to vector<5x20xf32>
    %cst_142 = arith.constant dense<0.000000e+00> : vector<8x20xf32>
    %197 = tpu.matmul %194, %196, %cst_142 {dimension_numbers = #tpu.dot_dimension_numbers<[1], [0], [0], [1], [0, 0, 1, 1], [], []>} : vector<8x5xf32>, vector<5x20xf32>, vector<8x20xf32> -> vector<8x20xf32>
    %198 = arith.addf %157, %197 : vector<8x20xf32>
    %199 = arith.addf %1, %198 : vector<8x20xf32>
    %c0_143 = arith.constant 0 : index
    %c0_144 = arith.constant 0 : index
    %c0_145 = arith.constant 0 : index
    %200 = vector.load %arg15[%c0_143, %c0_144, %c0_145] : memref<1x1x20xf32, #tpu.memory_space<vmem>>, vector<1x1x20xf32>
    %201 = vector.shape_cast %200 : vector<1x1x20xf32> to vector<1x20xf32>
    %202 = vector.broadcast %201 : vector<1x20xf32> to vector<8x20xf32>
    %203 = arith.addf %199, %202 : vector<8x20xf32>
    %c0_146 = arith.constant 0 : index
    %c0_147 = arith.constant 0 : index
    %c0_148 = arith.constant 0 : index
    %204 = vector.load %arg16[%c0_146, %c0_147, %c0_148] : memref<1x1x20xf32, #tpu.memory_space<vmem>>, vector<1x1x20xf32>
    %205 = vector.shape_cast %204 : vector<1x1x20xf32> to vector<1x20xf32>
    %c0_149 = arith.constant 0 : index
    %c0_150 = arith.constant 0 : index
    %c0_151 = arith.constant 0 : index
    %206 = vector.load %arg17[%c0_149, %c0_150, %c0_151] : memref<1x1x20xf32, #tpu.memory_space<vmem>>, vector<1x1x20xf32>
    %207 = vector.shape_cast %206 : vector<1x1x20xf32> to vector<1x20xf32>
    %cst_152 = arith.constant dense<0.000000e+00> : vector<8xf32>
    %208 = vector.multi_reduction <add>, %203, %cst_152 [1] : vector<8x20xf32> to vector<8xf32>
    %209 = vector.shape_cast %208 : vector<8xf32> to vector<8x1xf32>
    %cst_153 = arith.constant 2.000000e+01 : f32
    %210 = vector.broadcast %cst_153 : f32 to vector<8x1xf32>
    %211 = arith.divf %209, %210 : vector<8x1xf32>
    %212 = vector.broadcast %211 : vector<8x1xf32> to vector<8x20xf32>
    %213 = arith.subf %203, %212 : vector<8x20xf32>
    %214 = arith.mulf %213, %213 : vector<8x20xf32>
    %cst_154 = arith.constant dense<0.000000e+00> : vector<8xf32>
    %215 = vector.multi_reduction <add>, %214, %cst_154 [1] : vector<8x20xf32> to vector<8xf32>
    %216 = vector.shape_cast %215 : vector<8xf32> to vector<8x1xf32>
    %cst_155 = arith.constant 2.000000e+01 : f32
    %217 = vector.broadcast %cst_155 : f32 to vector<8x1xf32>
    %218 = arith.divf %216, %217 : vector<8x1xf32>
    %cst_156 = arith.constant 9.99999996E-13 : f32
    %219 = vector.broadcast %cst_156 : f32 to vector<8x1xf32>
    %220 = arith.addf %218, %219 : vector<8x1xf32>
    %221 = math.rsqrt %220 : vector<8x1xf32>
    %222 = vector.broadcast %221 : vector<8x1xf32> to vector<8x20xf32>
    %223 = arith.mulf %213, %222 : vector<8x20xf32>
    %224 = vector.broadcast %205 : vector<1x20xf32> to vector<8x20xf32>
    %225 = arith.mulf %223, %224 : vector<8x20xf32>
    %226 = vector.broadcast %207 : vector<1x20xf32> to vector<8x20xf32>
    %227 = arith.addf %225, %226 : vector<8x20xf32>
    %cst_157 = arith.constant 0.000000e+00 : f32
    %228 = vector.broadcast %cst_157 : f32 to vector<8x20xf32>
    %c0_158 = arith.constant 0 : index
    %c0_159 = arith.constant 0 : index
    %c0_160 = arith.constant 0 : index
    %229 = vector.load %arg18[%c0_158, %c0_159, %c0_160] : memref<5x20x4xf32, #tpu.memory_space<vmem>>, vector<1x20x4xf32>
    %230 = vector.shape_cast %229 : vector<1x20x4xf32> to vector<20x4xf32>
    %cst_161 = arith.constant dense<0.000000e+00> : vector<8x4xf32>
    %231 = tpu.matmul %227, %230, %cst_161 {dimension_numbers = #tpu.dot_dimension_numbers<[1], [0], [0], [1], [0, 0, 1, 1], [], []>} : vector<8x20xf32>, vector<20x4xf32>, vector<8x4xf32> -> vector<8x4xf32>
    %c0_162 = arith.constant 0 : index
    %c0_163 = arith.constant 0 : index
    %c0_164 = arith.constant 0 : index
    %232 = vector.load %arg19[%c0_162, %c0_163, %c0_164] : memref<5x1x4xf32, #tpu.memory_space<vmem>>, vector<1x1x4xf32>
    %233 = vector.shape_cast %232 : vector<1x1x4xf32> to vector<1x4xf32>
    %234 = vector.broadcast %233 : vector<1x4xf32> to vector<8x4xf32>
    %235 = arith.addf %231, %234 : vector<8x4xf32>
    %cst_165 = arith.constant 5.000000e-01 : f32
    %236 = vector.broadcast %cst_165 : f32 to vector<8x4xf32>
    %237 = arith.mulf %235, %236 : vector<8x4xf32>
    %c0_166 = arith.constant 0 : index
    %c0_167 = arith.constant 0 : index
    %c0_168 = arith.constant 0 : index
    %238 = vector.load %arg20[%c0_166, %c0_167, %c0_168] : memref<5x20x4xf32, #tpu.memory_space<vmem>>, vector<1x20x4xf32>
    %239 = vector.shape_cast %238 : vector<1x20x4xf32> to vector<20x4xf32>
    %cst_169 = arith.constant dense<0.000000e+00> : vector<8x4xf32>
    %240 = tpu.matmul %3, %239, %cst_169 {dimension_numbers = #tpu.dot_dimension_numbers<[1], [0], [0], [1], [0, 0, 1, 1], [], []>} : vector<8x20xf32>, vector<20x4xf32>, vector<8x4xf32> -> vector<8x4xf32>
    %c0_170 = arith.constant 0 : index
    %c0_171 = arith.constant 0 : index
    %c0_172 = arith.constant 0 : index
    %241 = vector.load %arg21[%c0_170, %c0_171, %c0_172] : memref<5x1x4xf32, #tpu.memory_space<vmem>>, vector<1x1x4xf32>
    %242 = vector.shape_cast %241 : vector<1x1x4xf32> to vector<1x4xf32>
    %243 = vector.broadcast %242 : vector<1x4xf32> to vector<8x4xf32>
    %244 = arith.addf %240, %243 : vector<8x4xf32>
    %c0_173 = arith.constant 0 : index
    %c0_174 = arith.constant 0 : index
    %c0_175 = arith.constant 0 : index
    %245 = vector.load %arg22[%c0_173, %c0_174, %c0_175] : memref<5x20x4xf32, #tpu.memory_space<vmem>>, vector<1x20x4xf32>
    %246 = vector.shape_cast %245 : vector<1x20x4xf32> to vector<20x4xf32>
    %cst_176 = arith.constant dense<0.000000e+00> : vector<8x4xf32>
    %247 = tpu.matmul %3, %246, %cst_176 {dimension_numbers = #tpu.dot_dimension_numbers<[1], [0], [0], [1], [0, 0, 1, 1], [], []>} : vector<8x20xf32>, vector<20x4xf32>, vector<8x4xf32> -> vector<8x4xf32>
    %c0_177 = arith.constant 0 : index
    %c0_178 = arith.constant 0 : index
    %c0_179 = arith.constant 0 : index
    %248 = vector.load %arg23[%c0_177, %c0_178, %c0_179] : memref<5x1x4xf32, #tpu.memory_space<vmem>>, vector<1x1x4xf32>
    %249 = vector.shape_cast %248 : vector<1x1x4xf32> to vector<1x4xf32>
    %250 = vector.broadcast %249 : vector<1x4xf32> to vector<8x4xf32>
    %251 = arith.addf %247, %250 : vector<8x4xf32>
    %cst_180 = arith.constant dense<0.000000e+00> : vector<8x8xf32>
    %252 = tpu.matmul %237, %244, %cst_180 {dimension_numbers = #tpu.dot_dimension_numbers<[1], [1], [0], [0], [0, 0, 1, 0], [], []>} : vector<8x4xf32>, vector<8x4xf32>, vector<8x8xf32> -> vector<8x8xf32>
    %253 = vector.extract_strided_slice %5 {offsets = [0, 0, 0], sizes = [1, 8, 8], strides = [1, 1, 1]} : vector<5x8x8xf32> to vector<1x8x8xf32>
    %254 = vector.shape_cast %253 : vector<1x8x8xf32> to vector<8x8xf32>
    %cst_181 = arith.constant 1.000000e+02 : f32
    %255 = vector.broadcast %cst_181 : f32 to vector<8x8xf32>
    %256 = arith.mulf %255, %254 : vector<8x8xf32>
    %257 = arith.addf %252, %256 : vector<8x8xf32>
    %258 = vector.broadcast %9 : vector<1x8xf32> to vector<8x8xf32>
    %259 = arith.addf %257, %258 : vector<8x8xf32>
    %cst_182 = arith.constant dense<0xFF800000> : vector<8xf32>
    %260 = vector.multi_reduction <maximumf>, %259, %cst_182 [1] : vector<8x8xf32> to vector<8xf32>
    %261 = vector.shape_cast %260 : vector<8xf32> to vector<8x1xf32>
    %262 = vector.broadcast %261 : vector<8x1xf32> to vector<8x8xf32>
    %263 = arith.subf %259, %262 : vector<8x8xf32>
    %264 = math.exp %263 : vector<8x8xf32>
    %cst_183 = arith.constant dense<0.000000e+00> : vector<8xf32>
    %265 = vector.multi_reduction <add>, %264, %cst_183 [1] : vector<8x8xf32> to vector<8xf32>
    %266 = vector.shape_cast %265 : vector<8xf32> to vector<8x1xf32>
    %267 = tpu.reciprocal %266 {approx = true} : vector<8x1xf32> -> vector<8x1xf32>
    %268 = vector.broadcast %267 : vector<8x1xf32> to vector<8x8xf32>
    %269 = arith.mulf %264, %268 : vector<8x8xf32>
    %cst_184 = arith.constant dense<0.000000e+00> : vector<8x4xf32>
    %270 = tpu.matmul %269, %251, %cst_184 {dimension_numbers = #tpu.dot_dimension_numbers<[1], [0], [0], [1], [0, 0, 1, 1], [], []>} : vector<8x8xf32>, vector<8x4xf32>, vector<8x4xf32> -> vector<8x4xf32>
    %c0_185 = arith.constant 0 : index
    %c0_186 = arith.constant 0 : index
    %c0_187 = arith.constant 0 : index
    %271 = vector.load %arg24[%c0_185, %c0_186, %c0_187] : memref<5x4x20xf32, #tpu.memory_space<vmem>>, vector<1x4x20xf32>
    %272 = vector.shape_cast %271 : vector<1x4x20xf32> to vector<4x20xf32>
    %cst_188 = arith.constant dense<0.000000e+00> : vector<8x20xf32>
    %273 = tpu.matmul %270, %272, %cst_188 {dimension_numbers = #tpu.dot_dimension_numbers<[1], [0], [0], [1], [0, 0, 1, 1], [], []>} : vector<8x4xf32>, vector<4x20xf32>, vector<8x20xf32> -> vector<8x20xf32>
    %274 = arith.addf %228, %273 : vector<8x20xf32>
    %c1_189 = arith.constant 1 : index
    %c0_190 = arith.constant 0 : index
    %c0_191 = arith.constant 0 : index
    %275 = vector.load %arg18[%c1_189, %c0_190, %c0_191] : memref<5x20x4xf32, #tpu.memory_space<vmem>>, vector<1x20x4xf32>
    %276 = vector.shape_cast %275 : vector<1x20x4xf32> to vector<20x4xf32>
    %cst_192 = arith.constant dense<0.000000e+00> : vector<8x4xf32>
    %277 = tpu.matmul %227, %276, %cst_192 {dimension_numbers = #tpu.dot_dimension_numbers<[1], [0], [0], [1], [0, 0, 1, 1], [], []>} : vector<8x20xf32>, vector<20x4xf32>, vector<8x4xf32> -> vector<8x4xf32>
    %c1_193 = arith.constant 1 : index
    %c0_194 = arith.constant 0 : index
    %c0_195 = arith.constant 0 : index
    %278 = vector.load %arg19[%c1_193, %c0_194, %c0_195] : memref<5x1x4xf32, #tpu.memory_space<vmem>>, vector<1x1x4xf32>
    %279 = vector.shape_cast %278 : vector<1x1x4xf32> to vector<1x4xf32>
    %280 = vector.broadcast %279 : vector<1x4xf32> to vector<8x4xf32>
    %281 = arith.addf %277, %280 : vector<8x4xf32>
    %cst_196 = arith.constant 5.000000e-01 : f32
    %282 = vector.broadcast %cst_196 : f32 to vector<8x4xf32>
    %283 = arith.mulf %281, %282 : vector<8x4xf32>
    %c1_197 = arith.constant 1 : index
    %c0_198 = arith.constant 0 : index
    %c0_199 = arith.constant 0 : index
    %284 = vector.load %arg20[%c1_197, %c0_198, %c0_199] : memref<5x20x4xf32, #tpu.memory_space<vmem>>, vector<1x20x4xf32>
    %285 = vector.shape_cast %284 : vector<1x20x4xf32> to vector<20x4xf32>
    %cst_200 = arith.constant dense<0.000000e+00> : vector<8x4xf32>
    %286 = tpu.matmul %3, %285, %cst_200 {dimension_numbers = #tpu.dot_dimension_numbers<[1], [0], [0], [1], [0, 0, 1, 1], [], []>} : vector<8x20xf32>, vector<20x4xf32>, vector<8x4xf32> -> vector<8x4xf32>
    %c1_201 = arith.constant 1 : index
    %c0_202 = arith.constant 0 : index
    %c0_203 = arith.constant 0 : index
    %287 = vector.load %arg21[%c1_201, %c0_202, %c0_203] : memref<5x1x4xf32, #tpu.memory_space<vmem>>, vector<1x1x4xf32>
    %288 = vector.shape_cast %287 : vector<1x1x4xf32> to vector<1x4xf32>
    %289 = vector.broadcast %288 : vector<1x4xf32> to vector<8x4xf32>
    %290 = arith.addf %286, %289 : vector<8x4xf32>
    %c1_204 = arith.constant 1 : index
    %c0_205 = arith.constant 0 : index
    %c0_206 = arith.constant 0 : index
    %291 = vector.load %arg22[%c1_204, %c0_205, %c0_206] : memref<5x20x4xf32, #tpu.memory_space<vmem>>, vector<1x20x4xf32>
    %292 = vector.shape_cast %291 : vector<1x20x4xf32> to vector<20x4xf32>
    %cst_207 = arith.constant dense<0.000000e+00> : vector<8x4xf32>
    %293 = tpu.matmul %3, %292, %cst_207 {dimension_numbers = #tpu.dot_dimension_numbers<[1], [0], [0], [1], [0, 0, 1, 1], [], []>} : vector<8x20xf32>, vector<20x4xf32>, vector<8x4xf32> -> vector<8x4xf32>
    %c1_208 = arith.constant 1 : index
    %c0_209 = arith.constant 0 : index
    %c0_210 = arith.constant 0 : index
    %294 = vector.load %arg23[%c1_208, %c0_209, %c0_210] : memref<5x1x4xf32, #tpu.memory_space<vmem>>, vector<1x1x4xf32>
    %295 = vector.shape_cast %294 : vector<1x1x4xf32> to vector<1x4xf32>
    %296 = vector.broadcast %295 : vector<1x4xf32> to vector<8x4xf32>
    %297 = arith.addf %293, %296 : vector<8x4xf32>
    %cst_211 = arith.constant dense<0.000000e+00> : vector<8x8xf32>
    %298 = tpu.matmul %283, %290, %cst_211 {dimension_numbers = #tpu.dot_dimension_numbers<[1], [1], [0], [0], [0, 0, 1, 0], [], []>} : vector<8x4xf32>, vector<8x4xf32>, vector<8x8xf32> -> vector<8x8xf32>
    %299 = vector.extract_strided_slice %5 {offsets = [1, 0, 0], sizes = [1, 8, 8], strides = [1, 1, 1]} : vector<5x8x8xf32> to vector<1x8x8xf32>
    %300 = vector.shape_cast %299 : vector<1x8x8xf32> to vector<8x8xf32>
    %cst_212 = arith.constant 1.000000e+02 : f32
    %301 = vector.broadcast %cst_212 : f32 to vector<8x8xf32>
    %302 = arith.mulf %301, %300 : vector<8x8xf32>
    %303 = arith.addf %298, %302 : vector<8x8xf32>
    %304 = vector.broadcast %9 : vector<1x8xf32> to vector<8x8xf32>
    %305 = arith.addf %303, %304 : vector<8x8xf32>
    %cst_213 = arith.constant dense<0xFF800000> : vector<8xf32>
    %306 = vector.multi_reduction <maximumf>, %305, %cst_213 [1] : vector<8x8xf32> to vector<8xf32>
    %307 = vector.shape_cast %306 : vector<8xf32> to vector<8x1xf32>
    %308 = vector.broadcast %307 : vector<8x1xf32> to vector<8x8xf32>
    %309 = arith.subf %305, %308 : vector<8x8xf32>
    %310 = math.exp %309 : vector<8x8xf32>
    %cst_214 = arith.constant dense<0.000000e+00> : vector<8xf32>
    %311 = vector.multi_reduction <add>, %310, %cst_214 [1] : vector<8x8xf32> to vector<8xf32>
    %312 = vector.shape_cast %311 : vector<8xf32> to vector<8x1xf32>
    %313 = tpu.reciprocal %312 {approx = true} : vector<8x1xf32> -> vector<8x1xf32>
    %314 = vector.broadcast %313 : vector<8x1xf32> to vector<8x8xf32>
    %315 = arith.mulf %310, %314 : vector<8x8xf32>
    %cst_215 = arith.constant dense<0.000000e+00> : vector<8x4xf32>
    %316 = tpu.matmul %315, %297, %cst_215 {dimension_numbers = #tpu.dot_dimension_numbers<[1], [0], [0], [1], [0, 0, 1, 1], [], []>} : vector<8x8xf32>, vector<8x4xf32>, vector<8x4xf32> -> vector<8x4xf32>
    %c1_216 = arith.constant 1 : index
    %c0_217 = arith.constant 0 : index
    %c0_218 = arith.constant 0 : index
    %317 = vector.load %arg24[%c1_216, %c0_217, %c0_218] : memref<5x4x20xf32, #tpu.memory_space<vmem>>, vector<1x4x20xf32>
    %318 = vector.shape_cast %317 : vector<1x4x20xf32> to vector<4x20xf32>
    %cst_219 = arith.constant dense<0.000000e+00> : vector<8x20xf32>
    %319 = tpu.matmul %316, %318, %cst_219 {dimension_numbers = #tpu.dot_dimension_numbers<[1], [0], [0], [1], [0, 0, 1, 1], [], []>} : vector<8x4xf32>, vector<4x20xf32>, vector<8x20xf32> -> vector<8x20xf32>
    %320 = arith.addf %274, %319 : vector<8x20xf32>
    %c2_220 = arith.constant 2 : index
    %c0_221 = arith.constant 0 : index
    %c0_222 = arith.constant 0 : index
    %321 = vector.load %arg18[%c2_220, %c0_221, %c0_222] : memref<5x20x4xf32, #tpu.memory_space<vmem>>, vector<1x20x4xf32>
    %322 = vector.shape_cast %321 : vector<1x20x4xf32> to vector<20x4xf32>
    %cst_223 = arith.constant dense<0.000000e+00> : vector<8x4xf32>
    %323 = tpu.matmul %227, %322, %cst_223 {dimension_numbers = #tpu.dot_dimension_numbers<[1], [0], [0], [1], [0, 0, 1, 1], [], []>} : vector<8x20xf32>, vector<20x4xf32>, vector<8x4xf32> -> vector<8x4xf32>
    %c2_224 = arith.constant 2 : index
    %c0_225 = arith.constant 0 : index
    %c0_226 = arith.constant 0 : index
    %324 = vector.load %arg19[%c2_224, %c0_225, %c0_226] : memref<5x1x4xf32, #tpu.memory_space<vmem>>, vector<1x1x4xf32>
    %325 = vector.shape_cast %324 : vector<1x1x4xf32> to vector<1x4xf32>
    %326 = vector.broadcast %325 : vector<1x4xf32> to vector<8x4xf32>
    %327 = arith.addf %323, %326 : vector<8x4xf32>
    %cst_227 = arith.constant 5.000000e-01 : f32
    %328 = vector.broadcast %cst_227 : f32 to vector<8x4xf32>
    %329 = arith.mulf %327, %328 : vector<8x4xf32>
    %c2_228 = arith.constant 2 : index
    %c0_229 = arith.constant 0 : index
    %c0_230 = arith.constant 0 : index
    %330 = vector.load %arg20[%c2_228, %c0_229, %c0_230] : memref<5x20x4xf32, #tpu.memory_space<vmem>>, vector<1x20x4xf32>
    %331 = vector.shape_cast %330 : vector<1x20x4xf32> to vector<20x4xf32>
    %cst_231 = arith.constant dense<0.000000e+00> : vector<8x4xf32>
    %332 = tpu.matmul %3, %331, %cst_231 {dimension_numbers = #tpu.dot_dimension_numbers<[1], [0], [0], [1], [0, 0, 1, 1], [], []>} : vector<8x20xf32>, vector<20x4xf32>, vector<8x4xf32> -> vector<8x4xf32>
    %c2_232 = arith.constant 2 : index
    %c0_233 = arith.constant 0 : index
    %c0_234 = arith.constant 0 : index
    %333 = vector.load %arg21[%c2_232, %c0_233, %c0_234] : memref<5x1x4xf32, #tpu.memory_space<vmem>>, vector<1x1x4xf32>
    %334 = vector.shape_cast %333 : vector<1x1x4xf32> to vector<1x4xf32>
    %335 = vector.broadcast %334 : vector<1x4xf32> to vector<8x4xf32>
    %336 = arith.addf %332, %335 : vector<8x4xf32>
    %c2_235 = arith.constant 2 : index
    %c0_236 = arith.constant 0 : index
    %c0_237 = arith.constant 0 : index
    %337 = vector.load %arg22[%c2_235, %c0_236, %c0_237] : memref<5x20x4xf32, #tpu.memory_space<vmem>>, vector<1x20x4xf32>
    %338 = vector.shape_cast %337 : vector<1x20x4xf32> to vector<20x4xf32>
    %cst_238 = arith.constant dense<0.000000e+00> : vector<8x4xf32>
    %339 = tpu.matmul %3, %338, %cst_238 {dimension_numbers = #tpu.dot_dimension_numbers<[1], [0], [0], [1], [0, 0, 1, 1], [], []>} : vector<8x20xf32>, vector<20x4xf32>, vector<8x4xf32> -> vector<8x4xf32>
    %c2_239 = arith.constant 2 : index
    %c0_240 = arith.constant 0 : index
    %c0_241 = arith.constant 0 : index
    %340 = vector.load %arg23[%c2_239, %c0_240, %c0_241] : memref<5x1x4xf32, #tpu.memory_space<vmem>>, vector<1x1x4xf32>
    %341 = vector.shape_cast %340 : vector<1x1x4xf32> to vector<1x4xf32>
    %342 = vector.broadcast %341 : vector<1x4xf32> to vector<8x4xf32>
    %343 = arith.addf %339, %342 : vector<8x4xf32>
    %cst_242 = arith.constant dense<0.000000e+00> : vector<8x8xf32>
    %344 = tpu.matmul %329, %336, %cst_242 {dimension_numbers = #tpu.dot_dimension_numbers<[1], [1], [0], [0], [0, 0, 1, 0], [], []>} : vector<8x4xf32>, vector<8x4xf32>, vector<8x8xf32> -> vector<8x8xf32>
    %345 = vector.extract_strided_slice %5 {offsets = [2, 0, 0], sizes = [1, 8, 8], strides = [1, 1, 1]} : vector<5x8x8xf32> to vector<1x8x8xf32>
    %346 = vector.shape_cast %345 : vector<1x8x8xf32> to vector<8x8xf32>
    %cst_243 = arith.constant 1.000000e+02 : f32
    %347 = vector.broadcast %cst_243 : f32 to vector<8x8xf32>
    %348 = arith.mulf %347, %346 : vector<8x8xf32>
    %349 = arith.addf %344, %348 : vector<8x8xf32>
    %350 = vector.broadcast %9 : vector<1x8xf32> to vector<8x8xf32>
    %351 = arith.addf %349, %350 : vector<8x8xf32>
    %cst_244 = arith.constant dense<0xFF800000> : vector<8xf32>
    %352 = vector.multi_reduction <maximumf>, %351, %cst_244 [1] : vector<8x8xf32> to vector<8xf32>
    %353 = vector.shape_cast %352 : vector<8xf32> to vector<8x1xf32>
    %354 = vector.broadcast %353 : vector<8x1xf32> to vector<8x8xf32>
    %355 = arith.subf %351, %354 : vector<8x8xf32>
    %356 = math.exp %355 : vector<8x8xf32>
    %cst_245 = arith.constant dense<0.000000e+00> : vector<8xf32>
    %357 = vector.multi_reduction <add>, %356, %cst_245 [1] : vector<8x8xf32> to vector<8xf32>
    %358 = vector.shape_cast %357 : vector<8xf32> to vector<8x1xf32>
    %359 = tpu.reciprocal %358 {approx = true} : vector<8x1xf32> -> vector<8x1xf32>
    %360 = vector.broadcast %359 : vector<8x1xf32> to vector<8x8xf32>
    %361 = arith.mulf %356, %360 : vector<8x8xf32>
    %cst_246 = arith.constant dense<0.000000e+00> : vector<8x4xf32>
    %362 = tpu.matmul %361, %343, %cst_246 {dimension_numbers = #tpu.dot_dimension_numbers<[1], [0], [0], [1], [0, 0, 1, 1], [], []>} : vector<8x8xf32>, vector<8x4xf32>, vector<8x4xf32> -> vector<8x4xf32>
    %c2_247 = arith.constant 2 : index
    %c0_248 = arith.constant 0 : index
    %c0_249 = arith.constant 0 : index
    %363 = vector.load %arg24[%c2_247, %c0_248, %c0_249] : memref<5x4x20xf32, #tpu.memory_space<vmem>>, vector<1x4x20xf32>
    %364 = vector.shape_cast %363 : vector<1x4x20xf32> to vector<4x20xf32>
    %cst_250 = arith.constant dense<0.000000e+00> : vector<8x20xf32>
    %365 = tpu.matmul %362, %364, %cst_250 {dimension_numbers = #tpu.dot_dimension_numbers<[1], [0], [0], [1], [0, 0, 1, 1], [], []>} : vector<8x4xf32>, vector<4x20xf32>, vector<8x20xf32> -> vector<8x20xf32>
    %366 = arith.addf %320, %365 : vector<8x20xf32>
    %c3_251 = arith.constant 3 : index
    %c0_252 = arith.constant 0 : index
    %c0_253 = arith.constant 0 : index
    %367 = vector.load %arg18[%c3_251, %c0_252, %c0_253] : memref<5x20x4xf32, #tpu.memory_space<vmem>>, vector<1x20x4xf32>
    %368 = vector.shape_cast %367 : vector<1x20x4xf32> to vector<20x4xf32>
    %cst_254 = arith.constant dense<0.000000e+00> : vector<8x4xf32>
    %369 = tpu.matmul %227, %368, %cst_254 {dimension_numbers = #tpu.dot_dimension_numbers<[1], [0], [0], [1], [0, 0, 1, 1], [], []>} : vector<8x20xf32>, vector<20x4xf32>, vector<8x4xf32> -> vector<8x4xf32>
    %c3_255 = arith.constant 3 : index
    %c0_256 = arith.constant 0 : index
    %c0_257 = arith.constant 0 : index
    %370 = vector.load %arg19[%c3_255, %c0_256, %c0_257] : memref<5x1x4xf32, #tpu.memory_space<vmem>>, vector<1x1x4xf32>
    %371 = vector.shape_cast %370 : vector<1x1x4xf32> to vector<1x4xf32>
    %372 = vector.broadcast %371 : vector<1x4xf32> to vector<8x4xf32>
    %373 = arith.addf %369, %372 : vector<8x4xf32>
    %cst_258 = arith.constant 5.000000e-01 : f32
    %374 = vector.broadcast %cst_258 : f32 to vector<8x4xf32>
    %375 = arith.mulf %373, %374 : vector<8x4xf32>
    %c3_259 = arith.constant 3 : index
    %c0_260 = arith.constant 0 : index
    %c0_261 = arith.constant 0 : index
    %376 = vector.load %arg20[%c3_259, %c0_260, %c0_261] : memref<5x20x4xf32, #tpu.memory_space<vmem>>, vector<1x20x4xf32>
    %377 = vector.shape_cast %376 : vector<1x20x4xf32> to vector<20x4xf32>
    %cst_262 = arith.constant dense<0.000000e+00> : vector<8x4xf32>
    %378 = tpu.matmul %3, %377, %cst_262 {dimension_numbers = #tpu.dot_dimension_numbers<[1], [0], [0], [1], [0, 0, 1, 1], [], []>} : vector<8x20xf32>, vector<20x4xf32>, vector<8x4xf32> -> vector<8x4xf32>
    %c3_263 = arith.constant 3 : index
    %c0_264 = arith.constant 0 : index
    %c0_265 = arith.constant 0 : index
    %379 = vector.load %arg21[%c3_263, %c0_264, %c0_265] : memref<5x1x4xf32, #tpu.memory_space<vmem>>, vector<1x1x4xf32>
    %380 = vector.shape_cast %379 : vector<1x1x4xf32> to vector<1x4xf32>
    %381 = vector.broadcast %380 : vector<1x4xf32> to vector<8x4xf32>
    %382 = arith.addf %378, %381 : vector<8x4xf32>
    %c3_266 = arith.constant 3 : index
    %c0_267 = arith.constant 0 : index
    %c0_268 = arith.constant 0 : index
    %383 = vector.load %arg22[%c3_266, %c0_267, %c0_268] : memref<5x20x4xf32, #tpu.memory_space<vmem>>, vector<1x20x4xf32>
    %384 = vector.shape_cast %383 : vector<1x20x4xf32> to vector<20x4xf32>
    %cst_269 = arith.constant dense<0.000000e+00> : vector<8x4xf32>
    %385 = tpu.matmul %3, %384, %cst_269 {dimension_numbers = #tpu.dot_dimension_numbers<[1], [0], [0], [1], [0, 0, 1, 1], [], []>} : vector<8x20xf32>, vector<20x4xf32>, vector<8x4xf32> -> vector<8x4xf32>
    %c3_270 = arith.constant 3 : index
    %c0_271 = arith.constant 0 : index
    %c0_272 = arith.constant 0 : index
    %386 = vector.load %arg23[%c3_270, %c0_271, %c0_272] : memref<5x1x4xf32, #tpu.memory_space<vmem>>, vector<1x1x4xf32>
    %387 = vector.shape_cast %386 : vector<1x1x4xf32> to vector<1x4xf32>
    %388 = vector.broadcast %387 : vector<1x4xf32> to vector<8x4xf32>
    %389 = arith.addf %385, %388 : vector<8x4xf32>
    %cst_273 = arith.constant dense<0.000000e+00> : vector<8x8xf32>
    %390 = tpu.matmul %375, %382, %cst_273 {dimension_numbers = #tpu.dot_dimension_numbers<[1], [1], [0], [0], [0, 0, 1, 0], [], []>} : vector<8x4xf32>, vector<8x4xf32>, vector<8x8xf32> -> vector<8x8xf32>
    %391 = vector.extract_strided_slice %5 {offsets = [3, 0, 0], sizes = [1, 8, 8], strides = [1, 1, 1]} : vector<5x8x8xf32> to vector<1x8x8xf32>
    %392 = vector.shape_cast %391 : vector<1x8x8xf32> to vector<8x8xf32>
    %cst_274 = arith.constant 1.000000e+02 : f32
    %393 = vector.broadcast %cst_274 : f32 to vector<8x8xf32>
    %394 = arith.mulf %393, %392 : vector<8x8xf32>
    %395 = arith.addf %390, %394 : vector<8x8xf32>
    %396 = vector.broadcast %9 : vector<1x8xf32> to vector<8x8xf32>
    %397 = arith.addf %395, %396 : vector<8x8xf32>
    %cst_275 = arith.constant dense<0xFF800000> : vector<8xf32>
    %398 = vector.multi_reduction <maximumf>, %397, %cst_275 [1] : vector<8x8xf32> to vector<8xf32>
    %399 = vector.shape_cast %398 : vector<8xf32> to vector<8x1xf32>
    %400 = vector.broadcast %399 : vector<8x1xf32> to vector<8x8xf32>
    %401 = arith.subf %397, %400 : vector<8x8xf32>
    %402 = math.exp %401 : vector<8x8xf32>
    %cst_276 = arith.constant dense<0.000000e+00> : vector<8xf32>
    %403 = vector.multi_reduction <add>, %402, %cst_276 [1] : vector<8x8xf32> to vector<8xf32>
    %404 = vector.shape_cast %403 : vector<8xf32> to vector<8x1xf32>
    %405 = tpu.reciprocal %404 {approx = true} : vector<8x1xf32> -> vector<8x1xf32>
    %406 = vector.broadcast %405 : vector<8x1xf32> to vector<8x8xf32>
    %407 = arith.mulf %402, %406 : vector<8x8xf32>
    %cst_277 = arith.constant dense<0.000000e+00> : vector<8x4xf32>
    %408 = tpu.matmul %407, %389, %cst_277 {dimension_numbers = #tpu.dot_dimension_numbers<[1], [0], [0], [1], [0, 0, 1, 1], [], []>} : vector<8x8xf32>, vector<8x4xf32>, vector<8x4xf32> -> vector<8x4xf32>
    %c3_278 = arith.constant 3 : index
    %c0_279 = arith.constant 0 : index
    %c0_280 = arith.constant 0 : index
    %409 = vector.load %arg24[%c3_278, %c0_279, %c0_280] : memref<5x4x20xf32, #tpu.memory_space<vmem>>, vector<1x4x20xf32>
    %410 = vector.shape_cast %409 : vector<1x4x20xf32> to vector<4x20xf32>
    %cst_281 = arith.constant dense<0.000000e+00> : vector<8x20xf32>
    %411 = tpu.matmul %408, %410, %cst_281 {dimension_numbers = #tpu.dot_dimension_numbers<[1], [0], [0], [1], [0, 0, 1, 1], [], []>} : vector<8x4xf32>, vector<4x20xf32>, vector<8x20xf32> -> vector<8x20xf32>
    %412 = arith.addf %366, %411 : vector<8x20xf32>
    %c4 = arith.constant 4 : index
    %c0_282 = arith.constant 0 : index
    %c0_283 = arith.constant 0 : index
    %413 = vector.load %arg18[%c4, %c0_282, %c0_283] : memref<5x20x4xf32, #tpu.memory_space<vmem>>, vector<1x20x4xf32>
    %414 = vector.shape_cast %413 : vector<1x20x4xf32> to vector<20x4xf32>
    %cst_284 = arith.constant dense<0.000000e+00> : vector<8x4xf32>
    %415 = tpu.matmul %227, %414, %cst_284 {dimension_numbers = #tpu.dot_dimension_numbers<[1], [0], [0], [1], [0, 0, 1, 1], [], []>} : vector<8x20xf32>, vector<20x4xf32>, vector<8x4xf32> -> vector<8x4xf32>
    %c4_285 = arith.constant 4 : index
    %c0_286 = arith.constant 0 : index
    %c0_287 = arith.constant 0 : index
    %416 = vector.load %arg19[%c4_285, %c0_286, %c0_287] : memref<5x1x4xf32, #tpu.memory_space<vmem>>, vector<1x1x4xf32>
    %417 = vector.shape_cast %416 : vector<1x1x4xf32> to vector<1x4xf32>
    %418 = vector.broadcast %417 : vector<1x4xf32> to vector<8x4xf32>
    %419 = arith.addf %415, %418 : vector<8x4xf32>
    %cst_288 = arith.constant 5.000000e-01 : f32
    %420 = vector.broadcast %cst_288 : f32 to vector<8x4xf32>
    %421 = arith.mulf %419, %420 : vector<8x4xf32>
    %c4_289 = arith.constant 4 : index
    %c0_290 = arith.constant 0 : index
    %c0_291 = arith.constant 0 : index
    %422 = vector.load %arg20[%c4_289, %c0_290, %c0_291] : memref<5x20x4xf32, #tpu.memory_space<vmem>>, vector<1x20x4xf32>
    %423 = vector.shape_cast %422 : vector<1x20x4xf32> to vector<20x4xf32>
    %cst_292 = arith.constant dense<0.000000e+00> : vector<8x4xf32>
    %424 = tpu.matmul %3, %423, %cst_292 {dimension_numbers = #tpu.dot_dimension_numbers<[1], [0], [0], [1], [0, 0, 1, 1], [], []>} : vector<8x20xf32>, vector<20x4xf32>, vector<8x4xf32> -> vector<8x4xf32>
    %c4_293 = arith.constant 4 : index
    %c0_294 = arith.constant 0 : index
    %c0_295 = arith.constant 0 : index
    %425 = vector.load %arg21[%c4_293, %c0_294, %c0_295] : memref<5x1x4xf32, #tpu.memory_space<vmem>>, vector<1x1x4xf32>
    %426 = vector.shape_cast %425 : vector<1x1x4xf32> to vector<1x4xf32>
    %427 = vector.broadcast %426 : vector<1x4xf32> to vector<8x4xf32>
    %428 = arith.addf %424, %427 : vector<8x4xf32>
    %c4_296 = arith.constant 4 : index
    %c0_297 = arith.constant 0 : index
    %c0_298 = arith.constant 0 : index
    %429 = vector.load %arg22[%c4_296, %c0_297, %c0_298] : memref<5x20x4xf32, #tpu.memory_space<vmem>>, vector<1x20x4xf32>
    %430 = vector.shape_cast %429 : vector<1x20x4xf32> to vector<20x4xf32>
    %cst_299 = arith.constant dense<0.000000e+00> : vector<8x4xf32>
    %431 = tpu.matmul %3, %430, %cst_299 {dimension_numbers = #tpu.dot_dimension_numbers<[1], [0], [0], [1], [0, 0, 1, 1], [], []>} : vector<8x20xf32>, vector<20x4xf32>, vector<8x4xf32> -> vector<8x4xf32>
    %c4_300 = arith.constant 4 : index
    %c0_301 = arith.constant 0 : index
    %c0_302 = arith.constant 0 : index
    %432 = vector.load %arg23[%c4_300, %c0_301, %c0_302] : memref<5x1x4xf32, #tpu.memory_space<vmem>>, vector<1x1x4xf32>
    %433 = vector.shape_cast %432 : vector<1x1x4xf32> to vector<1x4xf32>
    %434 = vector.broadcast %433 : vector<1x4xf32> to vector<8x4xf32>
    %435 = arith.addf %431, %434 : vector<8x4xf32>
    %cst_303 = arith.constant dense<0.000000e+00> : vector<8x8xf32>
    %436 = tpu.matmul %421, %428, %cst_303 {dimension_numbers = #tpu.dot_dimension_numbers<[1], [1], [0], [0], [0, 0, 1, 0], [], []>} : vector<8x4xf32>, vector<8x4xf32>, vector<8x8xf32> -> vector<8x8xf32>
    %437 = vector.extract_strided_slice %5 {offsets = [4, 0, 0], sizes = [1, 8, 8], strides = [1, 1, 1]} : vector<5x8x8xf32> to vector<1x8x8xf32>
    %438 = vector.shape_cast %437 : vector<1x8x8xf32> to vector<8x8xf32>
    %cst_304 = arith.constant 1.000000e+02 : f32
    %439 = vector.broadcast %cst_304 : f32 to vector<8x8xf32>
    %440 = arith.mulf %439, %438 : vector<8x8xf32>
    %441 = arith.addf %436, %440 : vector<8x8xf32>
    %442 = vector.broadcast %9 : vector<1x8xf32> to vector<8x8xf32>
    %443 = arith.addf %441, %442 : vector<8x8xf32>
    %cst_305 = arith.constant dense<0xFF800000> : vector<8xf32>
    %444 = vector.multi_reduction <maximumf>, %443, %cst_305 [1] : vector<8x8xf32> to vector<8xf32>
    %445 = vector.shape_cast %444 : vector<8xf32> to vector<8x1xf32>
    %446 = vector.broadcast %445 : vector<8x1xf32> to vector<8x8xf32>
    %447 = arith.subf %443, %446 : vector<8x8xf32>
    %448 = math.exp %447 : vector<8x8xf32>
    %cst_306 = arith.constant dense<0.000000e+00> : vector<8xf32>
    %449 = vector.multi_reduction <add>, %448, %cst_306 [1] : vector<8x8xf32> to vector<8xf32>
    %450 = vector.shape_cast %449 : vector<8xf32> to vector<8x1xf32>
    %451 = tpu.reciprocal %450 {approx = true} : vector<8x1xf32> -> vector<8x1xf32>
    %452 = vector.broadcast %451 : vector<8x1xf32> to vector<8x8xf32>
    %453 = arith.mulf %448, %452 : vector<8x8xf32>
    %cst_307 = arith.constant dense<0.000000e+00> : vector<8x4xf32>
    %454 = tpu.matmul %453, %435, %cst_307 {dimension_numbers = #tpu.dot_dimension_numbers<[1], [0], [0], [1], [0, 0, 1, 1], [], []>} : vector<8x8xf32>, vector<8x4xf32>, vector<8x4xf32> -> vector<8x4xf32>
    %c4_308 = arith.constant 4 : index
    %c0_309 = arith.constant 0 : index
    %c0_310 = arith.constant 0 : index
    %455 = vector.load %arg24[%c4_308, %c0_309, %c0_310] : memref<5x4x20xf32, #tpu.memory_space<vmem>>, vector<1x4x20xf32>
    %456 = vector.shape_cast %455 : vector<1x4x20xf32> to vector<4x20xf32>
    %cst_311 = arith.constant dense<0.000000e+00> : vector<8x20xf32>
    %457 = tpu.matmul %454, %456, %cst_311 {dimension_numbers = #tpu.dot_dimension_numbers<[1], [0], [0], [1], [0, 0, 1, 1], [], []>} : vector<8x4xf32>, vector<4x20xf32>, vector<8x20xf32> -> vector<8x20xf32>
    %458 = arith.addf %412, %457 : vector<8x20xf32>
    %459 = arith.addf %203, %458 : vector<8x20xf32>
    %c0_312 = arith.constant 0 : index
    %c0_313 = arith.constant 0 : index
    %c0_314 = arith.constant 0 : index
    %460 = vector.load %arg25[%c0_312, %c0_313, %c0_314] : memref<1x1x20xf32, #tpu.memory_space<vmem>>, vector<1x1x20xf32>
    %461 = vector.shape_cast %460 : vector<1x1x20xf32> to vector<1x20xf32>
    %462 = vector.broadcast %461 : vector<1x20xf32> to vector<8x20xf32>
    %463 = arith.addf %459, %462 : vector<8x20xf32>
    %c0_315 = arith.constant 0 : index
    %c0_316 = arith.constant 0 : index
    %c0_317 = arith.constant 0 : index
    %464 = vector.load %arg26[%c0_315, %c0_316, %c0_317] : memref<1x1x20xf32, #tpu.memory_space<vmem>>, vector<1x1x20xf32>
    %465 = vector.shape_cast %464 : vector<1x1x20xf32> to vector<1x20xf32>
    %c0_318 = arith.constant 0 : index
    %c0_319 = arith.constant 0 : index
    %c0_320 = arith.constant 0 : index
    %466 = vector.load %arg27[%c0_318, %c0_319, %c0_320] : memref<1x1x20xf32, #tpu.memory_space<vmem>>, vector<1x1x20xf32>
    %467 = vector.shape_cast %466 : vector<1x1x20xf32> to vector<1x20xf32>
    %c0_321 = arith.constant 0 : index
    %c0_322 = arith.constant 0 : index
    %c0_323 = arith.constant 0 : index
    %468 = vector.load %arg28[%c0_321, %c0_322, %c0_323] : memref<1x20x32xf32, #tpu.memory_space<vmem>>, vector<1x20x32xf32>
    %469 = vector.shape_cast %468 : vector<1x20x32xf32> to vector<20x32xf32>
    %c0_324 = arith.constant 0 : index
    %c0_325 = arith.constant 0 : index
    %c0_326 = arith.constant 0 : index
    %470 = vector.load %arg29[%c0_324, %c0_325, %c0_326] : memref<1x1x32xf32, #tpu.memory_space<vmem>>, vector<1x1x32xf32>
    %471 = vector.shape_cast %470 : vector<1x1x32xf32> to vector<1x32xf32>
    %c0_327 = arith.constant 0 : index
    %c0_328 = arith.constant 0 : index
    %c0_329 = arith.constant 0 : index
    %472 = vector.load %arg30[%c0_327, %c0_328, %c0_329] : memref<1x32x20xf32, #tpu.memory_space<vmem>>, vector<1x32x20xf32>
    %473 = vector.shape_cast %472 : vector<1x32x20xf32> to vector<32x20xf32>
    %c0_330 = arith.constant 0 : index
    %c0_331 = arith.constant 0 : index
    %c0_332 = arith.constant 0 : index
    %474 = vector.load %arg31[%c0_330, %c0_331, %c0_332] : memref<1x1x20xf32, #tpu.memory_space<vmem>>, vector<1x1x20xf32>
    %475 = vector.shape_cast %474 : vector<1x1x20xf32> to vector<1x20xf32>
    %cst_333 = arith.constant dense<0.000000e+00> : vector<8xf32>
    %476 = vector.multi_reduction <add>, %463, %cst_333 [1] : vector<8x20xf32> to vector<8xf32>
    %477 = vector.shape_cast %476 : vector<8xf32> to vector<8x1xf32>
    %cst_334 = arith.constant 2.000000e+01 : f32
    %478 = vector.broadcast %cst_334 : f32 to vector<8x1xf32>
    %479 = arith.divf %477, %478 : vector<8x1xf32>
    %480 = vector.broadcast %479 : vector<8x1xf32> to vector<8x20xf32>
    %481 = arith.subf %463, %480 : vector<8x20xf32>
    %482 = arith.mulf %481, %481 : vector<8x20xf32>
    %cst_335 = arith.constant dense<0.000000e+00> : vector<8xf32>
    %483 = vector.multi_reduction <add>, %482, %cst_335 [1] : vector<8x20xf32> to vector<8xf32>
    %484 = vector.shape_cast %483 : vector<8xf32> to vector<8x1xf32>
    %cst_336 = arith.constant 2.000000e+01 : f32
    %485 = vector.broadcast %cst_336 : f32 to vector<8x1xf32>
    %486 = arith.divf %484, %485 : vector<8x1xf32>
    %cst_337 = arith.constant 9.99999996E-13 : f32
    %487 = vector.broadcast %cst_337 : f32 to vector<8x1xf32>
    %488 = arith.addf %486, %487 : vector<8x1xf32>
    %489 = math.rsqrt %488 : vector<8x1xf32>
    %490 = vector.broadcast %489 : vector<8x1xf32> to vector<8x20xf32>
    %491 = arith.mulf %481, %490 : vector<8x20xf32>
    %492 = vector.broadcast %465 : vector<1x20xf32> to vector<8x20xf32>
    %493 = arith.mulf %491, %492 : vector<8x20xf32>
    %494 = vector.broadcast %467 : vector<1x20xf32> to vector<8x20xf32>
    %495 = arith.addf %493, %494 : vector<8x20xf32>
    %cst_338 = arith.constant dense<0.000000e+00> : vector<8x32xf32>
    %496 = tpu.matmul %495, %469, %cst_338 {dimension_numbers = #tpu.dot_dimension_numbers<[1], [0], [0], [1], [0, 0, 1, 1], [], []>} : vector<8x20xf32>, vector<20x32xf32>, vector<8x32xf32> -> vector<8x32xf32>
    %497 = vector.broadcast %471 : vector<1x32xf32> to vector<8x32xf32>
    %498 = arith.addf %496, %497 : vector<8x32xf32>
    %cst_339 = arith.constant 5.000000e-01 : f32
    %499 = vector.broadcast %cst_339 : f32 to vector<8x32xf32>
    %500 = arith.mulf %498, %499 : vector<8x32xf32>
    %cst_340 = arith.constant 0.707106769 : f32
    %501 = vector.broadcast %cst_340 : f32 to vector<8x32xf32>
    %502 = arith.mulf %498, %501 : vector<8x32xf32>
    %503 = math.absf %502 : vector<8x32xf32>
    %cst_341 = arith.constant 0.327591091 : f32
    %504 = vector.broadcast %cst_341 : f32 to vector<8x32xf32>
    %505 = arith.mulf %504, %503 : vector<8x32xf32>
    %cst_342 = arith.constant 1.000000e+00 : f32
    %506 = vector.broadcast %cst_342 : f32 to vector<8x32xf32>
    %507 = arith.addf %506, %505 : vector<8x32xf32>
    %cst_343 = arith.constant 1.000000e+00 : f32
    %508 = vector.broadcast %cst_343 : f32 to vector<8x32xf32>
    %509 = arith.divf %508, %507 : vector<8x32xf32>
    %cst_344 = arith.constant 1.06140542 : f32
    %510 = vector.broadcast %cst_344 : f32 to vector<8x32xf32>
    %511 = arith.mulf %510, %509 : vector<8x32xf32>
    %cst_345 = arith.constant -1.45315206 : f32
    %512 = vector.broadcast %cst_345 : f32 to vector<8x32xf32>
    %513 = arith.addf %511, %512 : vector<8x32xf32>
    %514 = arith.mulf %513, %509 : vector<8x32xf32>
    %cst_346 = arith.constant 1.42141378 : f32
    %515 = vector.broadcast %cst_346 : f32 to vector<8x32xf32>
    %516 = arith.addf %514, %515 : vector<8x32xf32>
    %517 = arith.mulf %516, %509 : vector<8x32xf32>
    %cst_347 = arith.constant -0.284496725 : f32
    %518 = vector.broadcast %cst_347 : f32 to vector<8x32xf32>
    %519 = arith.addf %517, %518 : vector<8x32xf32>
    %520 = arith.mulf %519, %509 : vector<8x32xf32>
    %cst_348 = arith.constant 0.254829586 : f32
    %521 = vector.broadcast %cst_348 : f32 to vector<8x32xf32>
    %522 = arith.addf %520, %521 : vector<8x32xf32>
    %523 = arith.mulf %522, %509 : vector<8x32xf32>
    %cst_349 = arith.constant 0.000000e+00 : f32
    %524 = vector.broadcast %cst_349 : f32 to vector<8x32xf32>
    %525 = arith.subf %524, %503 : vector<8x32xf32>
    %526 = arith.mulf %525, %503 : vector<8x32xf32>
    %527 = math.exp %526 : vector<8x32xf32>
    %528 = arith.mulf %523, %527 : vector<8x32xf32>
    %cst_350 = arith.constant 1.000000e+00 : f32
    %529 = vector.broadcast %cst_350 : f32 to vector<8x32xf32>
    %530 = arith.subf %529, %528 : vector<8x32xf32>
    %cst_351 = arith.constant 0.000000e+00 : f32
    %531 = vector.broadcast %cst_351 : f32 to vector<8x32xf32>
    %532 = arith.cmpf olt, %502, %531 : vector<8x32xf32>
    %cst_352 = arith.constant 0.000000e+00 : f32
    %533 = vector.broadcast %cst_352 : f32 to vector<8x32xf32>
    %534 = arith.subf %533, %530 : vector<8x32xf32>
    %535 = arith.select %532, %534, %530 : vector<8x32xi1>, vector<8x32xf32>
    %cst_353 = arith.constant 1.000000e+00 : f32
    %536 = vector.broadcast %cst_353 : f32 to vector<8x32xf32>
    %537 = arith.addf %536, %535 : vector<8x32xf32>
    %538 = arith.mulf %500, %537 : vector<8x32xf32>
    %cst_354 = arith.constant dense<0.000000e+00> : vector<8x20xf32>
    %539 = tpu.matmul %538, %473, %cst_354 {dimension_numbers = #tpu.dot_dimension_numbers<[1], [0], [0], [1], [0, 0, 1, 1], [], []>} : vector<8x32xf32>, vector<32x20xf32>, vector<8x20xf32> -> vector<8x20xf32>
    %540 = arith.addf %463, %539 : vector<8x20xf32>
    %541 = vector.broadcast %475 : vector<1x20xf32> to vector<8x20xf32>
    %542 = arith.addf %540, %541 : vector<8x20xf32>
    %c0_355 = arith.constant 0 : index
    %c0_356 = arith.constant 0 : index
    %543 = vector.load %arg32[%c0_355, %c0_356] : memref<1x20xf32, #tpu.memory_space<vmem>>, vector<1x20xf32>
    %c0_357 = arith.constant 0 : index
    %c0_358 = arith.constant 0 : index
    %544 = vector.load %arg33[%c0_357, %c0_358] : memref<1x20xf32, #tpu.memory_space<vmem>>, vector<1x20xf32>
    %cst_359 = arith.constant dense<0.000000e+00> : vector<8xf32>
    %545 = vector.multi_reduction <add>, %542, %cst_359 [1] : vector<8x20xf32> to vector<8xf32>
    %546 = vector.shape_cast %545 : vector<8xf32> to vector<8x1xf32>
    %cst_360 = arith.constant 2.000000e+01 : f32
    %547 = vector.broadcast %cst_360 : f32 to vector<8x1xf32>
    %548 = arith.divf %546, %547 : vector<8x1xf32>
    %549 = vector.broadcast %548 : vector<8x1xf32> to vector<8x20xf32>
    %550 = arith.subf %542, %549 : vector<8x20xf32>
    %551 = arith.mulf %550, %550 : vector<8x20xf32>
    %cst_361 = arith.constant dense<0.000000e+00> : vector<8xf32>
    %552 = vector.multi_reduction <add>, %551, %cst_361 [1] : vector<8x20xf32> to vector<8xf32>
    %553 = vector.shape_cast %552 : vector<8xf32> to vector<8x1xf32>
    %cst_362 = arith.constant 2.000000e+01 : f32
    %554 = vector.broadcast %cst_362 : f32 to vector<8x1xf32>
    %555 = arith.divf %553, %554 : vector<8x1xf32>
    %cst_363 = arith.constant 9.99999996E-13 : f32
    %556 = vector.broadcast %cst_363 : f32 to vector<8x1xf32>
    %557 = arith.addf %555, %556 : vector<8x1xf32>
    %558 = math.rsqrt %557 : vector<8x1xf32>
    %559 = vector.broadcast %558 : vector<8x1xf32> to vector<8x20xf32>
    %560 = arith.mulf %550, %559 : vector<8x20xf32>
    %561 = vector.broadcast %543 : vector<1x20xf32> to vector<8x20xf32>
    %562 = arith.mulf %560, %561 : vector<8x20xf32>
    %563 = vector.broadcast %544 : vector<1x20xf32> to vector<8x20xf32>
    %564 = arith.addf %562, %563 : vector<8x20xf32>
    %c0_364 = arith.constant 0 : index
    %c0_365 = arith.constant 0 : index
    %c0_366 = arith.constant 0 : index
    %565 = vector.load %arg34[%c0_364, %c0_365, %c0_366] : memref<1x8x20xf32, #tpu.memory_space<vmem>>, vector<1x8x20xf32>
    %566 = vector.shape_cast %565 : vector<1x8x20xf32> to vector<8x20xf32>
    %567 = vector.shape_cast %564 : vector<8x20xf32> to vector<1x8x20xf32>
    tpu.vector_store %arg34[%c0_364, %c0_365, %c0_366], %567 {strides = array<i32>} : memref<1x8x20xf32, #tpu.memory_space<vmem>>, vector<1x8x20xf32>,
    return
  }
  func.func @transform_0(%arg0: i32) -> (i32, i32, i32) {
    %c0_i32 = arith.constant 0 : i32
    %c0_i32_0 = arith.constant 0 : i32
    %c0_i32_1 = arith.constant 0 : i32
    return %arg0, %c0_i32, %c0_i32_0 : i32, i32, i32
  }
  func.func @transform_1(%arg0: i32) -> (i32, i32, i32) {
    %c0_i32 = arith.constant 0 : i32
    %c0_i32_0 = arith.constant 0 : i32
    %c0_i32_1 = arith.constant 0 : i32
    return %arg0, %c0_i32, %c0_i32_0 : i32, i32, i32
  }
  func.func @transform_2(%arg0: i32) -> (i32, i32, i32, i32) {
    %c0_i32 = arith.constant 0 : i32
    %c0_i32_0 = arith.constant 0 : i32
    %c0_i32_1 = arith.constant 0 : i32
    %c0_i32_2 = arith.constant 0 : i32
    return %arg0, %c0_i32, %c0_i32_0, %c0_i32_1 : i32, i32, i32, i32
  }
  func.func @transform_3(%arg0: i32) -> (i32, i32, i32) {
    %c0_i32 = arith.constant 0 : i32
    %c0_i32_0 = arith.constant 0 : i32
    %c0_i32_1 = arith.constant 0 : i32
    return %arg0, %c0_i32, %c0_i32_0 : i32, i32, i32
  }
  func.func @transform_4(%arg0: i32) -> (i32, i32, i32) {
    %c0_i32 = arith.constant 0 : i32
    %c0_i32_0 = arith.constant 0 : i32
    %c0_i32_1 = arith.constant 0 : i32
    return %arg0, %c0_i32, %c0_i32_0 : i32, i32, i32
  }
  func.func @transform_5(%arg0: i32) -> (i32, i32, i32) {
    %c0_i32 = arith.constant 0 : i32
    %c0_i32_0 = arith.constant 0 : i32
    %c0_i32_1 = arith.constant 0 : i32
    %c0_i32_2 = arith.constant 0 : i32
    return %c0_i32, %c0_i32_0, %c0_i32_1 : i32, i32, i32
  }
  func.func @transform_6(%arg0: i32) -> (i32, i32, i32) {
    %c0_i32 = arith.constant 0 : i32
    %c0_i32_0 = arith.constant 0 : i32
    %c0_i32_1 = arith.constant 0 : i32
    %c0_i32_2 = arith.constant 0 : i32
    return %c0_i32, %c0_i32_0, %c0_i32_1 : i32, i32, i32
  }
  func.func @transform_7(%arg0: i32) -> (i32, i32, i32) {
    %c0_i32 = arith.constant 0 : i32
    %c0_i32_0 = arith.constant 0 : i32
    %c0_i32_1 = arith.constant 0 : i32
    %c0_i32_2 = arith.constant 0 : i32
    return %c0_i32, %c0_i32_0, %c0_i32_1 : i32, i32, i32
  }
  func.func @transform_8(%arg0: i32) -> (i32, i32, i32) {
    %c0_i32 = arith.constant 0 : i32
    %c0_i32_0 = arith.constant 0 : i32
    %c0_i32_1 = arith.constant 0 : i32
    %c0_i32_2 = arith.constant 0 : i32
    return %c0_i32, %c0_i32_0, %c0_i32_1 : i32, i32, i32
  }
  func.func @transform_9(%arg0: i32) -> (i32, i32, i32) {
    %c0_i32 = arith.constant 0 : i32
    %c0_i32_0 = arith.constant 0 : i32
    %c0_i32_1 = arith.constant 0 : i32
    %c0_i32_2 = arith.constant 0 : i32
    return %c0_i32, %c0_i32_0, %c0_i32_1 : i32, i32, i32
  }
  func.func @transform_10(%arg0: i32) -> (i32, i32, i32) {
    %c0_i32 = arith.constant 0 : i32
    %c0_i32_0 = arith.constant 0 : i32
    %c0_i32_1 = arith.constant 0 : i32
    %c0_i32_2 = arith.constant 0 : i32
    return %c0_i32, %c0_i32_0, %c0_i32_1 : i32, i32, i32
  }
  func.func @transform_11(%arg0: i32) -> (i32, i32, i32) {
    %c0_i32 = arith.constant 0 : i32
    %c0_i32_0 = arith.constant 0 : i32
    %c0_i32_1 = arith.constant 0 : i32
    %c0_i32_2 = arith.constant 0 : i32
    return %c0_i32, %c0_i32_0, %c0_i32_1 : i32, i32, i32
  }
  func.func @transform_12(%arg0: i32) -> (i32, i32, i32) {
    %c0_i32 = arith.constant 0 : i32
    %c0_i32_0 = arith.constant 0 : i32
    %c0_i32_1 = arith.constant 0 : i32
    %c0_i32_2 = arith.constant 0 : i32
    return %c0_i32, %c0_i32_0, %c0_i32_1 : i32, i32, i32
  }
  func.func @transform_13(%arg0: i32) -> (i32, i32, i32) {
    %c0_i32 = arith.constant 0 : i32
    %c0_i32_0 = arith.constant 0 : i32
    %c0_i32_1 = arith.constant 0 : i32
    %c0_i32_2 = arith.constant 0 : i32
    return %c0_i32, %c0_i32_0, %c0_i32_1 : i32, i32, i32
  }
  func.func @transform_14(%arg0: i32) -> (i32, i32, i32) {
    %c0_i32 = arith.constant 0 : i32
    %c0_i32_0 = arith.constant 0 : i32
    %c0_i32_1 = arith.constant 0 : i32
    %c0_i32_2 = arith.constant 0 : i32
    return %c0_i32, %c0_i32_0, %c0_i32_1 : i32, i32, i32
  }
  func.func @transform_15(%arg0: i32) -> (i32, i32, i32) {
    %c0_i32 = arith.constant 0 : i32
    %c0_i32_0 = arith.constant 0 : i32
    %c0_i32_1 = arith.constant 0 : i32
    %c0_i32_2 = arith.constant 0 : i32
    return %c0_i32, %c0_i32_0, %c0_i32_1 : i32, i32, i32
  }
  func.func @transform_16(%arg0: i32) -> (i32, i32, i32) {
    %c0_i32 = arith.constant 0 : i32
    %c0_i32_0 = arith.constant 0 : i32
    %c0_i32_1 = arith.constant 0 : i32
    %c0_i32_2 = arith.constant 0 : i32
    return %c0_i32, %c0_i32_0, %c0_i32_1 : i32, i32, i32
  }
  func.func @transform_17(%arg0: i32) -> (i32, i32, i32) {
    %c0_i32 = arith.constant 0 : i32
    %c0_i32_0 = arith.constant 0 : i32
    %c0_i32_1 = arith.constant 0 : i32
    %c0_i32_2 = arith.constant 0 : i32
    return %c0_i32, %c0_i32_0, %c0_i32_1 : i32, i32, i32
  }
  func.func @transform_18(%arg0: i32) -> (i32, i32, i32) {
    %c0_i32 = arith.constant 0 : i32
    %c0_i32_0 = arith.constant 0 : i32
    %c0_i32_1 = arith.constant 0 : i32
    %c0_i32_2 = arith.constant 0 : i32
    return %c0_i32, %c0_i32_0, %c0_i32_1 : i32, i32, i32
  }
  func.func @transform_19(%arg0: i32) -> (i32, i32, i32) {
    %c0_i32 = arith.constant 0 : i32
    %c0_i32_0 = arith.constant 0 : i32
    %c0_i32_1 = arith.constant 0 : i32
    %c0_i32_2 = arith.constant 0 : i32
    return %c0_i32, %c0_i32_0, %c0_i32_1 : i32, i32, i32
  }
  func.func @transform_20(%arg0: i32) -> (i32, i32, i32) {
    %c0_i32 = arith.constant 0 : i32
    %c0_i32_0 = arith.constant 0 : i32
    %c0_i32_1 = arith.constant 0 : i32
    %c0_i32_2 = arith.constant 0 : i32
    return %c0_i32, %c0_i32_0, %c0_i32_1 : i32, i32, i32
  }
  func.func @transform_21(%arg0: i32) -> (i32, i32, i32) {
    %c0_i32 = arith.constant 0 : i32
    %c0_i32_0 = arith.constant 0 : i32
    %c0_i32_1 = arith.constant 0 : i32
    %c0_i32_2 = arith.constant 0 : i32
    return %c0_i32, %c0_i32_0, %c0_i32_1 : i32, i32, i32
  }
  func.func @transform_22(%arg0: i32) -> (i32, i32, i32) {
    %c0_i32 = arith.constant 0 : i32
    %c0_i32_0 = arith.constant 0 : i32
    %c0_i32_1 = arith.constant 0 : i32
    %c0_i32_2 = arith.constant 0 : i32
    return %c0_i32, %c0_i32_0, %c0_i32_1 : i32, i32, i32
  }
  func.func @transform_23(%arg0: i32) -> (i32, i32, i32) {
    %c0_i32 = arith.constant 0 : i32
    %c0_i32_0 = arith.constant 0 : i32
    %c0_i32_1 = arith.constant 0 : i32
    %c0_i32_2 = arith.constant 0 : i32
    return %c0_i32, %c0_i32_0, %c0_i32_1 : i32, i32, i32
  }
  func.func @transform_24(%arg0: i32) -> (i32, i32, i32) {
    %c0_i32 = arith.constant 0 : i32
    %c0_i32_0 = arith.constant 0 : i32
    %c0_i32_1 = arith.constant 0 : i32
    %c0_i32_2 = arith.constant 0 : i32
    return %c0_i32, %c0_i32_0, %c0_i32_1 : i32, i32, i32
  }
  func.func @transform_25(%arg0: i32) -> (i32, i32, i32) {
    %c0_i32 = arith.constant 0 : i32
    %c0_i32_0 = arith.constant 0 : i32
    %c0_i32_1 = arith.constant 0 : i32
    %c0_i32_2 = arith.constant 0 : i32
    return %c0_i32, %c0_i32_0, %c0_i32_1 : i32, i32, i32
  }
  func.func @transform_26(%arg0: i32) -> (i32, i32, i32) {
    %c0_i32 = arith.constant 0 : i32
    %c0_i32_0 = arith.constant 0 : i32
    %c0_i32_1 = arith.constant 0 : i32
    %c0_i32_2 = arith.constant 0 : i32
    return %c0_i32, %c0_i32_0, %c0_i32_1 : i32, i32, i32
  }
  func.func @transform_27(%arg0: i32) -> (i32, i32, i32) {
    %c0_i32 = arith.constant 0 : i32
    %c0_i32_0 = arith.constant 0 : i32
    %c0_i32_1 = arith.constant 0 : i32
    %c0_i32_2 = arith.constant 0 : i32
    return %c0_i32, %c0_i32_0, %c0_i32_1 : i32, i32, i32
  }
  func.func @transform_28(%arg0: i32) -> (i32, i32, i32) {
    %c0_i32 = arith.constant 0 : i32
    %c0_i32_0 = arith.constant 0 : i32
    %c0_i32_1 = arith.constant 0 : i32
    %c0_i32_2 = arith.constant 0 : i32
    return %c0_i32, %c0_i32_0, %c0_i32_1 : i32, i32, i32
  }
  func.func @transform_29(%arg0: i32) -> (i32, i32, i32) {
    %c0_i32 = arith.constant 0 : i32
    %c0_i32_0 = arith.constant 0 : i32
    %c0_i32_1 = arith.constant 0 : i32
    %c0_i32_2 = arith.constant 0 : i32
    return %c0_i32, %c0_i32_0, %c0_i32_1 : i32, i32, i32
  }
  func.func @transform_30(%arg0: i32) -> (i32, i32, i32) {
    %c0_i32 = arith.constant 0 : i32
    %c0_i32_0 = arith.constant 0 : i32
    %c0_i32_1 = arith.constant 0 : i32
    %c0_i32_2 = arith.constant 0 : i32
    return %c0_i32, %c0_i32_0, %c0_i32_1 : i32, i32, i32
  }
  func.func @transform_31(%arg0: i32) -> (i32, i32) {
    %c0_i32 = arith.constant 0 : i32
    %c0_i32_0 = arith.constant 0 : i32
    %c0_i32_1 = arith.constant 0 : i32
    return %c0_i32, %c0_i32_0 : i32, i32
  }
  func.func @transform_32(%arg0: i32) -> (i32, i32) {
    %c0_i32 = arith.constant 0 : i32
    %c0_i32_0 = arith.constant 0 : i32
    %c0_i32_1 = arith.constant 0 : i32
    return %c0_i32, %c0_i32_0 : i32, i32
  }
  func.func @transform_33(%arg0: i32) -> (i32, i32, i32) {
    %c0_i32 = arith.constant 0 : i32
    %c0_i32_0 = arith.constant 0 : i32
    %c0_i32_1 = arith.constant 0 : i32
    return %arg0, %c0_i32, %c0_i32_0 : i32, i32, i32
  }
}

module attributes {stable_mosaic.version = 11 : i64} {
  func.func @_embed_encoder_kernel(%arg0: i32, %arg1: memref<1x8x20xf32, #tpu.memory_space<vmem>>, %arg2: memref<1x1x8xf32, #tpu.memory_space<vmem>>, %arg3: memref<2x20x20xf32, #tpu.memory_space<vmem>>, %arg4: memref<2x1x20xf32, #tpu.memory_space<vmem>>, %arg5: memref<2x20x20xf32, #tpu.memory_space<vmem>>, %arg6: memref<2x1x20xf32, #tpu.memory_space<vmem>>, %arg7: memref<20x20xf32, #tpu.memory_space<vmem>>, %arg8: memref<1x20xf32, #tpu.memory_space<vmem>>, %arg9: memref<8x20xf32, #tpu.memory_space<vmem>>, %arg10: memref<1x20xf32, #tpu.memory_space<vmem>>, %arg11: memref<1x20xf32, #tpu.memory_space<vmem>>, %arg12: memref<2x1x20xf32, #tpu.memory_space<vmem>>, %arg13: memref<2x1x20xf32, #tpu.memory_space<vmem>>, %arg14: memref<8x20x5xf32, #tpu.memory_space<vmem>>, %arg15: memref<8x1x5xf32, #tpu.memory_space<vmem>>, %arg16: memref<8x20x5xf32, #tpu.memory_space<vmem>>, %arg17: memref<8x1x5xf32, #tpu.memory_space<vmem>>, %arg18: memref<8x20x5xf32, #tpu.memory_space<vmem>>, %arg19: memref<8x1x5xf32, #tpu.memory_space<vmem>>, %arg20: memref<8x5x20xf32, #tpu.memory_space<vmem>>, %arg21: memref<2x1x20xf32, #tpu.memory_space<vmem>>, %arg22: memref<2x1x20xf32, #tpu.memory_space<vmem>>, %arg23: memref<2x1x20xf32, #tpu.memory_space<vmem>>, %arg24: memref<2x20x32xf32, #tpu.memory_space<vmem>>, %arg25: memref<2x1x32xf32, #tpu.memory_space<vmem>>, %arg26: memref<2x32x20xf32, #tpu.memory_space<vmem>>, %arg27: memref<2x1x20xf32, #tpu.memory_space<vmem>>, %arg28: memref<1x20xf32, #tpu.memory_space<vmem>>, %arg29: memref<1x20xf32, #tpu.memory_space<vmem>>, %arg30: memref<1x8x20xf32, #tpu.memory_space<vmem>>) attributes {dimension_semantics = [#tpu.dimension_semantics<parallel>], iteration_bounds = array<i64: 2>, scalar_prefetch = 0 : i64, scratch_operands = 0 : i64, tpu.core_type = #tpu.core_type<tc>, window_params = [{transform_indices = @transform_0, window_bounds = array<i64: 1, 8, 20>}, {transform_indices = @transform_1, window_bounds = array<i64: 1, 1, 8>}, {pipeline_mode = #tpu.pipeline_mode<synchronous>, transform_indices = @transform_2, window_bounds = array<i64: 2, 20, 20>}, {pipeline_mode = #tpu.pipeline_mode<synchronous>, transform_indices = @transform_3, window_bounds = array<i64: 2, 1, 20>}, {pipeline_mode = #tpu.pipeline_mode<synchronous>, transform_indices = @transform_4, window_bounds = array<i64: 2, 20, 20>}, {pipeline_mode = #tpu.pipeline_mode<synchronous>, transform_indices = @transform_5, window_bounds = array<i64: 2, 1, 20>}, {pipeline_mode = #tpu.pipeline_mode<synchronous>, transform_indices = @transform_6, window_bounds = array<i64: 20, 20>}, {pipeline_mode = #tpu.pipeline_mode<synchronous>, transform_indices = @transform_7, window_bounds = array<i64: 1, 20>}, {pipeline_mode = #tpu.pipeline_mode<synchronous>, transform_indices = @transform_8, window_bounds = array<i64: 8, 20>}, {pipeline_mode = #tpu.pipeline_mode<synchronous>, transform_indices = @transform_9, window_bounds = array<i64: 1, 20>}, {pipeline_mode = #tpu.pipeline_mode<synchronous>, transform_indices = @transform_10, window_bounds = array<i64: 1, 20>}, {pipeline_mode = #tpu.pipeline_mode<synchronous>, transform_indices = @transform_11, window_bounds = array<i64: 2, 1, 20>}, {pipeline_mode = #tpu.pipeline_mode<synchronous>, transform_indices = @transform_12, window_bounds = array<i64: 2, 1, 20>}, {pipeline_mode = #tpu.pipeline_mode<synchronous>, transform_indices = @transform_13, window_bounds = array<i64: 8, 20, 5>}, {pipeline_mode = #tpu.pipeline_mode<synchronous>, transform_indices = @transform_14, window_bounds = array<i64: 8, 1, 5>}, {pipeline_mode = #tpu.pipeline_mode<synchronous>, transform_indices = @transform_15, window_bounds = array<i64: 8, 20, 5>}, {pipeline_mode = #tpu.pipeline_mode<synchronous>, transform_indices = @transform_16, window_bounds = array<i64: 8, 1, 5>}, {pipeline_mode = #tpu.pipeline_mode<synchronous>, transform_indices = @transform_17, window_bounds = array<i64: 8, 20, 5>}, {pipeline_mode = #tpu.pipeline_mode<synchronous>, transform_indices = @transform_18, window_bounds = array<i64: 8, 1, 5>}, {pipeline_mode = #tpu.pipeline_mode<synchronous>, transform_indices = @transform_19, window_bounds = array<i64: 8, 5, 20>}, {pipeline_mode = #tpu.pipeline_mode<synchronous>, transform_indices = @transform_20, window_bounds = array<i64: 2, 1, 20>}, {pipeline_mode = #tpu.pipeline_mode<synchronous>, transform_indices = @transform_21, window_bounds = array<i64: 2, 1, 20>}, {pipeline_mode = #tpu.pipeline_mode<synchronous>, transform_indices = @transform_22, window_bounds = array<i64: 2, 1, 20>}, {pipeline_mode = #tpu.pipeline_mode<synchronous>, transform_indices = @transform_23, window_bounds = array<i64: 2, 20, 32>}, {pipeline_mode = #tpu.pipeline_mode<synchronous>, transform_indices = @transform_24, window_bounds = array<i64: 2, 1, 32>}, {pipeline_mode = #tpu.pipeline_mode<synchronous>, transform_indices = @transform_25, window_bounds = array<i64: 2, 32, 20>}, {pipeline_mode = #tpu.pipeline_mode<synchronous>, transform_indices = @transform_26, window_bounds = array<i64: 2, 1, 20>}, {pipeline_mode = #tpu.pipeline_mode<synchronous>, transform_indices = @transform_27, window_bounds = array<i64: 1, 20>}, {pipeline_mode = #tpu.pipeline_mode<synchronous>, transform_indices = @transform_28, window_bounds = array<i64: 1, 20>}, {transform_indices = @transform_29, window_bounds = array<i64: 1, 8, 20>}]} {
    %c0 = arith.constant 0 : index
    %c0_0 = arith.constant 0 : index
    %c0_1 = arith.constant 0 : index
    %0 = vector.load %arg1[%c0, %c0_0, %c0_1] : memref<1x8x20xf32, #tpu.memory_space<vmem>>, vector<1x8x20xf32>
    %1 = vector.shape_cast %0 : vector<1x8x20xf32> to vector<8x20xf32>
    %c0_2 = arith.constant 0 : index
    %c0_3 = arith.constant 0 : index
    %c0_4 = arith.constant 0 : index
    %2 = vector.load %arg2[%c0_2, %c0_3, %c0_4] : memref<1x1x8xf32, #tpu.memory_space<vmem>>, vector<1x1x8xf32>
    %3 = vector.shape_cast %2 : vector<1x1x8xf32> to vector<1x8xf32>
    %c0_5 = arith.constant 0 : index
    %c0_6 = arith.constant 0 : index
    %c0_7 = arith.constant 0 : index
    %4 = vector.load %arg3[%c0_5, %c0_6, %c0_7] : memref<2x20x20xf32, #tpu.memory_space<vmem>>, vector<1x20x20xf32>
    %5 = vector.shape_cast %4 : vector<1x20x20xf32> to vector<20x20xf32>
    %cst = arith.constant dense<0.000000e+00> : vector<8x20xf32>
    %6 = tpu.matmul %1, %5, %cst {dimension_numbers = #tpu.dot_dimension_numbers<[1], [0], [0], [1], [0, 0, 1, 1], [], []>} : vector<8x20xf32>, vector<20x20xf32>, vector<8x20xf32> -> vector<8x20xf32>
    %c0_8 = arith.constant 0 : index
    %c0_9 = arith.constant 0 : index
    %c0_10 = arith.constant 0 : index
    %7 = vector.load %arg4[%c0_8, %c0_9, %c0_10] : memref<2x1x20xf32, #tpu.memory_space<vmem>>, vector<1x1x20xf32>
    %8 = vector.shape_cast %7 : vector<1x1x20xf32> to vector<1x20xf32>
    %9 = vector.broadcast %8 : vector<1x20xf32> to vector<8x20xf32>
    %10 = arith.addf %6, %9 : vector<8x20xf32>
    %cst_11 = arith.constant 5.000000e-01 : f32
    %11 = vector.broadcast %cst_11 : f32 to vector<8x20xf32>
    %12 = arith.mulf %10, %11 : vector<8x20xf32>
    %cst_12 = arith.constant 0.707106769 : f32
    %13 = vector.broadcast %cst_12 : f32 to vector<8x20xf32>
    %14 = arith.mulf %10, %13 : vector<8x20xf32>
    %15 = math.absf %14 : vector<8x20xf32>
    %cst_13 = arith.constant 0.327591091 : f32
    %16 = vector.broadcast %cst_13 : f32 to vector<8x20xf32>
    %17 = arith.mulf %16, %15 : vector<8x20xf32>
    %cst_14 = arith.constant 1.000000e+00 : f32
    %18 = vector.broadcast %cst_14 : f32 to vector<8x20xf32>
    %19 = arith.addf %18, %17 : vector<8x20xf32>
    %cst_15 = arith.constant 1.000000e+00 : f32
    %20 = vector.broadcast %cst_15 : f32 to vector<8x20xf32>
    %21 = arith.divf %20, %19 : vector<8x20xf32>
    %cst_16 = arith.constant 1.06140542 : f32
    %22 = vector.broadcast %cst_16 : f32 to vector<8x20xf32>
    %23 = arith.mulf %22, %21 : vector<8x20xf32>
    %cst_17 = arith.constant -1.45315206 : f32
    %24 = vector.broadcast %cst_17 : f32 to vector<8x20xf32>
    %25 = arith.addf %23, %24 : vector<8x20xf32>
    %26 = arith.mulf %25, %21 : vector<8x20xf32>
    %cst_18 = arith.constant 1.42141378 : f32
    %27 = vector.broadcast %cst_18 : f32 to vector<8x20xf32>
    %28 = arith.addf %26, %27 : vector<8x20xf32>
    %29 = arith.mulf %28, %21 : vector<8x20xf32>
    %cst_19 = arith.constant -0.284496725 : f32
    %30 = vector.broadcast %cst_19 : f32 to vector<8x20xf32>
    %31 = arith.addf %29, %30 : vector<8x20xf32>
    %32 = arith.mulf %31, %21 : vector<8x20xf32>
    %cst_20 = arith.constant 0.254829586 : f32
    %33 = vector.broadcast %cst_20 : f32 to vector<8x20xf32>
    %34 = arith.addf %32, %33 : vector<8x20xf32>
    %35 = arith.mulf %34, %21 : vector<8x20xf32>
    %cst_21 = arith.constant 0.000000e+00 : f32
    %36 = vector.broadcast %cst_21 : f32 to vector<8x20xf32>
    %37 = arith.subf %36, %15 : vector<8x20xf32>
    %38 = arith.mulf %37, %15 : vector<8x20xf32>
    %39 = math.exp %38 : vector<8x20xf32>
    %40 = arith.mulf %35, %39 : vector<8x20xf32>
    %cst_22 = arith.constant 1.000000e+00 : f32
    %41 = vector.broadcast %cst_22 : f32 to vector<8x20xf32>
    %42 = arith.subf %41, %40 : vector<8x20xf32>
    %cst_23 = arith.constant 0.000000e+00 : f32
    %43 = vector.broadcast %cst_23 : f32 to vector<8x20xf32>
    %44 = arith.cmpf olt, %14, %43 : vector<8x20xf32>
    %cst_24 = arith.constant 0.000000e+00 : f32
    %45 = vector.broadcast %cst_24 : f32 to vector<8x20xf32>
    %46 = arith.subf %45, %42 : vector<8x20xf32>
    %47 = arith.select %44, %46, %42 : vector<8x20xi1>, vector<8x20xf32>
    %cst_25 = arith.constant 1.000000e+00 : f32
    %48 = vector.broadcast %cst_25 : f32 to vector<8x20xf32>
    %49 = arith.addf %48, %47 : vector<8x20xf32>
    %50 = arith.mulf %12, %49 : vector<8x20xf32>
    %c0_26 = arith.constant 0 : index
    %c0_27 = arith.constant 0 : index
    %c0_28 = arith.constant 0 : index
    %51 = vector.load %arg5[%c0_26, %c0_27, %c0_28] : memref<2x20x20xf32, #tpu.memory_space<vmem>>, vector<1x20x20xf32>
    %52 = vector.shape_cast %51 : vector<1x20x20xf32> to vector<20x20xf32>
    %cst_29 = arith.constant dense<0.000000e+00> : vector<8x20xf32>
    %53 = tpu.matmul %1, %52, %cst_29 {dimension_numbers = #tpu.dot_dimension_numbers<[1], [0], [0], [1], [0, 0, 1, 1], [], []>} : vector<8x20xf32>, vector<20x20xf32>, vector<8x20xf32> -> vector<8x20xf32>
    %c0_30 = arith.constant 0 : index
    %c0_31 = arith.constant 0 : index
    %c0_32 = arith.constant 0 : index
    %54 = vector.load %arg6[%c0_30, %c0_31, %c0_32] : memref<2x1x20xf32, #tpu.memory_space<vmem>>, vector<1x1x20xf32>
    %55 = vector.shape_cast %54 : vector<1x1x20xf32> to vector<1x20xf32>
    %56 = vector.broadcast %55 : vector<1x20xf32> to vector<8x20xf32>
    %57 = arith.addf %53, %56 : vector<8x20xf32>
    %cst_33 = arith.constant 0.000000e+00 : f32
    %58 = vector.broadcast %cst_33 : f32 to vector<8x20xf32>
    %59 = arith.subf %58, %57 : vector<8x20xf32>
    %60 = math.exp %59 : vector<8x20xf32>
    %cst_34 = arith.constant 1.000000e+00 : f32
    %61 = vector.broadcast %cst_34 : f32 to vector<8x20xf32>
    %62 = arith.addf %61, %60 : vector<8x20xf32>
    %cst_35 = arith.constant 1.000000e+00 : f32
    %63 = vector.broadcast %cst_35 : f32 to vector<8x20xf32>
    %64 = arith.divf %63, %62 : vector<8x20xf32>
    %65 = arith.mulf %64, %50 : vector<8x20xf32>
    %cst_36 = arith.constant 1.000000e+00 : f32
    %66 = vector.broadcast %cst_36 : f32 to vector<8x20xf32>
    %67 = arith.subf %66, %64 : vector<8x20xf32>
    %68 = arith.mulf %67, %1 : vector<8x20xf32>
    %69 = arith.addf %65, %68 : vector<8x20xf32>
    %c1 = arith.constant 1 : index
    %c0_37 = arith.constant 0 : index
    %c0_38 = arith.constant 0 : index
    %70 = vector.load %arg3[%c1, %c0_37, %c0_38] : memref<2x20x20xf32, #tpu.memory_space<vmem>>, vector<1x20x20xf32>
    %71 = vector.shape_cast %70 : vector<1x20x20xf32> to vector<20x20xf32>
    %cst_39 = arith.constant dense<0.000000e+00> : vector<8x20xf32>
    %72 = tpu.matmul %69, %71, %cst_39 {dimension_numbers = #tpu.dot_dimension_numbers<[1], [0], [0], [1], [0, 0, 1, 1], [], []>} : vector<8x20xf32>, vector<20x20xf32>, vector<8x20xf32> -> vector<8x20xf32>
    %c1_40 = arith.constant 1 : index
    %c0_41 = arith.constant 0 : index
    %c0_42 = arith.constant 0 : index
    %73 = vector.load %arg4[%c1_40, %c0_41, %c0_42] : memref<2x1x20xf32, #tpu.memory_space<vmem>>, vector<1x1x20xf32>
    %74 = vector.shape_cast %73 : vector<1x1x20xf32> to vector<1x20xf32>
    %75 = vector.broadcast %74 : vector<1x20xf32> to vector<8x20xf32>
    %76 = arith.addf %72, %75 : vector<8x20xf32>
    %cst_43 = arith.constant 5.000000e-01 : f32
    %77 = vector.broadcast %cst_43 : f32 to vector<8x20xf32>
    %78 = arith.mulf %76, %77 : vector<8x20xf32>
    %cst_44 = arith.constant 0.707106769 : f32
    %79 = vector.broadcast %cst_44 : f32 to vector<8x20xf32>
    %80 = arith.mulf %76, %79 : vector<8x20xf32>
    %81 = math.absf %80 : vector<8x20xf32>
    %cst_45 = arith.constant 0.327591091 : f32
    %82 = vector.broadcast %cst_45 : f32 to vector<8x20xf32>
    %83 = arith.mulf %82, %81 : vector<8x20xf32>
    %cst_46 = arith.constant 1.000000e+00 : f32
    %84 = vector.broadcast %cst_46 : f32 to vector<8x20xf32>
    %85 = arith.addf %84, %83 : vector<8x20xf32>
    %cst_47 = arith.constant 1.000000e+00 : f32
    %86 = vector.broadcast %cst_47 : f32 to vector<8x20xf32>
    %87 = arith.divf %86, %85 : vector<8x20xf32>
    %cst_48 = arith.constant 1.06140542 : f32
    %88 = vector.broadcast %cst_48 : f32 to vector<8x20xf32>
    %89 = arith.mulf %88, %87 : vector<8x20xf32>
    %cst_49 = arith.constant -1.45315206 : f32
    %90 = vector.broadcast %cst_49 : f32 to vector<8x20xf32>
    %91 = arith.addf %89, %90 : vector<8x20xf32>
    %92 = arith.mulf %91, %87 : vector<8x20xf32>
    %cst_50 = arith.constant 1.42141378 : f32
    %93 = vector.broadcast %cst_50 : f32 to vector<8x20xf32>
    %94 = arith.addf %92, %93 : vector<8x20xf32>
    %95 = arith.mulf %94, %87 : vector<8x20xf32>
    %cst_51 = arith.constant -0.284496725 : f32
    %96 = vector.broadcast %cst_51 : f32 to vector<8x20xf32>
    %97 = arith.addf %95, %96 : vector<8x20xf32>
    %98 = arith.mulf %97, %87 : vector<8x20xf32>
    %cst_52 = arith.constant 0.254829586 : f32
    %99 = vector.broadcast %cst_52 : f32 to vector<8x20xf32>
    %100 = arith.addf %98, %99 : vector<8x20xf32>
    %101 = arith.mulf %100, %87 : vector<8x20xf32>
    %cst_53 = arith.constant 0.000000e+00 : f32
    %102 = vector.broadcast %cst_53 : f32 to vector<8x20xf32>
    %103 = arith.subf %102, %81 : vector<8x20xf32>
    %104 = arith.mulf %103, %81 : vector<8x20xf32>
    %105 = math.exp %104 : vector<8x20xf32>
    %106 = arith.mulf %101, %105 : vector<8x20xf32>
    %cst_54 = arith.constant 1.000000e+00 : f32
    %107 = vector.broadcast %cst_54 : f32 to vector<8x20xf32>
    %108 = arith.subf %107, %106 : vector<8x20xf32>
    %cst_55 = arith.constant 0.000000e+00 : f32
    %109 = vector.broadcast %cst_55 : f32 to vector<8x20xf32>
    %110 = arith.cmpf olt, %80, %109 : vector<8x20xf32>
    %cst_56 = arith.constant 0.000000e+00 : f32
    %111 = vector.broadcast %cst_56 : f32 to vector<8x20xf32>
    %112 = arith.subf %111, %108 : vector<8x20xf32>
    %113 = arith.select %110, %112, %108 : vector<8x20xi1>, vector<8x20xf32>
    %cst_57 = arith.constant 1.000000e+00 : f32
    %114 = vector.broadcast %cst_57 : f32 to vector<8x20xf32>
    %115 = arith.addf %114, %113 : vector<8x20xf32>
    %116 = arith.mulf %78, %115 : vector<8x20xf32>
    %c1_58 = arith.constant 1 : index
    %c0_59 = arith.constant 0 : index
    %c0_60 = arith.constant 0 : index
    %117 = vector.load %arg5[%c1_58, %c0_59, %c0_60] : memref<2x20x20xf32, #tpu.memory_space<vmem>>, vector<1x20x20xf32>
    %118 = vector.shape_cast %117 : vector<1x20x20xf32> to vector<20x20xf32>
    %cst_61 = arith.constant dense<0.000000e+00> : vector<8x20xf32>
    %119 = tpu.matmul %69, %118, %cst_61 {dimension_numbers = #tpu.dot_dimension_numbers<[1], [0], [0], [1], [0, 0, 1, 1], [], []>} : vector<8x20xf32>, vector<20x20xf32>, vector<8x20xf32> -> vector<8x20xf32>
    %c1_62 = arith.constant 1 : index
    %c0_63 = arith.constant 0 : index
    %c0_64 = arith.constant 0 : index
    %120 = vector.load %arg6[%c1_62, %c0_63, %c0_64] : memref<2x1x20xf32, #tpu.memory_space<vmem>>, vector<1x1x20xf32>
    %121 = vector.shape_cast %120 : vector<1x1x20xf32> to vector<1x20xf32>
    %122 = vector.broadcast %121 : vector<1x20xf32> to vector<8x20xf32>
    %123 = arith.addf %119, %122 : vector<8x20xf32>
    %cst_65 = arith.constant 0.000000e+00 : f32
    %124 = vector.broadcast %cst_65 : f32 to vector<8x20xf32>
    %125 = arith.subf %124, %123 : vector<8x20xf32>
    %126 = math.exp %125 : vector<8x20xf32>
    %cst_66 = arith.constant 1.000000e+00 : f32
    %127 = vector.broadcast %cst_66 : f32 to vector<8x20xf32>
    %128 = arith.addf %127, %126 : vector<8x20xf32>
    %cst_67 = arith.constant 1.000000e+00 : f32
    %129 = vector.broadcast %cst_67 : f32 to vector<8x20xf32>
    %130 = arith.divf %129, %128 : vector<8x20xf32>
    %131 = arith.mulf %130, %116 : vector<8x20xf32>
    %cst_68 = arith.constant 1.000000e+00 : f32
    %132 = vector.broadcast %cst_68 : f32 to vector<8x20xf32>
    %133 = arith.subf %132, %130 : vector<8x20xf32>
    %134 = arith.mulf %133, %69 : vector<8x20xf32>
    %135 = arith.addf %131, %134 : vector<8x20xf32>
    %c0_69 = arith.constant 0 : index
    %c0_70 = arith.constant 0 : index
    %136 = vector.load %arg7[%c0_69, %c0_70] : memref<20x20xf32, #tpu.memory_space<vmem>>, vector<20x20xf32>
    %cst_71 = arith.constant dense<0.000000e+00> : vector<8x20xf32>
    %137 = tpu.matmul %135, %136, %cst_71 {dimension_numbers = #tpu.dot_dimension_numbers<[1], [0], [0], [1], [0, 0, 1, 1], [], []>} : vector<8x20xf32>, vector<20x20xf32>, vector<8x20xf32> -> vector<8x20xf32>
    %c0_72 = arith.constant 0 : index
    %c0_73 = arith.constant 0 : index
    %138 = vector.load %arg8[%c0_72, %c0_73] : memref<1x20xf32, #tpu.memory_space<vmem>>, vector<1x20xf32>
    %139 = vector.broadcast %138 : vector<1x20xf32> to vector<8x20xf32>
    %140 = arith.addf %137, %139 : vector<8x20xf32>
    %c0_74 = arith.constant 0 : index
    %c0_75 = arith.constant 0 : index
    %141 = vector.load %arg9[%c0_74, %c0_75] : memref<8x20xf32, #tpu.memory_space<vmem>>, vector<8x20xf32>
    %142 = arith.addf %140, %141 : vector<8x20xf32>
    %c0_76 = arith.constant 0 : index
    %c0_77 = arith.constant 0 : index
    %143 = vector.load %arg10[%c0_76, %c0_77] : memref<1x20xf32, #tpu.memory_space<vmem>>, vector<1x20xf32>
    %c0_78 = arith.constant 0 : index
    %c0_79 = arith.constant 0 : index
    %144 = vector.load %arg11[%c0_78, %c0_79] : memref<1x20xf32, #tpu.memory_space<vmem>>, vector<1x20xf32>
    %cst_80 = arith.constant dense<0.000000e+00> : vector<8xf32>
    %145 = vector.multi_reduction <add>, %142, %cst_80 [1] : vector<8x20xf32> to vector<8xf32>
    %146 = vector.shape_cast %145 : vector<8xf32> to vector<8x1xf32>
    %cst_81 = arith.constant 2.000000e+01 : f32
    %147 = vector.broadcast %cst_81 : f32 to vector<8x1xf32>
    %148 = arith.divf %146, %147 : vector<8x1xf32>
    %149 = vector.broadcast %148 : vector<8x1xf32> to vector<8x20xf32>
    %150 = arith.subf %142, %149 : vector<8x20xf32>
    %151 = arith.mulf %150, %150 : vector<8x20xf32>
    %cst_82 = arith.constant dense<0.000000e+00> : vector<8xf32>
    %152 = vector.multi_reduction <add>, %151, %cst_82 [1] : vector<8x20xf32> to vector<8xf32>
    %153 = vector.shape_cast %152 : vector<8xf32> to vector<8x1xf32>
    %cst_83 = arith.constant 2.000000e+01 : f32
    %154 = vector.broadcast %cst_83 : f32 to vector<8x1xf32>
    %155 = arith.divf %153, %154 : vector<8x1xf32>
    %cst_84 = arith.constant 9.99999996E-13 : f32
    %156 = vector.broadcast %cst_84 : f32 to vector<8x1xf32>
    %157 = arith.addf %155, %156 : vector<8x1xf32>
    %158 = math.rsqrt %157 : vector<8x1xf32>
    %159 = vector.broadcast %158 : vector<8x1xf32> to vector<8x20xf32>
    %160 = arith.mulf %150, %159 : vector<8x20xf32>
    %161 = vector.broadcast %143 : vector<1x20xf32> to vector<8x20xf32>
    %162 = arith.mulf %160, %161 : vector<8x20xf32>
    %163 = vector.broadcast %144 : vector<1x20xf32> to vector<8x20xf32>
    %164 = arith.addf %162, %163 : vector<8x20xf32>
    %c0_85 = arith.constant 0 : index
    %c0_86 = arith.constant 0 : index
    %c0_87 = arith.constant 0 : index
    %165 = vector.load %arg12[%c0_85, %c0_86, %c0_87] : memref<2x1x20xf32, #tpu.memory_space<vmem>>, vector<1x1x20xf32>
    %166 = vector.shape_cast %165 : vector<1x1x20xf32> to vector<1x20xf32>
    %c0_88 = arith.constant 0 : index
    %c0_89 = arith.constant 0 : index
    %c0_90 = arith.constant 0 : index
    %167 = vector.load %arg13[%c0_88, %c0_89, %c0_90] : memref<2x1x20xf32, #tpu.memory_space<vmem>>, vector<1x1x20xf32>
    %168 = vector.shape_cast %167 : vector<1x1x20xf32> to vector<1x20xf32>
    %cst_91 = arith.constant dense<0.000000e+00> : vector<8xf32>
    %169 = vector.multi_reduction <add>, %164, %cst_91 [1] : vector<8x20xf32> to vector<8xf32>
    %170 = vector.shape_cast %169 : vector<8xf32> to vector<8x1xf32>
    %cst_92 = arith.constant 2.000000e+01 : f32
    %171 = vector.broadcast %cst_92 : f32 to vector<8x1xf32>
    %172 = arith.divf %170, %171 : vector<8x1xf32>
    %173 = vector.broadcast %172 : vector<8x1xf32> to vector<8x20xf32>
    %174 = arith.subf %164, %173 : vector<8x20xf32>
    %175 = arith.mulf %174, %174 : vector<8x20xf32>
    %cst_93 = arith.constant dense<0.000000e+00> : vector<8xf32>
    %176 = vector.multi_reduction <add>, %175, %cst_93 [1] : vector<8x20xf32> to vector<8xf32>
    %177 = vector.shape_cast %176 : vector<8xf32> to vector<8x1xf32>
    %cst_94 = arith.constant 2.000000e+01 : f32
    %178 = vector.broadcast %cst_94 : f32 to vector<8x1xf32>
    %179 = arith.divf %177, %178 : vector<8x1xf32>
    %cst_95 = arith.constant 9.99999996E-13 : f32
    %180 = vector.broadcast %cst_95 : f32 to vector<8x1xf32>
    %181 = arith.addf %179, %180 : vector<8x1xf32>
    %182 = math.rsqrt %181 : vector<8x1xf32>
    %183 = vector.broadcast %182 : vector<8x1xf32> to vector<8x20xf32>
    %184 = arith.mulf %174, %183 : vector<8x20xf32>
    %185 = vector.broadcast %166 : vector<1x20xf32> to vector<8x20xf32>
    %186 = arith.mulf %184, %185 : vector<8x20xf32>
    %187 = vector.broadcast %168 : vector<1x20xf32> to vector<8x20xf32>
    %188 = arith.addf %186, %187 : vector<8x20xf32>
    %cst_96 = arith.constant 0.000000e+00 : f32
    %189 = vector.broadcast %cst_96 : f32 to vector<8x20xf32>
    %c0_97 = arith.constant 0 : index
    %c0_98 = arith.constant 0 : index
    %c0_99 = arith.constant 0 : index
    %190 = vector.load %arg14[%c0_97, %c0_98, %c0_99] : memref<8x20x5xf32, #tpu.memory_space<vmem>>, vector<1x20x5xf32>
    %191 = vector.shape_cast %190 : vector<1x20x5xf32> to vector<20x5xf32>
    %cst_100 = arith.constant dense<0.000000e+00> : vector<8x5xf32>
    %192 = tpu.matmul %188, %191, %cst_100 {dimension_numbers = #tpu.dot_dimension_numbers<[1], [0], [0], [1], [0, 0, 1, 1], [], []>} : vector<8x20xf32>, vector<20x5xf32>, vector<8x5xf32> -> vector<8x5xf32>
    %c0_101 = arith.constant 0 : index
    %c0_102 = arith.constant 0 : index
    %c0_103 = arith.constant 0 : index
    %193 = vector.load %arg15[%c0_101, %c0_102, %c0_103] : memref<8x1x5xf32, #tpu.memory_space<vmem>>, vector<1x1x5xf32>
    %194 = vector.shape_cast %193 : vector<1x1x5xf32> to vector<1x5xf32>
    %195 = vector.broadcast %194 : vector<1x5xf32> to vector<8x5xf32>
    %196 = arith.addf %192, %195 : vector<8x5xf32>
    %cst_104 = arith.constant 0.44721359 : f32
    %197 = vector.broadcast %cst_104 : f32 to vector<8x5xf32>
    %198 = arith.mulf %196, %197 : vector<8x5xf32>
    %c0_105 = arith.constant 0 : index
    %c0_106 = arith.constant 0 : index
    %c0_107 = arith.constant 0 : index
    %199 = vector.load %arg16[%c0_105, %c0_106, %c0_107] : memref<8x20x5xf32, #tpu.memory_space<vmem>>, vector<1x20x5xf32>
    %200 = vector.shape_cast %199 : vector<1x20x5xf32> to vector<20x5xf32>
    %cst_108 = arith.constant dense<0.000000e+00> : vector<8x5xf32>
    %201 = tpu.matmul %188, %200, %cst_108 {dimension_numbers = #tpu.dot_dimension_numbers<[1], [0], [0], [1], [0, 0, 1, 1], [], []>} : vector<8x20xf32>, vector<20x5xf32>, vector<8x5xf32> -> vector<8x5xf32>
    %c0_109 = arith.constant 0 : index
    %c0_110 = arith.constant 0 : index
    %c0_111 = arith.constant 0 : index
    %202 = vector.load %arg17[%c0_109, %c0_110, %c0_111] : memref<8x1x5xf32, #tpu.memory_space<vmem>>, vector<1x1x5xf32>
    %203 = vector.shape_cast %202 : vector<1x1x5xf32> to vector<1x5xf32>
    %204 = vector.broadcast %203 : vector<1x5xf32> to vector<8x5xf32>
    %205 = arith.addf %201, %204 : vector<8x5xf32>
    %c0_112 = arith.constant 0 : index
    %c0_113 = arith.constant 0 : index
    %c0_114 = arith.constant 0 : index
    %206 = vector.load %arg18[%c0_112, %c0_113, %c0_114] : memref<8x20x5xf32, #tpu.memory_space<vmem>>, vector<1x20x5xf32>
    %207 = vector.shape_cast %206 : vector<1x20x5xf32> to vector<20x5xf32>
    %cst_115 = arith.constant dense<0.000000e+00> : vector<8x5xf32>
    %208 = tpu.matmul %188, %207, %cst_115 {dimension_numbers = #tpu.dot_dimension_numbers<[1], [0], [0], [1], [0, 0, 1, 1], [], []>} : vector<8x20xf32>, vector<20x5xf32>, vector<8x5xf32> -> vector<8x5xf32>
    %c0_116 = arith.constant 0 : index
    %c0_117 = arith.constant 0 : index
    %c0_118 = arith.constant 0 : index
    %209 = vector.load %arg19[%c0_116, %c0_117, %c0_118] : memref<8x1x5xf32, #tpu.memory_space<vmem>>, vector<1x1x5xf32>
    %210 = vector.shape_cast %209 : vector<1x1x5xf32> to vector<1x5xf32>
    %211 = vector.broadcast %210 : vector<1x5xf32> to vector<8x5xf32>
    %212 = arith.addf %208, %211 : vector<8x5xf32>
    %cst_119 = arith.constant dense<0.000000e+00> : vector<8x8xf32>
    %213 = tpu.matmul %198, %205, %cst_119 {dimension_numbers = #tpu.dot_dimension_numbers<[1], [1], [0], [0], [0, 0, 1, 0], [], []>} : vector<8x5xf32>, vector<8x5xf32>, vector<8x8xf32> -> vector<8x8xf32>
    %214 = vector.broadcast %3 : vector<1x8xf32> to vector<8x8xf32>
    %215 = arith.addf %213, %214 : vector<8x8xf32>
    %cst_120 = arith.constant dense<0xFF800000> : vector<8xf32>
    %216 = vector.multi_reduction <maximumf>, %215, %cst_120 [1] : vector<8x8xf32> to vector<8xf32>
    %217 = vector.shape_cast %216 : vector<8xf32> to vector<8x1xf32>
    %218 = vector.broadcast %217 : vector<8x1xf32> to vector<8x8xf32>
    %219 = arith.subf %215, %218 : vector<8x8xf32>
    %220 = math.exp %219 : vector<8x8xf32>
    %cst_121 = arith.constant dense<0.000000e+00> : vector<8xf32>
    %221 = vector.multi_reduction <add>, %220, %cst_121 [1] : vector<8x8xf32> to vector<8xf32>
    %222 = vector.shape_cast %221 : vector<8xf32> to vector<8x1xf32>
    %223 = tpu.reciprocal %222 {approx = true} : vector<8x1xf32> -> vector<8x1xf32>
    %224 = vector.broadcast %223 : vector<8x1xf32> to vector<8x8xf32>
    %225 = arith.mulf %220, %224 : vector<8x8xf32>
    %cst_122 = arith.constant dense<0.000000e+00> : vector<8x5xf32>
    %226 = tpu.matmul %225, %212, %cst_122 {dimension_numbers = #tpu.dot_dimension_numbers<[1], [0], [0], [1], [0, 0, 1, 1], [], []>} : vector<8x8xf32>, vector<8x5xf32>, vector<8x5xf32> -> vector<8x5xf32>
    %c0_123 = arith.constant 0 : index
    %c0_124 = arith.constant 0 : index
    %c0_125 = arith.constant 0 : index
    %227 = vector.load %arg20[%c0_123, %c0_124, %c0_125] : memref<8x5x20xf32, #tpu.memory_space<vmem>>, vector<1x5x20xf32>
    %228 = vector.shape_cast %227 : vector<1x5x20xf32> to vector<5x20xf32>
    %cst_126 = arith.constant dense<0.000000e+00> : vector<8x20xf32>
    %229 = tpu.matmul %226, %228, %cst_126 {dimension_numbers = #tpu.dot_dimension_numbers<[1], [0], [0], [1], [0, 0, 1, 1], [], []>} : vector<8x5xf32>, vector<5x20xf32>, vector<8x20xf32> -> vector<8x20xf32>
    %230 = arith.addf %189, %229 : vector<8x20xf32>
    %c1_127 = arith.constant 1 : index
    %c0_128 = arith.constant 0 : index
    %c0_129 = arith.constant 0 : index
    %231 = vector.load %arg14[%c1_127, %c0_128, %c0_129] : memref<8x20x5xf32, #tpu.memory_space<vmem>>, vector<1x20x5xf32>
    %232 = vector.shape_cast %231 : vector<1x20x5xf32> to vector<20x5xf32>
    %cst_130 = arith.constant dense<0.000000e+00> : vector<8x5xf32>
    %233 = tpu.matmul %188, %232, %cst_130 {dimension_numbers = #tpu.dot_dimension_numbers<[1], [0], [0], [1], [0, 0, 1, 1], [], []>} : vector<8x20xf32>, vector<20x5xf32>, vector<8x5xf32> -> vector<8x5xf32>
    %c1_131 = arith.constant 1 : index
    %c0_132 = arith.constant 0 : index
    %c0_133 = arith.constant 0 : index
    %234 = vector.load %arg15[%c1_131, %c0_132, %c0_133] : memref<8x1x5xf32, #tpu.memory_space<vmem>>, vector<1x1x5xf32>
    %235 = vector.shape_cast %234 : vector<1x1x5xf32> to vector<1x5xf32>
    %236 = vector.broadcast %235 : vector<1x5xf32> to vector<8x5xf32>
    %237 = arith.addf %233, %236 : vector<8x5xf32>
    %cst_134 = arith.constant 0.44721359 : f32
    %238 = vector.broadcast %cst_134 : f32 to vector<8x5xf32>
    %239 = arith.mulf %237, %238 : vector<8x5xf32>
    %c1_135 = arith.constant 1 : index
    %c0_136 = arith.constant 0 : index
    %c0_137 = arith.constant 0 : index
    %240 = vector.load %arg16[%c1_135, %c0_136, %c0_137] : memref<8x20x5xf32, #tpu.memory_space<vmem>>, vector<1x20x5xf32>
    %241 = vector.shape_cast %240 : vector<1x20x5xf32> to vector<20x5xf32>
    %cst_138 = arith.constant dense<0.000000e+00> : vector<8x5xf32>
    %242 = tpu.matmul %188, %241, %cst_138 {dimension_numbers = #tpu.dot_dimension_numbers<[1], [0], [0], [1], [0, 0, 1, 1], [], []>} : vector<8x20xf32>, vector<20x5xf32>, vector<8x5xf32> -> vector<8x5xf32>
    %c1_139 = arith.constant 1 : index
    %c0_140 = arith.constant 0 : index
    %c0_141 = arith.constant 0 : index
    %243 = vector.load %arg17[%c1_139, %c0_140, %c0_141] : memref<8x1x5xf32, #tpu.memory_space<vmem>>, vector<1x1x5xf32>
    %244 = vector.shape_cast %243 : vector<1x1x5xf32> to vector<1x5xf32>
    %245 = vector.broadcast %244 : vector<1x5xf32> to vector<8x5xf32>
    %246 = arith.addf %242, %245 : vector<8x5xf32>
    %c1_142 = arith.constant 1 : index
    %c0_143 = arith.constant 0 : index
    %c0_144 = arith.constant 0 : index
    %247 = vector.load %arg18[%c1_142, %c0_143, %c0_144] : memref<8x20x5xf32, #tpu.memory_space<vmem>>, vector<1x20x5xf32>
    %248 = vector.shape_cast %247 : vector<1x20x5xf32> to vector<20x5xf32>
    %cst_145 = arith.constant dense<0.000000e+00> : vector<8x5xf32>
    %249 = tpu.matmul %188, %248, %cst_145 {dimension_numbers = #tpu.dot_dimension_numbers<[1], [0], [0], [1], [0, 0, 1, 1], [], []>} : vector<8x20xf32>, vector<20x5xf32>, vector<8x5xf32> -> vector<8x5xf32>
    %c1_146 = arith.constant 1 : index
    %c0_147 = arith.constant 0 : index
    %c0_148 = arith.constant 0 : index
    %250 = vector.load %arg19[%c1_146, %c0_147, %c0_148] : memref<8x1x5xf32, #tpu.memory_space<vmem>>, vector<1x1x5xf32>
    %251 = vector.shape_cast %250 : vector<1x1x5xf32> to vector<1x5xf32>
    %252 = vector.broadcast %251 : vector<1x5xf32> to vector<8x5xf32>
    %253 = arith.addf %249, %252 : vector<8x5xf32>
    %cst_149 = arith.constant dense<0.000000e+00> : vector<8x8xf32>
    %254 = tpu.matmul %239, %246, %cst_149 {dimension_numbers = #tpu.dot_dimension_numbers<[1], [1], [0], [0], [0, 0, 1, 0], [], []>} : vector<8x5xf32>, vector<8x5xf32>, vector<8x8xf32> -> vector<8x8xf32>
    %255 = vector.broadcast %3 : vector<1x8xf32> to vector<8x8xf32>
    %256 = arith.addf %254, %255 : vector<8x8xf32>
    %cst_150 = arith.constant dense<0xFF800000> : vector<8xf32>
    %257 = vector.multi_reduction <maximumf>, %256, %cst_150 [1] : vector<8x8xf32> to vector<8xf32>
    %258 = vector.shape_cast %257 : vector<8xf32> to vector<8x1xf32>
    %259 = vector.broadcast %258 : vector<8x1xf32> to vector<8x8xf32>
    %260 = arith.subf %256, %259 : vector<8x8xf32>
    %261 = math.exp %260 : vector<8x8xf32>
    %cst_151 = arith.constant dense<0.000000e+00> : vector<8xf32>
    %262 = vector.multi_reduction <add>, %261, %cst_151 [1] : vector<8x8xf32> to vector<8xf32>
    %263 = vector.shape_cast %262 : vector<8xf32> to vector<8x1xf32>
    %264 = tpu.reciprocal %263 {approx = true} : vector<8x1xf32> -> vector<8x1xf32>
    %265 = vector.broadcast %264 : vector<8x1xf32> to vector<8x8xf32>
    %266 = arith.mulf %261, %265 : vector<8x8xf32>
    %cst_152 = arith.constant dense<0.000000e+00> : vector<8x5xf32>
    %267 = tpu.matmul %266, %253, %cst_152 {dimension_numbers = #tpu.dot_dimension_numbers<[1], [0], [0], [1], [0, 0, 1, 1], [], []>} : vector<8x8xf32>, vector<8x5xf32>, vector<8x5xf32> -> vector<8x5xf32>
    %c1_153 = arith.constant 1 : index
    %c0_154 = arith.constant 0 : index
    %c0_155 = arith.constant 0 : index
    %268 = vector.load %arg20[%c1_153, %c0_154, %c0_155] : memref<8x5x20xf32, #tpu.memory_space<vmem>>, vector<1x5x20xf32>
    %269 = vector.shape_cast %268 : vector<1x5x20xf32> to vector<5x20xf32>
    %cst_156 = arith.constant dense<0.000000e+00> : vector<8x20xf32>
    %270 = tpu.matmul %267, %269, %cst_156 {dimension_numbers = #tpu.dot_dimension_numbers<[1], [0], [0], [1], [0, 0, 1, 1], [], []>} : vector<8x5xf32>, vector<5x20xf32>, vector<8x20xf32> -> vector<8x20xf32>
    %271 = arith.addf %230, %270 : vector<8x20xf32>
    %c2 = arith.constant 2 : index
    %c0_157 = arith.constant 0 : index
    %c0_158 = arith.constant 0 : index
    %272 = vector.load %arg14[%c2, %c0_157, %c0_158] : memref<8x20x5xf32, #tpu.memory_space<vmem>>, vector<1x20x5xf32>
    %273 = vector.shape_cast %272 : vector<1x20x5xf32> to vector<20x5xf32>
    %cst_159 = arith.constant dense<0.000000e+00> : vector<8x5xf32>
    %274 = tpu.matmul %188, %273, %cst_159 {dimension_numbers = #tpu.dot_dimension_numbers<[1], [0], [0], [1], [0, 0, 1, 1], [], []>} : vector<8x20xf32>, vector<20x5xf32>, vector<8x5xf32> -> vector<8x5xf32>
    %c2_160 = arith.constant 2 : index
    %c0_161 = arith.constant 0 : index
    %c0_162 = arith.constant 0 : index
    %275 = vector.load %arg15[%c2_160, %c0_161, %c0_162] : memref<8x1x5xf32, #tpu.memory_space<vmem>>, vector<1x1x5xf32>
    %276 = vector.shape_cast %275 : vector<1x1x5xf32> to vector<1x5xf32>
    %277 = vector.broadcast %276 : vector<1x5xf32> to vector<8x5xf32>
    %278 = arith.addf %274, %277 : vector<8x5xf32>
    %cst_163 = arith.constant 0.44721359 : f32
    %279 = vector.broadcast %cst_163 : f32 to vector<8x5xf32>
    %280 = arith.mulf %278, %279 : vector<8x5xf32>
    %c2_164 = arith.constant 2 : index
    %c0_165 = arith.constant 0 : index
    %c0_166 = arith.constant 0 : index
    %281 = vector.load %arg16[%c2_164, %c0_165, %c0_166] : memref<8x20x5xf32, #tpu.memory_space<vmem>>, vector<1x20x5xf32>
    %282 = vector.shape_cast %281 : vector<1x20x5xf32> to vector<20x5xf32>
    %cst_167 = arith.constant dense<0.000000e+00> : vector<8x5xf32>
    %283 = tpu.matmul %188, %282, %cst_167 {dimension_numbers = #tpu.dot_dimension_numbers<[1], [0], [0], [1], [0, 0, 1, 1], [], []>} : vector<8x20xf32>, vector<20x5xf32>, vector<8x5xf32> -> vector<8x5xf32>
    %c2_168 = arith.constant 2 : index
    %c0_169 = arith.constant 0 : index
    %c0_170 = arith.constant 0 : index
    %284 = vector.load %arg17[%c2_168, %c0_169, %c0_170] : memref<8x1x5xf32, #tpu.memory_space<vmem>>, vector<1x1x5xf32>
    %285 = vector.shape_cast %284 : vector<1x1x5xf32> to vector<1x5xf32>
    %286 = vector.broadcast %285 : vector<1x5xf32> to vector<8x5xf32>
    %287 = arith.addf %283, %286 : vector<8x5xf32>
    %c2_171 = arith.constant 2 : index
    %c0_172 = arith.constant 0 : index
    %c0_173 = arith.constant 0 : index
    %288 = vector.load %arg18[%c2_171, %c0_172, %c0_173] : memref<8x20x5xf32, #tpu.memory_space<vmem>>, vector<1x20x5xf32>
    %289 = vector.shape_cast %288 : vector<1x20x5xf32> to vector<20x5xf32>
    %cst_174 = arith.constant dense<0.000000e+00> : vector<8x5xf32>
    %290 = tpu.matmul %188, %289, %cst_174 {dimension_numbers = #tpu.dot_dimension_numbers<[1], [0], [0], [1], [0, 0, 1, 1], [], []>} : vector<8x20xf32>, vector<20x5xf32>, vector<8x5xf32> -> vector<8x5xf32>
    %c2_175 = arith.constant 2 : index
    %c0_176 = arith.constant 0 : index
    %c0_177 = arith.constant 0 : index
    %291 = vector.load %arg19[%c2_175, %c0_176, %c0_177] : memref<8x1x5xf32, #tpu.memory_space<vmem>>, vector<1x1x5xf32>
    %292 = vector.shape_cast %291 : vector<1x1x5xf32> to vector<1x5xf32>
    %293 = vector.broadcast %292 : vector<1x5xf32> to vector<8x5xf32>
    %294 = arith.addf %290, %293 : vector<8x5xf32>
    %cst_178 = arith.constant dense<0.000000e+00> : vector<8x8xf32>
    %295 = tpu.matmul %280, %287, %cst_178 {dimension_numbers = #tpu.dot_dimension_numbers<[1], [1], [0], [0], [0, 0, 1, 0], [], []>} : vector<8x5xf32>, vector<8x5xf32>, vector<8x8xf32> -> vector<8x8xf32>
    %296 = vector.broadcast %3 : vector<1x8xf32> to vector<8x8xf32>
    %297 = arith.addf %295, %296 : vector<8x8xf32>
    %cst_179 = arith.constant dense<0xFF800000> : vector<8xf32>
    %298 = vector.multi_reduction <maximumf>, %297, %cst_179 [1] : vector<8x8xf32> to vector<8xf32>
    %299 = vector.shape_cast %298 : vector<8xf32> to vector<8x1xf32>
    %300 = vector.broadcast %299 : vector<8x1xf32> to vector<8x8xf32>
    %301 = arith.subf %297, %300 : vector<8x8xf32>
    %302 = math.exp %301 : vector<8x8xf32>
    %cst_180 = arith.constant dense<0.000000e+00> : vector<8xf32>
    %303 = vector.multi_reduction <add>, %302, %cst_180 [1] : vector<8x8xf32> to vector<8xf32>
    %304 = vector.shape_cast %303 : vector<8xf32> to vector<8x1xf32>
    %305 = tpu.reciprocal %304 {approx = true} : vector<8x1xf32> -> vector<8x1xf32>
    %306 = vector.broadcast %305 : vector<8x1xf32> to vector<8x8xf32>
    %307 = arith.mulf %302, %306 : vector<8x8xf32>
    %cst_181 = arith.constant dense<0.000000e+00> : vector<8x5xf32>
    %308 = tpu.matmul %307, %294, %cst_181 {dimension_numbers = #tpu.dot_dimension_numbers<[1], [0], [0], [1], [0, 0, 1, 1], [], []>} : vector<8x8xf32>, vector<8x5xf32>, vector<8x5xf32> -> vector<8x5xf32>
    %c2_182 = arith.constant 2 : index
    %c0_183 = arith.constant 0 : index
    %c0_184 = arith.constant 0 : index
    %309 = vector.load %arg20[%c2_182, %c0_183, %c0_184] : memref<8x5x20xf32, #tpu.memory_space<vmem>>, vector<1x5x20xf32>
    %310 = vector.shape_cast %309 : vector<1x5x20xf32> to vector<5x20xf32>
    %cst_185 = arith.constant dense<0.000000e+00> : vector<8x20xf32>
    %311 = tpu.matmul %308, %310, %cst_185 {dimension_numbers = #tpu.dot_dimension_numbers<[1], [0], [0], [1], [0, 0, 1, 1], [], []>} : vector<8x5xf32>, vector<5x20xf32>, vector<8x20xf32> -> vector<8x20xf32>
    %312 = arith.addf %271, %311 : vector<8x20xf32>
    %c3 = arith.constant 3 : index
    %c0_186 = arith.constant 0 : index
    %c0_187 = arith.constant 0 : index
    %313 = vector.load %arg14[%c3, %c0_186, %c0_187] : memref<8x20x5xf32, #tpu.memory_space<vmem>>, vector<1x20x5xf32>
    %314 = vector.shape_cast %313 : vector<1x20x5xf32> to vector<20x5xf32>
    %cst_188 = arith.constant dense<0.000000e+00> : vector<8x5xf32>
    %315 = tpu.matmul %188, %314, %cst_188 {dimension_numbers = #tpu.dot_dimension_numbers<[1], [0], [0], [1], [0, 0, 1, 1], [], []>} : vector<8x20xf32>, vector<20x5xf32>, vector<8x5xf32> -> vector<8x5xf32>
    %c3_189 = arith.constant 3 : index
    %c0_190 = arith.constant 0 : index
    %c0_191 = arith.constant 0 : index
    %316 = vector.load %arg15[%c3_189, %c0_190, %c0_191] : memref<8x1x5xf32, #tpu.memory_space<vmem>>, vector<1x1x5xf32>
    %317 = vector.shape_cast %316 : vector<1x1x5xf32> to vector<1x5xf32>
    %318 = vector.broadcast %317 : vector<1x5xf32> to vector<8x5xf32>
    %319 = arith.addf %315, %318 : vector<8x5xf32>
    %cst_192 = arith.constant 0.44721359 : f32
    %320 = vector.broadcast %cst_192 : f32 to vector<8x5xf32>
    %321 = arith.mulf %319, %320 : vector<8x5xf32>
    %c3_193 = arith.constant 3 : index
    %c0_194 = arith.constant 0 : index
    %c0_195 = arith.constant 0 : index
    %322 = vector.load %arg16[%c3_193, %c0_194, %c0_195] : memref<8x20x5xf32, #tpu.memory_space<vmem>>, vector<1x20x5xf32>
    %323 = vector.shape_cast %322 : vector<1x20x5xf32> to vector<20x5xf32>
    %cst_196 = arith.constant dense<0.000000e+00> : vector<8x5xf32>
    %324 = tpu.matmul %188, %323, %cst_196 {dimension_numbers = #tpu.dot_dimension_numbers<[1], [0], [0], [1], [0, 0, 1, 1], [], []>} : vector<8x20xf32>, vector<20x5xf32>, vector<8x5xf32> -> vector<8x5xf32>
    %c3_197 = arith.constant 3 : index
    %c0_198 = arith.constant 0 : index
    %c0_199 = arith.constant 0 : index
    %325 = vector.load %arg17[%c3_197, %c0_198, %c0_199] : memref<8x1x5xf32, #tpu.memory_space<vmem>>, vector<1x1x5xf32>
    %326 = vector.shape_cast %325 : vector<1x1x5xf32> to vector<1x5xf32>
    %327 = vector.broadcast %326 : vector<1x5xf32> to vector<8x5xf32>
    %328 = arith.addf %324, %327 : vector<8x5xf32>
    %c3_200 = arith.constant 3 : index
    %c0_201 = arith.constant 0 : index
    %c0_202 = arith.constant 0 : index
    %329 = vector.load %arg18[%c3_200, %c0_201, %c0_202] : memref<8x20x5xf32, #tpu.memory_space<vmem>>, vector<1x20x5xf32>
    %330 = vector.shape_cast %329 : vector<1x20x5xf32> to vector<20x5xf32>
    %cst_203 = arith.constant dense<0.000000e+00> : vector<8x5xf32>
    %331 = tpu.matmul %188, %330, %cst_203 {dimension_numbers = #tpu.dot_dimension_numbers<[1], [0], [0], [1], [0, 0, 1, 1], [], []>} : vector<8x20xf32>, vector<20x5xf32>, vector<8x5xf32> -> vector<8x5xf32>
    %c3_204 = arith.constant 3 : index
    %c0_205 = arith.constant 0 : index
    %c0_206 = arith.constant 0 : index
    %332 = vector.load %arg19[%c3_204, %c0_205, %c0_206] : memref<8x1x5xf32, #tpu.memory_space<vmem>>, vector<1x1x5xf32>
    %333 = vector.shape_cast %332 : vector<1x1x5xf32> to vector<1x5xf32>
    %334 = vector.broadcast %333 : vector<1x5xf32> to vector<8x5xf32>
    %335 = arith.addf %331, %334 : vector<8x5xf32>
    %cst_207 = arith.constant dense<0.000000e+00> : vector<8x8xf32>
    %336 = tpu.matmul %321, %328, %cst_207 {dimension_numbers = #tpu.dot_dimension_numbers<[1], [1], [0], [0], [0, 0, 1, 0], [], []>} : vector<8x5xf32>, vector<8x5xf32>, vector<8x8xf32> -> vector<8x8xf32>
    %337 = vector.broadcast %3 : vector<1x8xf32> to vector<8x8xf32>
    %338 = arith.addf %336, %337 : vector<8x8xf32>
    %cst_208 = arith.constant dense<0xFF800000> : vector<8xf32>
    %339 = vector.multi_reduction <maximumf>, %338, %cst_208 [1] : vector<8x8xf32> to vector<8xf32>
    %340 = vector.shape_cast %339 : vector<8xf32> to vector<8x1xf32>
    %341 = vector.broadcast %340 : vector<8x1xf32> to vector<8x8xf32>
    %342 = arith.subf %338, %341 : vector<8x8xf32>
    %343 = math.exp %342 : vector<8x8xf32>
    %cst_209 = arith.constant dense<0.000000e+00> : vector<8xf32>
    %344 = vector.multi_reduction <add>, %343, %cst_209 [1] : vector<8x8xf32> to vector<8xf32>
    %345 = vector.shape_cast %344 : vector<8xf32> to vector<8x1xf32>
    %346 = tpu.reciprocal %345 {approx = true} : vector<8x1xf32> -> vector<8x1xf32>
    %347 = vector.broadcast %346 : vector<8x1xf32> to vector<8x8xf32>
    %348 = arith.mulf %343, %347 : vector<8x8xf32>
    %cst_210 = arith.constant dense<0.000000e+00> : vector<8x5xf32>
    %349 = tpu.matmul %348, %335, %cst_210 {dimension_numbers = #tpu.dot_dimension_numbers<[1], [0], [0], [1], [0, 0, 1, 1], [], []>} : vector<8x8xf32>, vector<8x5xf32>, vector<8x5xf32> -> vector<8x5xf32>
    %c3_211 = arith.constant 3 : index
    %c0_212 = arith.constant 0 : index
    %c0_213 = arith.constant 0 : index
    %350 = vector.load %arg20[%c3_211, %c0_212, %c0_213] : memref<8x5x20xf32, #tpu.memory_space<vmem>>, vector<1x5x20xf32>
    %351 = vector.shape_cast %350 : vector<1x5x20xf32> to vector<5x20xf32>
    %cst_214 = arith.constant dense<0.000000e+00> : vector<8x20xf32>
    %352 = tpu.matmul %349, %351, %cst_214 {dimension_numbers = #tpu.dot_dimension_numbers<[1], [0], [0], [1], [0, 0, 1, 1], [], []>} : vector<8x5xf32>, vector<5x20xf32>, vector<8x20xf32> -> vector<8x20xf32>
    %353 = arith.addf %312, %352 : vector<8x20xf32>
    %354 = arith.addf %164, %353 : vector<8x20xf32>
    %c0_215 = arith.constant 0 : index
    %c0_216 = arith.constant 0 : index
    %c0_217 = arith.constant 0 : index
    %355 = vector.load %arg21[%c0_215, %c0_216, %c0_217] : memref<2x1x20xf32, #tpu.memory_space<vmem>>, vector<1x1x20xf32>
    %356 = vector.shape_cast %355 : vector<1x1x20xf32> to vector<1x20xf32>
    %357 = vector.broadcast %356 : vector<1x20xf32> to vector<8x20xf32>
    %358 = arith.addf %354, %357 : vector<8x20xf32>
    %c0_218 = arith.constant 0 : index
    %c0_219 = arith.constant 0 : index
    %c0_220 = arith.constant 0 : index
    %359 = vector.load %arg22[%c0_218, %c0_219, %c0_220] : memref<2x1x20xf32, #tpu.memory_space<vmem>>, vector<1x1x20xf32>
    %360 = vector.shape_cast %359 : vector<1x1x20xf32> to vector<1x20xf32>
    %c0_221 = arith.constant 0 : index
    %c0_222 = arith.constant 0 : index
    %c0_223 = arith.constant 0 : index
    %361 = vector.load %arg23[%c0_221, %c0_222, %c0_223] : memref<2x1x20xf32, #tpu.memory_space<vmem>>, vector<1x1x20xf32>
    %362 = vector.shape_cast %361 : vector<1x1x20xf32> to vector<1x20xf32>
    %c0_224 = arith.constant 0 : index
    %c0_225 = arith.constant 0 : index
    %c0_226 = arith.constant 0 : index
    %363 = vector.load %arg24[%c0_224, %c0_225, %c0_226] : memref<2x20x32xf32, #tpu.memory_space<vmem>>, vector<1x20x32xf32>
    %364 = vector.shape_cast %363 : vector<1x20x32xf32> to vector<20x32xf32>
    %c0_227 = arith.constant 0 : index
    %c0_228 = arith.constant 0 : index
    %c0_229 = arith.constant 0 : index
    %365 = vector.load %arg25[%c0_227, %c0_228, %c0_229] : memref<2x1x32xf32, #tpu.memory_space<vmem>>, vector<1x1x32xf32>
    %366 = vector.shape_cast %365 : vector<1x1x32xf32> to vector<1x32xf32>
    %c0_230 = arith.constant 0 : index
    %c0_231 = arith.constant 0 : index
    %c0_232 = arith.constant 0 : index
    %367 = vector.load %arg26[%c0_230, %c0_231, %c0_232] : memref<2x32x20xf32, #tpu.memory_space<vmem>>, vector<1x32x20xf32>
    %368 = vector.shape_cast %367 : vector<1x32x20xf32> to vector<32x20xf32>
    %c0_233 = arith.constant 0 : index
    %c0_234 = arith.constant 0 : index
    %c0_235 = arith.constant 0 : index
    %369 = vector.load %arg27[%c0_233, %c0_234, %c0_235] : memref<2x1x20xf32, #tpu.memory_space<vmem>>, vector<1x1x20xf32>
    %370 = vector.shape_cast %369 : vector<1x1x20xf32> to vector<1x20xf32>
    %cst_236 = arith.constant dense<0.000000e+00> : vector<8xf32>
    %371 = vector.multi_reduction <add>, %358, %cst_236 [1] : vector<8x20xf32> to vector<8xf32>
    %372 = vector.shape_cast %371 : vector<8xf32> to vector<8x1xf32>
    %cst_237 = arith.constant 2.000000e+01 : f32
    %373 = vector.broadcast %cst_237 : f32 to vector<8x1xf32>
    %374 = arith.divf %372, %373 : vector<8x1xf32>
    %375 = vector.broadcast %374 : vector<8x1xf32> to vector<8x20xf32>
    %376 = arith.subf %358, %375 : vector<8x20xf32>
    %377 = arith.mulf %376, %376 : vector<8x20xf32>
    %cst_238 = arith.constant dense<0.000000e+00> : vector<8xf32>
    %378 = vector.multi_reduction <add>, %377, %cst_238 [1] : vector<8x20xf32> to vector<8xf32>
    %379 = vector.shape_cast %378 : vector<8xf32> to vector<8x1xf32>
    %cst_239 = arith.constant 2.000000e+01 : f32
    %380 = vector.broadcast %cst_239 : f32 to vector<8x1xf32>
    %381 = arith.divf %379, %380 : vector<8x1xf32>
    %cst_240 = arith.constant 9.99999996E-13 : f32
    %382 = vector.broadcast %cst_240 : f32 to vector<8x1xf32>
    %383 = arith.addf %381, %382 : vector<8x1xf32>
    %384 = math.rsqrt %383 : vector<8x1xf32>
    %385 = vector.broadcast %384 : vector<8x1xf32> to vector<8x20xf32>
    %386 = arith.mulf %376, %385 : vector<8x20xf32>
    %387 = vector.broadcast %360 : vector<1x20xf32> to vector<8x20xf32>
    %388 = arith.mulf %386, %387 : vector<8x20xf32>
    %389 = vector.broadcast %362 : vector<1x20xf32> to vector<8x20xf32>
    %390 = arith.addf %388, %389 : vector<8x20xf32>
    %cst_241 = arith.constant dense<0.000000e+00> : vector<8x32xf32>
    %391 = tpu.matmul %390, %364, %cst_241 {dimension_numbers = #tpu.dot_dimension_numbers<[1], [0], [0], [1], [0, 0, 1, 1], [], []>} : vector<8x20xf32>, vector<20x32xf32>, vector<8x32xf32> -> vector<8x32xf32>
    %392 = vector.broadcast %366 : vector<1x32xf32> to vector<8x32xf32>
    %393 = arith.addf %391, %392 : vector<8x32xf32>
    %cst_242 = arith.constant 5.000000e-01 : f32
    %394 = vector.broadcast %cst_242 : f32 to vector<8x32xf32>
    %395 = arith.mulf %393, %394 : vector<8x32xf32>
    %cst_243 = arith.constant 0.707106769 : f32
    %396 = vector.broadcast %cst_243 : f32 to vector<8x32xf32>
    %397 = arith.mulf %393, %396 : vector<8x32xf32>
    %398 = math.absf %397 : vector<8x32xf32>
    %cst_244 = arith.constant 0.327591091 : f32
    %399 = vector.broadcast %cst_244 : f32 to vector<8x32xf32>
    %400 = arith.mulf %399, %398 : vector<8x32xf32>
    %cst_245 = arith.constant 1.000000e+00 : f32
    %401 = vector.broadcast %cst_245 : f32 to vector<8x32xf32>
    %402 = arith.addf %401, %400 : vector<8x32xf32>
    %cst_246 = arith.constant 1.000000e+00 : f32
    %403 = vector.broadcast %cst_246 : f32 to vector<8x32xf32>
    %404 = arith.divf %403, %402 : vector<8x32xf32>
    %cst_247 = arith.constant 1.06140542 : f32
    %405 = vector.broadcast %cst_247 : f32 to vector<8x32xf32>
    %406 = arith.mulf %405, %404 : vector<8x32xf32>
    %cst_248 = arith.constant -1.45315206 : f32
    %407 = vector.broadcast %cst_248 : f32 to vector<8x32xf32>
    %408 = arith.addf %406, %407 : vector<8x32xf32>
    %409 = arith.mulf %408, %404 : vector<8x32xf32>
    %cst_249 = arith.constant 1.42141378 : f32
    %410 = vector.broadcast %cst_249 : f32 to vector<8x32xf32>
    %411 = arith.addf %409, %410 : vector<8x32xf32>
    %412 = arith.mulf %411, %404 : vector<8x32xf32>
    %cst_250 = arith.constant -0.284496725 : f32
    %413 = vector.broadcast %cst_250 : f32 to vector<8x32xf32>
    %414 = arith.addf %412, %413 : vector<8x32xf32>
    %415 = arith.mulf %414, %404 : vector<8x32xf32>
    %cst_251 = arith.constant 0.254829586 : f32
    %416 = vector.broadcast %cst_251 : f32 to vector<8x32xf32>
    %417 = arith.addf %415, %416 : vector<8x32xf32>
    %418 = arith.mulf %417, %404 : vector<8x32xf32>
    %cst_252 = arith.constant 0.000000e+00 : f32
    %419 = vector.broadcast %cst_252 : f32 to vector<8x32xf32>
    %420 = arith.subf %419, %398 : vector<8x32xf32>
    %421 = arith.mulf %420, %398 : vector<8x32xf32>
    %422 = math.exp %421 : vector<8x32xf32>
    %423 = arith.mulf %418, %422 : vector<8x32xf32>
    %cst_253 = arith.constant 1.000000e+00 : f32
    %424 = vector.broadcast %cst_253 : f32 to vector<8x32xf32>
    %425 = arith.subf %424, %423 : vector<8x32xf32>
    %cst_254 = arith.constant 0.000000e+00 : f32
    %426 = vector.broadcast %cst_254 : f32 to vector<8x32xf32>
    %427 = arith.cmpf olt, %397, %426 : vector<8x32xf32>
    %cst_255 = arith.constant 0.000000e+00 : f32
    %428 = vector.broadcast %cst_255 : f32 to vector<8x32xf32>
    %429 = arith.subf %428, %425 : vector<8x32xf32>
    %430 = arith.select %427, %429, %425 : vector<8x32xi1>, vector<8x32xf32>
    %cst_256 = arith.constant 1.000000e+00 : f32
    %431 = vector.broadcast %cst_256 : f32 to vector<8x32xf32>
    %432 = arith.addf %431, %430 : vector<8x32xf32>
    %433 = arith.mulf %395, %432 : vector<8x32xf32>
    %cst_257 = arith.constant dense<0.000000e+00> : vector<8x20xf32>
    %434 = tpu.matmul %433, %368, %cst_257 {dimension_numbers = #tpu.dot_dimension_numbers<[1], [0], [0], [1], [0, 0, 1, 1], [], []>} : vector<8x32xf32>, vector<32x20xf32>, vector<8x20xf32> -> vector<8x20xf32>
    %435 = arith.addf %358, %434 : vector<8x20xf32>
    %436 = vector.broadcast %370 : vector<1x20xf32> to vector<8x20xf32>
    %437 = arith.addf %435, %436 : vector<8x20xf32>
    %c1_258 = arith.constant 1 : index
    %c0_259 = arith.constant 0 : index
    %c0_260 = arith.constant 0 : index
    %438 = vector.load %arg12[%c1_258, %c0_259, %c0_260] : memref<2x1x20xf32, #tpu.memory_space<vmem>>, vector<1x1x20xf32>
    %439 = vector.shape_cast %438 : vector<1x1x20xf32> to vector<1x20xf32>
    %c1_261 = arith.constant 1 : index
    %c0_262 = arith.constant 0 : index
    %c0_263 = arith.constant 0 : index
    %440 = vector.load %arg13[%c1_261, %c0_262, %c0_263] : memref<2x1x20xf32, #tpu.memory_space<vmem>>, vector<1x1x20xf32>
    %441 = vector.shape_cast %440 : vector<1x1x20xf32> to vector<1x20xf32>
    %cst_264 = arith.constant dense<0.000000e+00> : vector<8xf32>
    %442 = vector.multi_reduction <add>, %437, %cst_264 [1] : vector<8x20xf32> to vector<8xf32>
    %443 = vector.shape_cast %442 : vector<8xf32> to vector<8x1xf32>
    %cst_265 = arith.constant 2.000000e+01 : f32
    %444 = vector.broadcast %cst_265 : f32 to vector<8x1xf32>
    %445 = arith.divf %443, %444 : vector<8x1xf32>
    %446 = vector.broadcast %445 : vector<8x1xf32> to vector<8x20xf32>
    %447 = arith.subf %437, %446 : vector<8x20xf32>
    %448 = arith.mulf %447, %447 : vector<8x20xf32>
    %cst_266 = arith.constant dense<0.000000e+00> : vector<8xf32>
    %449 = vector.multi_reduction <add>, %448, %cst_266 [1] : vector<8x20xf32> to vector<8xf32>
    %450 = vector.shape_cast %449 : vector<8xf32> to vector<8x1xf32>
    %cst_267 = arith.constant 2.000000e+01 : f32
    %451 = vector.broadcast %cst_267 : f32 to vector<8x1xf32>
    %452 = arith.divf %450, %451 : vector<8x1xf32>
    %cst_268 = arith.constant 9.99999996E-13 : f32
    %453 = vector.broadcast %cst_268 : f32 to vector<8x1xf32>
    %454 = arith.addf %452, %453 : vector<8x1xf32>
    %455 = math.rsqrt %454 : vector<8x1xf32>
    %456 = vector.broadcast %455 : vector<8x1xf32> to vector<8x20xf32>
    %457 = arith.mulf %447, %456 : vector<8x20xf32>
    %458 = vector.broadcast %439 : vector<1x20xf32> to vector<8x20xf32>
    %459 = arith.mulf %457, %458 : vector<8x20xf32>
    %460 = vector.broadcast %441 : vector<1x20xf32> to vector<8x20xf32>
    %461 = arith.addf %459, %460 : vector<8x20xf32>
    %cst_269 = arith.constant 0.000000e+00 : f32
    %462 = vector.broadcast %cst_269 : f32 to vector<8x20xf32>
    %c4 = arith.constant 4 : index
    %c0_270 = arith.constant 0 : index
    %c0_271 = arith.constant 0 : index
    %463 = vector.load %arg14[%c4, %c0_270, %c0_271] : memref<8x20x5xf32, #tpu.memory_space<vmem>>, vector<1x20x5xf32>
    %464 = vector.shape_cast %463 : vector<1x20x5xf32> to vector<20x5xf32>
    %cst_272 = arith.constant dense<0.000000e+00> : vector<8x5xf32>
    %465 = tpu.matmul %461, %464, %cst_272 {dimension_numbers = #tpu.dot_dimension_numbers<[1], [0], [0], [1], [0, 0, 1, 1], [], []>} : vector<8x20xf32>, vector<20x5xf32>, vector<8x5xf32> -> vector<8x5xf32>
    %c4_273 = arith.constant 4 : index
    %c0_274 = arith.constant 0 : index
    %c0_275 = arith.constant 0 : index
    %466 = vector.load %arg15[%c4_273, %c0_274, %c0_275] : memref<8x1x5xf32, #tpu.memory_space<vmem>>, vector<1x1x5xf32>
    %467 = vector.shape_cast %466 : vector<1x1x5xf32> to vector<1x5xf32>
    %468 = vector.broadcast %467 : vector<1x5xf32> to vector<8x5xf32>
    %469 = arith.addf %465, %468 : vector<8x5xf32>
    %cst_276 = arith.constant 0.44721359 : f32
    %470 = vector.broadcast %cst_276 : f32 to vector<8x5xf32>
    %471 = arith.mulf %469, %470 : vector<8x5xf32>
    %c4_277 = arith.constant 4 : index
    %c0_278 = arith.constant 0 : index
    %c0_279 = arith.constant 0 : index
    %472 = vector.load %arg16[%c4_277, %c0_278, %c0_279] : memref<8x20x5xf32, #tpu.memory_space<vmem>>, vector<1x20x5xf32>
    %473 = vector.shape_cast %472 : vector<1x20x5xf32> to vector<20x5xf32>
    %cst_280 = arith.constant dense<0.000000e+00> : vector<8x5xf32>
    %474 = tpu.matmul %461, %473, %cst_280 {dimension_numbers = #tpu.dot_dimension_numbers<[1], [0], [0], [1], [0, 0, 1, 1], [], []>} : vector<8x20xf32>, vector<20x5xf32>, vector<8x5xf32> -> vector<8x5xf32>
    %c4_281 = arith.constant 4 : index
    %c0_282 = arith.constant 0 : index
    %c0_283 = arith.constant 0 : index
    %475 = vector.load %arg17[%c4_281, %c0_282, %c0_283] : memref<8x1x5xf32, #tpu.memory_space<vmem>>, vector<1x1x5xf32>
    %476 = vector.shape_cast %475 : vector<1x1x5xf32> to vector<1x5xf32>
    %477 = vector.broadcast %476 : vector<1x5xf32> to vector<8x5xf32>
    %478 = arith.addf %474, %477 : vector<8x5xf32>
    %c4_284 = arith.constant 4 : index
    %c0_285 = arith.constant 0 : index
    %c0_286 = arith.constant 0 : index
    %479 = vector.load %arg18[%c4_284, %c0_285, %c0_286] : memref<8x20x5xf32, #tpu.memory_space<vmem>>, vector<1x20x5xf32>
    %480 = vector.shape_cast %479 : vector<1x20x5xf32> to vector<20x5xf32>
    %cst_287 = arith.constant dense<0.000000e+00> : vector<8x5xf32>
    %481 = tpu.matmul %461, %480, %cst_287 {dimension_numbers = #tpu.dot_dimension_numbers<[1], [0], [0], [1], [0, 0, 1, 1], [], []>} : vector<8x20xf32>, vector<20x5xf32>, vector<8x5xf32> -> vector<8x5xf32>
    %c4_288 = arith.constant 4 : index
    %c0_289 = arith.constant 0 : index
    %c0_290 = arith.constant 0 : index
    %482 = vector.load %arg19[%c4_288, %c0_289, %c0_290] : memref<8x1x5xf32, #tpu.memory_space<vmem>>, vector<1x1x5xf32>
    %483 = vector.shape_cast %482 : vector<1x1x5xf32> to vector<1x5xf32>
    %484 = vector.broadcast %483 : vector<1x5xf32> to vector<8x5xf32>
    %485 = arith.addf %481, %484 : vector<8x5xf32>
    %cst_291 = arith.constant dense<0.000000e+00> : vector<8x8xf32>
    %486 = tpu.matmul %471, %478, %cst_291 {dimension_numbers = #tpu.dot_dimension_numbers<[1], [1], [0], [0], [0, 0, 1, 0], [], []>} : vector<8x5xf32>, vector<8x5xf32>, vector<8x8xf32> -> vector<8x8xf32>
    %487 = vector.broadcast %3 : vector<1x8xf32> to vector<8x8xf32>
    %488 = arith.addf %486, %487 : vector<8x8xf32>
    %cst_292 = arith.constant dense<0xFF800000> : vector<8xf32>
    %489 = vector.multi_reduction <maximumf>, %488, %cst_292 [1] : vector<8x8xf32> to vector<8xf32>
    %490 = vector.shape_cast %489 : vector<8xf32> to vector<8x1xf32>
    %491 = vector.broadcast %490 : vector<8x1xf32> to vector<8x8xf32>
    %492 = arith.subf %488, %491 : vector<8x8xf32>
    %493 = math.exp %492 : vector<8x8xf32>
    %cst_293 = arith.constant dense<0.000000e+00> : vector<8xf32>
    %494 = vector.multi_reduction <add>, %493, %cst_293 [1] : vector<8x8xf32> to vector<8xf32>
    %495 = vector.shape_cast %494 : vector<8xf32> to vector<8x1xf32>
    %496 = tpu.reciprocal %495 {approx = true} : vector<8x1xf32> -> vector<8x1xf32>
    %497 = vector.broadcast %496 : vector<8x1xf32> to vector<8x8xf32>
    %498 = arith.mulf %493, %497 : vector<8x8xf32>
    %cst_294 = arith.constant dense<0.000000e+00> : vector<8x5xf32>
    %499 = tpu.matmul %498, %485, %cst_294 {dimension_numbers = #tpu.dot_dimension_numbers<[1], [0], [0], [1], [0, 0, 1, 1], [], []>} : vector<8x8xf32>, vector<8x5xf32>, vector<8x5xf32> -> vector<8x5xf32>
    %c4_295 = arith.constant 4 : index
    %c0_296 = arith.constant 0 : index
    %c0_297 = arith.constant 0 : index
    %500 = vector.load %arg20[%c4_295, %c0_296, %c0_297] : memref<8x5x20xf32, #tpu.memory_space<vmem>>, vector<1x5x20xf32>
    %501 = vector.shape_cast %500 : vector<1x5x20xf32> to vector<5x20xf32>
    %cst_298 = arith.constant dense<0.000000e+00> : vector<8x20xf32>
    %502 = tpu.matmul %499, %501, %cst_298 {dimension_numbers = #tpu.dot_dimension_numbers<[1], [0], [0], [1], [0, 0, 1, 1], [], []>} : vector<8x5xf32>, vector<5x20xf32>, vector<8x20xf32> -> vector<8x20xf32>
    %503 = arith.addf %462, %502 : vector<8x20xf32>
    %c5 = arith.constant 5 : index
    %c0_299 = arith.constant 0 : index
    %c0_300 = arith.constant 0 : index
    %504 = vector.load %arg14[%c5, %c0_299, %c0_300] : memref<8x20x5xf32, #tpu.memory_space<vmem>>, vector<1x20x5xf32>
    %505 = vector.shape_cast %504 : vector<1x20x5xf32> to vector<20x5xf32>
    %cst_301 = arith.constant dense<0.000000e+00> : vector<8x5xf32>
    %506 = tpu.matmul %461, %505, %cst_301 {dimension_numbers = #tpu.dot_dimension_numbers<[1], [0], [0], [1], [0, 0, 1, 1], [], []>} : vector<8x20xf32>, vector<20x5xf32>, vector<8x5xf32> -> vector<8x5xf32>
    %c5_302 = arith.constant 5 : index
    %c0_303 = arith.constant 0 : index
    %c0_304 = arith.constant 0 : index
    %507 = vector.load %arg15[%c5_302, %c0_303, %c0_304] : memref<8x1x5xf32, #tpu.memory_space<vmem>>, vector<1x1x5xf32>
    %508 = vector.shape_cast %507 : vector<1x1x5xf32> to vector<1x5xf32>
    %509 = vector.broadcast %508 : vector<1x5xf32> to vector<8x5xf32>
    %510 = arith.addf %506, %509 : vector<8x5xf32>
    %cst_305 = arith.constant 0.44721359 : f32
    %511 = vector.broadcast %cst_305 : f32 to vector<8x5xf32>
    %512 = arith.mulf %510, %511 : vector<8x5xf32>
    %c5_306 = arith.constant 5 : index
    %c0_307 = arith.constant 0 : index
    %c0_308 = arith.constant 0 : index
    %513 = vector.load %arg16[%c5_306, %c0_307, %c0_308] : memref<8x20x5xf32, #tpu.memory_space<vmem>>, vector<1x20x5xf32>
    %514 = vector.shape_cast %513 : vector<1x20x5xf32> to vector<20x5xf32>
    %cst_309 = arith.constant dense<0.000000e+00> : vector<8x5xf32>
    %515 = tpu.matmul %461, %514, %cst_309 {dimension_numbers = #tpu.dot_dimension_numbers<[1], [0], [0], [1], [0, 0, 1, 1], [], []>} : vector<8x20xf32>, vector<20x5xf32>, vector<8x5xf32> -> vector<8x5xf32>
    %c5_310 = arith.constant 5 : index
    %c0_311 = arith.constant 0 : index
    %c0_312 = arith.constant 0 : index
    %516 = vector.load %arg17[%c5_310, %c0_311, %c0_312] : memref<8x1x5xf32, #tpu.memory_space<vmem>>, vector<1x1x5xf32>
    %517 = vector.shape_cast %516 : vector<1x1x5xf32> to vector<1x5xf32>
    %518 = vector.broadcast %517 : vector<1x5xf32> to vector<8x5xf32>
    %519 = arith.addf %515, %518 : vector<8x5xf32>
    %c5_313 = arith.constant 5 : index
    %c0_314 = arith.constant 0 : index
    %c0_315 = arith.constant 0 : index
    %520 = vector.load %arg18[%c5_313, %c0_314, %c0_315] : memref<8x20x5xf32, #tpu.memory_space<vmem>>, vector<1x20x5xf32>
    %521 = vector.shape_cast %520 : vector<1x20x5xf32> to vector<20x5xf32>
    %cst_316 = arith.constant dense<0.000000e+00> : vector<8x5xf32>
    %522 = tpu.matmul %461, %521, %cst_316 {dimension_numbers = #tpu.dot_dimension_numbers<[1], [0], [0], [1], [0, 0, 1, 1], [], []>} : vector<8x20xf32>, vector<20x5xf32>, vector<8x5xf32> -> vector<8x5xf32>
    %c5_317 = arith.constant 5 : index
    %c0_318 = arith.constant 0 : index
    %c0_319 = arith.constant 0 : index
    %523 = vector.load %arg19[%c5_317, %c0_318, %c0_319] : memref<8x1x5xf32, #tpu.memory_space<vmem>>, vector<1x1x5xf32>
    %524 = vector.shape_cast %523 : vector<1x1x5xf32> to vector<1x5xf32>
    %525 = vector.broadcast %524 : vector<1x5xf32> to vector<8x5xf32>
    %526 = arith.addf %522, %525 : vector<8x5xf32>
    %cst_320 = arith.constant dense<0.000000e+00> : vector<8x8xf32>
    %527 = tpu.matmul %512, %519, %cst_320 {dimension_numbers = #tpu.dot_dimension_numbers<[1], [1], [0], [0], [0, 0, 1, 0], [], []>} : vector<8x5xf32>, vector<8x5xf32>, vector<8x8xf32> -> vector<8x8xf32>
    %528 = vector.broadcast %3 : vector<1x8xf32> to vector<8x8xf32>
    %529 = arith.addf %527, %528 : vector<8x8xf32>
    %cst_321 = arith.constant dense<0xFF800000> : vector<8xf32>
    %530 = vector.multi_reduction <maximumf>, %529, %cst_321 [1] : vector<8x8xf32> to vector<8xf32>
    %531 = vector.shape_cast %530 : vector<8xf32> to vector<8x1xf32>
    %532 = vector.broadcast %531 : vector<8x1xf32> to vector<8x8xf32>
    %533 = arith.subf %529, %532 : vector<8x8xf32>
    %534 = math.exp %533 : vector<8x8xf32>
    %cst_322 = arith.constant dense<0.000000e+00> : vector<8xf32>
    %535 = vector.multi_reduction <add>, %534, %cst_322 [1] : vector<8x8xf32> to vector<8xf32>
    %536 = vector.shape_cast %535 : vector<8xf32> to vector<8x1xf32>
    %537 = tpu.reciprocal %536 {approx = true} : vector<8x1xf32> -> vector<8x1xf32>
    %538 = vector.broadcast %537 : vector<8x1xf32> to vector<8x8xf32>
    %539 = arith.mulf %534, %538 : vector<8x8xf32>
    %cst_323 = arith.constant dense<0.000000e+00> : vector<8x5xf32>
    %540 = tpu.matmul %539, %526, %cst_323 {dimension_numbers = #tpu.dot_dimension_numbers<[1], [0], [0], [1], [0, 0, 1, 1], [], []>} : vector<8x8xf32>, vector<8x5xf32>, vector<8x5xf32> -> vector<8x5xf32>
    %c5_324 = arith.constant 5 : index
    %c0_325 = arith.constant 0 : index
    %c0_326 = arith.constant 0 : index
    %541 = vector.load %arg20[%c5_324, %c0_325, %c0_326] : memref<8x5x20xf32, #tpu.memory_space<vmem>>, vector<1x5x20xf32>
    %542 = vector.shape_cast %541 : vector<1x5x20xf32> to vector<5x20xf32>
    %cst_327 = arith.constant dense<0.000000e+00> : vector<8x20xf32>
    %543 = tpu.matmul %540, %542, %cst_327 {dimension_numbers = #tpu.dot_dimension_numbers<[1], [0], [0], [1], [0, 0, 1, 1], [], []>} : vector<8x5xf32>, vector<5x20xf32>, vector<8x20xf32> -> vector<8x20xf32>
    %544 = arith.addf %503, %543 : vector<8x20xf32>
    %c6 = arith.constant 6 : index
    %c0_328 = arith.constant 0 : index
    %c0_329 = arith.constant 0 : index
    %545 = vector.load %arg14[%c6, %c0_328, %c0_329] : memref<8x20x5xf32, #tpu.memory_space<vmem>>, vector<1x20x5xf32>
    %546 = vector.shape_cast %545 : vector<1x20x5xf32> to vector<20x5xf32>
    %cst_330 = arith.constant dense<0.000000e+00> : vector<8x5xf32>
    %547 = tpu.matmul %461, %546, %cst_330 {dimension_numbers = #tpu.dot_dimension_numbers<[1], [0], [0], [1], [0, 0, 1, 1], [], []>} : vector<8x20xf32>, vector<20x5xf32>, vector<8x5xf32> -> vector<8x5xf32>
    %c6_331 = arith.constant 6 : index
    %c0_332 = arith.constant 0 : index
    %c0_333 = arith.constant 0 : index
    %548 = vector.load %arg15[%c6_331, %c0_332, %c0_333] : memref<8x1x5xf32, #tpu.memory_space<vmem>>, vector<1x1x5xf32>
    %549 = vector.shape_cast %548 : vector<1x1x5xf32> to vector<1x5xf32>
    %550 = vector.broadcast %549 : vector<1x5xf32> to vector<8x5xf32>
    %551 = arith.addf %547, %550 : vector<8x5xf32>
    %cst_334 = arith.constant 0.44721359 : f32
    %552 = vector.broadcast %cst_334 : f32 to vector<8x5xf32>
    %553 = arith.mulf %551, %552 : vector<8x5xf32>
    %c6_335 = arith.constant 6 : index
    %c0_336 = arith.constant 0 : index
    %c0_337 = arith.constant 0 : index
    %554 = vector.load %arg16[%c6_335, %c0_336, %c0_337] : memref<8x20x5xf32, #tpu.memory_space<vmem>>, vector<1x20x5xf32>
    %555 = vector.shape_cast %554 : vector<1x20x5xf32> to vector<20x5xf32>
    %cst_338 = arith.constant dense<0.000000e+00> : vector<8x5xf32>
    %556 = tpu.matmul %461, %555, %cst_338 {dimension_numbers = #tpu.dot_dimension_numbers<[1], [0], [0], [1], [0, 0, 1, 1], [], []>} : vector<8x20xf32>, vector<20x5xf32>, vector<8x5xf32> -> vector<8x5xf32>
    %c6_339 = arith.constant 6 : index
    %c0_340 = arith.constant 0 : index
    %c0_341 = arith.constant 0 : index
    %557 = vector.load %arg17[%c6_339, %c0_340, %c0_341] : memref<8x1x5xf32, #tpu.memory_space<vmem>>, vector<1x1x5xf32>
    %558 = vector.shape_cast %557 : vector<1x1x5xf32> to vector<1x5xf32>
    %559 = vector.broadcast %558 : vector<1x5xf32> to vector<8x5xf32>
    %560 = arith.addf %556, %559 : vector<8x5xf32>
    %c6_342 = arith.constant 6 : index
    %c0_343 = arith.constant 0 : index
    %c0_344 = arith.constant 0 : index
    %561 = vector.load %arg18[%c6_342, %c0_343, %c0_344] : memref<8x20x5xf32, #tpu.memory_space<vmem>>, vector<1x20x5xf32>
    %562 = vector.shape_cast %561 : vector<1x20x5xf32> to vector<20x5xf32>
    %cst_345 = arith.constant dense<0.000000e+00> : vector<8x5xf32>
    %563 = tpu.matmul %461, %562, %cst_345 {dimension_numbers = #tpu.dot_dimension_numbers<[1], [0], [0], [1], [0, 0, 1, 1], [], []>} : vector<8x20xf32>, vector<20x5xf32>, vector<8x5xf32> -> vector<8x5xf32>
    %c6_346 = arith.constant 6 : index
    %c0_347 = arith.constant 0 : index
    %c0_348 = arith.constant 0 : index
    %564 = vector.load %arg19[%c6_346, %c0_347, %c0_348] : memref<8x1x5xf32, #tpu.memory_space<vmem>>, vector<1x1x5xf32>
    %565 = vector.shape_cast %564 : vector<1x1x5xf32> to vector<1x5xf32>
    %566 = vector.broadcast %565 : vector<1x5xf32> to vector<8x5xf32>
    %567 = arith.addf %563, %566 : vector<8x5xf32>
    %cst_349 = arith.constant dense<0.000000e+00> : vector<8x8xf32>
    %568 = tpu.matmul %553, %560, %cst_349 {dimension_numbers = #tpu.dot_dimension_numbers<[1], [1], [0], [0], [0, 0, 1, 0], [], []>} : vector<8x5xf32>, vector<8x5xf32>, vector<8x8xf32> -> vector<8x8xf32>
    %569 = vector.broadcast %3 : vector<1x8xf32> to vector<8x8xf32>
    %570 = arith.addf %568, %569 : vector<8x8xf32>
    %cst_350 = arith.constant dense<0xFF800000> : vector<8xf32>
    %571 = vector.multi_reduction <maximumf>, %570, %cst_350 [1] : vector<8x8xf32> to vector<8xf32>
    %572 = vector.shape_cast %571 : vector<8xf32> to vector<8x1xf32>
    %573 = vector.broadcast %572 : vector<8x1xf32> to vector<8x8xf32>
    %574 = arith.subf %570, %573 : vector<8x8xf32>
    %575 = math.exp %574 : vector<8x8xf32>
    %cst_351 = arith.constant dense<0.000000e+00> : vector<8xf32>
    %576 = vector.multi_reduction <add>, %575, %cst_351 [1] : vector<8x8xf32> to vector<8xf32>
    %577 = vector.shape_cast %576 : vector<8xf32> to vector<8x1xf32>
    %578 = tpu.reciprocal %577 {approx = true} : vector<8x1xf32> -> vector<8x1xf32>
    %579 = vector.broadcast %578 : vector<8x1xf32> to vector<8x8xf32>
    %580 = arith.mulf %575, %579 : vector<8x8xf32>
    %cst_352 = arith.constant dense<0.000000e+00> : vector<8x5xf32>
    %581 = tpu.matmul %580, %567, %cst_352 {dimension_numbers = #tpu.dot_dimension_numbers<[1], [0], [0], [1], [0, 0, 1, 1], [], []>} : vector<8x8xf32>, vector<8x5xf32>, vector<8x5xf32> -> vector<8x5xf32>
    %c6_353 = arith.constant 6 : index
    %c0_354 = arith.constant 0 : index
    %c0_355 = arith.constant 0 : index
    %582 = vector.load %arg20[%c6_353, %c0_354, %c0_355] : memref<8x5x20xf32, #tpu.memory_space<vmem>>, vector<1x5x20xf32>
    %583 = vector.shape_cast %582 : vector<1x5x20xf32> to vector<5x20xf32>
    %cst_356 = arith.constant dense<0.000000e+00> : vector<8x20xf32>
    %584 = tpu.matmul %581, %583, %cst_356 {dimension_numbers = #tpu.dot_dimension_numbers<[1], [0], [0], [1], [0, 0, 1, 1], [], []>} : vector<8x5xf32>, vector<5x20xf32>, vector<8x20xf32> -> vector<8x20xf32>
    %585 = arith.addf %544, %584 : vector<8x20xf32>
    %c7 = arith.constant 7 : index
    %c0_357 = arith.constant 0 : index
    %c0_358 = arith.constant 0 : index
    %586 = vector.load %arg14[%c7, %c0_357, %c0_358] : memref<8x20x5xf32, #tpu.memory_space<vmem>>, vector<1x20x5xf32>
    %587 = vector.shape_cast %586 : vector<1x20x5xf32> to vector<20x5xf32>
    %cst_359 = arith.constant dense<0.000000e+00> : vector<8x5xf32>
    %588 = tpu.matmul %461, %587, %cst_359 {dimension_numbers = #tpu.dot_dimension_numbers<[1], [0], [0], [1], [0, 0, 1, 1], [], []>} : vector<8x20xf32>, vector<20x5xf32>, vector<8x5xf32> -> vector<8x5xf32>
    %c7_360 = arith.constant 7 : index
    %c0_361 = arith.constant 0 : index
    %c0_362 = arith.constant 0 : index
    %589 = vector.load %arg15[%c7_360, %c0_361, %c0_362] : memref<8x1x5xf32, #tpu.memory_space<vmem>>, vector<1x1x5xf32>
    %590 = vector.shape_cast %589 : vector<1x1x5xf32> to vector<1x5xf32>
    %591 = vector.broadcast %590 : vector<1x5xf32> to vector<8x5xf32>
    %592 = arith.addf %588, %591 : vector<8x5xf32>
    %cst_363 = arith.constant 0.44721359 : f32
    %593 = vector.broadcast %cst_363 : f32 to vector<8x5xf32>
    %594 = arith.mulf %592, %593 : vector<8x5xf32>
    %c7_364 = arith.constant 7 : index
    %c0_365 = arith.constant 0 : index
    %c0_366 = arith.constant 0 : index
    %595 = vector.load %arg16[%c7_364, %c0_365, %c0_366] : memref<8x20x5xf32, #tpu.memory_space<vmem>>, vector<1x20x5xf32>
    %596 = vector.shape_cast %595 : vector<1x20x5xf32> to vector<20x5xf32>
    %cst_367 = arith.constant dense<0.000000e+00> : vector<8x5xf32>
    %597 = tpu.matmul %461, %596, %cst_367 {dimension_numbers = #tpu.dot_dimension_numbers<[1], [0], [0], [1], [0, 0, 1, 1], [], []>} : vector<8x20xf32>, vector<20x5xf32>, vector<8x5xf32> -> vector<8x5xf32>
    %c7_368 = arith.constant 7 : index
    %c0_369 = arith.constant 0 : index
    %c0_370 = arith.constant 0 : index
    %598 = vector.load %arg17[%c7_368, %c0_369, %c0_370] : memref<8x1x5xf32, #tpu.memory_space<vmem>>, vector<1x1x5xf32>
    %599 = vector.shape_cast %598 : vector<1x1x5xf32> to vector<1x5xf32>
    %600 = vector.broadcast %599 : vector<1x5xf32> to vector<8x5xf32>
    %601 = arith.addf %597, %600 : vector<8x5xf32>
    %c7_371 = arith.constant 7 : index
    %c0_372 = arith.constant 0 : index
    %c0_373 = arith.constant 0 : index
    %602 = vector.load %arg18[%c7_371, %c0_372, %c0_373] : memref<8x20x5xf32, #tpu.memory_space<vmem>>, vector<1x20x5xf32>
    %603 = vector.shape_cast %602 : vector<1x20x5xf32> to vector<20x5xf32>
    %cst_374 = arith.constant dense<0.000000e+00> : vector<8x5xf32>
    %604 = tpu.matmul %461, %603, %cst_374 {dimension_numbers = #tpu.dot_dimension_numbers<[1], [0], [0], [1], [0, 0, 1, 1], [], []>} : vector<8x20xf32>, vector<20x5xf32>, vector<8x5xf32> -> vector<8x5xf32>
    %c7_375 = arith.constant 7 : index
    %c0_376 = arith.constant 0 : index
    %c0_377 = arith.constant 0 : index
    %605 = vector.load %arg19[%c7_375, %c0_376, %c0_377] : memref<8x1x5xf32, #tpu.memory_space<vmem>>, vector<1x1x5xf32>
    %606 = vector.shape_cast %605 : vector<1x1x5xf32> to vector<1x5xf32>
    %607 = vector.broadcast %606 : vector<1x5xf32> to vector<8x5xf32>
    %608 = arith.addf %604, %607 : vector<8x5xf32>
    %cst_378 = arith.constant dense<0.000000e+00> : vector<8x8xf32>
    %609 = tpu.matmul %594, %601, %cst_378 {dimension_numbers = #tpu.dot_dimension_numbers<[1], [1], [0], [0], [0, 0, 1, 0], [], []>} : vector<8x5xf32>, vector<8x5xf32>, vector<8x8xf32> -> vector<8x8xf32>
    %610 = vector.broadcast %3 : vector<1x8xf32> to vector<8x8xf32>
    %611 = arith.addf %609, %610 : vector<8x8xf32>
    %cst_379 = arith.constant dense<0xFF800000> : vector<8xf32>
    %612 = vector.multi_reduction <maximumf>, %611, %cst_379 [1] : vector<8x8xf32> to vector<8xf32>
    %613 = vector.shape_cast %612 : vector<8xf32> to vector<8x1xf32>
    %614 = vector.broadcast %613 : vector<8x1xf32> to vector<8x8xf32>
    %615 = arith.subf %611, %614 : vector<8x8xf32>
    %616 = math.exp %615 : vector<8x8xf32>
    %cst_380 = arith.constant dense<0.000000e+00> : vector<8xf32>
    %617 = vector.multi_reduction <add>, %616, %cst_380 [1] : vector<8x8xf32> to vector<8xf32>
    %618 = vector.shape_cast %617 : vector<8xf32> to vector<8x1xf32>
    %619 = tpu.reciprocal %618 {approx = true} : vector<8x1xf32> -> vector<8x1xf32>
    %620 = vector.broadcast %619 : vector<8x1xf32> to vector<8x8xf32>
    %621 = arith.mulf %616, %620 : vector<8x8xf32>
    %cst_381 = arith.constant dense<0.000000e+00> : vector<8x5xf32>
    %622 = tpu.matmul %621, %608, %cst_381 {dimension_numbers = #tpu.dot_dimension_numbers<[1], [0], [0], [1], [0, 0, 1, 1], [], []>} : vector<8x8xf32>, vector<8x5xf32>, vector<8x5xf32> -> vector<8x5xf32>
    %c7_382 = arith.constant 7 : index
    %c0_383 = arith.constant 0 : index
    %c0_384 = arith.constant 0 : index
    %623 = vector.load %arg20[%c7_382, %c0_383, %c0_384] : memref<8x5x20xf32, #tpu.memory_space<vmem>>, vector<1x5x20xf32>
    %624 = vector.shape_cast %623 : vector<1x5x20xf32> to vector<5x20xf32>
    %cst_385 = arith.constant dense<0.000000e+00> : vector<8x20xf32>
    %625 = tpu.matmul %622, %624, %cst_385 {dimension_numbers = #tpu.dot_dimension_numbers<[1], [0], [0], [1], [0, 0, 1, 1], [], []>} : vector<8x5xf32>, vector<5x20xf32>, vector<8x20xf32> -> vector<8x20xf32>
    %626 = arith.addf %585, %625 : vector<8x20xf32>
    %627 = arith.addf %437, %626 : vector<8x20xf32>
    %c1_386 = arith.constant 1 : index
    %c0_387 = arith.constant 0 : index
    %c0_388 = arith.constant 0 : index
    %628 = vector.load %arg21[%c1_386, %c0_387, %c0_388] : memref<2x1x20xf32, #tpu.memory_space<vmem>>, vector<1x1x20xf32>
    %629 = vector.shape_cast %628 : vector<1x1x20xf32> to vector<1x20xf32>
    %630 = vector.broadcast %629 : vector<1x20xf32> to vector<8x20xf32>
    %631 = arith.addf %627, %630 : vector<8x20xf32>
    %c1_389 = arith.constant 1 : index
    %c0_390 = arith.constant 0 : index
    %c0_391 = arith.constant 0 : index
    %632 = vector.load %arg22[%c1_389, %c0_390, %c0_391] : memref<2x1x20xf32, #tpu.memory_space<vmem>>, vector<1x1x20xf32>
    %633 = vector.shape_cast %632 : vector<1x1x20xf32> to vector<1x20xf32>
    %c1_392 = arith.constant 1 : index
    %c0_393 = arith.constant 0 : index
    %c0_394 = arith.constant 0 : index
    %634 = vector.load %arg23[%c1_392, %c0_393, %c0_394] : memref<2x1x20xf32, #tpu.memory_space<vmem>>, vector<1x1x20xf32>
    %635 = vector.shape_cast %634 : vector<1x1x20xf32> to vector<1x20xf32>
    %c1_395 = arith.constant 1 : index
    %c0_396 = arith.constant 0 : index
    %c0_397 = arith.constant 0 : index
    %636 = vector.load %arg24[%c1_395, %c0_396, %c0_397] : memref<2x20x32xf32, #tpu.memory_space<vmem>>, vector<1x20x32xf32>
    %637 = vector.shape_cast %636 : vector<1x20x32xf32> to vector<20x32xf32>
    %c1_398 = arith.constant 1 : index
    %c0_399 = arith.constant 0 : index
    %c0_400 = arith.constant 0 : index
    %638 = vector.load %arg25[%c1_398, %c0_399, %c0_400] : memref<2x1x32xf32, #tpu.memory_space<vmem>>, vector<1x1x32xf32>
    %639 = vector.shape_cast %638 : vector<1x1x32xf32> to vector<1x32xf32>
    %c1_401 = arith.constant 1 : index
    %c0_402 = arith.constant 0 : index
    %c0_403 = arith.constant 0 : index
    %640 = vector.load %arg26[%c1_401, %c0_402, %c0_403] : memref<2x32x20xf32, #tpu.memory_space<vmem>>, vector<1x32x20xf32>
    %641 = vector.shape_cast %640 : vector<1x32x20xf32> to vector<32x20xf32>
    %c1_404 = arith.constant 1 : index
    %c0_405 = arith.constant 0 : index
    %c0_406 = arith.constant 0 : index
    %642 = vector.load %arg27[%c1_404, %c0_405, %c0_406] : memref<2x1x20xf32, #tpu.memory_space<vmem>>, vector<1x1x20xf32>
    %643 = vector.shape_cast %642 : vector<1x1x20xf32> to vector<1x20xf32>
    %cst_407 = arith.constant dense<0.000000e+00> : vector<8xf32>
    %644 = vector.multi_reduction <add>, %631, %cst_407 [1] : vector<8x20xf32> to vector<8xf32>
    %645 = vector.shape_cast %644 : vector<8xf32> to vector<8x1xf32>
    %cst_408 = arith.constant 2.000000e+01 : f32
    %646 = vector.broadcast %cst_408 : f32 to vector<8x1xf32>
    %647 = arith.divf %645, %646 : vector<8x1xf32>
    %648 = vector.broadcast %647 : vector<8x1xf32> to vector<8x20xf32>
    %649 = arith.subf %631, %648 : vector<8x20xf32>
    %650 = arith.mulf %649, %649 : vector<8x20xf32>
    %cst_409 = arith.constant dense<0.000000e+00> : vector<8xf32>
    %651 = vector.multi_reduction <add>, %650, %cst_409 [1] : vector<8x20xf32> to vector<8xf32>
    %652 = vector.shape_cast %651 : vector<8xf32> to vector<8x1xf32>
    %cst_410 = arith.constant 2.000000e+01 : f32
    %653 = vector.broadcast %cst_410 : f32 to vector<8x1xf32>
    %654 = arith.divf %652, %653 : vector<8x1xf32>
    %cst_411 = arith.constant 9.99999996E-13 : f32
    %655 = vector.broadcast %cst_411 : f32 to vector<8x1xf32>
    %656 = arith.addf %654, %655 : vector<8x1xf32>
    %657 = math.rsqrt %656 : vector<8x1xf32>
    %658 = vector.broadcast %657 : vector<8x1xf32> to vector<8x20xf32>
    %659 = arith.mulf %649, %658 : vector<8x20xf32>
    %660 = vector.broadcast %633 : vector<1x20xf32> to vector<8x20xf32>
    %661 = arith.mulf %659, %660 : vector<8x20xf32>
    %662 = vector.broadcast %635 : vector<1x20xf32> to vector<8x20xf32>
    %663 = arith.addf %661, %662 : vector<8x20xf32>
    %cst_412 = arith.constant dense<0.000000e+00> : vector<8x32xf32>
    %664 = tpu.matmul %663, %637, %cst_412 {dimension_numbers = #tpu.dot_dimension_numbers<[1], [0], [0], [1], [0, 0, 1, 1], [], []>} : vector<8x20xf32>, vector<20x32xf32>, vector<8x32xf32> -> vector<8x32xf32>
    %665 = vector.broadcast %639 : vector<1x32xf32> to vector<8x32xf32>
    %666 = arith.addf %664, %665 : vector<8x32xf32>
    %cst_413 = arith.constant 5.000000e-01 : f32
    %667 = vector.broadcast %cst_413 : f32 to vector<8x32xf32>
    %668 = arith.mulf %666, %667 : vector<8x32xf32>
    %cst_414 = arith.constant 0.707106769 : f32
    %669 = vector.broadcast %cst_414 : f32 to vector<8x32xf32>
    %670 = arith.mulf %666, %669 : vector<8x32xf32>
    %671 = math.absf %670 : vector<8x32xf32>
    %cst_415 = arith.constant 0.327591091 : f32
    %672 = vector.broadcast %cst_415 : f32 to vector<8x32xf32>
    %673 = arith.mulf %672, %671 : vector<8x32xf32>
    %cst_416 = arith.constant 1.000000e+00 : f32
    %674 = vector.broadcast %cst_416 : f32 to vector<8x32xf32>
    %675 = arith.addf %674, %673 : vector<8x32xf32>
    %cst_417 = arith.constant 1.000000e+00 : f32
    %676 = vector.broadcast %cst_417 : f32 to vector<8x32xf32>
    %677 = arith.divf %676, %675 : vector<8x32xf32>
    %cst_418 = arith.constant 1.06140542 : f32
    %678 = vector.broadcast %cst_418 : f32 to vector<8x32xf32>
    %679 = arith.mulf %678, %677 : vector<8x32xf32>
    %cst_419 = arith.constant -1.45315206 : f32
    %680 = vector.broadcast %cst_419 : f32 to vector<8x32xf32>
    %681 = arith.addf %679, %680 : vector<8x32xf32>
    %682 = arith.mulf %681, %677 : vector<8x32xf32>
    %cst_420 = arith.constant 1.42141378 : f32
    %683 = vector.broadcast %cst_420 : f32 to vector<8x32xf32>
    %684 = arith.addf %682, %683 : vector<8x32xf32>
    %685 = arith.mulf %684, %677 : vector<8x32xf32>
    %cst_421 = arith.constant -0.284496725 : f32
    %686 = vector.broadcast %cst_421 : f32 to vector<8x32xf32>
    %687 = arith.addf %685, %686 : vector<8x32xf32>
    %688 = arith.mulf %687, %677 : vector<8x32xf32>
    %cst_422 = arith.constant 0.254829586 : f32
    %689 = vector.broadcast %cst_422 : f32 to vector<8x32xf32>
    %690 = arith.addf %688, %689 : vector<8x32xf32>
    %691 = arith.mulf %690, %677 : vector<8x32xf32>
    %cst_423 = arith.constant 0.000000e+00 : f32
    %692 = vector.broadcast %cst_423 : f32 to vector<8x32xf32>
    %693 = arith.subf %692, %671 : vector<8x32xf32>
    %694 = arith.mulf %693, %671 : vector<8x32xf32>
    %695 = math.exp %694 : vector<8x32xf32>
    %696 = arith.mulf %691, %695 : vector<8x32xf32>
    %cst_424 = arith.constant 1.000000e+00 : f32
    %697 = vector.broadcast %cst_424 : f32 to vector<8x32xf32>
    %698 = arith.subf %697, %696 : vector<8x32xf32>
    %cst_425 = arith.constant 0.000000e+00 : f32
    %699 = vector.broadcast %cst_425 : f32 to vector<8x32xf32>
    %700 = arith.cmpf olt, %670, %699 : vector<8x32xf32>
    %cst_426 = arith.constant 0.000000e+00 : f32
    %701 = vector.broadcast %cst_426 : f32 to vector<8x32xf32>
    %702 = arith.subf %701, %698 : vector<8x32xf32>
    %703 = arith.select %700, %702, %698 : vector<8x32xi1>, vector<8x32xf32>
    %cst_427 = arith.constant 1.000000e+00 : f32
    %704 = vector.broadcast %cst_427 : f32 to vector<8x32xf32>
    %705 = arith.addf %704, %703 : vector<8x32xf32>
    %706 = arith.mulf %668, %705 : vector<8x32xf32>
    %cst_428 = arith.constant dense<0.000000e+00> : vector<8x20xf32>
    %707 = tpu.matmul %706, %641, %cst_428 {dimension_numbers = #tpu.dot_dimension_numbers<[1], [0], [0], [1], [0, 0, 1, 1], [], []>} : vector<8x32xf32>, vector<32x20xf32>, vector<8x20xf32> -> vector<8x20xf32>
    %708 = arith.addf %631, %707 : vector<8x20xf32>
    %709 = vector.broadcast %643 : vector<1x20xf32> to vector<8x20xf32>
    %710 = arith.addf %708, %709 : vector<8x20xf32>
    %c0_429 = arith.constant 0 : index
    %c0_430 = arith.constant 0 : index
    %711 = vector.load %arg28[%c0_429, %c0_430] : memref<1x20xf32, #tpu.memory_space<vmem>>, vector<1x20xf32>
    %c0_431 = arith.constant 0 : index
    %c0_432 = arith.constant 0 : index
    %712 = vector.load %arg29[%c0_431, %c0_432] : memref<1x20xf32, #tpu.memory_space<vmem>>, vector<1x20xf32>
    %cst_433 = arith.constant dense<0.000000e+00> : vector<8xf32>
    %713 = vector.multi_reduction <add>, %710, %cst_433 [1] : vector<8x20xf32> to vector<8xf32>
    %714 = vector.shape_cast %713 : vector<8xf32> to vector<8x1xf32>
    %cst_434 = arith.constant 2.000000e+01 : f32
    %715 = vector.broadcast %cst_434 : f32 to vector<8x1xf32>
    %716 = arith.divf %714, %715 : vector<8x1xf32>
    %717 = vector.broadcast %716 : vector<8x1xf32> to vector<8x20xf32>
    %718 = arith.subf %710, %717 : vector<8x20xf32>
    %719 = arith.mulf %718, %718 : vector<8x20xf32>
    %cst_435 = arith.constant dense<0.000000e+00> : vector<8xf32>
    %720 = vector.multi_reduction <add>, %719, %cst_435 [1] : vector<8x20xf32> to vector<8xf32>
    %721 = vector.shape_cast %720 : vector<8xf32> to vector<8x1xf32>
    %cst_436 = arith.constant 2.000000e+01 : f32
    %722 = vector.broadcast %cst_436 : f32 to vector<8x1xf32>
    %723 = arith.divf %721, %722 : vector<8x1xf32>
    %cst_437 = arith.constant 9.99999996E-13 : f32
    %724 = vector.broadcast %cst_437 : f32 to vector<8x1xf32>
    %725 = arith.addf %723, %724 : vector<8x1xf32>
    %726 = math.rsqrt %725 : vector<8x1xf32>
    %727 = vector.broadcast %726 : vector<8x1xf32> to vector<8x20xf32>
    %728 = arith.mulf %718, %727 : vector<8x20xf32>
    %729 = vector.broadcast %711 : vector<1x20xf32> to vector<8x20xf32>
    %730 = arith.mulf %728, %729 : vector<8x20xf32>
    %731 = vector.broadcast %712 : vector<1x20xf32> to vector<8x20xf32>
    %732 = arith.addf %730, %731 : vector<8x20xf32>
    %c0_438 = arith.constant 0 : index
    %c0_439 = arith.constant 0 : index
    %c0_440 = arith.constant 0 : index
    %733 = vector.load %arg30[%c0_438, %c0_439, %c0_440] : memref<1x8x20xf32, #tpu.memory_space<vmem>>, vector<1x8x20xf32>
    %734 = vector.shape_cast %733 : vector<1x8x20xf32> to vector<8x20xf32>
    %735 = vector.shape_cast %732 : vector<8x20xf32> to vector<1x8x20xf32>
    tpu.vector_store %arg30[%c0_438, %c0_439, %c0_440], %735 {strides = array<i32>} : memref<1x8x20xf32, #tpu.memory_space<vmem>>, vector<1x8x20xf32>,
    return
  }
  func.func @transform_0(%arg0: i32) -> (i32, i32, i32) {
    %c0_i32 = arith.constant 0 : i32
    %c0_i32_0 = arith.constant 0 : i32
    %c0_i32_1 = arith.constant 0 : i32
    return %arg0, %c0_i32, %c0_i32_0 : i32, i32, i32
  }
  func.func @transform_1(%arg0: i32) -> (i32, i32, i32) {
    %c0_i32 = arith.constant 0 : i32
    %c0_i32_0 = arith.constant 0 : i32
    %c0_i32_1 = arith.constant 0 : i32
    return %arg0, %c0_i32, %c0_i32_0 : i32, i32, i32
  }
  func.func @transform_2(%arg0: i32) -> (i32, i32, i32) {
    %c0_i32 = arith.constant 0 : i32
    %c0_i32_0 = arith.constant 0 : i32
    %c0_i32_1 = arith.constant 0 : i32
    %c0_i32_2 = arith.constant 0 : i32
    return %c0_i32, %c0_i32_0, %c0_i32_1 : i32, i32, i32
  }
  func.func @transform_3(%arg0: i32) -> (i32, i32, i32) {
    %c0_i32 = arith.constant 0 : i32
    %c0_i32_0 = arith.constant 0 : i32
    %c0_i32_1 = arith.constant 0 : i32
    %c0_i32_2 = arith.constant 0 : i32
    return %c0_i32, %c0_i32_0, %c0_i32_1 : i32, i32, i32
  }
  func.func @transform_4(%arg0: i32) -> (i32, i32, i32) {
    %c0_i32 = arith.constant 0 : i32
    %c0_i32_0 = arith.constant 0 : i32
    %c0_i32_1 = arith.constant 0 : i32
    %c0_i32_2 = arith.constant 0 : i32
    return %c0_i32, %c0_i32_0, %c0_i32_1 : i32, i32, i32
  }
  func.func @transform_5(%arg0: i32) -> (i32, i32, i32) {
    %c0_i32 = arith.constant 0 : i32
    %c0_i32_0 = arith.constant 0 : i32
    %c0_i32_1 = arith.constant 0 : i32
    %c0_i32_2 = arith.constant 0 : i32
    return %c0_i32, %c0_i32_0, %c0_i32_1 : i32, i32, i32
  }
  func.func @transform_6(%arg0: i32) -> (i32, i32) {
    %c0_i32 = arith.constant 0 : i32
    %c0_i32_0 = arith.constant 0 : i32
    %c0_i32_1 = arith.constant 0 : i32
    return %c0_i32, %c0_i32_0 : i32, i32
  }
  func.func @transform_7(%arg0: i32) -> (i32, i32) {
    %c0_i32 = arith.constant 0 : i32
    %c0_i32_0 = arith.constant 0 : i32
    %c0_i32_1 = arith.constant 0 : i32
    return %c0_i32, %c0_i32_0 : i32, i32
  }
  func.func @transform_8(%arg0: i32) -> (i32, i32) {
    %c0_i32 = arith.constant 0 : i32
    %c0_i32_0 = arith.constant 0 : i32
    %c0_i32_1 = arith.constant 0 : i32
    return %c0_i32, %c0_i32_0 : i32, i32
  }
  func.func @transform_9(%arg0: i32) -> (i32, i32) {
    %c0_i32 = arith.constant 0 : i32
    %c0_i32_0 = arith.constant 0 : i32
    %c0_i32_1 = arith.constant 0 : i32
    return %c0_i32, %c0_i32_0 : i32, i32
  }
  func.func @transform_10(%arg0: i32) -> (i32, i32) {
    %c0_i32 = arith.constant 0 : i32
    %c0_i32_0 = arith.constant 0 : i32
    %c0_i32_1 = arith.constant 0 : i32
    return %c0_i32, %c0_i32_0 : i32, i32
  }
  func.func @transform_11(%arg0: i32) -> (i32, i32, i32) {
    %c0_i32 = arith.constant 0 : i32
    %c0_i32_0 = arith.constant 0 : i32
    %c0_i32_1 = arith.constant 0 : i32
    %c0_i32_2 = arith.constant 0 : i32
    return %c0_i32, %c0_i32_0, %c0_i32_1 : i32, i32, i32
  }
  func.func @transform_12(%arg0: i32) -> (i32, i32, i32) {
    %c0_i32 = arith.constant 0 : i32
    %c0_i32_0 = arith.constant 0 : i32
    %c0_i32_1 = arith.constant 0 : i32
    %c0_i32_2 = arith.constant 0 : i32
    return %c0_i32, %c0_i32_0, %c0_i32_1 : i32, i32, i32
  }
  func.func @transform_13(%arg0: i32) -> (i32, i32, i32) {
    %c0_i32 = arith.constant 0 : i32
    %c0_i32_0 = arith.constant 0 : i32
    %c0_i32_1 = arith.constant 0 : i32
    %c0_i32_2 = arith.constant 0 : i32
    return %c0_i32, %c0_i32_0, %c0_i32_1 : i32, i32, i32
  }
  func.func @transform_14(%arg0: i32) -> (i32, i32, i32) {
    %c0_i32 = arith.constant 0 : i32
    %c0_i32_0 = arith.constant 0 : i32
    %c0_i32_1 = arith.constant 0 : i32
    %c0_i32_2 = arith.constant 0 : i32
    return %c0_i32, %c0_i32_0, %c0_i32_1 : i32, i32, i32
  }
  func.func @transform_15(%arg0: i32) -> (i32, i32, i32) {
    %c0_i32 = arith.constant 0 : i32
    %c0_i32_0 = arith.constant 0 : i32
    %c0_i32_1 = arith.constant 0 : i32
    %c0_i32_2 = arith.constant 0 : i32
    return %c0_i32, %c0_i32_0, %c0_i32_1 : i32, i32, i32
  }
  func.func @transform_16(%arg0: i32) -> (i32, i32, i32) {
    %c0_i32 = arith.constant 0 : i32
    %c0_i32_0 = arith.constant 0 : i32
    %c0_i32_1 = arith.constant 0 : i32
    %c0_i32_2 = arith.constant 0 : i32
    return %c0_i32, %c0_i32_0, %c0_i32_1 : i32, i32, i32
  }
  func.func @transform_17(%arg0: i32) -> (i32, i32, i32) {
    %c0_i32 = arith.constant 0 : i32
    %c0_i32_0 = arith.constant 0 : i32
    %c0_i32_1 = arith.constant 0 : i32
    %c0_i32_2 = arith.constant 0 : i32
    return %c0_i32, %c0_i32_0, %c0_i32_1 : i32, i32, i32
  }
  func.func @transform_18(%arg0: i32) -> (i32, i32, i32) {
    %c0_i32 = arith.constant 0 : i32
    %c0_i32_0 = arith.constant 0 : i32
    %c0_i32_1 = arith.constant 0 : i32
    %c0_i32_2 = arith.constant 0 : i32
    return %c0_i32, %c0_i32_0, %c0_i32_1 : i32, i32, i32
  }
  func.func @transform_19(%arg0: i32) -> (i32, i32, i32) {
    %c0_i32 = arith.constant 0 : i32
    %c0_i32_0 = arith.constant 0 : i32
    %c0_i32_1 = arith.constant 0 : i32
    %c0_i32_2 = arith.constant 0 : i32
    return %c0_i32, %c0_i32_0, %c0_i32_1 : i32, i32, i32
  }
  func.func @transform_20(%arg0: i32) -> (i32, i32, i32) {
    %c0_i32 = arith.constant 0 : i32
    %c0_i32_0 = arith.constant 0 : i32
    %c0_i32_1 = arith.constant 0 : i32
    %c0_i32_2 = arith.constant 0 : i32
    return %c0_i32, %c0_i32_0, %c0_i32_1 : i32, i32, i32
  }
  func.func @transform_21(%arg0: i32) -> (i32, i32, i32) {
    %c0_i32 = arith.constant 0 : i32
    %c0_i32_0 = arith.constant 0 : i32
    %c0_i32_1 = arith.constant 0 : i32
    %c0_i32_2 = arith.constant 0 : i32
    return %c0_i32, %c0_i32_0, %c0_i32_1 : i32, i32, i32
  }
  func.func @transform_22(%arg0: i32) -> (i32, i32, i32) {
    %c0_i32 = arith.constant 0 : i32
    %c0_i32_0 = arith.constant 0 : i32
    %c0_i32_1 = arith.constant 0 : i32
    %c0_i32_2 = arith.constant 0 : i32
    return %c0_i32, %c0_i32_0, %c0_i32_1 : i32, i32, i32
  }
  func.func @transform_23(%arg0: i32) -> (i32, i32, i32) {
    %c0_i32 = arith.constant 0 : i32
    %c0_i32_0 = arith.constant 0 : i32
    %c0_i32_1 = arith.constant 0 : i32
    %c0_i32_2 = arith.constant 0 : i32
    return %c0_i32, %c0_i32_0, %c0_i32_1 : i32, i32, i32
  }
  func.func @transform_24(%arg0: i32) -> (i32, i32, i32) {
    %c0_i32 = arith.constant 0 : i32
    %c0_i32_0 = arith.constant 0 : i32
    %c0_i32_1 = arith.constant 0 : i32
    %c0_i32_2 = arith.constant 0 : i32
    return %c0_i32, %c0_i32_0, %c0_i32_1 : i32, i32, i32
  }
  func.func @transform_25(%arg0: i32) -> (i32, i32, i32) {
    %c0_i32 = arith.constant 0 : i32
    %c0_i32_0 = arith.constant 0 : i32
    %c0_i32_1 = arith.constant 0 : i32
    %c0_i32_2 = arith.constant 0 : i32
    return %c0_i32, %c0_i32_0, %c0_i32_1 : i32, i32, i32
  }
  func.func @transform_26(%arg0: i32) -> (i32, i32, i32) {
    %c0_i32 = arith.constant 0 : i32
    %c0_i32_0 = arith.constant 0 : i32
    %c0_i32_1 = arith.constant 0 : i32
    %c0_i32_2 = arith.constant 0 : i32
    return %c0_i32, %c0_i32_0, %c0_i32_1 : i32, i32, i32
  }
  func.func @transform_27(%arg0: i32) -> (i32, i32) {
    %c0_i32 = arith.constant 0 : i32
    %c0_i32_0 = arith.constant 0 : i32
    %c0_i32_1 = arith.constant 0 : i32
    return %c0_i32, %c0_i32_0 : i32, i32
  }
  func.func @transform_28(%arg0: i32) -> (i32, i32) {
    %c0_i32 = arith.constant 0 : i32
    %c0_i32_0 = arith.constant 0 : i32
    %c0_i32_1 = arith.constant 0 : i32
    return %c0_i32, %c0_i32_0 : i32, i32
  }
  func.func @transform_29(%arg0: i32) -> (i32, i32, i32) {
    %c0_i32 = arith.constant 0 : i32
    %c0_i32_0 = arith.constant 0 : i32
    %c0_i32_1 = arith.constant 0 : i32
    return %arg0, %c0_i32, %c0_i32_0 : i32, i32, i32
  }
}

</mosaic_0001>

<bundles_post_ra>
// kernel: _lambda_.9
= control target key start
LH: loop header
LB: loop body
LE: loop exit
PB: predicated region body
PF: predicated region fallthrough
CT: control target
= control target key end

     0   :  { %11 = vsyncpa [#allocation3], 0  ;;  %s989_s0 = inlined_call_operand.vmem [shape: f32[2,8,20], index: 0, kind: input, shape index: {}]   ;;  %s990_s1 = inlined_call_operand.vmem [shape: f32[2,8,20], index: 1, kind: input, shape index: {}]   ;;  %s991_s2 = inlined_call_operand.hbm [shape: f32[4,20,80], index: 2, kind: input, shape index: {}]   ;;  %s992_s3 = inlined_call_operand.vmem [shape: f32[1,80], index: 3, kind: input, shape index: {}]   ;;  %s993_s4 = inlined_call_operand.hbm [shape: f32[80,3], index: 4, kind: input, shape index: {}]   ;;  %s994_s5 = inlined_call_operand.vmem [shape: f32[1,3], index: 5, kind: input, shape index: {}]   ;;  %s995_s6 = inlined_call_operand.hbm [shape: f32[2,1,3], index: 6, kind: output, shape index: {}]  }
   0x1   :  { %12 = vsyncpa [#allocation6], 0 }
   0x2   :  { %13 = vsyncpa [#allocation4], 0 }
   0x3   :  { %15 = vsyncpa [#allocation4 + $0x1], 0  ;;  %s858_s21 = smov 0   ;;  %s860_s22 = smov 0  }
   0x4   :  { %s862_s23 = smov 0   ;;  %s864_s24 = smov 0  }
   0x5 LB: > { %s879_s25 = sadd.s32 4294967295, %s816_s24   ;;  %s600_s26 = sadd.s32 4294967294, %s816_s24   ;;  %s816_s24 = sphi %s864_s24, %s1002_s24   ;;  %s812_s23 = sphi %s862_s23, %s1001_s23   ;;  %s808_s22 = sphi %s860_s22, %s1000_s22   ;;  %s804_s21 = sphi %s858_s21, %s999_s21  }
   0x6   : > { %s883_s27 = sadd.s32 1, %s816_s24   ;;  %s164_s28 = sadd.s32 1, %s812_s23 }
   0x7   : > { %s161_s29 = ssub.s32 %s816_s24, %s883_s27  ;;  %p174_p0 = scmp.ne.s32.totalorder %s812_s23, %s808_s22 }
   0x8   : > { %p162_p1 = scmp.eq.s32.totalorder %s161_s29, 0  ;;  %p175_p2 = scmp.eq.s32.totalorder %s879_s25, 1 }
   0x9   : > { %p180_p3 = scmp.ne.s32.totalorder %s808_s22, %s804_s21  ;;  %p181_p4 = scmp.eq.s32.totalorder %s600_s26, 1 }
   0xa   : > { %s894_s30 = scalar_select %p162_p1, %s812_s23, %s164_s28  }
   0xb   : > { %p896_p5 = por %p175_p2, %p174_p0  ;;  %p900_p6 = por %p181_p4, %p180_p3 }
   0xc   : > { %p601_p7 = scmp.ge.s32.totalorder %s816_s24, 1  ;;  %p188_p8 = scmp.lt.s32.totalorder %s816_s24, 3 }
   0xd   : > { %p642_p9 = scmp.eq.s32.totalorder %s879_s25, 0  ;;  %s199_s12 = sshll.u32 %s991_s2, 4  ;;  %s200_s12 = int_to_ptr.hbm [resolvable:$true] %s199_s12 }
   0xe   : > { %p907_p10 = pnand %p601_p7, %p188_p8  ;;  %s818_s13 = smov [#allocation2]  }
   0xf   : > { %s201_s14 = sshll.u32 %s818_s13, 4  ;;  %s216_s17 = sshll.u32 %s993_s4, 4  ;;  %s202_s14 = int_to_ptr.vmem [resolvable:$true] %s201_s14  ;;  %s217_s17 = int_to_ptr.hbm [resolvable:$true] %s216_s17 }
  0x10   : > { %p631_p11 = pneg %p907_p10  ;;  %s819_s18 = smov 128  }
  0x11   : > { %s820_s19 = smov 8   ;;  %s821_s20 = smov [#allocation5]  }
  0x12   : > { %p632_p12 = pnand %p642_p9, %p631_p11  ;;  %s218_s26 = sshll.u32 %s821_s20, 4  ;;  %s219_s26 = int_to_ptr.vmem [resolvable:$true] %s218_s26 }
  0x13   : > { %251 = sbr.rel (%p907_p10) target bundleno = 320 (0x140), region = 44 }
  0x14   : > { %634 = dma.hbm_to_vmem [thread:$0]  (!%p632_p12), %s200_s12, 1536, %s202_s14, [#allocation3], %s819_s18, %s819_s18, %s820_s19  }
  0x15   : > { %637 = dma.hbm_to_vmem [thread:$0]  (!%p632_p12), %s217_s17, 1280, %s219_s26, [#allocation6], %s819_s18, %s819_s18, %s820_s19  }
  0x18   : > { %791 = dma.done.wait (%p642_p9), [#allocation3], 1536  }
  0x19   : > { %793 = vsyncadd (%p642_p9), [#allocation3], 4294965760 }
  0x1a   : > { %795 = dma.done.wait (%p642_p9), [#allocation6], 1280  }
  0x1b   : > { %797 = vsyncadd (%p642_p9), [#allocation6], 4294966016  ;;  %p289_p13 = scmp.lt.s32.totalorder %s879_s25, 1  ;;  %v822_v0 = vmov 8.0   ;;  %vm347_vm0 = vcmask 1043456   ;;  %vm299_vm1 = vcmask 162816   ;;  %s507_s20 = scalar_lea.hbm %s995_s6, %s879_s25 }
  0x1c   : > { %684 = vrcp.f32 %v822_v0  ;;  %v343_v2 = vld [vmem:[#allocation2 + $0x28] sm:$0xf]  ;;  %v342_v3 = vld [vmem:[#allocation2 + $0x20] sm:$0xff]  ;;  %v339_v6 = vld [vmem:[#allocation2 + $0x10] sm:$0xf]  ;;  %vm472_vm3 = vcmask 654336  }
  0x1d   : > { %s290_s28 = scalar_select %p289_p13, %s879_s25, 1  ;;  %610 = vmatpush.msk.msra.mxu1 %vm347_vm0, %v343_v2  ;;  %v400_v4 = vld [vmem:[#allocation2 + $0x40] sm:$0xf]  ;;  %v341_v8 = vld [vmem:[#allocation2 + $0x18] sm:$0xff]  ;;  %v398_v15 = vld [vmem:[#allocation2 + $0x30] sm:$0xff]  ;;  %vm496_vm4 = vcmask 16384  }
  0x1e   : > { %614 = vmatpush.msk.msra.mxu2 %vm347_vm0, %v400_v4  ;;  %v399_v11 = vld [vmem:[#allocation2 + $0x38] sm:$0xff]  ;;  %v430_v16 = vld [vmem:[#allocation2 + $0x50] sm:$0xff]  ;;  %v429_v20 = vld [vmem:[#allocation2 + $0x48] sm:$0xff]  ;;  %s287_s17 = sand.u32 1, %s808_s22   ;;  %s511_s10 = sshll.u32 %s507_s20, 4  ;;  %s512_s10 = int_to_ptr.hbm [resolvable:$true] %s511_s10 }
  0x1f   : > { %s608_s29 = sshll.u32 %s290_s28, 3  ;;  %v431_v12 = vld [vmem:[#allocation2 + $0x58] sm:$0xf]  ;;  %365 = vmatpush.msra.mxu1 %v342_v3  ;;  %v470_v22 = vld [vmem:[#allocation5 + $0x48] sm:$0xff]  ;;  %v337_v32 = vld [vmem:[#allocation2] sm:$0xff]  ;;  %s760_s12 = sshra.s32 %s512_s10, 4  ;;  %s761_s12 = int_to_ptr.hbm [resolvable:$true] %s760_s12 }
  0x20   : > { %s292_s11 = scalar_lea.vmem %s989_s0, %s608_s29  ;;  %s296_s14 = scalar_lea.vmem %s990_s1, %s608_s29  ;;  %616 = vmatpush.msk.msra.mxu3 %vm347_vm0, %v431_v12  ;;  %421 = vmatpush.msra.mxu2 %v399_v11  ;;  %v338_v24 = vld [vmem:[#allocation2 + $0x8] sm:$0xff]  ;;  %v469_v52 = vld [vmem:[#allocation5 + $0x40] sm:$0xff]  ;;  %v468_v53 = vld [vmem:[#allocation5 + $0x38] sm:$0xff] }
  0x21   : > { %v297_v5 = vld [vmem:[%s292_s11] sm:$0xff]  ;;  %366 = vmatpush.msra.mxu1 %v341_v8  ;;  %482 = vmatpush.msra.mxu0 %v470_v22  ;;  %v467_v54 = vld [vmem:[#allocation5 + $0x30] sm:$0xff]  ;;  %v466_v55 = vld [vmem:[#allocation5 + $0x28] sm:$0xff]  ;;  %s288_s29 = scalar_lea.vmem [#allocation7], %s287_s17  ;;  %s499_s11 = scalar_lea.sflag [#allocation4], %s287_s17 }
  0x22   : > { %v685_v1 = vpop.eup %684  ;;  %v300_v9 = vsel %vm299_vm1, %v297_v5, 0.0  ;;  %v315_v10 = vsel %vm299_vm1, %v297_v5, -inf  ;;  %v298_v17 = vld [vmem:[%s296_s14] sm:$0xff]  ;;  %452 = vmatpush.msra.mxu3 %v430_v16  ;;  %422 = vmatpush.msra.mxu2 %v398_v15  ;;  %v464_v57 = vld [vmem:[#allocation5 + $0x18] sm:$0xff]  ;;  %v463_v58 = vld [vmem:[#allocation5 + $0x10] sm:$0xff]  ;;  %s509_s9 = sshll.u32 %s288_s29, 4  ;;  %p767_p3 = scmp.lt.s32.totalorder %s761_s12, %s995_s6  ;;  %s510_s9 = int_to_ptr.vmem [resolvable:$true] %s509_s9 }
  0x23   : > { %v308_v7 = vmul.f32 8.0, %v685_v1  ;;  %v301_v13 = vrot.slane %v300_v9, 4  ;;  %v316_v14 = vrot.slane %v315_v10, 4  ;;  %v322_v19 = vsel %vm299_vm1, %v298_v17, 0.0  ;;  %612 = vmatpush.msk.msrb.mxu1 %vm347_vm0, %v339_v6  ;;  %483 = vmatpush.msra.mxu0 %v469_v52  ;;  %v465_v56 = vld [vmem:[#allocation5 + $0x20] sm:$0xff]  ;;  %v462_v59 = vld [vmem:[#allocation5 + $0x8] sm:$0xff] }
  0x24   : > { %v330_v21 = vsel %vm299_vm1, %v298_v17, -inf  ;;  %v323_v26 = vrot.slane %v322_v19, 4  ;;  %453 = vmatpush.msra.mxu3 %v429_v20  ;;  %vm312_vm2 = vweird.f32 %v685_v1  ;;  %v461_v60 = vld [vmem:[#allocation5] sm:$0xff]  ;;  %s762_s13 = scalar_lea.hbm %s761_s12, 1  ;;  %s766_s15 = scalar_lea.hbm %s995_s6, 2 }
  0x25   : > { %v309_v18 = vsub.f32 1.0, %v308_v7  ;;  %v317_v23 = vmax.f32 %v315_v10, %v316_v14  ;;  %v302_v25 = vadd.f32 %v301_v13, %v300_v9  ;;  %v331_v28 = vrot.slane %v330_v21, 4  ;;  %391 = vmatpush.msrb.mxu1 %v338_v24  ;;  %484 = vmatpush.msra.mxu0 %v468_v53  ;;  %v459_v3 = vld [vmem:[%s992_s3] sm:$0x1]  ;;  %p763_p0 = scmp.ne.s32.totalorder %s761_s12, %s762_s13  ;;  %p768_p4 = scmp.lt.s32.totalorder %s766_s15, %s762_s13 }
  0x26   : > { %v324_v31 = vadd.f32 %v323_v26, %v322_v19  ;;  %v471_v6 = vld [vmem:[%s994_s5] sm:$0x1] }
  0x27   : > { %v310_v27 = vmul.f32 %v685_v1, %v309_v18  ;;  %v318_v29 = vrot.slane %v317_v23, 2  ;;  %v303_v30 = vrot.slane %v302_v25, 2  ;;  %v332_v33 = vmax.f32 %v330_v21, %v331_v28  ;;  %392 = vmatpush.msrb.mxu1 %v337_v32  ;;  %485 = vmatpush.msra.mxu0 %v467_v54  ;;  %p764_p1 = pnand %p763_p0, %p896_p5  ;;  %p769_p7 = por %p768_p4, %p767_p3 }
  0x28   : > { %v325_v36 = vrot.slane %v324_v31, 2 }
  0x29   : > { %v319_v34 = vmax.f32 %v317_v23, %v318_v29  ;;  %v304_v35 = vadd.f32 %v303_v30, %v302_v25  ;;  %v311_v37 = vadd.f32 %v685_v1, %v310_v27  ;;  %v333_v38 = vrot.slane %v332_v33, 2  ;;  %486 = vmatpush.msra.mxu0 %v466_v55  ;;  %p765_p2 = pneg %p764_p1 }
  0x2a   : > { %v326_v41 = vadd.f32 %v325_v36, %v324_v31 }
  0x2b   : > { %v320_v39 = vrot.slane %v319_v34, 1  ;;  %v305_v40 = vrot.slane %v304_v35, 1  ;;  %v334_v42 = vmax.f32 %v332_v33, %v333_v38  ;;  %v313_v45 = vsel %vm312_vm2, %v685_v1, %v311_v37  ;;  %487 = vmatpush.msra.mxu0 %v465_v56  ;;  %p770_p8 = pnand %p769_p7, %p765_p2 }
  0x2c   : > { %v327_v44 = vrot.slane %v326_v41, 1 }
  0x2d   : > { %v321_v43 = vmax.f32 %v319_v34, %v320_v39  ;;  %v335_v46 = vrot.slane %v334_v42, 1  ;;  %v306_v47 = vadd.f32 %v305_v40, %v304_v35  ;;  %488 = vmatpush.msra.mxu0 %v464_v57 }
  0x2e   : > { %v328_v48 = vadd.f32 %v327_v44, %v326_v41 }
  0x2f   : > { %611 = vmatmul.msk.f32.vlgmr.msra.gmra.mxu1 %vm299_vm1, %v321_v43  ;;  %v336_v49 = vmax.f32 %v334_v42, %v335_v46  ;;  %v314_v51 = vmul.f32 %v313_v45, %v306_v47  ;;  %489 = vmatpush.msra.mxu0 %v463_v58 }
  0x30   : > { %v329_v50 = vmul.f32 %v328_v48, %v313_v45 }
  0x31   : > { %617 = vmatmul.msk.f32.vlgmr.msra.gmra.mxu3 %vm299_vm1, %v336_v49  ;;  %490 = vmatpush.msra.mxu0 %v462_v59 }
  0x32   : > { %615 = vmatmul.msk.f32.vlgmr.msra.gmra.mxu2 %vm299_vm1, %v329_v50 }
  0x33   : > { %491 = vmatpush.msra.mxu0 %v461_v60 }
  0x37   : > { %613 = vmatmul.msk.f32.vlgmr.msrb.gmra.mxu1 %vm299_vm1, %v314_v51 }
  0xac   : > { %v368_v61 = vpop.f32.mrf.mxu1 }
  0xb4   : > { %v394_v62 = vpop.f32.mrf.mxu1  ;;  %v455_v1 = vpop.f32.mrf.mxu3 }
  0xb5   : > { %v395_v63 = vadd.f32 %v394_v62, %v368_v61  ;;  %v424_v0 = vpop.f32.mrf.mxu2 }
  0xb7   : > { %v427_v2 = vadd.f32 %v424_v0, %v395_v63 }
  0xb9   : > { %v458_v4 = vadd.f32 %v455_v1, %v427_v2 }
  0xbb   : > { %v460_v5 = vadd.f32 %v459_v3, %v458_v4 }
  0xbd   : > { %618 = vmatmul.msk.f32.vlgmr.msra.gmra.mxu0 %vm472_vm3, %v460_v5 }
 0x13a   : > { %v493_v7 = vpop.f32.mrf.mxu0 }
 0x13b   : > { %v494_v8 = vadd.f32 %v493_v7, %v471_v6 }
 0x13d   : > { %497 = vst.msk [vmem:[%s288_s29] sm:$0x1] %vm496_vm4, %v494_v8 }
 0x13e   : > { %773 = shalt.err (!%p770_p8)
}
 0x13f   : > { %629 = dma.vmem_to_hbm [thread:$0]  (%p896_p5), %s510_s9, 16, %s512_s10, %s499_s11  }
 0x140 PF: > { %p646_p9 = scmp.ge.s32.totalorder %s816_s24, 2  ;;  %s523_s17 = sand.u32 1, %s804_s21  }
 0x141   : > { %s524_s19 = scalar_lea.sflag [#allocation4], %s523_s17 }
 0x142   : > { %p639_p10 = pnand %p646_p9, %p900_p6 }
 0x144   : > { %p640_p11 = pneg %p639_p10 }
 0x146   : > { %799 = dma.done.wait (%p640_p11), %s524_s19, 16  }
 0x147   : > { %801 = vsyncadd (%p640_p11), %s524_s19, 4294967280  ;;  %p18_p12 = scmp.ge.s32.totalorder %s883_s27, 4   ;;  %s999_s21 = smov %s808_s22 }
 0x148   : > { %s1000_s22 = smov %s812_s23  ;;  %s1001_s23 = smov %s894_s30 }
 0x149   : > { %s1002_s24 = smov %s883_s27  ;;  %20 = sbr.rel (!%p18_p12) target bundleno = 5 (0x5), region = 94 }
 0x14e   :  { %529 = vsyncpa [#allocation3], 1 }
 0x14f   :  { %531 = vsyncpa [#allocation3 + $0x1], 1 }
 0x150   :  { %532 = vsyncpa [#allocation6], 1 }
 0x151   :  { %533 = vsyncpa [#allocation4], 1 }
 0x152   :  { %535 = vsyncpa [#allocation4 + $0x1], 1 }

// kernel: _lambda_.6
= control target key start
LH: loop header
LB: loop body
LE: loop exit
PB: predicated region body
PF: predicated region fallthrough
CT: control target
= control target key end

     0   :  { %s4215_s6 = smov 1   ;;  %s4216_s10 = smov 2   ;;  %s4929_s0 = inlined_call_operand.smem [shape: u32[30], index: -1, kind: input, shape index: {}] }
   0x1   :  { %s4263_s5 = sld [smem:[%s4929_s0]]   ;;  %s4217_s14 = smov 3  }
   0x2   :  { %s4268_s9 = sld [smem:[%s4929_s0 + %s4215_s6]]   ;;  %s4218_s18 = smov 4  }
   0x3   :  { %s4273_s13 = sld [smem:[%s4929_s0 + %s4216_s10]]   ;;  %s4219_s22 = smov 5  }
   0x4   :  { %s4278_s17 = sld [smem:[%s4929_s0 + %s4217_s14]]   ;;  %s4220_s26 = smov 6  }
   0x5   :  { %s4283_s21 = sld [smem:[%s4929_s0 + %s4218_s18]]   ;;  %s4221_s30 = smov 7  }
   0x6   :  { %s4288_s25 = sld [smem:[%s4929_s0 + %s4219_s22]]   ;;  %s4222_s4 = smov 8  }
   0x7   :  { %s4293_s29 = sld [smem:[%s4929_s0 + %s4220_s26]]   ;;  %s4223_s10 = smov 9  }
   0x8   :  { %4942 = sst [smem:[#allocation21_spill]] %s4268_s9  ;;  %s4224_s15 = smov 10  }
   0x9   :  { %4943 = sst [smem:[#allocation22_spill]] %s4273_s13  ;;  %s4225_s20 = smov 11  }
   0xa   :  { %s4298_s3 = sld [smem:[%s4929_s0 + %s4221_s30]]   ;;  %s4226_s26 = smov 12  }
   0xb   :  { %s4303_s8 = sld [smem:[%s4929_s0 + %s4222_s4]]   ;;  %s4227_s1 = smov 13  }
   0xc   :  { %s4308_s14 = sld [smem:[%s4929_s0 + %s4223_s10]]   ;;  %s4228_s7 = smov 14  }
   0xd   :  { %s4313_s19 = sld [smem:[%s4929_s0 + %s4224_s15]]   ;;  %s4229_s15 = smov 15  }
   0xe   :  { %s4318_s24 = sld [smem:[%s4929_s0 + %s4225_s20]]   ;;  %s4230_s22 = smov 16  }
   0xf   :  { %s4323_s30 = sld [smem:[%s4929_s0 + %s4226_s26]]   ;;  %s4231_s28 = smov 17  }
  0x10   :  { %s4328_s6 = sld [smem:[%s4929_s0 + %s4227_s1]]  }
  0x11   :  { %4944 = sst [smem:[#allocation23_spill]] %s4303_s8 }
  0x12   :  { %4945 = sst [smem:[#allocation24_spill]] %s4308_s14 }
  0x13   :  { %4946 = sst [smem:[#allocation25_spill]] %s4313_s19 }
  0x14   :  { %4947 = sst [smem:[#allocation26_spill]] %s4318_s24 }
  0x15   :  { %4948 = sst [smem:[#allocation27_spill]] %s4323_s30 }
  0x16   :  { %s4333_s12 = sld [smem:[%s4929_s0 + %s4228_s7]]   ;;  %s4232_s7 = smov 18  }
  0x17   :  { %s4338_s20 = sld [smem:[%s4929_s0 + %s4229_s15]]   ;;  %s4233_s15 = smov 19  }
  0x18   :  { %s4343_s27 = sld [smem:[%s4929_s0 + %s4230_s22]]   ;;  %s4234_s22 = smov 20  }
  0x19   :  { %s4348_s4 = sld [smem:[%s4929_s0 + %s4231_s28]]   ;;  %s4235_s28 = smov 21  }
  0x1a   :  { %s4358_s9 = sld [smem:[%s4929_s0 + %s4233_s15]]   ;;  %s4237_s15 = smov 23  }
  0x1b   :  { %s4368_s30 = sld [smem:[%s4929_s0 + %s4235_s28]]   ;;  %s4239_s28 = smov 25  }
  0x1c   :  { %4949 = sst [smem:[#allocation28_spill]] %s4333_s12 }
  0x1d   :  { %s4353_s12 = sld [smem:[%s4929_s0 + %s4232_s7]]   ;;  %s4236_s7 = smov 22  }
  0x1e   :  { %4950 = sst [smem:[#allocation29_spill]] %s4343_s27 }
  0x1f   :  { %s4363_s27 = sld [smem:[%s4929_s0 + %s4234_s22]]   ;;  %s4238_s22 = smov 24  }
  0x20   :  { %s4378_s24 = sld [smem:[%s4929_s0 + %s4237_s15]]   ;;  %s4241_s15 = smov 27  }
  0x21   :  { %4953 = sst [smem:[#allocation32_spill]] %s4368_s30 }
  0x22   :  { %s4388_s30 = sld [smem:[%s4929_s0 + %s4239_s28]]   ;;  %s4243_s28 = smov 29  }
  0x23   :  { %4951 = sst [smem:[#allocation30_spill]] %s4353_s12 }
  0x24   :  { %s4373_s12 = sld [smem:[%s4929_s0 + %s4236_s7]]   ;;  %s4240_s7 = smov 26  }
  0x25   :  { %4952 = sst [smem:[#allocation31_spill]] %s4363_s27 }
  0x26   :  { %s4383_s27 = sld [smem:[%s4929_s0 + %s4238_s22]]   ;;  %s4242_s22 = smov 28  }
  0x27   :  { %s4398_s19 = sld [smem:[%s4929_s0 + %s4241_s15]]  }
  0x28   :  { %s4408_s14 = sld [smem:[%s4929_s0 + %s4243_s28]]  }
  0x2a   :  { %4954 = sst [smem:[#allocation33_spill]] %s4373_s12 }
  0x2b   :  { %s4393_s12 = sld [smem:[%s4929_s0 + %s4240_s7]]  }
  0x2c   :  { %4955 = sst [smem:[#allocation34_spill]] %s4383_s27 }
  0x2d   :  { %4957 = sst [smem:[#allocation36_spill]] %s4398_s19 }
  0x2e   :  { %s4403_s27 = sld [smem:[%s4929_s0 + %s4242_s22]]  }
  0x2f   :  { %4959 = sst [smem:[#allocation38_spill]] %s4408_s14 }
  0x31   :  { %4956 = sst [smem:[#allocation35_spill]] %s4393_s12 }
  0x34   :  { %4958 = sst [smem:[#allocation37_spill]] %s4403_s27 }
  0x35   :  { %64 = vsyncpa [#allocation3], 0 }
  0x36   :  { %66 = vsyncpa [#allocation3 + $0x1], 0 }
  0x37   :  { %67 = vsyncpa [#allocation5], 0 }
  0x38   :  { %68 = vsyncpa [#allocation8], 0 }
  0x39   :  { %69 = vsyncpa [#allocation11], 0 }
  0x3a   :  { %70 = vsyncpa [#allocation14], 0  ;;  %s4410_s7 = smov 0   ;;  %s4412_s10 = smov 0  }
  0x3b   :  { %s4414_s11 = smov 0   ;;  %s4416_s15 = smov 0  }
  0x3c LB: > { %s4960_s13 = sld [smem:[#allocation22_spill]]  ;;  %s4434_s16 = sadd.s32 4294967295, %s4213_s15   ;;  %s4201_s7 = sphi %s4410_s7, %s4983_s7   ;;  %s4213_s15 = sphi %s4416_s15, %s4986_s15   ;;  %s4209_s11 = sphi %s4414_s11, %s4985_s11   ;;  %s4205_s10 = sphi %s4412_s10, %s4984_s10  }
  0x3d   : > { %p3464_p0 = scmp.ge.s32.totalorder %s4213_s15, 1  ;;  %p97_p1 = scmp.eq.s32.totalorder %s4434_s16, 0 }
  0x3e   : > { %p726_p2 = scmp.lt.s32.totalorder %s4213_s15, 3  ;;  %s4244_s22 = smov [#allocation4]  }
  0x3f   : > { %s739_s23 = sshll.u32 %s4244_s22, 4  ;;  %s792_s26 = sshll.u32 %s4328_s6, 4  ;;  %s740_s23 = int_to_ptr.vmem [resolvable:$true] %s739_s23  ;;  %s4452_s26 = int_to_ptr.hbm [resolvable:$true] %s792_s26 }
  0x40   : > { %p4439_p3 = pnand %p3464_p0, %p726_p2  ;;  %s826_s1 = sshll.u32 %s4348_s4, 4  ;;  %s4475_s1 = int_to_ptr.hbm [resolvable:$true] %s826_s1 }
  0x41   : > { %s4245_s2 = smov [#allocation7]  }
  0x42   : > { %s737_s0 = sshll.u32 %s4960_s13, 4  ;;  %p3657_p4 = pneg %p4439_p3  ;;  %s4431_s0 = int_to_ptr.hbm [resolvable:$true] %s737_s0 }
  0x43   : > { %s4455_s14 = sshll.u32 %s4245_s2, 4  ;;  %s3893_s27 = sshra.s32 %s4431_s0, 4  ;;  %s3894_s27 = int_to_ptr.hbm [resolvable:$true] %s3893_s27  ;;  %s795_s14 = int_to_ptr.vmem [resolvable:$true] %s4455_s14 }
  0x44   : > { %p4448_p5 = pnand %p3657_p4, %p97_p1  ;;  %s3895_s22 = scalar_lea.hbm %s3894_s27, 48 }
  0x45   : > { %p3896_p6 = scmp.ne.s32.totalorder %s3894_s27, %s3895_s22  ;;  %s3900_s12 = scalar_lea.hbm %s4960_s13, 48 }
  0x46   : > { %p4460_p7 = pneg %p4448_p5  ;;  %p3901_p10 = scmp.lt.s32.totalorder %s3894_s27, %s4960_s13 }
  0x47   : > { %p3902_p11 = scmp.lt.s32.totalorder %s3900_s12, %s3895_s22 }
  0x48   : > { %p3898_p8 = pnand %p4460_p7, %p3896_p6 }
  0x49   : > { %p3903_p12 = por %p3902_p11, %p3901_p10 }
  0x4a   : > { %p3899_p9 = pneg %p3898_p8 }
  0x4c   : > { %p3904_p13 = pnand %p3903_p12, %p3899_p9 }
  0x4e   : > { %3907 = shalt.err (!%p3904_p13)
}
  0x4f   : > { %s4246_s2 = smov 128   ;;  %s4247_s8 = smov 8  }
  0x50   : > { %3660 = dma.hbm_to_vmem [thread:$0]  (!%p4448_p5), %s4431_s0, 768, %s740_s23, [#allocation5], %s4246_s2, %s4246_s2, %s4247_s8  }
  0x51   : > { %s3923_s12 = sshra.s32 %s4452_s26, 4  ;;  %s3930_s22 = scalar_lea.hbm %s4328_s6, 192  ;;  %s3924_s12 = int_to_ptr.hbm [resolvable:$true] %s3923_s12 }
  0x52   : > { %s3925_s27 = scalar_lea.hbm %s3924_s12, 192  ;;  %p3931_p6 = scmp.lt.s32.totalorder %s3924_s12, %s4328_s6 }
  0x53   : > { %p3926_p0 = scmp.ne.s32.totalorder %s3924_s12, %s3925_s27  ;;  %p3932_p8 = scmp.lt.s32.totalorder %s3930_s22, %s3925_s27 }
  0x55   : > { %p3928_p2 = pnand %p3926_p0, %p4460_p7  ;;  %p3933_p9 = por %p3932_p8, %p3931_p6 }
  0x57   : > { %p3929_p4 = pneg %p3928_p2 }
  0x59   : > { %p3934_p10 = pnand %p3933_p9, %p3929_p4 }
  0x5b   : > { %3937 = shalt.err (!%p3934_p10)
}
  0x5c   : > { %3666 = dma.hbm_to_vmem [thread:$0]  (!%p4448_p5), %s4452_s26, 3072, %s795_s14, [#allocation8], %s4246_s2, %s4246_s2, %s4247_s8  }
  0x5d   : > { %s866_s0 = sshll.u32 %s4378_s24, 4  ;;  %s4248_s23 = smov [#allocation10]   ;;  %s4489_s0 = int_to_ptr.hbm [resolvable:$true] %s866_s0 }
  0x5e   : > { %s828_s13 = sshll.u32 %s4248_s23, 4  ;;  %s3953_s12 = sshra.s32 %s4475_s1, 4  ;;  %s829_s13 = int_to_ptr.vmem [resolvable:$true] %s828_s13  ;;  %s3954_s12 = int_to_ptr.hbm [resolvable:$true] %s3953_s12 }
  0x5f   : > { %s3955_s27 = scalar_lea.hbm %s3954_s12, 192  ;;  %s3960_s22 = scalar_lea.hbm %s4348_s4, 192 }
  0x60   : > { %p3956_p11 = scmp.ne.s32.totalorder %s3954_s12, %s3955_s27  ;;  %p3961_p0 = scmp.lt.s32.totalorder %s3954_s12, %s4348_s4 }
  0x61   : > { %p3962_p2 = scmp.lt.s32.totalorder %s3960_s22, %s3955_s27 }
  0x62   : > { %p3958_p12 = pnand %p3956_p11, %p4460_p7 }
  0x63   : > { %p3963_p4 = por %p3962_p2, %p3961_p0 }
  0x64   : > { %p3959_p13 = pneg %p3958_p12 }
  0x66   : > { %p3964_p6 = pnand %p3963_p4, %p3959_p13 }
  0x68   : > { %3967 = shalt.err (!%p3964_p6)
}
  0x69   : > { %3672 = dma.hbm_to_vmem [thread:$0]  (!%p4448_p5), %s4475_s1, 3072, %s829_s13, [#allocation11], %s4246_s2, %s4246_s2, %s4247_s8  }
  0x6a   : > { %s4249_s14 = smov [#allocation13]   ;;  %s754_s23 = sshll.u32 %s4283_s21, 4  ;;  %s4503_s23 = int_to_ptr.hbm [resolvable:$true] %s754_s23 }
  0x6b   : > { %s868_s26 = sshll.u32 %s4249_s14, 4  ;;  %s3983_s12 = sshra.s32 %s4489_s0, 4  ;;  %s869_s26 = int_to_ptr.vmem [resolvable:$true] %s868_s26  ;;  %s3984_s12 = int_to_ptr.hbm [resolvable:$true] %s3983_s12 }
  0x6c   : > { %s3985_s27 = scalar_lea.hbm %s3984_s12, 48  ;;  %s3990_s22 = scalar_lea.hbm %s4378_s24, 48 }
  0x6d   : > { %p3986_p8 = scmp.ne.s32.totalorder %s3984_s12, %s3985_s27  ;;  %p3991_p11 = scmp.lt.s32.totalorder %s3984_s12, %s4378_s24 }
  0x6e   : > { %p3992_p12 = scmp.lt.s32.totalorder %s3990_s22, %s3985_s27 }
  0x6f   : > { %p3988_p9 = pnand %p3986_p8, %p4460_p7 }
  0x70   : > { %p3993_p13 = por %p3992_p12, %p3991_p11 }
  0x71   : > { %p3989_p10 = pneg %p3988_p9 }
  0x73   : > { %p3994_p0 = pnand %p3993_p13, %p3989_p10 }
  0x75   : > { %3997 = shalt.err (!%p3994_p0)
}
  0x76   : > { %3678 = dma.hbm_to_vmem [thread:$0]  (!%p4448_p5), %s4489_s0, 768, %s869_s26, [#allocation14], %s4246_s2, %s4246_s2, %s4247_s8  }
  0x77   : > { %s809_s13 = sshll.u32 %s4338_s20, 4  ;;  %s4250_s1 = smov [#allocation6]   ;;  %s4517_s13 = int_to_ptr.hbm [resolvable:$true] %s809_s13 }
  0x78   : > { %s756_s14 = sshll.u32 %s4250_s1, 4  ;;  %s4013_s12 = sshra.s32 %s4503_s23, 4  ;;  %s757_s14 = int_to_ptr.vmem [resolvable:$true] %s756_s14  ;;  %s4014_s12 = int_to_ptr.hbm [resolvable:$true] %s4013_s12 }
  0x79   : > { %s4015_s27 = scalar_lea.hbm %s4014_s12, 48  ;;  %s4020_s22 = scalar_lea.hbm %s4283_s21, 48 }
  0x7a   : > { %p4016_p2 = scmp.ne.s32.totalorder %s4014_s12, %s4015_s27  ;;  %p4021_p8 = scmp.lt.s32.totalorder %s4014_s12, %s4283_s21 }
  0x7b   : > { %p4022_p9 = scmp.lt.s32.totalorder %s4020_s22, %s4015_s27 }
  0x7c   : > { %p4018_p4 = pnand %p4016_p2, %p4460_p7 }
  0x7d   : > { %p4023_p10 = por %p4022_p9, %p4021_p8 }
  0x7e   : > { %p4019_p6 = pneg %p4018_p4 }
  0x80   : > { %p4024_p11 = pnand %p4023_p10, %p4019_p6 }
  0x82   : > { %4027 = shalt.err (!%p4024_p11)
}
  0x83   : > { %3663 = dma.hbm_to_vmem [thread:$0]  (!%p4448_p5), %s4503_s23, 768, %s757_s14, [#allocation5], %s4246_s2, %s4246_s2, %s4247_s8  }
  0x84   : > { %s4251_s0 = smov [#allocation9]   ;;  %s843_s1 = sshll.u32 %s4358_s9, 4  ;;  %s4531_s1 = int_to_ptr.hbm [resolvable:$true] %s843_s1 }
  0x85   : > { %s811_s26 = sshll.u32 %s4251_s0, 4  ;;  %s4043_s12 = sshra.s32 %s4517_s13, 4  ;;  %s812_s26 = int_to_ptr.vmem [resolvable:$true] %s811_s26  ;;  %s4044_s12 = int_to_ptr.hbm [resolvable:$true] %s4043_s12 }
  0x86   : > { %s4045_s27 = scalar_lea.hbm %s4044_s12, 192  ;;  %s4050_s22 = scalar_lea.hbm %s4338_s20, 192 }
  0x87   : > { %p4046_p12 = scmp.ne.s32.totalorder %s4044_s12, %s4045_s27  ;;  %p4051_p2 = scmp.lt.s32.totalorder %s4044_s12, %s4338_s20 }
  0x88   : > { %p4052_p4 = scmp.lt.s32.totalorder %s4050_s22, %s4045_s27 }
  0x89   : > { %p4048_p13 = pnand %p4046_p12, %p4460_p7 }
  0x8a   : > { %p4053_p6 = por %p4052_p4, %p4051_p2 }
  0x8b   : > { %p4049_p0 = pneg %p4048_p13 }
  0x8d   : > { %p4054_p8 = pnand %p4053_p6, %p4049_p0 }
  0x8f   : > { %4057 = shalt.err (!%p4054_p8)
}
  0x90   : > { %3669 = dma.hbm_to_vmem [thread:$0]  (!%p4448_p5), %s4517_s13, 3072, %s812_s26, [#allocation8], %s4246_s2, %s4246_s2, %s4247_s8  }
  0x91   : > { %s883_s23 = sshll.u32 %s4388_s30, 4  ;;  %s4252_s14 = smov [#allocation12]   ;;  %s4545_s23 = int_to_ptr.hbm [resolvable:$true] %s883_s23 }
  0x92   : > { %s845_s0 = sshll.u32 %s4252_s14, 4  ;;  %s4073_s12 = sshra.s32 %s4531_s1, 4  ;;  %s846_s0 = int_to_ptr.vmem [resolvable:$true] %s845_s0  ;;  %s4074_s12 = int_to_ptr.hbm [resolvable:$true] %s4073_s12 }
  0x93   : > { %s4075_s27 = scalar_lea.hbm %s4074_s12, 64  ;;  %s4080_s22 = scalar_lea.hbm %s4358_s9, 64 }
  0x94   : > { %p4076_p9 = scmp.ne.s32.totalorder %s4074_s12, %s4075_s27  ;;  %p4081_p12 = scmp.lt.s32.totalorder %s4074_s12, %s4358_s9 }
  0x95   : > { %p4082_p13 = scmp.lt.s32.totalorder %s4080_s22, %s4075_s27 }
  0x96   : > { %p4078_p10 = pnand %p4076_p9, %p4460_p7 }
  0x97   : > { %p4083_p0 = por %p4082_p13, %p4081_p12 }
  0x98   : > { %p4079_p11 = pneg %p4078_p10 }
  0x9a   : > { %p4084_p2 = pnand %p4083_p0, %p4079_p11 }
  0x9c   : > { %4087 = shalt.err (!%p4084_p2)
}
  0x9d   : > { %3675 = dma.hbm_to_vmem [thread:$0]  (!%p4448_p5), %s4531_s1, 1024, %s846_s0, [#allocation11], %s4246_s2, %s4246_s2, %s4247_s8  }
  0x9e   : > { %s4253_s13 = smov [#allocation15]   ;;  %s4103_s14 = sshra.s32 %s4545_s23, 4  ;;  %s4104_s14 = int_to_ptr.hbm [resolvable:$true] %s4103_s14 }
  0x9f   : > { %s885_s26 = sshll.u32 %s4253_s13, 4  ;;  %s4105_s12 = scalar_lea.hbm %s4104_s14, 64  ;;  %s886_s26 = int_to_ptr.vmem [resolvable:$true] %s885_s26 }
  0xa0   : > { %p4106_p4 = scmp.ne.s32.totalorder %s4104_s14, %s4105_s12  ;;  %s4110_s27 = scalar_lea.hbm %s4388_s30, 64 }
  0xa1   : > { %p4111_p9 = scmp.lt.s32.totalorder %s4104_s14, %s4388_s30  ;;  %p4112_p10 = scmp.lt.s32.totalorder %s4110_s27, %s4105_s12 }
  0xa2   : > { %p4108_p6 = pnand %p4106_p4, %p4460_p7 }
  0xa3   : > { %p4113_p11 = por %p4112_p10, %p4111_p9 }
  0xa4   : > { %p4109_p8 = pneg %p4108_p6 }
  0xa6   : > { %p4114_p12 = pnand %p4113_p11, %p4109_p8 }
  0xa8   : > { %4117 = shalt.err (!%p4114_p12)
}
  0xa9   : > { %3681 = dma.hbm_to_vmem [thread:$0]  (!%p4448_p5), %s4545_s23, 1024, %s886_s26, [#allocation14], %s4246_s2, %s4246_s2, %s4247_s8  }
  0xaa   : > { %s4570_s19 = sadd.s32 1, %s4213_s15   ;;  %s83_s1 = sadd.s32 1, %s4209_s11 }
  0xab   : > { %s80_s28 = ssub.s32 %s4213_s15, %s4570_s19  ;;  %p90_p13 = scmp.ne.s32.totalorder %s4209_s11, %s4205_s10 }
  0xac   : > { %p81_p7 = scmp.eq.s32.totalorder %s80_s28, 0  ;;  %p91_p0 = scmp.eq.s32.totalorder %s4213_s15, 0 }
  0xad   : > { %p96_p2 = scmp.ne.s32.totalorder %s4205_s10, %s4201_s7  ;;  %p3694_p6 = scmp.lt.s32.totalorder %s4213_s15, 2 }
  0xae   : > { %s4581_s0 = scalar_select %p81_p7, %s4209_s11, %s83_s1  }
  0xaf   : > { %p4585_p4 = por %p97_p1, %p96_p2  ;;  %s908_s13 = sand.u32 1, %s4209_s11  }
  0xb0   : > { %s3475_s14 = sshll.u32 %s4213_s15, 3  ;;  %p92_p5 = por %p91_p0, %p90_p13 }
  0xb1   : > { %s3474_s8 = sshll.u32 %s908_s13, 3  ;;  %s916_s2 = scalar_lea.hbm %s4263_s5, %s3475_s14 }
  0xb2   : > { %s918_s23 = sshll.u32 %s916_s2, 4  ;;  %s912_s26 = scalar_lea.vmem [#allocation2], %s3474_s8  ;;  %s919_s23 = int_to_ptr.hbm [resolvable:$true] %s918_s23 }
  0xb3   : > { %s920_s12 = sshll.u32 %s912_s26, 4  ;;  %p4593_p8 = pnand %p3694_p6, %p92_p5  ;;  %s921_s12 = int_to_ptr.vmem [resolvable:$true] %s920_s12 }
  0xb4   : > { %s909_s27 = scalar_lea.sflag [#allocation3], %s908_s13  ;;  %s4133_s28 = sshra.s32 %s919_s23, 4  ;;  %s4134_s28 = int_to_ptr.hbm [resolvable:$true] %s4133_s28 }
  0xb5   : > { %s4135_s1 = scalar_lea.hbm %s4134_s28, 8  ;;  %p4137_p10 = pneg %p4593_p8 }
  0xb6   : > { %p4136_p9 = scmp.ne.s32.totalorder %s4134_s28, %s4135_s1  ;;  %s4140_s15 = scalar_lea.hbm %s4263_s5, 16 }
  0xb7   : > { %p4141_p7 = scmp.lt.s32.totalorder %s4134_s28, %s4263_s5  ;;  %p4142_p13 = scmp.lt.s32.totalorder %s4140_s15, %s4135_s1 }
  0xb8   : > { %p4138_p11 = pnand %p4137_p10, %p4136_p9 }
  0xb9   : > { %p4143_p0 = por %p4142_p13, %p4141_p7 }
  0xba   : > { %p4139_p12 = pneg %p4138_p11 }
  0xbc   : > { %p4144_p2 = pnand %p4143_p0, %p4139_p12 }
  0xbe   : > { %4147 = shalt.err (!%p4144_p2)
}
  0xbf   : > { %3685 = dma.hbm_to_vmem [thread:$0]  (!%p4593_p8), %s919_s23, 128, %s921_s12, %s909_s27  }
  0xc0   : > { %935 = sbr.rel (%p4439_p3) target bundleno = 7421 (0x1cfd), region = 136  ;;  %s937_s13 = sand.u32 (!%p4439_p3), 1, %s4205_s10  }
  0xc1   : > { %s3477_s14 = sshll.u32 (!%p4439_p3), %s937_s13, 3  ;;  %s938_s8 = scalar_lea.sflag (!%p4439_p3), [#allocation3], %s937_s13 }
  0xc2   : > { %s941_s2 = scalar_lea.vmem (!%p4439_p3), [#allocation2], %s3477_s14 }
  0xc5   : > { %4180 = dma.done.wait (%p4585_p4), %s938_s8, 128  }
  0xc6   : > { %4182 = vsyncadd (%p4585_p4), %s938_s8, 4294967168 }
  0xc7   : > { %4184 = dma.done.wait (%p97_p1), [#allocation5], 1536  }
  0xc8   : > { %4186 = vsyncadd (%p97_p1), [#allocation5], 4294965760 }
  0xc9   : > { %4188 = dma.done.wait (%p97_p1), [#allocation8], 6144  }
  0xca   : > { %4190 = vsyncadd (%p97_p1), [#allocation8], 4294961152 }
  0xcb   : > { %4192 = dma.done.wait (%p97_p1), [#allocation11], 4096  }
  0xcc   : > { %4194 = vsyncadd (%p97_p1), [#allocation11], 4294963200 }
  0xcd   : > { %4196 = dma.done.wait (%p97_p1), [#allocation14], 1792  }
  0xce   : > { %4198 = vsyncadd (%p97_p1), [#allocation14], 4294965504  ;;  %vm1079_vm0 = vcmask 1043456   ;;  %v1070_v0 = vld [vmem:[#allocation4 + $0x10] sm:$0xf]  ;;  %v1069_v1 = vld [vmem:[#allocation4 + $0x8] sm:$0xff] }
  0xcf   : > { %3487 = vmatpush.msk.msra.mxu0 %vm1079_vm0, %v1070_v0  ;;  %v1068_v2 = vld [vmem:[#allocation4] sm:$0xff]  ;;  %v1144_v4 = vld [vmem:[#allocation6 + $0x8] sm:$0xff]  ;;  %vm1075_vm1 = vcmask 162816   ;;  %v1143_v6 = vld [vmem:[#allocation6] sm:$0xff]  ;;  %s4966_s18 = sld [smem:[#allocation23_spill]]  ;;  %p1059_p1 = scmp.lt.s32.totalorder %s4434_s16, 1 }
  0xd0   : > { %v1145_v3 = vld [vmem:[#allocation6 + $0x10] sm:$0xf]  ;;  %v4627_v5 = vld [vmem:[%s941_s2] sm:$0xff]  ;;  %v1199_v27 = vld [vmem:[#allocation4 + $0x28] sm:$0xf]  ;;  %s4967_s22 = sld [smem:[#allocation24_spill]] }
  0xd1   : > { %3489 = vmatpush.msk.msra.mxu1 %vm1079_vm0, %v1145_v3  ;;  %1097 = vmatpush.msra.mxu0 %v1069_v1  ;;  %v3775_v7 = vld [vmem:[%s4278_s17] ss:$0 sm:$0xff]  ;;  %v1274_v28 = vld [vmem:[#allocation6 + $0x28] sm:$0xf]  ;;  %v1198_v29 = vld [vmem:[#allocation4 + $0x20] sm:$0xff]  ;;  %s4968_s23 = sld [smem:[#allocation25_spill]] }
  0xd2   : > { %v3776_v8 = vld [vmem:[%s4288_s25] ss:$0 sm:$0xff]  ;;  %3492 = vmatpush.msk.msra.mxu2 %vm1079_vm0, %v1199_v27  ;;  %3495 = vmatpush.msk.msra.mxu3 %vm1079_vm0, %v1274_v28  ;;  %v1197_v33 = vld [vmem:[#allocation4 + $0x18] sm:$0xff]  ;;  %v1272_v34 = vld [vmem:[#allocation6 + $0x18] sm:$0xff]  ;;  %s4969_s26 = sld [smem:[#allocation26_spill]]  ;;  %s4988_s16 = smov (!%p1059_p1, %s4434_s16), 1 }
  0xd3   : > { %1167 = vmatpush.msra.mxu1 %v1144_v4  ;;  %1098 = vmatpush.msra.mxu0 %v1068_v2  ;;  %v1273_v31 = vld [vmem:[#allocation6 + $0x20] sm:$0xff]  ;;  %v1328_v27 = vld [vmem:[%s4293_s29 + $0x10] sm:$0xf]  ;;  %v1327_v28 = vld [vmem:[%s4293_s29 + $0x8] sm:$0xff]  ;;  %s4970_s12 = sld [smem:[#allocation27_spill]] }
  0xd4   : > { %3488 = vmatmul.msk.f32.vlgmr.msra.gmra.mxu0 %vm1075_vm1, %v4627_v5  ;;  %1225 = vmatpush.msra.mxu2 %v1198_v29  ;;  %s4971_s7 = sld [smem:[#allocation21_spill]] }
  0xd5   : > { %1168 = vmatpush.msra.mxu1 %v1143_v6  ;;  %1297 = vmatpush.msra.mxu3 %v1273_v31  ;;  %v1326_v31 = vld [vmem:[%s4293_s29] sm:$0xff]  ;;  %s4972_s27 = sld [smem:[#allocation28_spill]] }
  0xd6   : > { %3490 = vmatmul.msk.f32.vlgmr.msra.gmra.mxu1 %vm1075_vm1, %v4627_v5  ;;  %1226 = vmatpush.msra.mxu2 %v1197_v33  ;;  %s4973_s28 = sld [smem:[#allocation29_spill]] }
  0xd7   : > { %1298 = vmatpush.msra.mxu3 %v1272_v34  ;;  %3497 = vmatpush.msk.msrb.mxu0 %vm1079_vm0, %v1328_v27  ;;  %s4974_s1 = sld [smem:[#allocation30_spill]] }
  0xd8   : > { %s4975_s13 = sld [smem:[#allocation31_spill]] }
  0xd9   : > { %1353 = vmatpush.msrb.mxu0 %v1327_v28  ;;  %s4976_s14 = sld [smem:[#allocation32_spill]] }
  0xda   : > { %s1061_s15 = scalar_lea.vmem %s4971_s7, %s4988_s16  ;;  %s4977_s8 = sld [smem:[#allocation33_spill]] }
  0xdb   : > { %1354 = vmatpush.msrb.mxu0 %v1326_v31  ;;  %v3780_v31 = vld [vmem:[%s4967_s22] ss:$0 sm:$0xff]  ;;  %s4978_s2 = sld [smem:[#allocation34_spill]] }
  0xdc   : > { %s4980_s22 = sld [smem:[#allocation36_spill]] }
  0xdd   : > { %s4982_s7 = sld [smem:[#allocation38_spill]] }
 0x151   : > { %v1100_v9 = vpop.f32.mrf.mxu0 }
 0x152   : > { %v4636_v10 = vadd.f32 %v3775_v7, %v1100_v9  ;;  %v3778_v9 = vld [vmem:[%s4288_s25 + $0x1] ss:$0 sm:$0xff] }
 0x153   : > { %v1170_v11 = vpop.f32.mrf.mxu1 }
 0x154   : > { %v1171_v12 = vadd.f32 %v3776_v8, %v1170_v11  ;;  %v4639_v13 = vmul.f32 0.70710677, %v4636_v10  ;;  %v1103_v0 = vmul.f32 0.5, %v4636_v10  ;;  %v3777_v8 = vld [vmem:[%s4278_s17 + $0x1] ss:$0 sm:$0xff] }
 0x156   : > { %v1173_v14 = vsub.f32 0.0, %v1171_v12  ;;  %v1105_v15 = vand.u32 2147483647, %v4639_v13  ;;  %vm1138_vm10 = vcmp.lt.f32.partialorder %v4639_v13, 0.0 }
 0x158   : > { %v1174_v16 = vmul.f32 1.442695, %v1173_v14  ;;  %v1106_v17 = vmul.f32 0.3275911, %v1105_v15  ;;  %v1132_v37 = vsub.f32 0.0, %v1105_v15 }
 0x15a   : > { %v1107_v18 = vadd.f32 1.0, %v1106_v17  ;;  %3823 = vpow2.f32 %v1174_v16  ;;  %v1133_v41 = vmul.f32 %v1132_v37, %v1105_v15 }
 0x15c   : > { %3825 = vrcp.f32 %v1107_v18  ;;  %v1119_v24 = vand.u32 2147483648, %v1107_v18  ;;  %v1117_v26 = vand.u32 2147483647, %v1107_v18  ;;  %vm1113_vm3 = vweird.f32 %v1107_v18 }
 0x15d   : > { %v1134_v45 = vmul.f32 1.442695, %v1133_v41 }
 0x15e   : > { %v1120_v32 = vor.u32 1.1754944e-38, %v1119_v24  ;;  %vm1118_vm5 = vcmp.eq.f32.partialorder %v1117_v26, 8.507059e+37 }
 0x160   : > { %v3824_v19 = vpop.eup %3823 }
 0x161   : > { %v1176_v22 = vadd.f32 1.0, %v3824_v19 }
 0x162   : > { %v3826_v20 = vpop.eup %3825 }
 0x163   : > { %v1109_v21 = vmul.f32 %v3826_v20, %v1107_v18  ;;  %vm1114_vm2 = vweird.f32 %v3826_v20  ;;  %3827 = vrcp.f32 %v1176_v22  ;;  %vm1182_vm6 = vweird.f32 %v1176_v22 }
 0x164   : > { %vm1115_vm4 = vmor %vm1113_vm3, %vm1114_vm2  ;;  %3829 = vpow2.f32 %v1134_v45  ;;  %v1188_v52 = vand.u32 2147483648, %v1176_v22  ;;  %v1186_v54 = vand.u32 2147483647, %v1176_v22 }
 0x165   : > { %v1110_v23 = vsub.f32 1.0, %v1109_v21 }
 0x166   : > { %v1189_v58 = vor.u32 1.1754944e-38, %v1188_v52  ;;  %vm1187_vm9 = vcmp.eq.f32.partialorder %v1186_v54, 8.507059e+37 }
 0x167   : > { %v1111_v25 = vmul.f32 %v3826_v20, %v1110_v23 }
 0x169   : > { %v1112_v30 = vadd.f32 %v3826_v20, %v1111_v25  ;;  %v3828_v38 = vpop.eup %3827 }
 0x16a   : > { %v1178_v42 = vmul.f32 %v3828_v38, %v1176_v22  ;;  %vm1183_vm7 = vweird.f32 %v3828_v38  ;;  %v3830_v56 = vpop.eup %3829 }
 0x16b   : > { %v1116_v35 = vsel %vm1115_vm4, %v3826_v20, %v1112_v30  ;;  %vm1184_vm8 = vmor %vm1182_vm6, %vm1183_vm7 }
 0x16c   : > { %v1121_v36 = vsel %vm1118_vm5, %v1120_v32, %v1116_v35  ;;  %v1179_v46 = vsub.f32 1.0, %v1178_v42 }
 0x16d   : > { %v1123_v39 = vmul.f32 1.0614054, %v1121_v36 }
 0x16e   : > { %v1180_v49 = vmul.f32 %v3828_v38, %v1179_v46 }
 0x16f   : > { %v1124_v40 = vadd.f32 -1.4531521, %v1123_v39 }
 0x170   : > { %v1181_v53 = vadd.f32 %v3828_v38, %v1180_v49 }
 0x171   : > { %v1125_v43 = vmul.f32 %v1124_v40, %v1121_v36 }
 0x172   : > { %v1185_v59 = vsel %vm1184_vm8, %v3828_v38, %v1181_v53 }
 0x173   : > { %v1126_v44 = vadd.f32 1.4214138, %v1125_v43  ;;  %v1190_v62 = vsel %vm1187_vm9, %v1189_v58, %v1185_v59 }
 0x174   : > { %v1193_v2 = vsub.f32 1.0, %v1190_v62 }
 0x175   : > { %v1127_v47 = vmul.f32 %v1126_v44, %v1121_v36 }
 0x176   : > { %v1194_v6 = vmul.f32 %v1193_v2, %v4627_v5 }
 0x177   : > { %v1128_v48 = vadd.f32 -0.28449672, %v1127_v47 }
 0x179   : > { %v1129_v50 = vmul.f32 %v1128_v48, %v1121_v36 }
 0x17b   : > { %v1130_v51 = vadd.f32 0.2548296, %v1129_v50 }
 0x17d   : > { %v1131_v55 = vmul.f32 %v1130_v51, %v1121_v36 }
 0x17f   : > { %v1136_v57 = vmul.f32 %v3830_v56, %v1131_v55 }
 0x181   : > { %v1137_v60 = vsub.f32 1.0, %v1136_v57 }
 0x183   : > { %v1139_v61 = vsub.f32 0.0, %v1137_v60 }
 0x185   : > { %v1140_v63 = vsel %vm1138_vm10, %v1139_v61, %v1137_v60 }
 0x186   : > { %v1141_v1 = vadd.f32 1.0, %v1140_v63 }
 0x188   : > { %v1142_v3 = vmul.f32 %v1141_v1, %v1103_v0 }
 0x18a   : > { %v1192_v4 = vmul.f32 %v1190_v62, %v1142_v3 }
 0x18c   : > { %v4647_v7 = vadd.f32 %v1194_v6, %v1192_v4  ;;  %v3779_v4 = vld [vmem:[%s4298_s3] ss:$0 sm:$0xff] }
 0x18e   : > { %3493 = vmatmul.msk.f32.vlgmr.msra.gmra.mxu2 %vm1075_vm1, %v4647_v7  ;;  %3496 = vmatmul.msk.f32.vlgmr.msra.gmra.mxu3 %vm1075_vm1, %v4647_v7 }
 0x211   : > { %v1228_v11 = vpop.f32.mrf.mxu2  ;;  %v1300_v12 = vpop.f32.mrf.mxu3 }
 0x212   : > { %v4655_v13 = vadd.f32 %v3777_v8, %v1228_v11  ;;  %v1301_v10 = vadd.f32 %v3778_v9, %v1300_v12  ;;  %v1359_v8 = vld [vmem:[%s4966_s18] sm:$0xff]  ;;  %s4979_s18 = sld [smem:[#allocation35_spill]] }
 0x214   : > { %v4658_v14 = vmul.f32 0.70710677, %v4655_v13  ;;  %v1303_v15 = vsub.f32 0.0, %v1301_v10  ;;  %v1231_v61 = vmul.f32 0.5, %v4655_v13  ;;  %v4254_v10 = vmov 20.0  }
 0x216   : > { %v1233_v5 = vand.u32 2147483647, %v4658_v14  ;;  %v1304_v16 = vmul.f32 1.442695, %v1303_v15  ;;  %vm1266_vm5 = vcmp.lt.f32.partialorder %v4658_v14, 0.0 }
 0x218   : > { %v1234_v17 = vmul.f32 0.3275911, %v1233_v5  ;;  %3831 = vpow2.f32 %v1304_v16  ;;  %v1260_v34 = vsub.f32 0.0, %v1233_v5 }
 0x21a   : > { %v1235_v18 = vadd.f32 1.0, %v1234_v17  ;;  %v1261_v38 = vmul.f32 %v1260_v34, %v1233_v5  ;;  %v3781_v34 = vld [vmem:[%s4968_s23] ss:$0 sm:$0xff]  ;;  %s4981_s23 = sld [smem:[#allocation37_spill]] }
 0x21c   : > { %3833 = vrcp.f32 %v1235_v18  ;;  %v1247_v24 = vand.u32 2147483648, %v1235_v18  ;;  %v1245_v26 = vand.u32 2147483647, %v1235_v18  ;;  %vm1241_vm12 = vweird.f32 %v1235_v18 }
 0x21d   : > { %v1262_v42 = vmul.f32 1.442695, %v1261_v38 }
 0x21e   : > { %v3832_v19 = vpop.eup %3831  ;;  %v1248_v30 = vor.u32 1.1754944e-38, %v1247_v24  ;;  %vm1246_vm14 = vcmp.eq.f32.partialorder %v1245_v26, 8.507059e+37 }
 0x21f   : > { %v1306_v22 = vadd.f32 1.0, %v3832_v19 }
 0x221   : > { %3835 = vrcp.f32 %v1306_v22  ;;  %v1318_v51 = vand.u32 2147483648, %v1306_v22  ;;  %vm1312_vm2 = vweird.f32 %v1306_v22  ;;  %v1316_v53 = vand.u32 2147483647, %v1306_v22 }
 0x222   : > { %v3834_v20 = vpop.eup %3833  ;;  %3837 = vpow2.f32 %v1262_v42 }
 0x223   : > { %v1237_v21 = vmul.f32 %v3834_v20, %v1235_v18  ;;  %vm1242_vm11 = vweird.f32 %v3834_v20  ;;  %v1319_v57 = vor.u32 1.1754944e-38, %v1318_v51  ;;  %vm1317_vm4 = vcmp.eq.f32.partialorder %v1316_v53, 8.507059e+37  ;;  %v1496_v51 = vld [vmem:[#allocation10] sm:$0xff]  ;;  %v1628_v53 = vld [vmem:[#allocation9 + $0x28] sm:$0xf] }
 0x224   : > { %vm1243_vm13 = vmor %vm1241_vm12, %vm1242_vm11  ;;  %3839 = vrcp.f32 %v4254_v10 }
 0x225   : > { %v1238_v23 = vsub.f32 1.0, %v1237_v21 }
 0x227   : > { %v1239_v25 = vmul.f32 %v3834_v20, %v1238_v23  ;;  %v3836_v35 = vpop.eup %3835 }
 0x228   : > { %v1308_v39 = vmul.f32 %v3836_v35, %v1306_v22  ;;  %vm1313_vm15 = vweird.f32 %v3836_v35  ;;  %v3838_v52 = vpop.eup %3837 }
 0x229   : > { %v1240_v29 = vadd.f32 %v3834_v20, %v1239_v25  ;;  %vm1314_vm3 = vmor %vm1312_vm2, %vm1313_vm15  ;;  %vm1754_vm15 = vcmask 1044480  }
 0x22a   : > { %v1309_v43 = vsub.f32 1.0, %v1308_v39  ;;  %v3840_v13 = vpop.eup %3839 }
 0x22b   : > { %v1244_v32 = vsel %vm1243_vm13, %v3834_v20, %v1240_v29  ;;  %v1367_v14 = vmul.f32 20.0, %v3840_v13  ;;  %vm1371_vm6 = vweird.f32 %v3840_v13  ;;  %vm1529_vm13 = vcmask 39936  }
 0x22c   : > { %v1249_v33 = vsel %vm1246_vm14, %v1248_v30, %v1244_v32  ;;  %v1310_v46 = vmul.f32 %v3836_v35, %v1309_v43  ;;  %v1434_v43 = vld [vmem:[#allocation7 + $0x10] sm:$0xf]  ;;  %vm1556_vm14 = vcmask 64512  }
 0x22d   : > { %v1251_v36 = vmul.f32 1.0614054, %v1249_v33  ;;  %v1368_v15 = vsub.f32 1.0, %v1367_v14  ;;  %3499 = vmatpush.msk.msrb.mxu1 %vm1079_vm0, %v1434_v43  ;;  %v3786_v14 = vld [vmem:[%s4974_s1] ss:$0 sm:$0xff] }
 0x22e   : > { %v1311_v49 = vadd.f32 %v3836_v35, %v1310_v46  ;;  %v1433_v46 = vld [vmem:[#allocation7 + $0x8] sm:$0xff]  ;;  %v1807_v43 = vld [vmem:[#allocation7 + $0x40] sm:$0xf] }
 0x22f   : > { %v1252_v37 = vadd.f32 -1.4531521, %v1251_v36  ;;  %v1369_v5 = vmul.f32 %v3840_v13, %v1368_v15  ;;  %1459 = vmatpush.msrb.mxu1 %v1433_v46 }
 0x230   : > { %v1315_v55 = vsel %vm1314_vm3, %v3836_v35, %v1311_v49  ;;  %v1432_v49 = vld [vmem:[#allocation7] sm:$0xff] }
 0x231   : > { %v1253_v40 = vmul.f32 %v1252_v37, %v1249_v33  ;;  %v1320_v59 = vsel %vm1317_vm4, %v1319_v57, %v1315_v55  ;;  %v1370_v16 = vadd.f32 %v3840_v13, %v1369_v5  ;;  %1460 = vmatpush.msrb.mxu1 %v1432_v49  ;;  %v1627_v55 = vld [vmem:[#allocation9 + $0x20] sm:$0xff]  ;;  %v1593_v57 = vld [vmem:[#allocation7 + $0x18] sm:$0xff] }
 0x232   : > { %v1323_v63 = vsub.f32 1.0, %v1320_v59  ;;  %v1591_v49 = vld [vmem:[#allocation12] sm:$0x1f] }
 0x233   : > { %v1254_v41 = vadd.f32 1.4214138, %v1253_v40 }
 0x234   : > { %v1324_v2 = vmul.f32 %v1323_v63, %v4647_v7  ;;  %v4672_v7 = vsel %vm1371_vm6, %v3840_v13, %v1370_v16  ;;  %v3785_v13 = vld [vmem:[%s4973_s28] ss:$0 sm:$0xff] }
 0x235   : > { %v1255_v44 = vmul.f32 %v1254_v41, %v1249_v33 }
 0x237   : > { %v1256_v45 = vadd.f32 -0.28449672, %v1255_v44  ;;  %v1468_v44 = vld [vmem:[#allocation9 + $0x10] sm:$0xf] }
 0x238   : > { %3501 = vmatpush.msk.msrb.mxu2 %vm1079_vm0, %v1468_v44 }
 0x239   : > { %v1257_v47 = vmul.f32 %v1256_v45, %v1249_v33  ;;  %v1498_v45 = vld [vmem:[#allocation10 + $0x10] sm:$0xf] }
 0x23a   : > { %3503 = vmatpush.msk.msrb.mxu3 %vm1079_vm0, %v1498_v45  ;;  %v1806_v45 = vld [vmem:[#allocation7 + $0x38] sm:$0xff] }
 0x23b   : > { %v1258_v48 = vadd.f32 0.2548296, %v1257_v47  ;;  %v1467_v47 = vld [vmem:[#allocation9 + $0x8] sm:$0xff] }
 0x23c   : > { %1490 = vmatpush.msrb.mxu2 %v1467_v47  ;;  %v1805_v47 = vld [vmem:[#allocation7 + $0x30] sm:$0xff] }
 0x23d   : > { %v1259_v50 = vmul.f32 %v1258_v48, %v1249_v33  ;;  %v1497_v48 = vld [vmem:[#allocation10 + $0x8] sm:$0xff] }
 0x23e   : > { %1520 = vmatpush.msrb.mxu3 %v1497_v48 }
 0x23f   : > { %v1264_v54 = vmul.f32 %v3838_v52, %v1259_v50  ;;  %v1466_v50 = vld [vmem:[#allocation9] sm:$0xff]  ;;  %v1595_v52 = vld [vmem:[#allocation7 + $0x28] sm:$0xf] }
 0x240   : > { %1491 = vmatpush.msrb.mxu2 %v1466_v50  ;;  %1521 = vmatpush.msrb.mxu3 %v1496_v51 }
 0x241   : > { %v1265_v56 = vsub.f32 1.0, %v1264_v54  ;;  %v1594_v54 = vld [vmem:[#allocation7 + $0x20] sm:$0xff] }
 0x242   : > { %3509 = vmatpush.msk.msra.mxu2 %vm1079_vm0, %v1595_v52  ;;  %3512 = vmatpush.msk.msra.mxu3 %vm1079_vm0, %v1628_v53 }
 0x243   : > { %v1267_v58 = vsub.f32 0.0, %v1265_v56 }
 0x244   : > { %1618 = vmatpush.msra.mxu2 %v1594_v54  ;;  %1651 = vmatpush.msra.mxu3 %v1627_v55 }
 0x245   : > { %v1268_v60 = vsel %vm1266_vm5, %v1267_v58, %v1265_v56  ;;  %v1626_v58 = vld [vmem:[#allocation9 + $0x18] sm:$0xff] }
 0x246   : > { %v1269_v62 = vadd.f32 1.0, %v1268_v60  ;;  %1619 = vmatpush.msra.mxu2 %v1593_v57  ;;  %1652 = vmatpush.msra.mxu3 %v1626_v58 }
 0x248   : > { %v1270_v0 = vmul.f32 %v1269_v62, %v1231_v61 }
 0x24a   : > { %v1322_v1 = vmul.f32 %v1320_v59, %v1270_v0 }
 0x24c   : > { %v1325_v3 = vadd.f32 %v1324_v2, %v1322_v1 }
 0x24e   : > { %3498 = vmatmul.msk.f32.vlgmr.msrb.gmra.mxu0 %vm1075_vm1, %v1325_v3  ;;  %v3782_v3 = vld [vmem:[%s4969_s26] ss:$0 sm:$0xff] }
 0x2cb   : > { %v1356_v6 = vpop.f32.mrf.mxu0 }
 0x2cc   : > { %v1357_v9 = vadd.f32 %v3779_v4, %v1356_v6  ;;  %v3783_v6 = vld [vmem:[%s4970_s12] ss:$0 sm:$0xff] }
 0x2ce   : > { %v1360_v11 = vadd.f32 %v1359_v8, %v1357_v9 }
 0x2d0   : > { %v1363_v12 = vsel %vm1075_vm1, %v1360_v11, 0.0 }
 0x2d1   : > { %1364 = vadd.xlane.f32.xlu0 %v1363_v12  ;;  %v3784_v12 = vld [vmem:[%s4972_s27] ss:$0 sm:$0xff] }
 0x344   : > { %v1365_v17 = vpop.xlane.xlu0 %1364 }
 0x345   : > { %v1373_v18 = vmul.f32 %v4672_v7, %v1365_v17 }
 0x347   : > { %v1374_v19 = vsub.f32 %v1360_v11, %v1373_v18  ;;  %v1660_v18 = vld [vmem:[#allocation10 + $0x28] sm:$0xf] }
 0x349   : > { %v1375_v20 = vmul.f32 %v1374_v19, %v1374_v19 }
 0x34b   : > { %v1376_v21 = vsel %vm1075_vm1, %v1375_v20, 0.0 }
 0x34c   : > { %1377 = vadd.xlane.f32.xlu0 %v1376_v21  ;;  %v1659_v21 = vld [vmem:[#allocation10 + $0x20] sm:$0xff] }
 0x3bf   : > { %v1378_v22 = vpop.xlane.xlu0 %1377 }
 0x3c0   : > { %v1379_v23 = vmul.f32 %v1378_v22, %v4672_v7  ;;  %v3788_v22 = vld [vmem:[%s4973_s28 + $0x1] ss:$0 sm:$0xff] }
 0x3c2   : > { %v1380_v24 = vadd.f32 1e-12, %v1379_v23  ;;  %v1658_v23 = vld [vmem:[#allocation10 + $0x18] sm:$0xff] }
 0x3c4   : > { %3841 = vrsqrt.f32 %v1380_v24  ;;  %vm1387_vm8 = vweird.f32 %v1380_v24 }
 0x3ca   : > { %v3842_v25 = vpop.eup %3841 }
 0x3cb   : > { %v1382_v26 = vmul.f32 %v3842_v25, %v1380_v24  ;;  %vm1388_vm7 = vweird.f32 %v3842_v25 }
 0x3cc   : > { %vm1389_vm9 = vmor %vm1387_vm8, %vm1388_vm7 }
 0x3cd   : > { %v1383_v27 = vmul.f32 %v3842_v25, %v1382_v26  ;;  %v4722_v26 = vld [vmem:[%s1061_s15] ss:$0 sm:$0xff]  ;;  %s3486_s15 = sshll.u32 %s4988_s16, 3 }
 0x3cf   : > { %v1384_v28 = vmul.f32 0.5, %v1383_v27 }
 0x3d1   : > { %v1385_v29 = vsub.f32 1.5, %v1384_v28 }
 0x3d3   : > { %v1386_v30 = vmul.f32 %v3842_v25, %v1385_v29 }
 0x3d5   : > { %v1390_v32 = vsel %vm1389_vm9, %v3842_v25, %v1386_v30  ;;  %v3790_v30 = vld [vmem:[%s4974_s1 + $0x1] ss:$0 sm:$0xff] }
 0x3d6   : > { %v1391_v33 = vmul.f32 %v1390_v32, %v1374_v19 }
 0x3d8   : > { %v1395_v35 = vmul.f32 %v3780_v31, %v1391_v33 }
 0x3da   : > { %v4679_v36 = vadd.f32 %v3781_v34, %v1395_v35 }
 0x3dc   : > { %v1402_v37 = vsel %vm1075_vm1, %v4679_v36, 0.0 }
 0x3dd   : > { %1403 = vadd.xlane.f32.xlu1 %v1402_v37 }
 0x450   : > { %v1404_v38 = vpop.xlane.xlu1 %1403 }
 0x451   : > { %v1405_v39 = vmul.f32 %v1404_v38, %v4672_v7 }
 0x453   : > { %v1406_v40 = vsub.f32 %v4679_v36, %v1405_v39 }
 0x455   : > { %v1407_v41 = vmul.f32 %v1406_v40, %v1406_v40 }
 0x457   : > { %v1408_v42 = vsel %vm1075_vm1, %v1407_v41, 0.0  ;;  %v3787_v41 = vld [vmem:[%s4972_s27 + $0x1] ss:$0 sm:$0xff] }
 0x458   : > { %1409 = vadd.xlane.f32.xlu1 %v1408_v42 }
 0x4cb   : > { %v1410_v56 = vpop.xlane.xlu1 %1409 }
 0x4cc   : > { %v1411_v59 = vmul.f32 %v1410_v56, %v4672_v7 }
 0x4ce   : > { %v1412_v60 = vadd.f32 1e-12, %v1411_v59  ;;  %v1840_v59 = vld [vmem:[#allocation9 + $0x40] sm:$0xf] }
 0x4d0   : > { %3843 = vrsqrt.f32 %v1412_v60  ;;  %vm1419_vm11 = vweird.f32 %v1412_v60 }
 0x4d6   : > { %v3844_v61 = vpop.eup %3843 }
 0x4d7   : > { %v1414_v62 = vmul.f32 %v3844_v61, %v1412_v60  ;;  %vm1420_vm10 = vweird.f32 %v3844_v61  ;;  %v1839_v60 = vld [vmem:[#allocation9 + $0x38] sm:$0xff] }
 0x4d8   : > { %vm1421_vm12 = vmor %vm1419_vm11, %vm1420_vm10  ;;  %vm2292_vm10 = vcmask 261120  }
 0x4d9   : > { %v1415_v63 = vmul.f32 %v3844_v61, %v1414_v62 }
 0x4db   : > { %v1416_v0 = vmul.f32 0.5, %v1415_v63 }
 0x4dd   : > { %v1417_v1 = vsub.f32 1.5, %v1416_v0 }
 0x4df   : > { %v1418_v2 = vmul.f32 %v3844_v61, %v1417_v1  ;;  %v1750_v1 = vld [vmem:[#allocation12 + $0x8] sm:$0x1f] }
 0x4e1   : > { %v1422_v4 = vsel %vm1421_vm12, %v3844_v61, %v1418_v2  ;;  %v1838_v61 = vld [vmem:[#allocation9 + $0x30] sm:$0xff]  ;;  %v1872_v2 = vld [vmem:[#allocation10 + $0x40] sm:$0xf] }
 0x4e2   : > { %v1423_v8 = vmul.f32 %v1422_v4, %v1406_v40  ;;  %v1870_v4 = vld [vmem:[#allocation10 + $0x30] sm:$0xff] }
 0x4e4   : > { %v1427_v9 = vmul.f32 %v3782_v3, %v1423_v8  ;;  %v1871_v3 = vld [vmem:[#allocation10 + $0x38] sm:$0xff] }
 0x4e6   : > { %v4694_v11 = vadd.f32 %v3783_v6, %v1427_v9  ;;  %v1993_v6 = vld [vmem:[#allocation7 + $0x58] sm:$0xf]  ;;  %v1992_v9 = vld [vmem:[#allocation7 + $0x50] sm:$0xff] }
 0x4e8   : > { %3500 = vmatmul.msk.f32.vlgmr.msrb.gmra.mxu1 %vm1075_vm1, %v4694_v11  ;;  %3502 = vmatmul.msk.f32.vlgmr.msrb.gmra.mxu2 %vm1075_vm1, %v4694_v11 }
 0x4e9   : > { %3504 = vmatmul.msk.f32.vlgmr.msrb.gmra.mxu3 %vm1075_vm1, %v4694_v11 }
 0x4ea   : > { %3520 = vmatpush.msk.msrb.mxu3 %vm1754_vm15, %v1750_v1 }
 0x4f0   : > { %3510 = vmatmul.msk.f32.vlgmr.msra.gmra.mxu2 %vm1075_vm1, %v4694_v11 }
 0x4f1   : > { %3513 = vmatmul.msk.f32.vlgmr.msra.gmra.mxu3 %vm1075_vm1, %v4694_v11 }
 0x4f2   : > { %3531 = vmatpush.msk.msra.mxu3 %vm1079_vm0, %v1872_v2 }
 0x4f4   : > { %1895 = vmatpush.msra.mxu3 %v1871_v3 }
 0x4f6   : > { %1896 = vmatpush.msra.mxu3 %v1870_v4 }
 0x565   : > { %v1462_v10 = vpop.f32.mrf.mxu1 }
 0x566   : > { %v1463_v15 = vadd.f32 %v3784_v12, %v1462_v10  ;;  %v1991_v12 = vld [vmem:[#allocation7 + $0x48] sm:$0xff]  ;;  %v3791_v10 = vld [vmem:[%s4972_s27 + $0x2] ss:$0 sm:$0xff] }
 0x568   : > { %v1465_v20 = vmul.f32 0.4472136, %v1463_v15 }
 0x56b   : > { %v1493_v5 = vpop.f32.mrf.mxu2 }
 0x56c   : > { %v1494_v16 = vadd.f32 %v3785_v13, %v1493_v5  ;;  %v1523_v17 = vpop.f32.mrf.mxu3 }
 0x56d   : > { %v1524_v19 = vadd.f32 %v3786_v14, %v1523_v17  ;;  %v3792_v14 = vld [vmem:[%s4973_s28 + $0x2] ss:$0 sm:$0xff]  ;;  %v2026_v17 = vld [vmem:[#allocation9 + $0x58] sm:$0xf] }
 0x56e   : > { %3505 = vmatpush.xpose.msk.msra.mxu0 %vm1529_vm13, %v1494_v16 }
 0x56f   : > { %1586 = vmatpush.msra.mxu1 %v1524_v19  ;;  %v2025_v19 = vld [vmem:[#allocation9 + $0x50] sm:$0xff] }
 0x571   : > { %3506 = vmatmul.msk.f32.vlgmr.msra.gmra.mxu0 %vm1529_vm13, %v1465_v20  ;;  %v2024_v20 = vld [vmem:[#allocation9 + $0x48] sm:$0xff] }
 0x572   : > { %3515 = vmatpush.msk.msrb.mxu0 %vm1079_vm0, %v1660_v18 }
 0x573   : > { %v1621_v44 = vpop.f32.mrf.mxu2 }
 0x574   : > { %1683 = vmatpush.msrb.mxu0 %v1659_v21  ;;  %v1654_v24 = vpop.f32.mrf.mxu3  ;;  %v1622_v46 = vadd.f32 %v3787_v41, %v1621_v44  ;;  %v1962_v21 = vld [vmem:[#allocation12 + $0x10] sm:$0x1f]  ;;  %v2058_v41 = vld [vmem:[#allocation10 + $0x58] sm:$0xf] }
 0x575   : > { %v1655_v25 = vadd.f32 %v3788_v22, %v1654_v24 }
 0x576   : > { %1684 = vmatpush.msrb.mxu0 %v1658_v23  ;;  %v1624_v48 = vmul.f32 0.4472136, %v1622_v46 }
 0x577   : > { %3517 = vmatpush.xpose.msk.msrb.mxu1 %vm1529_vm13, %v1655_v25  ;;  %v3793_v25 = vld [vmem:[%s4974_s1 + $0x2] ss:$0 sm:$0xff] }
 0x578   : > { %3522 = vmatpush.msk.msra.mxu0 %vm1754_vm15, %v1591_v49 }
 0x579   : > { %3516 = vmatmul.msk.f32.vlgmr.msrb.gmra.mxu0 %vm1075_vm1, %v4694_v11 }
 0x5ee   : > { %v1553_v27 = vpop.f32.mrf.mxu0 }
 0x5ef   : > { %v1554_v28 = vadd.f32 %v4722_v26, %v1553_v27 }
 0x5f1   : > { %v1557_v29 = vsel %vm1556_vm14, %v1554_v28, -inf }
 0x5f2   : > { %1558 = vmax.xlane.f32.xlu2 %v1557_v29 }
 0x5f6   : > { %v1686_v31 = vpop.f32.mrf.mxu0 }
 0x5f7   : > { %v1687_v32 = vadd.f32 %v3790_v30, %v1686_v31 }
 0x5f9   : > { %1744 = vmatpush.msrb.mxu2 %v1687_v32  ;;  %v3794_v32 = vld [vmem:[%s4973_s28 + $0x3] ss:$0 sm:$0xff] }
 0x5fb   : > { %3528 = vmatpush.msk.msra.mxu2 %vm1079_vm0, %v1840_v59 }
 0x5fd   : > { %1863 = vmatpush.msra.mxu2 %v1839_v60 }
 0x5ff   : > { %1864 = vmatpush.msra.mxu2 %v1838_v61 }
 0x665   : > { %v1559_v33 = vpop.xlane.xlu2 %1558 }
 0x666   : > { %v1560_v34 = vsub.f32 %v1554_v28, %v1559_v33 }
 0x668   : > { %v1561_v35 = vmul.f32 1.442695, %v1560_v34 }
 0x66a   : > { %3845 = vpow2.f32 %v1561_v35 }
 0x670   : > { %v3846_v37 = vpop.eup %3845 }
 0x671   : > { %v1563_v38 = vsel %vm1556_vm14, %v3846_v37, 0.0 }
 0x672   : > { %1564 = vadd.xlane.f32.xlu2 %v1563_v38 }
 0x6e5   : > { %v1565_v39 = vpop.xlane.xlu2 %1564 }
 0x6e6   : > { %3847 = vrcp.f32 %v1565_v39 }
 0x6ec   : > { %v3848_v40 = vpop.eup %3847 }
 0x6ed   : > { %v1567_v42 = vmul.f32 %v3848_v40, %v3846_v37 }
 0x6ef   : > { %3507 = vmatmul.msk.f32.vlgmr.msra.gmra.mxu1 %vm1556_vm14, %v1567_v42  ;;  %v2057_v42 = vld [vmem:[#allocation10 + $0x50] sm:$0xff] }
 0x6f0   : > { %3525 = vmatpush.msk.msra.mxu1 %vm1079_vm0, %v1807_v43  ;;  %v2056_v43 = vld [vmem:[#allocation10 + $0x48] sm:$0xff] }
 0x6f2   : > { %1830 = vmatpush.msra.mxu1 %v1806_v45 }
 0x6f4   : > { %1831 = vmatpush.msra.mxu1 %v1805_v47  ;;  %v3795_v47 = vld [vmem:[%s4972_s27 + $0x3] ss:$0 sm:$0xff] }
 0x6f7   : > { %3518 = vmatmul.msk.f32.vlgmr.msrb.gmra.mxu1 %vm1529_vm13, %v1624_v48 }
 0x6ff   : > { %3526 = vmatmul.msk.f32.vlgmr.msra.gmra.mxu1 %vm1075_vm1, %v4694_v11 }
 0x76c   : > { %v1588_v50 = vpop.f32.mrf.mxu1 }
 0x76d   : > { %3523 = vmatmul.msk.f32.vlgmr.msra.gmra.mxu0 %vm1529_vm13, %v1588_v50 }
 0x774   : > { %v1712_v51 = vpop.f32.mrf.mxu1 }
 0x775   : > { %v1713_v52 = vadd.f32 %v4722_v26, %v1712_v51  ;;  %v3796_v51 = vld [vmem:[%s4974_s1 + $0x3] ss:$0 sm:$0xff] }
 0x777   : > { %v1715_v53 = vsel %vm1556_vm14, %v1713_v52, -inf }
 0x778   : > { %1716 = vmax.xlane.f32.xlu0 %v1715_v53 }
 0x77c   : > { %v1833_v13 = vpop.f32.mrf.mxu1 }
 0x77d   : > { %v1834_v15 = vadd.f32 %v3791_v10, %v1833_v13 }
 0x77f   : > { %v1836_v18 = vmul.f32 0.4472136, %v1834_v15 }
 0x7ea   : > { %v1801_v22 = vpop.f32.mrf.mxu0 }
 0x7eb   : > { %v1717_v54 = vpop.xlane.xlu0 %1716 }
 0x7ec   : > { %v1718_v55 = vsub.f32 %v1713_v52, %v1717_v54 }
 0x7ee   : > { %v1719_v56 = vmul.f32 1.442695, %v1718_v55 }
 0x7f0   : > { %3849 = vpow2.f32 %v1719_v56 }
 0x7f6   : > { %v3850_v57 = vpop.eup %3849 }
 0x7f7   : > { %v1721_v58 = vsel %vm1556_vm14, %v3850_v57, 0.0 }
 0x7f8   : > { %1722 = vadd.xlane.f32.xlu1 %v1721_v58 }
 0x86b   : > { %v1723_v62 = vpop.xlane.xlu1 %1722 }
 0x86c   : > { %3851 = vrcp.f32 %v1723_v62 }
 0x872   : > { %v3852_v63 = vpop.eup %3851 }
 0x873   : > { %v1725_v0 = vmul.f32 %v3852_v63, %v3850_v57 }
 0x875   : > { %3519 = vmatmul.msk.f32.vlgmr.msrb.gmra.mxu2 %vm1556_vm14, %v1725_v0  ;;  %v2148_v0 = vld [vmem:[#allocation12 + $0x18] sm:$0x1f] }
 0x876   : > { %3536 = vmatpush.msk.msrb.mxu2 %vm1754_vm15, %v1962_v21 }
 0x87d   : > { %3529 = vmatmul.msk.f32.vlgmr.msra.gmra.mxu2 %vm1075_vm1, %v4694_v11 }
 0x8f8   : > { %v1746_v8 = vpop.f32.mrf.mxu2 }
 0x8f9   : > { %3521 = vmatmul.msk.f32.vlgmr.msrb.gmra.mxu3 %vm1529_vm13, %v1746_v8 }
 0x8fa   : > { %3539 = vmatpush.msk.msrb.mxu3 %vm1079_vm0, %v1993_v6 }
 0x8fc   : > { %2016 = vmatpush.msrb.mxu3 %v1992_v9  ;;  %v3797_v9 = vld [vmem:[%s4975_s13] ss:$0 sm:$0xff] }
 0x8fe   : > { %2017 = vmatpush.msrb.mxu3 %v1991_v12 }
 0x900   : > { %v1866_v5 = vpop.f32.mrf.mxu2 }
 0x901   : > { %v1867_v16 = vadd.f32 %v3792_v14, %v1866_v5  ;;  %3532 = vmatmul.msk.f32.vlgmr.msra.gmra.mxu3 %vm1075_vm1, %v4694_v11 }
 0x903   : > { %3533 = vmatpush.xpose.msk.msrb.mxu0 %vm1529_vm13, %v1867_v16 }
 0x906   : > { %3534 = vmatmul.msk.f32.vlgmr.msrb.gmra.mxu0 %vm1529_vm13, %v1836_v18  ;;  %v2186_v18 = vld [vmem:[#allocation13 + $0x10] sm:$0xf] }
 0x907   : > { %3542 = vmatpush.msk.msra.mxu0 %vm1079_vm0, %v2026_v17 }
 0x909   : > { %2049 = vmatpush.msra.mxu0 %v2025_v19  ;;  %3540 = vmatmul.msk.f32.vlgmr.msrb.gmra.mxu3 %vm1075_vm1, %v4694_v11  ;;  %v2185_v19 = vld [vmem:[#allocation13 + $0x8] sm:$0xff] }
 0x90b   : > { %2050 = vmatpush.msra.mxu0 %v2024_v20 }
 0x90d   : > { %3550 = vmatpush.msk.msrb.mxu0 %vm1754_vm15, %v2148_v0 }
 0x90e   : > { %3543 = vmatmul.msk.f32.vlgmr.msra.gmra.mxu0 %vm1075_vm1, %v4694_v11 }
 0x97c   : > { %v1775_v23 = vpop.f32.mrf.mxu3 }
 0x97d   : > { %v1802_v24 = vadd.f32 %v1801_v22, %v1775_v23 }
 0x983   : > { %v1924_v27 = vpop.f32.mrf.mxu0 }
 0x984   : > { %v1925_v28 = vadd.f32 %v4722_v26, %v1924_v27  ;;  %v1898_v29 = vpop.f32.mrf.mxu3 }
 0x985   : > { %v1899_v30 = vadd.f32 %v3793_v25, %v1898_v29 }
 0x986   : > { %v1927_v31 = vsel %vm1556_vm14, %v1925_v28, -inf }
 0x987   : > { %1928 = vmax.xlane.f32.xlu2 %v1927_v31  ;;  %1956 = vmatpush.msrb.mxu1 %v1899_v30  ;;  %v3798_v30 = vld [vmem:[%s4976_s14] ss:$0 sm:$0xff] }
 0x989   : > { %3545 = vmatpush.msk.msra.mxu1 %vm1079_vm0, %v2058_v41 }
 0x98b   : > { %v2052_v33 = vpop.f32.mrf.mxu0  ;;  %2081 = vmatpush.msra.mxu1 %v2057_v42 }
 0x98c   : > { %v2053_v34 = vadd.f32 %v3794_v32, %v2052_v33  ;;  %v2019_v48 = vpop.f32.mrf.mxu3  ;;  %v3799_v33 = vld [vmem:[%s4977_s8] ss:$0 sm:$0xff] }
 0x98d   : > { %2082 = vmatpush.msra.mxu1 %v2056_v43  ;;  %v2020_v50 = vadd.f32 %v3795_v47, %v2019_v48  ;;  %v2190_v48 = vld [vmem:[#allocation15 + $0x10] sm:$0xff] }
 0x98e   : > { %3547 = vmatpush.xpose.msk.msra.mxu2 %vm1529_vm13, %v2053_v34 }
 0x98f   : > { %v2022_v52 = vmul.f32 0.4472136, %v2020_v50 }
 0x9fa   : > { %v1929_v35 = vpop.xlane.xlu2 %1928 }
 0x9fb   : > { %v1930_v37 = vsub.f32 %v1925_v28, %v1929_v35 }
 0x9fd   : > { %v1931_v38 = vmul.f32 1.442695, %v1930_v37  ;;  %v3800_v37 = vld [vmem:[%s4978_s2] ss:$0 sm:$0xff] }
 0x9ff   : > { %3853 = vpow2.f32 %v1931_v38 }
 0xa05   : > { %v3854_v39 = vpop.eup %3853 }
 0xa06   : > { %v1933_v40 = vsel %vm1556_vm14, %v3854_v39, 0.0 }
 0xa07   : > { %1934 = vadd.xlane.f32.xlu0 %v1933_v40 }
 0xa7a   : > { %v1935_v44 = vpop.xlane.xlu0 %1934 }
 0xa7b   : > { %3855 = vrcp.f32 %v1935_v44 }
 0xa81   : > { %v3856_v45 = vpop.eup %3855 }
 0xa82   : > { %v1937_v46 = vmul.f32 %v3856_v45, %v3854_v39 }
 0xa84   : > { %3535 = vmatmul.msk.f32.vlgmr.msrb.gmra.mxu1 %vm1556_vm14, %v1937_v46  ;;  %v2191_v46 = vld [vmem:[#allocation15 + $0x18] sm:$0xff] }
 0xa85   : > { %3552 = vmatpush.msk.msrb.mxu1 %vm1079_vm0, %v2186_v18 }
 0xa87   : > { %2246 = vmatpush.msrb.mxu1 %v2185_v19 }
 0xa8c   : > { %3546 = vmatmul.msk.f32.vlgmr.msra.gmra.mxu1 %vm1075_vm1, %v4694_v11 }
 0xb01   : > { %v1958_v49 = vpop.f32.mrf.mxu1 }
 0xb02   : > { %3537 = vmatmul.msk.f32.vlgmr.msrb.gmra.mxu2 %vm1529_vm13, %v1958_v49 }
 0xb03   : > { %2308 = vmatpush.msrb.mxu2 %v2191_v46 }
 0xb05   : > { %2309 = vmatpush.msrb.mxu2 %v2190_v48 }
 0xb09   : > { %v2084_v53 = vpop.f32.mrf.mxu1 }
 0xb0a   : > { %v2085_v54 = vadd.f32 %v3796_v51, %v2084_v53  ;;  %3548 = vmatmul.msk.f32.vlgmr.msra.gmra.mxu2 %vm1529_vm13, %v2022_v52  ;;  %v2189_v52 = vld [vmem:[#allocation15 + $0x8] sm:$0xff]  ;;  %v2188_v53 = vld [vmem:[#allocation15] sm:$0xff] }
 0xb0b   : > { %2310 = vmatpush.msrb.mxu2 %v2189_v52  ;;  %v3803_v52 = vld [vmem:[%s4970_s12 + $0x1] ss:$0 sm:$0xff] }
 0xb0c   : > { %2142 = vmatpush.msra.mxu3 %v2085_v54 }
 0xb0d   : > { %2311 = vmatpush.msrb.mxu2 %v2188_v53 }
 0xb85   : > { %v1986_v55 = vpop.f32.mrf.mxu2 }
 0xb86   : > { %v1989_v56 = vadd.f32 %v1986_v55, %v1802_v24 }
 0xb8d   : > { %v2110_v57 = vpop.f32.mrf.mxu2 }
 0xb8e   : > { %v2111_v58 = vadd.f32 %v4722_v26, %v2110_v57 }
 0xb90   : > { %v2113_v11 = vsel %vm1556_vm14, %v2111_v58, -inf }
 0xb91   : > { %2114 = vmax.xlane.f32.xlu1 %v2113_v11 }
 0xc04   : > { %v2115_v59 = vpop.xlane.xlu1 %2114 }
 0xc05   : > { %v2116_v60 = vsub.f32 %v2111_v58, %v2115_v59 }
 0xc07   : > { %v2117_v61 = vmul.f32 1.442695, %v2116_v60 }
 0xc09   : > { %3857 = vpow2.f32 %v2117_v61 }
 0xc0f   : > { %v3858_v62 = vpop.eup %3857 }
 0xc10   : > { %v2119_v63 = vsel %vm1556_vm14, %v3858_v62, 0.0 }
 0xc11   : > { %2120 = vadd.xlane.f32.xlu2 %v2119_v63 }
 0xc84   : > { %v2121_v1 = vpop.xlane.xlu2 %2120 }
 0xc85   : > { %3859 = vrcp.f32 %v2121_v1 }
 0xc8b   : > { %v3860_v2 = vpop.eup %3859 }
 0xc8c   : > { %v2123_v3 = vmul.f32 %v3860_v2, %v3858_v62 }
 0xc8e   : > { %3549 = vmatmul.msk.f32.vlgmr.msra.gmra.mxu3 %vm1556_vm14, %v2123_v3 }
 0xd11   : > { %v2144_v4 = vpop.f32.mrf.mxu3 }
 0xd12   : > { %3551 = vmatmul.msk.f32.vlgmr.msrb.gmra.mxu0 %vm1529_vm13, %v2144_v4 }
 0xd8f   : > { %v2172_v6 = vpop.f32.mrf.mxu0 }
 0xd90   : > { %v2175_v8 = vadd.f32 %v2172_v6, %v1989_v56 }
 0xd92   : > { %v2176_v12 = vadd.f32 %v2175_v8, %v4679_v36  ;;  %v2184_v36 = vld [vmem:[#allocation13] sm:$0xff] }
 0xd93   : > { %2247 = vmatpush.msrb.mxu1 %v2184_v36 }
 0xd94   : > { %v4781_v10 = vadd.f32 %v3797_v9, %v2176_v12 }
 0xd96   : > { %v2193_v13 = vsel %vm1075_vm1, %v4781_v10, 0.0 }
 0xd97   : > { %2194 = vadd.xlane.f32.xlu0 %v2193_v13 }
 0xe0a   : > { %v2195_v14 = vpop.xlane.xlu0 %2194 }
 0xe0b   : > { %v2196_v15 = vmul.f32 %v2195_v14, %v4672_v7 }
 0xe0d   : > { %v2197_v5 = vsub.f32 %v4781_v10, %v2196_v15 }
 0xe0f   : > { %v2198_v16 = vmul.f32 %v2197_v5, %v2197_v5 }
 0xe11   : > { %v2199_v17 = vsel %vm1075_vm1, %v2198_v16, 0.0  ;;  %v3801_v16 = vld [vmem:[%s4979_s18] ss:$0 sm:$0xff] }
 0xe12   : > { %2200 = vadd.xlane.f32.xlu1 %v2199_v17 }
 0xe85   : > { %v2201_v20 = vpop.xlane.xlu1 %2200 }
 0xe86   : > { %v2202_v21 = vmul.f32 %v2201_v20, %v4672_v7 }
 0xe88   : > { %v2203_v22 = vadd.f32 1e-12, %v2202_v21 }
 0xe8a   : > { %3861 = vrsqrt.f32 %v2203_v22  ;;  %vm2210_vm3 = vweird.f32 %v2203_v22 }
 0xe90   : > { %v3862_v23 = vpop.eup %3861 }
 0xe91   : > { %v2205_v24 = vmul.f32 %v3862_v23, %v2203_v22  ;;  %vm2211_vm2 = vweird.f32 %v3862_v23 }
 0xe92   : > { %vm2212_vm4 = vmor %vm2210_vm3, %vm2211_vm2 }
 0xe93   : > { %v2206_v25 = vmul.f32 %v3862_v23, %v2205_v24 }
 0xe95   : > { %v2207_v27 = vmul.f32 0.5, %v2206_v25  ;;  %v2358_v25 = vld [vmem:[#allocation7 + $0x70] sm:$0xf] }
 0xe96   : > { %3558 = vmatpush.msk.msrb.mxu3 %vm1079_vm0, %v2358_v25  ;;  %v2731_v25 = vld [vmem:[#allocation7 + $0xa0] sm:$0xf] }
 0xe97   : > { %v2208_v28 = vsub.f32 1.5, %v2207_v27  ;;  %v2394_v27 = vld [vmem:[#allocation9 + $0x70] sm:$0xf] }
 0xe98   : > { %3561 = vmatpush.msk.msra.mxu0 %vm1079_vm0, %v2394_v27 }
 0xe99   : > { %v2209_v29 = vmul.f32 %v3862_v23, %v2208_v28  ;;  %v2426_v28 = vld [vmem:[#allocation10 + $0x70] sm:$0xf] }
 0xe9a   : > { %3564 = vmatpush.msk.msra.mxu1 %vm1079_vm0, %v2426_v28  ;;  %v2730_v28 = vld [vmem:[#allocation7 + $0x98] sm:$0xff] }
 0xe9b   : > { %v2213_v31 = vsel %vm2212_vm4, %v3862_v23, %v2209_v29  ;;  %v2393_v29 = vld [vmem:[#allocation9 + $0x68] sm:$0xff] }
 0xe9c   : > { %v2214_v32 = vmul.f32 %v2213_v31, %v2197_v5  ;;  %2417 = vmatpush.msra.mxu0 %v2393_v29  ;;  %v2356_v31 = vld [vmem:[#allocation7 + $0x60] sm:$0xff]  ;;  %v2729_v29 = vld [vmem:[#allocation7 + $0x90] sm:$0xff] }
 0xe9e   : > { %v2218_v34 = vmul.f32 %v3798_v30, %v2214_v32  ;;  %v2425_v30 = vld [vmem:[#allocation10 + $0x68] sm:$0xff]  ;;  %v2392_v32 = vld [vmem:[#allocation9 + $0x60] sm:$0xff] }
 0xe9f   : > { %2449 = vmatpush.msra.mxu1 %v2425_v30  ;;  %2418 = vmatpush.msra.mxu0 %v2392_v32 }
 0xea0   : > { %v2222_v35 = vadd.f32 %v3799_v33, %v2218_v34  ;;  %v2424_v33 = vld [vmem:[#allocation10 + $0x60] sm:$0xff]  ;;  %v2520_v34 = vld [vmem:[#allocation7 + $0x88] sm:$0xf] }
 0xea1   : > { %2450 = vmatpush.msra.mxu1 %v2424_v33  ;;  %3570 = vmatpush.msk.msrb.mxu0 %vm1079_vm0, %v2520_v34 }
 0xea2   : > { %3553 = vmatmul.msk.f32.vlgmr.msrb.gmra.mxu1 %vm1075_vm1, %v2222_v35  ;;  %v2553_v35 = vld [vmem:[#allocation9 + $0x88] sm:$0xf] }
 0xea3   : > { %3573 = vmatpush.msk.msrb.mxu1 %vm1079_vm0, %v2553_v35 }
 0xf1f   : > { %v2249_v38 = vpop.f32.mrf.mxu1 }
 0xf20   : > { %v2250_v39 = vadd.f32 %v3800_v37, %v2249_v38  ;;  %v2519_v37 = vld [vmem:[#allocation7 + $0x80] sm:$0xff] }
 0xf21   : > { %v2552_v38 = vld [vmem:[#allocation9 + $0x80] sm:$0xff]  ;;  %2543 = vmatpush.msrb.mxu0 %v2519_v37 }
 0xf22   : > { %v2253_v40 = vmul.f32 0.70710677, %v2250_v39  ;;  %v2252_v14 = vmul.f32 0.5, %v2250_v39  ;;  %2576 = vmatpush.msrb.mxu1 %v2552_v38 }
 0xf24   : > { %v2254_v41 = vand.u32 2147483647, %v2253_v40  ;;  %vm2287_vm9 = vcmp.lt.f32.partialorder %v2253_v40, 0.0  ;;  %v2518_v40 = vld [vmem:[#allocation7 + $0x78] sm:$0xff] }
 0xf25   : > { %2544 = vmatpush.msrb.mxu0 %v2518_v40 }
 0xf26   : > { %v2255_v42 = vmul.f32 0.3275911, %v2254_v41  ;;  %v2281_v58 = vsub.f32 0.0, %v2254_v41 }
 0xf28   : > { %v2256_v43 = vadd.f32 1.0, %v2255_v42  ;;  %v2282_v60 = vmul.f32 %v2281_v58, %v2254_v41  ;;  %v2551_v41 = vld [vmem:[#allocation9 + $0x78] sm:$0xff] }
 0xf29   : > { %2577 = vmatpush.msrb.mxu1 %v2551_v41 }
 0xf2a   : > { %3863 = vrcp.f32 %v2256_v43  ;;  %v2268_v49 = vand.u32 2147483648, %v2256_v43  ;;  %v2266_v51 = vand.u32 2147483647, %v2256_v43  ;;  %vm2262_vm6 = vweird.f32 %v2256_v43 }
 0xf2b   : > { %v2283_v63 = vmul.f32 1.442695, %v2282_v60  ;;  %v2585_v60 = vld [vmem:[#allocation10 + $0x88] sm:$0xf] }
 0xf2c   : > { %v2269_v55 = vor.u32 1.1754944e-38, %v2268_v49  ;;  %vm2267_vm8 = vcmp.eq.f32.partialorder %v2266_v51, 8.507059e+37 }
 0xf2d   : > { %3865 = vpow2.f32 %v2283_v63  ;;  %v2584_v63 = vld [vmem:[#allocation10 + $0x80] sm:$0xff] }
 0xf30   : > { %v3864_v44 = vpop.eup %3863 }
 0xf31   : > { %v2258_v45 = vmul.f32 %v3864_v44, %v2256_v43  ;;  %vm2263_vm5 = vweird.f32 %v3864_v44 }
 0xf32   : > { %vm2264_vm7 = vmor %vm2262_vm6, %vm2263_vm5 }
 0xf33   : > { %v2259_v47 = vsub.f32 1.0, %v2258_v45  ;;  %v3866_v6 = vpop.eup %3865 }
 0xf35   : > { %v2260_v50 = vmul.f32 %v3864_v44, %v2259_v47 }
 0xf37   : > { %v2261_v54 = vadd.f32 %v3864_v44, %v2260_v50  ;;  %v3802_v50 = vld [vmem:[%s4969_s26 + $0x1] ss:$0 sm:$0xff] }
 0xf39   : > { %v2265_v56 = vsel %vm2264_vm7, %v3864_v44, %v2261_v54 }
 0xf3a   : > { %v2270_v57 = vsel %vm2267_vm8, %v2269_v55, %v2265_v56  ;;  %v3804_v56 = vld [vmem:[%s4973_s28 + $0x4] ss:$0 sm:$0xff] }
 0xf3b   : > { %v2272_v11 = vmul.f32 1.0614054, %v2270_v57 }
 0xf3d   : > { %v2273_v59 = vadd.f32 -1.4531521, %v2272_v11 }
 0xf3f   : > { %v2274_v61 = vmul.f32 %v2273_v59, %v2270_v57 }
 0xf41   : > { %v2275_v62 = vadd.f32 1.4214138, %v2274_v61 }
 0xf43   : > { %v2276_v0 = vmul.f32 %v2275_v62, %v2270_v57  ;;  %v3806_v62 = vld [vmem:[%s4972_s27 + $0x4] ss:$0 sm:$0xff] }
 0xf45   : > { %v2277_v1 = vadd.f32 -0.28449672, %v2276_v0  ;;  %v2583_v0 = vld [vmem:[#allocation10 + $0x78] sm:$0xff] }
 0xf47   : > { %v2278_v2 = vmul.f32 %v2277_v1, %v2270_v57 }
 0xf49   : > { %v2279_v3 = vadd.f32 0.2548296, %v2278_v2  ;;  %v3808_v2 = vld [vmem:[%s4973_s28 + $0x5] ss:$0 sm:$0xff] }
 0xf4b   : > { %v2280_v4 = vmul.f32 %v2279_v3, %v2270_v57  ;;  %v3805_v57 = vld [vmem:[%s4974_s1 + $0x4] ss:$0 sm:$0xff] }
 0xf4d   : > { %v2285_v8 = vmul.f32 %v3866_v6, %v2280_v4 }
 0xf4f   : > { %v2286_v9 = vsub.f32 1.0, %v2285_v8 }
 0xf51   : > { %v2288_v12 = vsub.f32 0.0, %v2286_v9 }
 0xf53   : > { %v2289_v13 = vsel %vm2287_vm9, %v2288_v12, %v2286_v9 }
 0xf54   : > { %v2290_v15 = vadd.f32 1.0, %v2289_v13 }
 0xf56   : > { %v2291_v5 = vmul.f32 %v2290_v15, %v2252_v14  ;;  %v3809_v14 = vld [vmem:[%s4974_s1 + $0x5] ss:$0 sm:$0xff] }
 0xf58   : > { %3554 = vmatmul.msk.f32.vlgmr.msrb.gmra.mxu2 %vm2292_vm10, %v2291_v5 }
 0xfdb   : > { %v2313_v17 = vpop.f32.mrf.mxu2 }
 0xfdc   : > { %v2316_v18 = vadd.f32 %v2313_v17, %v4781_v10  ;;  %v2357_v10 = vld [vmem:[#allocation7 + $0x68] sm:$0xff] }
 0xfdd   : > { %2384 = vmatpush.msrb.mxu3 %v2357_v10 }
 0xfde   : > { %v4797_v19 = vadd.f32 %v3801_v16, %v2316_v18 }
 0xfdf   : > { %2385 = vmatpush.msrb.mxu3 %v2356_v31  ;;  %v2516_v31 = vld [vmem:[#allocation12 + $0x20] sm:$0x1f] }
 0xfe0   : > { %v2325_v36 = vsel %vm1075_vm1, %v4797_v19, 0.0 }
 0xfe1   : > { %2326 = vadd.xlane.f32.xlu2 %v2325_v36 }
0x1054   : > { %v2327_v20 = vpop.xlane.xlu2 %2326 }
0x1055   : > { %v2328_v21 = vmul.f32 %v2327_v20, %v4672_v7 }
0x1057   : > { %v2329_v22 = vsub.f32 %v4797_v19, %v2328_v21 }
0x1059   : > { %v2330_v23 = vmul.f32 %v2329_v22, %v2329_v22 }
0x105b   : > { %v2331_v24 = vsel %vm1075_vm1, %v2330_v23, 0.0  ;;  %v3807_v23 = vld [vmem:[%s4972_s27 + $0x5] ss:$0 sm:$0xff] }
0x105c   : > { %2332 = vadd.xlane.f32.xlu0 %v2331_v24 }
0x10cf   : > { %v2333_v39 = vpop.xlane.xlu0 %2332 }
0x10d0   : > { %v2334_v42 = vmul.f32 %v2333_v39, %v4672_v7 }
0x10d2   : > { %v2335_v43 = vadd.f32 1e-12, %v2334_v42  ;;  %v2764_v42 = vld [vmem:[#allocation9 + $0xa0] sm:$0xf] }
0x10d4   : > { %3867 = vrsqrt.f32 %v2335_v43  ;;  %vm2342_vm12 = vweird.f32 %v2335_v43 }
0x10da   : > { %v3868_v44 = vpop.eup %3867 }
0x10db   : > { %v2337_v45 = vmul.f32 %v3868_v44, %v2335_v43  ;;  %vm2343_vm11 = vweird.f32 %v3868_v44  ;;  %v2763_v43 = vld [vmem:[#allocation9 + $0x98] sm:$0xff] }
0x10dc   : > { %vm2344_vm2 = vmor %vm2342_vm12, %vm2343_vm11 }
0x10dd   : > { %v2338_v46 = vmul.f32 %v3868_v44, %v2337_v45 }
0x10df   : > { %v2339_v47 = vmul.f32 0.5, %v2338_v46 }
0x10e1   : > { %v2340_v48 = vsub.f32 1.5, %v2339_v47 }
0x10e3   : > { %v2341_v49 = vmul.f32 %v3868_v44, %v2340_v48  ;;  %v2675_v48 = vld [vmem:[#allocation12 + $0x28] sm:$0x1f] }
0x10e5   : > { %v2345_v51 = vsel %vm2344_vm2, %v3868_v44, %v2341_v49  ;;  %v2762_v44 = vld [vmem:[#allocation9 + $0x90] sm:$0xff]  ;;  %v2796_v49 = vld [vmem:[#allocation10 + $0xa0] sm:$0xf] }
0x10e6   : > { %v2346_v53 = vmul.f32 %v2345_v51, %v2329_v22  ;;  %v2794_v51 = vld [vmem:[#allocation10 + $0x90] sm:$0xff] }
0x10e8   : > { %v2350_v54 = vmul.f32 %v3802_v50, %v2346_v53  ;;  %v2795_v50 = vld [vmem:[#allocation10 + $0x98] sm:$0xff] }
0x10ea   : > { %v4812_v55 = vadd.f32 %v3803_v52, %v2350_v54  ;;  %v2917_v52 = vld [vmem:[#allocation7 + $0xb8] sm:$0xf]  ;;  %v2916_v54 = vld [vmem:[#allocation7 + $0xb0] sm:$0xff] }
0x10ec   : > { %3559 = vmatmul.msk.f32.vlgmr.msrb.gmra.mxu3 %vm1075_vm1, %v4812_v55  ;;  %3562 = vmatmul.msk.f32.vlgmr.msra.gmra.mxu0 %vm1075_vm1, %v4812_v55 }
0x10ed   : > { %3565 = vmatmul.msk.f32.vlgmr.msra.gmra.mxu1 %vm1075_vm1, %v4812_v55 }
0x10ee   : > { %3581 = vmatpush.msk.msra.mxu1 %vm1754_vm15, %v2675_v48 }
0x10f4   : > { %3571 = vmatmul.msk.f32.vlgmr.msrb.gmra.mxu0 %vm1075_vm1, %v4812_v55 }
0x10f5   : > { %3574 = vmatmul.msk.f32.vlgmr.msrb.gmra.mxu1 %vm1075_vm1, %v4812_v55 }
0x10f6   : > { %3592 = vmatpush.msk.msrb.mxu1 %vm1079_vm0, %v2796_v49 }
0x10f8   : > { %2819 = vmatpush.msrb.mxu1 %v2795_v50 }
0x10fa   : > { %2820 = vmatpush.msrb.mxu1 %v2794_v51 }
0x1169   : > { %v2420_v58 = vpop.f32.mrf.mxu0 }
0x116a   : > { %v2421_v11 = vadd.f32 %v3804_v56, %v2420_v58  ;;  %v2452_v59 = vpop.f32.mrf.mxu1  ;;  %v2915_v56 = vld [vmem:[#allocation7 + $0xa8] sm:$0xff] }
0x116b   : > { %v2453_v61 = vadd.f32 %v3805_v57, %v2452_v59  ;;  %v3810_v57 = vld [vmem:[%s4972_s27 + $0x6] ss:$0 sm:$0xff] }
0x116c   : > { %3566 = vmatpush.xpose.msk.msra.mxu2 %vm1529_vm13, %v2421_v11  ;;  %v3811_v11 = vld [vmem:[%s4973_s28 + $0x6] ss:$0 sm:$0xff] }
0x116d   : > { %2510 = vmatpush.msra.mxu3 %v2453_v61 }
0x116f   : > { %v2387_v1 = vpop.f32.mrf.mxu3 }
0x1170   : > { %3576 = vmatpush.msk.msrb.mxu2 %vm1079_vm0, %v2585_v60  ;;  %v2388_v3 = vadd.f32 %v3806_v62, %v2387_v1  ;;  %v2950_v62 = vld [vmem:[#allocation9 + $0xb8] sm:$0xf]  ;;  %v2948_v1 = vld [vmem:[#allocation9 + $0xa8] sm:$0xff] }
0x1171   : > { %v2546_v27 = vpop.f32.mrf.mxu0 }
0x1172   : > { %2608 = vmatpush.msrb.mxu2 %v2584_v63  ;;  %v2390_v4 = vmul.f32 0.4472136, %v2388_v3  ;;  %v2579_v6 = vpop.f32.mrf.mxu1  ;;  %v2547_v10 = vadd.f32 %v3807_v23, %v2546_v27  ;;  %v2982_v23 = vld [vmem:[#allocation10 + $0xb8] sm:$0xf] }
0x1173   : > { %v2580_v8 = vadd.f32 %v3808_v2, %v2579_v6  ;;  %v2886_v2 = vld [vmem:[#allocation12 + $0x30] sm:$0x1f] }
0x1174   : > { %2609 = vmatpush.msrb.mxu2 %v2583_v0  ;;  %v2549_v30 = vmul.f32 0.4472136, %v2547_v10  ;;  %v2949_v0 = vld [vmem:[#allocation9 + $0xb0] sm:$0xff] }
0x1175   : > { %3567 = vmatmul.msk.f32.vlgmr.msra.gmra.mxu2 %vm1529_vm13, %v2390_v4  ;;  %3578 = vmatpush.xpose.msk.msrb.mxu3 %vm1529_vm13, %v2580_v8  ;;  %v3812_v8 = vld [vmem:[%s4974_s1 + $0x6] ss:$0 sm:$0xff] }
0x1176   : > { %3583 = vmatpush.msk.msra.mxu2 %vm1754_vm15, %v2516_v31 }
0x117d   : > { %3577 = vmatmul.msk.f32.vlgmr.msrb.gmra.mxu2 %vm1075_vm1, %v4812_v55 }
0x11f8   : > { %v2478_v9 = vpop.f32.mrf.mxu2 }
0x11f9   : > { %v2479_v12 = vadd.f32 %v4722_v26, %v2478_v9 }
0x11fb   : > { %v2481_v13 = vsel %vm1556_vm14, %v2479_v12, -inf }
0x11fc   : > { %2482 = vmax.xlane.f32.xlu1 %v2481_v13 }
0x1200   : > { %v2611_v15 = vpop.f32.mrf.mxu2 }
0x1201   : > { %v2612_v5 = vadd.f32 %v3809_v14, %v2611_v15 }
0x1203   : > { %2669 = vmatpush.msra.mxu0 %v2612_v5  ;;  %v3814_v5 = vld [vmem:[%s4973_s28 + $0x7] ss:$0 sm:$0xff] }
0x1205   : > { %3589 = vmatpush.msk.msrb.mxu0 %vm1079_vm0, %v2764_v42 }
0x1207   : > { %2787 = vmatpush.msrb.mxu0 %v2763_v43 }
0x1209   : > { %2788 = vmatpush.msrb.mxu0 %v2762_v44 }
0x126f   : > { %v2483_v16 = vpop.xlane.xlu1 %2482 }
0x1270   : > { %v2484_v17 = vsub.f32 %v2479_v12, %v2483_v16 }
0x1272   : > { %v2485_v18 = vmul.f32 1.442695, %v2484_v17 }
0x1274   : > { %3869 = vpow2.f32 %v2485_v18 }
0x127a   : > { %v3870_v36 = vpop.eup %3869 }
0x127b   : > { %v2487_v20 = vsel %vm1556_vm14, %v3870_v36, 0.0 }
0x127c   : > { %2488 = vadd.xlane.f32.xlu2 %v2487_v20 }
0x12ef   : > { %v2489_v21 = vpop.xlane.xlu2 %2488 }
0x12f0   : > { %3871 = vrcp.f32 %v2489_v21 }
0x12f6   : > { %v3872_v22 = vpop.eup %3871 }
0x12f7   : > { %v2491_v24 = vmul.f32 %v3872_v22, %v3870_v36 }
0x12f9   : > { %3568 = vmatmul.msk.f32.vlgmr.msra.gmra.mxu3 %vm1556_vm14, %v2491_v24  ;;  %v2981_v24 = vld [vmem:[#allocation10 + $0xb0] sm:$0xff] }
0x12fa   : > { %3586 = vmatpush.msk.msra.mxu3 %vm1079_vm0, %v2731_v25  ;;  %v2980_v25 = vld [vmem:[#allocation10 + $0xa8] sm:$0xff] }
0x12fc   : > { %2754 = vmatpush.msra.mxu3 %v2730_v28 }
0x12fe   : > { %2755 = vmatpush.msra.mxu3 %v2729_v29  ;;  %v3813_v29 = vld [vmem:[%s4972_s27 + $0x7] ss:$0 sm:$0xff] }
0x1301   : > { %3579 = vmatmul.msk.f32.vlgmr.msrb.gmra.mxu3 %vm1529_vm13, %v2549_v30 }
0x1309   : > { %3587 = vmatmul.msk.f32.vlgmr.msra.gmra.mxu3 %vm1075_vm1, %v4812_v55 }
0x137c   : > { %v2512_v32 = vpop.f32.mrf.mxu3 }
0x137d   : > { %3584 = vmatmul.msk.f32.vlgmr.msra.gmra.mxu2 %vm1529_vm13, %v2512_v32 }
0x1384   : > { %v2637_v33 = vpop.f32.mrf.mxu3 }
0x1385   : > { %v2638_v34 = vadd.f32 %v4722_v26, %v2637_v33  ;;  %v3815_v33 = vld [vmem:[%s4974_s1 + $0x7] ss:$0 sm:$0xff]  ;;  %s1065_s1 = scalar_lea.vmem %s4982_s7, %s3486_s15 }
0x1387   : > { %v2640_v35 = vsel %vm1556_vm14, %v2638_v34, -inf }
0x1388   : > { %2641 = vmax.xlane.f32.xlu0 %v2640_v35 }
0x138c   : > { %v2757_v58 = vpop.f32.mrf.mxu3 }
0x138d   : > { %v2758_v59 = vadd.f32 %v3810_v57, %v2757_v58 }
0x138f   : > { %v2760_v63 = vmul.f32 0.4472136, %v2758_v59 }
0x13fb   : > { %v2642_v37 = vpop.xlane.xlu0 %2641 }
0x13fc   : > { %v2643_v38 = vsub.f32 %v2638_v34, %v2642_v37 }
0x13fe   : > { %v2644_v39 = vmul.f32 1.442695, %v2643_v38 }
0x1400   : > { %3873 = vpow2.f32 %v2644_v39  ;;  %v2725_v3 = vpop.f32.mrf.mxu2 }
0x1406   : > { %v3874_v40 = vpop.eup %3873 }
0x1407   : > { %v2646_v41 = vsel %vm1556_vm14, %v3874_v40, 0.0 }
0x1408   : > { %2647 = vadd.xlane.f32.xlu1 %v2646_v41 }
0x147b   : > { %v2648_v45 = vpop.xlane.xlu1 %2647 }
0x147c   : > { %3875 = vrcp.f32 %v2648_v45 }
0x1482   : > { %v3876_v46 = vpop.eup %3875 }
0x1483   : > { %v2650_v47 = vmul.f32 %v3876_v46, %v3874_v40 }
0x1485   : > { %3580 = vmatmul.msk.f32.vlgmr.msra.gmra.mxu0 %vm1556_vm14, %v2650_v47  ;;  %v3072_v47 = vld [vmem:[#allocation12 + $0x38] sm:$0x1f] }
0x1486   : > { %3597 = vmatpush.msk.msra.mxu0 %vm1754_vm15, %v2886_v2 }
0x148d   : > { %3590 = vmatmul.msk.f32.vlgmr.msrb.gmra.mxu0 %vm1075_vm1, %v4812_v55 }
0x1502   : > { %v2671_v53 = vpop.f32.mrf.mxu0 }
0x1503   : > { %3582 = vmatmul.msk.f32.vlgmr.msra.gmra.mxu1 %vm1529_vm13, %v2671_v53  ;;  %v3816_v53 = vld [vmem:[%s4975_s13 + $0x1] ss:$0 sm:$0xff] }
0x1504   : > { %3600 = vmatpush.msk.msra.mxu1 %vm1079_vm0, %v2917_v52 }
0x1506   : > { %2940 = vmatpush.msra.mxu1 %v2916_v54 }
0x1508   : > { %2941 = vmatpush.msra.mxu1 %v2915_v56 }
0x150a   : > { %v2790_v60 = vpop.f32.mrf.mxu0 }
0x150b   : > { %v2791_v61 = vadd.f32 %v3811_v11, %v2790_v60  ;;  %3593 = vmatmul.msk.f32.vlgmr.msrb.gmra.mxu1 %vm1075_vm1, %v4812_v55 }
0x150d   : > { %3594 = vmatpush.xpose.msk.msrb.mxu2 %vm1529_vm13, %v2791_v61 }
0x1510   : > { %3595 = vmatmul.msk.f32.vlgmr.msrb.gmra.mxu2 %vm1529_vm13, %v2760_v63  ;;  %v3113_v63 = vld [vmem:[#allocation13 + $0x20] sm:$0xff] }
0x1511   : > { %3603 = vmatpush.msk.msra.mxu2 %vm1079_vm0, %v2950_v62  ;;  %v3114_v62 = vld [vmem:[#allocation13 + $0x28] sm:$0xf] }
0x1513   : > { %2973 = vmatpush.msra.mxu2 %v2949_v0  ;;  %3601 = vmatmul.msk.f32.vlgmr.msra.gmra.mxu1 %vm1075_vm1, %v4812_v55 }
0x1515   : > { %2974 = vmatpush.msra.mxu2 %v2948_v1 }
0x1517   : > { %3611 = vmatpush.msk.msrb.mxu2 %vm1754_vm15, %v3072_v47 }
0x1518   : > { %3604 = vmatmul.msk.f32.vlgmr.msra.gmra.mxu2 %vm1075_vm1, %v4812_v55 }
0x1580   : > { %v2699_v4 = vpop.f32.mrf.mxu1 }
0x1581   : > { %v2726_v6 = vadd.f32 %v2725_v3, %v2699_v4 }
0x1588   : > { %v2822_v9 = vpop.f32.mrf.mxu1 }
0x1589   : > { %v2823_v12 = vadd.f32 %v3812_v8, %v2822_v9 }
0x158b   : > { %2880 = vmatpush.msrb.mxu3 %v2823_v12 }
0x158d   : > { %3606 = vmatpush.msk.msra.mxu3 %vm1079_vm0, %v2982_v23 }
0x158f   : > { %3005 = vmatpush.msra.mxu3 %v2981_v24 }
0x1590   : > { %v2943_v30 = vpop.f32.mrf.mxu1 }
0x1591   : > { %3006 = vmatpush.msra.mxu3 %v2980_v25  ;;  %v2944_v32 = vadd.f32 %v3813_v29, %v2943_v30  ;;  %v3120_v29 = vld [vmem:[#allocation15 + $0x30] sm:$0xff] }
0x1593   : > { %v2848_v13 = vpop.f32.mrf.mxu2  ;;  %v2946_v34 = vmul.f32 0.4472136, %v2944_v32 }
0x1594   : > { %v2849_v14 = vadd.f32 %v4722_v26, %v2848_v13  ;;  %v3817_v13 = vld [vmem:[%s4976_s14 + $0x1] ss:$0 sm:$0xff] }
0x1596   : > { %v2851_v15 = vsel %vm1556_vm14, %v2849_v14, -inf }
0x1597   : > { %2852 = vmax.xlane.f32.xlu2 %v2851_v15 }
0x159b   : > { %v2976_v16 = vpop.f32.mrf.mxu2 }
0x159c   : > { %v2977_v17 = vadd.f32 %v3814_v5, %v2976_v16  ;;  %v3818_v5 = vld [vmem:[%s4977_s8 + $0x1] ss:$0 sm:$0xff] }
0x159e   : > { %3608 = vmatpush.xpose.msk.msrb.mxu0 %vm1529_vm13, %v2977_v17 }
0x160a   : > { %v2853_v18 = vpop.xlane.xlu2 %2852 }
0x160b   : > { %v2854_v36 = vsub.f32 %v2849_v14, %v2853_v18  ;;  %v3819_v18 = vld [vmem:[%s4978_s2 + $0x1] ss:$0 sm:$0xff] }
0x160d   : > { %v2855_v20 = vmul.f32 1.442695, %v2854_v36 }
0x160f   : > { %3877 = vpow2.f32 %v2855_v20 }
0x1615   : > { %v3878_v21 = vpop.eup %3877 }
0x1616   : > { %v2857_v22 = vsel %vm1556_vm14, %v3878_v21, 0.0 }
0x1617   : > { %2858 = vadd.xlane.f32.xlu0 %v2857_v22 }
0x168a   : > { %v2859_v27 = vpop.xlane.xlu0 %2858 }
0x168b   : > { %3879 = vrcp.f32 %v2859_v27 }
0x1691   : > { %v3880_v28 = vpop.eup %3879 }
0x1692   : > { %v2861_v10 = vmul.f32 %v3880_v28, %v3878_v21  ;;  %v3121_v28 = vld [vmem:[#allocation15 + $0x38] sm:$0xff] }
0x1694   : > { %3596 = vmatmul.msk.f32.vlgmr.msrb.gmra.mxu3 %vm1556_vm14, %v2861_v10 }
0x1695   : > { %3618 = vmatpush.msk.msrb.mxu3 %vm1079_vm0, %v3114_v62 }
0x1697   : > { %3177 = vmatpush.msrb.mxu3 %v3113_v63 }
0x169c   : > { %3607 = vmatmul.msk.f32.vlgmr.msra.gmra.mxu3 %vm1075_vm1, %v4812_v55 }
0x1717   : > { %v2882_v31 = vpop.f32.mrf.mxu3 }
0x1718   : > { %3598 = vmatmul.msk.f32.vlgmr.msra.gmra.mxu0 %vm1529_vm13, %v2882_v31 }
0x1719   : > { %3238 = vmatpush.msra.mxu0 %v3121_v28 }
0x171b   : > { %3239 = vmatpush.msra.mxu0 %v3120_v29 }
0x171f   : > { %v3008_v35 = vpop.f32.mrf.mxu3 }
0x1720   : > { %v3009_v37 = vadd.f32 %v3815_v33, %v3008_v35  ;;  %3609 = vmatmul.msk.f32.vlgmr.msrb.gmra.mxu0 %vm1529_vm13, %v2946_v34  ;;  %v3119_v33 = vld [vmem:[#allocation15 + $0x28] sm:$0xff]  ;;  %v3118_v34 = vld [vmem:[#allocation15 + $0x20] sm:$0xff] }
0x1721   : > { %3240 = vmatpush.msra.mxu0 %v3119_v33 }
0x1722   : > { %3066 = vmatpush.msrb.mxu1 %v3009_v37 }
0x1723   : > { %3241 = vmatpush.msra.mxu0 %v3118_v34 }
0x1795   : > { %v2910_v38 = vpop.f32.mrf.mxu0 }
0x1796   : > { %v2913_v39 = vadd.f32 %v2910_v38, %v2726_v6 }
0x179d   : > { %v3034_v40 = vpop.f32.mrf.mxu0 }
0x179e   : > { %v3035_v41 = vadd.f32 %v4722_v26, %v3034_v40 }
0x17a0   : > { %v3037_v55 = vsel %vm1556_vm14, %v3035_v41, -inf }
0x17a1   : > { %3038 = vmax.xlane.f32.xlu1 %v3037_v55 }
0x1814   : > { %v3039_v42 = vpop.xlane.xlu1 %3038 }
0x1815   : > { %v3040_v43 = vsub.f32 %v3035_v41, %v3039_v42 }
0x1817   : > { %v3041_v44 = vmul.f32 1.442695, %v3040_v43 }
0x1819   : > { %3881 = vpow2.f32 %v3041_v44 }
0x181f   : > { %v3882_v45 = vpop.eup %3881 }
0x1820   : > { %v3043_v46 = vsel %vm1556_vm14, %v3882_v45, 0.0 }
0x1821   : > { %3044 = vadd.xlane.f32.xlu2 %v3043_v46 }
0x1894   : > { %v3045_v48 = vpop.xlane.xlu2 %3044 }
0x1895   : > { %3883 = vrcp.f32 %v3045_v48 }
0x189b   : > { %v3884_v49 = vpop.eup %3883 }
0x189c   : > { %v3047_v50 = vmul.f32 %v3884_v49, %v3882_v45 }
0x189e   : > { %3610 = vmatmul.msk.f32.vlgmr.msrb.gmra.mxu1 %vm1556_vm14, %v3047_v50 }
0x191b   : > { %v3068_v26 = vpop.f32.mrf.mxu1 }
0x191c   : > { %3612 = vmatmul.msk.f32.vlgmr.msrb.gmra.mxu2 %vm1529_vm13, %v3068_v26 }
0x199f   : > { %v3096_v51 = vpop.f32.mrf.mxu2 }
0x19a0   : > { %v3099_v52 = vadd.f32 %v3096_v51, %v2913_v39 }
0x19a2   : > { %v3100_v54 = vadd.f32 %v3099_v52, %v4797_v19  ;;  %v3112_v19 = vld [vmem:[#allocation13 + $0x18] sm:$0xff] }
0x19a3   : > { %3178 = vmatpush.msrb.mxu3 %v3112_v19 }
0x19a4   : > { %v4891_v56 = vadd.f32 %v3816_v53, %v3100_v54 }
0x19a6   : > { %v3124_v57 = vsel %vm1075_vm1, %v4891_v56, 0.0 }
0x19a7   : > { %3125 = vadd.xlane.f32.xlu0 %v3124_v57 }
0x1a1a   : > { %v3126_v58 = vpop.xlane.xlu0 %3125 }
0x1a1b   : > { %v3127_v11 = vmul.f32 %v3126_v58, %v4672_v7 }
0x1a1d   : > { %v3128_v59 = vsub.f32 %v4891_v56, %v3127_v11 }
0x1a1f   : > { %v3129_v60 = vmul.f32 %v3128_v59, %v3128_v59 }
0x1a21   : > { %v3130_v61 = vsel %vm1075_vm1, %v3129_v60, 0.0 }
0x1a22   : > { %3131 = vadd.xlane.f32.xlu1 %v3130_v61 }
0x1a95   : > { %v3132_v0 = vpop.xlane.xlu1 %3131 }
0x1a96   : > { %v3133_v1 = vmul.f32 %v3132_v0, %v4672_v7 }
0x1a98   : > { %v3134_v2 = vadd.f32 1e-12, %v3133_v1 }
0x1a9a   : > { %3885 = vrsqrt.f32 %v3134_v2  ;;  %vm3141_vm0 = vweird.f32 %v3134_v2 }
0x1aa0   : > { %v3886_v3 = vpop.eup %3885 }
0x1aa1   : > { %v3136_v4 = vmul.f32 %v3886_v3, %v3134_v2  ;;  %vm3142_vm13 = vweird.f32 %v3886_v3 }
0x1aa2   : > { %vm3143_vm14 = vmor %vm3141_vm0, %vm3142_vm13 }
0x1aa3   : > { %v3137_v6 = vmul.f32 %v3886_v3, %v3136_v4 }
0x1aa5   : > { %v3138_v8 = vmul.f32 0.5, %v3137_v6 }
0x1aa7   : > { %v3139_v9 = vsub.f32 1.5, %v3138_v8 }
0x1aa9   : > { %v3140_v12 = vmul.f32 %v3886_v3, %v3139_v9 }
0x1aab   : > { %v3144_v14 = vsel %vm3143_vm14, %v3886_v3, %v3140_v12 }
0x1aac   : > { %v3145_v15 = vmul.f32 %v3144_v14, %v3128_v59  ;;  %v3820_v59 = vld [vmem:[%s4979_s18 + $0x1] ss:$0 sm:$0xff] }
0x1aae   : > { %v3149_v16 = vmul.f32 %v3817_v13, %v3145_v15 }
0x1ab0   : > { %v3153_v17 = vadd.f32 %v3818_v5, %v3149_v16  ;;  %v3821_v5 = vld [vmem:[%s4980_s22] ss:$0 sm:$0xff] }
0x1ab2   : > { %3619 = vmatmul.msk.f32.vlgmr.msrb.gmra.mxu3 %vm1075_vm1, %v3153_v17  ;;  %v3822_v17 = vld [vmem:[%s4981_s23] ss:$0 sm:$0xff] }
0x1b35   : > { %v3180_v36 = vpop.f32.mrf.mxu3 }
0x1b36   : > { %v3181_v20 = vadd.f32 %v3819_v18, %v3180_v36 }
0x1b38   : > { %v3184_v21 = vmul.f32 0.70710677, %v3181_v20  ;;  %v3183_v57 = vmul.f32 0.5, %v3181_v20 }
0x1b3a   : > { %v3185_v22 = vand.u32 2147483647, %v3184_v21  ;;  %vm3218_vm6 = vcmp.lt.f32.partialorder %v3184_v21, 0.0 }
0x1b3c   : > { %v3186_v23 = vmul.f32 0.3275911, %v3185_v22  ;;  %v3212_v40 = vsub.f32 0.0, %v3185_v22 }
0x1b3e   : > { %v3187_v24 = vadd.f32 1.0, %v3186_v23  ;;  %v3213_v42 = vmul.f32 %v3212_v40, %v3185_v22 }
0x1b40   : > { %3887 = vrcp.f32 %v3187_v24  ;;  %v3199_v30 = vand.u32 2147483648, %v3187_v24  ;;  %v3197_v32 = vand.u32 2147483647, %v3187_v24  ;;  %vm3193_vm3 = vweird.f32 %v3187_v24 }
0x1b41   : > { %v3214_v45 = vmul.f32 1.442695, %v3213_v42 }
0x1b42   : > { %v3200_v37 = vor.u32 1.1754944e-38, %v3199_v30  ;;  %vm3198_vm5 = vcmp.eq.f32.partialorder %v3197_v32, 8.507059e+37 }
0x1b43   : > { %3889 = vpow2.f32 %v3214_v45 }
0x1b46   : > { %v3888_v25 = vpop.eup %3887 }
0x1b47   : > { %v3189_v27 = vmul.f32 %v3888_v25, %v3187_v24  ;;  %vm3194_vm15 = vweird.f32 %v3888_v25 }
0x1b48   : > { %vm3195_vm4 = vmor %vm3193_vm3, %vm3194_vm15 }
0x1b49   : > { %v3190_v10 = vsub.f32 1.0, %v3189_v27  ;;  %v3890_v26 = vpop.eup %3889 }
0x1b4b   : > { %v3191_v31 = vmul.f32 %v3888_v25, %v3190_v10 }
0x1b4d   : > { %v3192_v35 = vadd.f32 %v3888_v25, %v3191_v31 }
0x1b4f   : > { %v3196_v38 = vsel %vm3195_vm4, %v3888_v25, %v3192_v35 }
0x1b50   : > { %v3201_v39 = vsel %vm3198_vm5, %v3200_v37, %v3196_v38 }
0x1b51   : > { %v3203_v41 = vmul.f32 1.0614054, %v3201_v39 }
0x1b53   : > { %v3204_v55 = vadd.f32 -1.4531521, %v3203_v41 }
0x1b55   : > { %v3205_v43 = vmul.f32 %v3204_v55, %v3201_v39 }
0x1b57   : > { %v3206_v44 = vadd.f32 1.4214138, %v3205_v43 }
0x1b59   : > { %v3207_v46 = vmul.f32 %v3206_v44, %v3201_v39 }
0x1b5b   : > { %v3208_v47 = vadd.f32 -0.28449672, %v3207_v46 }
0x1b5d   : > { %v3209_v48 = vmul.f32 %v3208_v47, %v3201_v39 }
0x1b5f   : > { %v3210_v49 = vadd.f32 0.2548296, %v3209_v48 }
0x1b61   : > { %v3211_v50 = vmul.f32 %v3210_v49, %v3201_v39 }
0x1b63   : > { %v3216_v51 = vmul.f32 %v3890_v26, %v3211_v50 }
0x1b65   : > { %v3217_v52 = vsub.f32 1.0, %v3216_v51 }
0x1b67   : > { %v3219_v53 = vsub.f32 0.0, %v3217_v52 }
0x1b69   : > { %v3220_v54 = vsel %vm3218_vm6, %v3219_v53, %v3217_v52 }
0x1b6a   : > { %v3221_v58 = vadd.f32 1.0, %v3220_v54 }
0x1b6c   : > { %v3222_v11 = vmul.f32 %v3221_v58, %v3183_v57 }
0x1b6e   : > { %3620 = vmatmul.msk.f32.vlgmr.msra.gmra.mxu0 %vm2292_vm10, %v3222_v11 }
0x1beb   : > { %v3243_v60 = vpop.f32.mrf.mxu0 }
0x1bec   : > { %v3246_v61 = vadd.f32 %v3243_v60, %v4891_v56 }
0x1bee   : > { %v3250_v62 = vadd.f32 %v3820_v59, %v3246_v61 }
0x1bf0   : > { %v3253_v63 = vsel %vm1075_vm1, %v3250_v62, 0.0 }
0x1bf1   : > { %3254 = vadd.xlane.f32.xlu2 %v3253_v63 }
0x1c64   : > { %v3255_v19 = vpop.xlane.xlu2 %3254 }
0x1c65   : > { %v3256_v0 = vmul.f32 %v3255_v19, %v4672_v7 }
0x1c67   : > { %v3257_v1 = vsub.f32 %v3250_v62, %v3256_v0 }
0x1c69   : > { %v3258_v2 = vmul.f32 %v3257_v1, %v3257_v1 }
0x1c6b   : > { %v3259_v3 = vsel %vm1075_vm1, %v3258_v2, 0.0 }
0x1c6c   : > { %3260 = vadd.xlane.f32.xlu0 %v3259_v3 }
0x1cdf   : > { %v3261_v4 = vpop.xlane.xlu0 %3260 }
0x1ce0   : > { %v3262_v6 = vmul.f32 %v3261_v4, %v4672_v7 }
0x1ce2   : > { %v3263_v8 = vadd.f32 1e-12, %v3262_v6 }
0x1ce4   : > { %3891 = vrsqrt.f32 %v3263_v8  ;;  %vm3270_vm8 = vweird.f32 %v3263_v8 }
0x1cea   : > { %v3892_v56 = vpop.eup %3891 }
0x1ceb   : > { %v3265_v9 = vmul.f32 %v3892_v56, %v3263_v8  ;;  %vm3271_vm7 = vweird.f32 %v3892_v56 }
0x1cec   : > { %vm3272_vm9 = vmor %vm3270_vm8, %vm3271_vm7 }
0x1ced   : > { %v3266_v12 = vmul.f32 %v3892_v56, %v3265_v9 }
0x1cef   : > { %v3267_v13 = vmul.f32 0.5, %v3266_v12 }
0x1cf1   : > { %v3268_v14 = vsub.f32 1.5, %v3267_v13 }
0x1cf3   : > { %v3269_v15 = vmul.f32 %v3892_v56, %v3268_v14 }
0x1cf5   : > { %v3273_v16 = vsel %vm3272_vm9, %v3892_v56, %v3269_v15 }
0x1cf6   : > { %v3274_v18 = vmul.f32 %v3273_v16, %v3257_v1 }
0x1cf8   : > { %v3278_v36 = vmul.f32 %v3821_v5, %v3274_v18 }
0x1cfa   : > { %v3282_v7 = vadd.f32 %v3822_v17, %v3278_v36 }
0x1cfc   : > { %3283 = vst.msk [vmem:[%s1065_s1] sm:$0xff] %vm1075_vm1, %v3282_v7 }
0x1cfd PF: > { %p73_p3 = scmp.ge.s32.totalorder %s4570_s19, 4   ;;  %s4983_s7 = smov %s4205_s10 }
0x1cfe   : > { %s4984_s10 = smov %s4209_s11  ;;  %s4985_s11 = smov %s4581_s0 }
0x1cff   : > { %s4986_s15 = smov %s4570_s19  ;;  %75 = sbr.rel (!%p73_p3) target bundleno = 60 (0x3c), region = 302 }
0x1d04   :  { %3303 = vsyncpa [#allocation3], 1 }
0x1d05   :  { %3305 = vsyncpa [#allocation3 + $0x1], 1 }
0x1d06   :  { %3306 = vsyncpa [#allocation5], 1 }
0x1d07   :  { %3307 = vsyncpa [#allocation8], 1 }
0x1d08   :  { %3308 = vsyncpa [#allocation11], 1 }
0x1d09   :  { %3309 = vsyncpa [#allocation14], 1 }

// kernel: _lambda_.7
= control target key start
LH: loop header
LB: loop body
LE: loop exit
PB: predicated region body
PF: predicated region fallthrough
CT: control target
= control target key end

     0   :  { %s4192_s6 = smov 1   ;;  %s4193_s10 = smov 2   ;;  %s4928_s0 = inlined_call_operand.smem [shape: u32[34], index: -1, kind: input, shape index: {}] }
   0x1   :  { %s4247_s5 = sld [smem:[%s4928_s0]]   ;;  %s4194_s14 = smov 3  }
   0x2   :  { %s4252_s9 = sld [smem:[%s4928_s0 + %s4192_s6]]   ;;  %s4195_s18 = smov 4  }
   0x3   :  { %s4257_s13 = sld [smem:[%s4928_s0 + %s4193_s10]]   ;;  %s4196_s22 = smov 5  }
   0x4   :  { %s4262_s17 = sld [smem:[%s4928_s0 + %s4194_s14]]   ;;  %s4197_s26 = smov 6  }
   0x5   :  { %s4267_s21 = sld [smem:[%s4928_s0 + %s4195_s18]]   ;;  %s4198_s30 = smov 7  }
   0x6   :  { %s4272_s25 = sld [smem:[%s4928_s0 + %s4196_s22]]   ;;  %s4199_s4 = smov 8  }
   0x7   :  { %s4277_s29 = sld [smem:[%s4928_s0 + %s4197_s26]]   ;;  %s4200_s10 = smov 9  }
   0x8   :  { %4941 = sst [smem:[#allocation24_spill]] %s4252_s9  ;;  %s4201_s15 = smov 10  }
   0x9   :  { %s4282_s3 = sld [smem:[%s4928_s0 + %s4198_s30]]   ;;  %s4202_s20 = smov 11  }
   0xa   :  { %4942 = sst [smem:[#allocation25_spill]] %s4262_s17  ;;  %s4203_s26 = smov 12  }
   0xb   :  { %s4287_s8 = sld [smem:[%s4928_s0 + %s4199_s4]]   ;;  %s4204_s1 = smov 13  }
   0xc   :  { %s4292_s14 = sld [smem:[%s4928_s0 + %s4200_s10]]   ;;  %s4205_s7 = smov 14  }
   0xd   :  { %4943 = sst [smem:[#allocation26_spill]] %s4277_s29  ;;  %s4207_s22 = smov 16  }
   0xe   :  { %s4297_s19 = sld [smem:[%s4928_s0 + %s4201_s15]]   ;;  %s4206_s15 = smov 15  }
   0xf   :  { %4944 = sst [smem:[#allocation27_spill]] %s4282_s3  ;;  %s4208_s28 = smov 17  }
  0x10   :  { %s4302_s24 = sld [smem:[%s4928_s0 + %s4202_s20]]  }
  0x11   :  { %4945 = sst [smem:[#allocation28_spill]] %s4287_s8 }
  0x12   :  { %s4307_s30 = sld [smem:[%s4928_s0 + %s4203_s26]]  }
  0x13   :  { %s4312_s6 = sld [smem:[%s4928_s0 + %s4204_s1]]  }
  0x14   :  { %4946 = sst [smem:[#allocation29_spill]] %s4297_s19 }
  0x15   :  { %s4317_s12 = sld [smem:[%s4928_s0 + %s4205_s7]]   ;;  %s4209_s7 = smov 18  }
  0x16   :  { %s4322_s20 = sld [smem:[%s4928_s0 + %s4206_s15]]   ;;  %s4210_s15 = smov 19  }
  0x17   :  { %s4327_s27 = sld [smem:[%s4928_s0 + %s4207_s22]]   ;;  %s4211_s22 = smov 20  }
  0x18   :  { %4947 = sst [smem:[#allocation30_spill]] %s4307_s30 }
  0x19   :  { %s4332_s4 = sld [smem:[%s4928_s0 + %s4208_s28]]   ;;  %s4212_s28 = smov 21  }
  0x1a   :  { %s4337_s9 = sld [smem:[%s4928_s0 + %s4209_s7]]   ;;  %s4213_s7 = smov 22  }
  0x1b   :  { %4948 = sst [smem:[#allocation31_spill]] %s4317_s12 }
  0x1c   :  { %4949 = sst [smem:[#allocation32_spill]] %s4322_s20 }
  0x1d   :  { %4950 = sst [smem:[#allocation33_spill]] %s4327_s27 }
  0x1e   :  { %s4342_s20 = sld [smem:[%s4928_s0 + %s4210_s15]]   ;;  %s4214_s15 = smov 23  }
  0x1f   :  { %4951 = sst [smem:[#allocation34_spill]] %s4332_s4 }
  0x20   :  { %4952 = sst [smem:[#allocation35_spill]] %s4337_s9 }
  0x21   :  { %s4347_s27 = sld [smem:[%s4928_s0 + %s4211_s22]]   ;;  %s4215_s22 = smov 24  }
  0x22   :  { %s4352_s12 = sld [smem:[%s4928_s0 + %s4212_s28]]   ;;  %s4216_s28 = smov 25  }
  0x23   :  { %s4357_s9 = sld [smem:[%s4928_s0 + %s4213_s7]]   ;;  %s4217_s7 = smov 26  }
  0x24   :  { %s4362_s30 = sld [smem:[%s4928_s0 + %s4214_s15]]   ;;  %s4218_s15 = smov 27  }
  0x25   :  { %s4372_s19 = sld [smem:[%s4928_s0 + %s4216_s28]]   ;;  %s4220_s28 = smov 29  }
  0x26   :  { %s4382_s8 = sld [smem:[%s4928_s0 + %s4218_s15]]   ;;  %s4222_s15 = smov 31  }
  0x27   :  { %4953 = sst [smem:[#allocation36_spill]] %s4347_s27 }
  0x28   :  { %s4367_s27 = sld [smem:[%s4928_s0 + %s4215_s22]]   ;;  %s4219_s22 = smov 28  }
  0x29   :  { %4954 = sst [smem:[#allocation37_spill]] %s4357_s9 }
  0x2a   :  { %s4377_s9 = sld [smem:[%s4928_s0 + %s4217_s7]]   ;;  %s4221_s7 = smov 30  }
  0x2b   :  { %4956 = sst [smem:[#allocation39_spill]] %s4372_s19 }
  0x2c   :  { %4958 = sst [smem:[#allocation41_spill]] %s4382_s8 }
  0x2d   :  { %s4392_s19 = sld [smem:[%s4928_s0 + %s4220_s28]]   ;;  %s4224_s28 = smov 33  }
  0x2e   :  { %4955 = sst [smem:[#allocation38_spill]] %s4367_s27 }
  0x2f   :  { %s4387_s27 = sld [smem:[%s4928_s0 + %s4219_s22]]   ;;  %s4223_s22 = smov 32  }
  0x30   :  { %4957 = sst [smem:[#allocation40_spill]] %s4377_s9 }
  0x31   :  { %s4397_s9 = sld [smem:[%s4928_s0 + %s4221_s7]]  }
  0x32   :  { %s4402_s8 = sld [smem:[%s4928_s0 + %s4222_s15]]  }
  0x33   :  { %s4412_s17 = sld [smem:[%s4928_s0 + %s4224_s28]]  }
  0x35   :  { %4959 = sst [smem:[#allocation42_spill]] %s4387_s27 }
  0x36   :  { %s4407_s27 = sld [smem:[%s4928_s0 + %s4223_s22]]  }
  0x37   :  { %4960 = sst [smem:[#allocation43_spill]] %s4397_s9 }
  0x38   :  { %4961 = sst [smem:[#allocation44_spill]] %s4402_s8 }
  0x39   :  { %4963 = sst [smem:[#allocation46_spill]] %s4412_s17 }
  0x3c   :  { %4962 = sst [smem:[#allocation45_spill]] %s4407_s27 }
  0x3d   :  { %72 = vsyncpa [#allocation3], 0 }
  0x3e   :  { %74 = vsyncpa [#allocation3 + $0x1], 0 }
  0x3f   :  { %75 = vsyncpa [#allocation5], 0 }
  0x40   :  { %76 = vsyncpa [#allocation8], 0 }
  0x41   :  { %77 = vsyncpa [#allocation11], 0 }
  0x42   :  { %78 = vsyncpa [#allocation14], 0 }
  0x43   :  { %79 = vsyncpa [#allocation17], 0  ;;  %s4414_s7 = smov 0   ;;  %s4416_s10 = smov 0  }
  0x44   :  { %s4418_s11 = smov 0   ;;  %s4420_s15 = smov 0  }
  0x45 LB: > { %s4964_s4 = sld [smem:[#allocation34_spill]]  ;;  %s4438_s16 = sadd.s32 4294967295, %s4190_s15   ;;  %s4182_s10 = sphi %s4416_s10, %s4995_s10   ;;  %s4178_s7 = sphi %s4414_s7, %s4994_s7   ;;  %s4190_s15 = sphi %s4420_s15, %s4997_s15   ;;  %s4186_s11 = sphi %s4418_s11, %s4996_s11  }
  0x46   : > { %s4965_s3 = sld [smem:[#allocation27_spill]]  ;;  %p3424_p0 = scmp.ge.s32.totalorder %s4190_s15, 1 }
  0x47   : > { %p158_p1 = scmp.eq.s32.totalorder %s4438_s16, 0  ;;  %p834_p2 = scmp.lt.s32.totalorder %s4190_s15, 3 }
  0x48   : > { %s4225_s22 = smov [#allocation4]   ;;  %s885_s26 = sshll.u32 %s4302_s24, 4  ;;  %s4456_s26 = int_to_ptr.hbm [resolvable:$true] %s885_s26 }
  0x49   : > { %p4443_p3 = pnand %p3424_p0, %p834_p2  ;;  %s853_s23 = sshll.u32 %s4225_s22, 4  ;;  %s854_s23 = int_to_ptr.vmem [resolvable:$true] %s853_s23 }
  0x4a   : > { %s4226_s2 = smov [#allocation7]  }
  0x4b   : > { %p3615_p4 = pneg %p4443_p3  ;;  %s925_s1 = sshll.u32 %s4964_s4, 4  ;;  %s4479_s1 = int_to_ptr.hbm [resolvable:$true] %s925_s1 }
  0x4c   : > { %s851_s0 = sshll.u32 %s4965_s3, 4  ;;  %s4459_s17 = sshll.u32 %s4226_s2, 4  ;;  %s4435_s0 = int_to_ptr.hbm [resolvable:$true] %s851_s0  ;;  %s888_s17 = int_to_ptr.vmem [resolvable:$true] %s4459_s17 }
  0x4d   : > { %p4452_p5 = pnand %p3615_p4, %p158_p1  ;;  %s3836_s27 = sshra.s32 %s4435_s0, 4  ;;  %s3837_s27 = int_to_ptr.hbm [resolvable:$true] %s3836_s27 }
  0x4e   : > { %s3838_s22 = scalar_lea.hbm %s3837_s27, 96  ;;  %s3843_s9 = scalar_lea.hbm %s4965_s3, 96 }
  0x4f   : > { %p3839_p6 = scmp.ne.s32.totalorder %s3837_s27, %s3838_s22  ;;  %p4464_p7 = pneg %p4452_p5 }
  0x50   : > { %p3844_p10 = scmp.lt.s32.totalorder %s3837_s27, %s4965_s3  ;;  %p3845_p11 = scmp.lt.s32.totalorder %s3843_s9, %s3838_s22 }
  0x51   : > { %p3841_p8 = pnand %p4464_p7, %p3839_p6 }
  0x52   : > { %p3846_p12 = por %p3845_p11, %p3844_p10 }
  0x53   : > { %p3842_p9 = pneg %p3841_p8 }
  0x55   : > { %p3847_p13 = pnand %p3846_p12, %p3842_p9 }
  0x57   : > { %3850 = shalt.err (!%p3847_p13)
}
  0x58   : > { %s4937_s2 = smov 128   ;;  %s4939_s29 = smov 8  }
  0x59   : > { %3618 = dma.hbm_to_vmem [thread:$0]  (!%p4452_p5), %s4435_s0, 1536, %s854_s23, [#allocation5], %s4937_s2, %s4937_s2, %s4939_s29  }
  0x5a   : > { %s3866_s9 = sshra.s32 %s4456_s26, 4  ;;  %s3873_s22 = scalar_lea.hbm %s4302_s24, 96  ;;  %s3867_s9 = int_to_ptr.hbm [resolvable:$true] %s3866_s9 }
  0x5b   : > { %s3868_s27 = scalar_lea.hbm %s3867_s9, 96  ;;  %p3874_p6 = scmp.lt.s32.totalorder %s3867_s9, %s4302_s24 }
  0x5c   : > { %p3869_p0 = scmp.ne.s32.totalorder %s3867_s9, %s3868_s27  ;;  %p3875_p8 = scmp.lt.s32.totalorder %s3873_s22, %s3868_s27 }
  0x5e   : > { %p3871_p2 = pnand %p3869_p0, %p4464_p7  ;;  %p3876_p9 = por %p3875_p8, %p3874_p6 }
  0x60   : > { %p3872_p4 = pneg %p3871_p2 }
  0x62   : > { %p3877_p10 = pnand %p3876_p9, %p3872_p4 }
  0x64   : > { %3880 = shalt.err (!%p3877_p10)
}
  0x65   : > { %3624 = dma.hbm_to_vmem [thread:$0]  (!%p4452_p5), %s4456_s26, 1536, %s888_s17, [#allocation8], %s4937_s2, %s4937_s2, %s4939_s29  }
  0x66   : > { %s959_s0 = sshll.u32 %s4352_s12, 4  ;;  %s4229_s23 = smov [#allocation10]   ;;  %s4493_s0 = int_to_ptr.hbm [resolvable:$true] %s959_s0 }
  0x67   : > { %s927_s3 = sshll.u32 %s4229_s23, 4  ;;  %s3896_s9 = sshra.s32 %s4479_s1, 4  ;;  %s928_s3 = int_to_ptr.vmem [resolvable:$true] %s927_s3  ;;  %s3897_s9 = int_to_ptr.hbm [resolvable:$true] %s3896_s9 }
  0x68   : > { %s3898_s27 = scalar_lea.hbm %s3897_s9, 120  ;;  %s3903_s22 = scalar_lea.hbm %s4964_s4, 120 }
  0x69   : > { %p3899_p11 = scmp.ne.s32.totalorder %s3897_s9, %s3898_s27  ;;  %p3904_p0 = scmp.lt.s32.totalorder %s3897_s9, %s4964_s4 }
  0x6a   : > { %p3905_p2 = scmp.lt.s32.totalorder %s3903_s22, %s3898_s27 }
  0x6b   : > { %p3901_p12 = pnand %p3899_p11, %p4464_p7 }
  0x6c   : > { %p3906_p4 = por %p3905_p2, %p3904_p0 }
  0x6d   : > { %p3902_p13 = pneg %p3901_p12 }
  0x6f   : > { %p3907_p6 = pnand %p3906_p4, %p3902_p13 }
  0x71   : > { %3910 = shalt.err (!%p3907_p6)
}
  0x72   : > { %3630 = dma.hbm_to_vmem [thread:$0]  (!%p4452_p5), %s4479_s1, 1920, %s928_s3, [#allocation11], %s4937_s2, %s4937_s2, %s4939_s29  }
  0x73   : > { %s4230_s17 = smov [#allocation13]   ;;  %s868_s23 = sshll.u32 %s4292_s14, 4  ;;  %s4507_s23 = int_to_ptr.hbm [resolvable:$true] %s868_s23 }
  0x74   : > { %s961_s26 = sshll.u32 %s4230_s17, 4  ;;  %s3926_s9 = sshra.s32 %s4493_s0, 4  ;;  %s962_s26 = int_to_ptr.vmem [resolvable:$true] %s961_s26  ;;  %s3927_s9 = int_to_ptr.hbm [resolvable:$true] %s3926_s9 }
  0x75   : > { %s3928_s27 = scalar_lea.hbm %s3927_s9, 120  ;;  %s3933_s22 = scalar_lea.hbm %s4352_s12, 120 }
  0x76   : > { %p3929_p8 = scmp.ne.s32.totalorder %s3927_s9, %s3928_s27  ;;  %p3934_p11 = scmp.lt.s32.totalorder %s3927_s9, %s4352_s12 }
  0x77   : > { %p3935_p12 = scmp.lt.s32.totalorder %s3933_s22, %s3928_s27 }
  0x78   : > { %p3931_p9 = pnand %p3929_p8, %p4464_p7 }
  0x79   : > { %p3936_p13 = por %p3935_p12, %p3934_p11 }
  0x7a   : > { %p3932_p10 = pneg %p3931_p9 }
  0x7c   : > { %p3937_p0 = pnand %p3936_p13, %p3932_p10 }
  0x7e   : > { %3940 = shalt.err (!%p3937_p0)
}
  0x7f   : > { %3636 = dma.hbm_to_vmem [thread:$0]  (!%p4452_p5), %s4493_s0, 1920, %s962_s26, [#allocation14], %s4937_s2, %s4937_s2, %s4939_s29  }
  0x80   : > { %s902_s3 = sshll.u32 %s4312_s6, 4  ;;  %s4231_s1 = smov [#allocation6]   ;;  %s4521_s3 = int_to_ptr.hbm [resolvable:$true] %s902_s3 }
  0x81   : > { %s870_s17 = sshll.u32 %s4231_s1, 4  ;;  %s3956_s9 = sshra.s32 %s4507_s23, 4  ;;  %s871_s17 = int_to_ptr.vmem [resolvable:$true] %s870_s17  ;;  %s3957_s9 = int_to_ptr.hbm [resolvable:$true] %s3956_s9 }
  0x82   : > { %s3958_s27 = scalar_lea.hbm %s3957_s9, 96  ;;  %s3963_s22 = scalar_lea.hbm %s4292_s14, 96 }
  0x83   : > { %p3959_p2 = scmp.ne.s32.totalorder %s3957_s9, %s3958_s27  ;;  %p3964_p8 = scmp.lt.s32.totalorder %s3957_s9, %s4292_s14 }
  0x84   : > { %p3965_p9 = scmp.lt.s32.totalorder %s3963_s22, %s3958_s27 }
  0x85   : > { %p3961_p4 = pnand %p3959_p2, %p4464_p7 }
  0x86   : > { %p3966_p10 = por %p3965_p9, %p3964_p8 }
  0x87   : > { %p3962_p6 = pneg %p3961_p4 }
  0x89   : > { %p3967_p11 = pnand %p3966_p10, %p3962_p6 }
  0x8b   : > { %3970 = shalt.err (!%p3967_p11)
}
  0x8c   : > { %3621 = dma.hbm_to_vmem [thread:$0]  (!%p4452_p5), %s4507_s23, 1536, %s871_s17, [#allocation5], %s4937_s2, %s4937_s2, %s4939_s29  }
  0x8d   : > { %s4232_s0 = smov [#allocation9]   ;;  %s942_s1 = sshll.u32 %s4342_s20, 4  ;;  %s4535_s1 = int_to_ptr.hbm [resolvable:$true] %s942_s1 }
  0x8e   : > { %s904_s26 = sshll.u32 %s4232_s0, 4  ;;  %s3986_s9 = sshra.s32 %s4521_s3, 4  ;;  %s905_s26 = int_to_ptr.vmem [resolvable:$true] %s904_s26  ;;  %s3987_s9 = int_to_ptr.hbm [resolvable:$true] %s3986_s9 }
  0x8f   : > { %s3988_s27 = scalar_lea.hbm %s3987_s9, 32  ;;  %s3993_s22 = scalar_lea.hbm %s4312_s6, 32 }
  0x90   : > { %p3989_p12 = scmp.ne.s32.totalorder %s3987_s9, %s3988_s27  ;;  %p3994_p2 = scmp.lt.s32.totalorder %s3987_s9, %s4312_s6 }
  0x91   : > { %p3995_p4 = scmp.lt.s32.totalorder %s3993_s22, %s3988_s27 }
  0x92   : > { %p3991_p13 = pnand %p3989_p12, %p4464_p7 }
  0x93   : > { %p3996_p6 = por %p3995_p4, %p3994_p2 }
  0x94   : > { %p3992_p0 = pneg %p3991_p13 }
  0x96   : > { %p3997_p8 = pnand %p3996_p6, %p3992_p0 }
  0x98   : > { %4000 = shalt.err (!%p3997_p8)
}
  0x99   : > { %3627 = dma.hbm_to_vmem [thread:$0]  (!%p4452_p5), %s4521_s3, 512, %s905_s26, [#allocation8], %s4937_s2, %s4937_s2, %s4939_s29  }
  0x9a   : > { %s976_s23 = sshll.u32 %s4362_s30, 4  ;;  %s4233_s17 = smov [#allocation12]   ;;  %s4549_s23 = int_to_ptr.hbm [resolvable:$true] %s976_s23 }
  0x9b   : > { %s944_s0 = sshll.u32 %s4233_s17, 4  ;;  %s4016_s9 = sshra.s32 %s4535_s1, 4  ;;  %s945_s0 = int_to_ptr.vmem [resolvable:$true] %s944_s0  ;;  %s4017_s9 = int_to_ptr.hbm [resolvable:$true] %s4016_s9 }
  0x9c   : > { %s4018_s27 = scalar_lea.hbm %s4017_s9, 120  ;;  %s4023_s22 = scalar_lea.hbm %s4342_s20, 120 }
  0x9d   : > { %p4019_p9 = scmp.ne.s32.totalorder %s4017_s9, %s4018_s27  ;;  %p4024_p12 = scmp.lt.s32.totalorder %s4017_s9, %s4342_s20 }
  0x9e   : > { %p4025_p13 = scmp.lt.s32.totalorder %s4023_s22, %s4018_s27 }
  0x9f   : > { %p4021_p10 = pnand %p4019_p9, %p4464_p7 }
  0xa0   : > { %p4026_p0 = por %p4025_p13, %p4024_p12 }
  0xa1   : > { %p4022_p11 = pneg %p4021_p10 }
  0xa3   : > { %p4027_p2 = pnand %p4026_p0, %p4022_p11 }
  0xa5   : > { %4030 = shalt.err (!%p4027_p2)
}
  0xa6   : > { %3633 = dma.hbm_to_vmem [thread:$0]  (!%p4452_p5), %s4535_s1, 1920, %s945_s0, [#allocation11], %s4937_s2, %s4937_s2, %s4939_s29  }
  0xa7   : > { %s4234_s3 = smov [#allocation15]   ;;  %s4046_s17 = sshra.s32 %s4549_s23, 4  ;;  %s4047_s17 = int_to_ptr.hbm [resolvable:$true] %s4046_s17 }
  0xa8   : > { %s978_s26 = sshll.u32 %s4234_s3, 4  ;;  %s4048_s9 = scalar_lea.hbm %s4047_s17, 20  ;;  %s979_s26 = int_to_ptr.vmem [resolvable:$true] %s978_s26 }
  0xa9   : > { %p4049_p4 = scmp.ne.s32.totalorder %s4047_s17, %s4048_s9  ;;  %s4053_s27 = scalar_lea.hbm %s4362_s30, 20 }
  0xaa   : > { %p4054_p9 = scmp.lt.s32.totalorder %s4047_s17, %s4362_s30  ;;  %p4055_p10 = scmp.lt.s32.totalorder %s4053_s27, %s4048_s9 }
  0xab   : > { %p4051_p6 = pnand %p4049_p4, %p4464_p7 }
  0xac   : > { %p4056_p11 = por %p4055_p10, %p4054_p9 }
  0xad   : > { %p4052_p8 = pneg %p4051_p6 }
  0xaf   : > { %p4057_p12 = pnand %p4056_p11, %p4052_p8 }
  0xb1   : > { %4060 = shalt.err (!%p4057_p12)
}
  0xb2   : > { %s4235_s22 = smov 64   ;;  %s4236_s1 = smov 4  }
  0xb3   : > { %3639 = dma.hbm_to_vmem [thread:$0]  (!%p4452_p5), %s4549_s23, 320, %s979_s26, [#allocation14], %s4235_s22, %s4235_s22, %s4236_s1  }
  0xb4   : > { %s1005_s0 = sshll.u32 %s4392_s19, 4  ;;  %s4237_s3 = smov [#allocation16]   ;;  %s1006_s0 = int_to_ptr.hbm [resolvable:$true] %s1005_s0 }
  0xb5   : > { %s1007_s2 = sshll.u32 %s4237_s3, 4  ;;  %s4076_s17 = sshra.s32 %s1006_s0, 4  ;;  %s1008_s2 = int_to_ptr.vmem [resolvable:$true] %s1007_s2  ;;  %s4077_s17 = int_to_ptr.hbm [resolvable:$true] %s4076_s17 }
  0xb6   : > { %s4078_s9 = scalar_lea.hbm %s4077_s17, 32  ;;  %s4083_s27 = scalar_lea.hbm %s4392_s19, 32 }
  0xb7   : > { %p4079_p13 = scmp.ne.s32.totalorder %s4077_s17, %s4078_s9  ;;  %p4084_p4 = scmp.lt.s32.totalorder %s4077_s17, %s4392_s19 }
  0xb8   : > { %p4085_p6 = scmp.lt.s32.totalorder %s4083_s27, %s4078_s9 }
  0xb9   : > { %p4081_p0 = pnand %p4079_p13, %p4464_p7 }
  0xba   : > { %p4086_p8 = por %p4085_p6, %p4084_p4 }
  0xbb   : > { %p4082_p2 = pneg %p4081_p0 }
  0xbd   : > { %p4087_p9 = pnand %p4086_p8, %p4082_p2 }
  0xbf   : > { %4090 = shalt.err (!%p4087_p9)
}
  0xc0   : > { %s4969_s23 = smov 128   ;;  %s4581_s8 = sadd.s32 1, %s4190_s15  }
  0xc1   : > { %3642 = dma.hbm_to_vmem [thread:$0]  (!%p4452_p5), %s1006_s0, 512, %s1008_s2, [#allocation17], %s4969_s23, %s4969_s23, %s4939_s29  }
  0xc2   : > { %s141_s28 = ssub.s32 %s4190_s15, %s4581_s8  ;;  %s144_s26 = sadd.s32 1, %s4186_s11 }
  0xc3   : > { %p142_p7 = scmp.eq.s32.totalorder %s141_s28, 0  ;;  %p151_p10 = scmp.ne.s32.totalorder %s4186_s11, %s4182_s10 }
  0xc4   : > { %p152_p11 = scmp.eq.s32.totalorder %s4190_s15, 0  ;;  %p157_p12 = scmp.ne.s32.totalorder %s4182_s10, %s4178_s7 }
  0xc5   : > { %s4592_s22 = scalar_select %p142_p7, %s4186_s11, %s144_s26  }
  0xc6   : > { %p153_p13 = por %p152_p11, %p151_p10  ;;  %p4596_p0 = por %p158_p1, %p157_p12 }
  0xc7   : > { %p3656_p2 = scmp.lt.s32.totalorder %s4190_s15, 2  ;;  %s1044_s2 = sand.u32 1, %s4186_s11  }
  0xc8   : > { %s3574_s0 = smul.u32 40, %s1044_s2  ;;  %s1045_s26 = scalar_lea.sflag [#allocation3], %s1044_s2 }
  0xc9   : > { %s3575_s3 = smul.u32 40, %s4190_s15  ;;  %p4603_p5 = pnand %p3656_p2, %p153_p13 }
  0xca   : > { %s1048_s9 = scalar_lea.vmem [#allocation2], %s3574_s0  ;;  %s4113_s15 = scalar_lea.hbm %s4257_s13, 80 }
  0xcb   : > { %s1053_s7 = scalar_lea.hbm %s4257_s13, %s3575_s3  ;;  %s1056_s27 = sshll.u32 %s1048_s9, 4  ;;  %s1057_s27 = int_to_ptr.vmem [resolvable:$true] %s1056_s27 }
  0xcc   : > { %s1054_s28 = sshll.u32 %s1053_s7, 4  ;;  %p4110_p6 = pneg %p4603_p5  ;;  %s1055_s28 = int_to_ptr.hbm [resolvable:$true] %s1054_s28 }
  0xcd   : > { %s4106_s29 = sshra.s32 %s1055_s28, 4  ;;  %s4107_s29 = int_to_ptr.hbm [resolvable:$true] %s4106_s29 }
  0xce   : > { %s4108_s4 = scalar_lea.hbm %s4107_s29, 40  ;;  %p4114_p7 = scmp.lt.s32.totalorder %s4107_s29, %s4257_s13 }
  0xcf   : > { %p4109_p4 = scmp.ne.s32.totalorder %s4107_s29, %s4108_s4  ;;  %p4115_p10 = scmp.lt.s32.totalorder %s4113_s15, %s4108_s4 }
  0xd1   : > { %p4111_p8 = pnand %p4110_p6, %p4109_p4  ;;  %p4116_p11 = por %p4115_p10, %p4114_p7 }
  0xd3   : > { %p4112_p9 = pneg %p4111_p8 }
  0xd5   : > { %p4117_p12 = pnand %p4116_p11, %p4112_p9 }
  0xd7   : > { %4120 = shalt.err (!%p4117_p12)
}
  0xd8   : > { %s4972_s0 = smov 8   ;;  %1080 = sbr.rel (%p4443_p3) target bundleno = 6623 (0x19df), region = 152 }
  0xd9   : > { %3646 = dma.hbm_to_vmem [thread:$0]  (!%p4603_p5), %s1055_s28, 640, %s1057_s27, %s1045_s26, %s4969_s23, %s4969_s23, %s4972_s0  }
  0xda   : > { %s1082_s2 = sand.u32 (!%p4443_p3), 1, %s4182_s10  }
  0xdb   : > { %s3576_s3 = smul.u32 (!%p4443_p3), 40, %s1082_s2  ;;  %s1083_s7 = scalar_lea.sflag (!%p4443_p3), [#allocation3], %s1082_s2 }
  0xdd   : > { %s4620_s9 = scalar_lea.vmem [#allocation2], %s3576_s3 }
  0xde   : > { %4153 = dma.done.wait (%p4596_p0), %s1083_s7, 640  }
  0xdf   : > { %4155 = vsyncadd (%p4596_p0), %s1083_s7, 4294966656 }
  0xe0   : > { %4157 = dma.done.wait (%p158_p1), [#allocation5], 3072  }
  0xe1   : > { %4159 = vsyncadd (%p158_p1), [#allocation5], 4294964224 }
  0xe2   : > { %4161 = dma.done.wait (%p158_p1), [#allocation8], 2048  }
  0xe3   : > { %4163 = vsyncadd (%p158_p1), [#allocation8], 4294965248 }
  0xe4   : > { %4165 = dma.done.wait (%p158_p1), [#allocation11], 3840  }
  0xe5   : > { %4167 = vsyncadd (%p158_p1), [#allocation11], 4294963456 }
  0xe6   : > { %4169 = dma.done.wait (%p158_p1), [#allocation14], 2240  }
  0xe7   : > { %4171 = vsyncadd (%p158_p1), [#allocation14], 4294965056 }
  0xe8   : > { %4173 = dma.done.wait (%p158_p1), [#allocation17], 512  }
  0xe9   : > { %4175 = vsyncadd (%p158_p1), [#allocation17], 4294966784  ;;  %p1228_p3 = scmp.lt.s32.totalorder %s4438_s16, 1  ;;  %vm1257_vm0 = vcmask 162816   ;;  %v4238_v2 = vmov 20.0   ;;  %vm1305_vm2 = vcmask 1043456  }
  0xea   : > { %3786 = vrcp.f32 %v4238_v2  ;;  %v1297_v14 = vld [vmem:[#allocation4 + $0x10] sm:$0xf]  ;;  %v1296_v17 = vld [vmem:[#allocation4 + $0x8] sm:$0xff]  ;;  %v1295_v20 = vld [vmem:[#allocation4] sm:$0xff]  ;;  %s4973_s23 = sld [smem:[#allocation26_spill]]  ;;  %vm1393_vm6 = vcmask 39936  }
  0xeb   : > { %s4999_s16 = smov (!%p1228_p3, %s4438_s16), 1  ;;  %v1332_v15 = vld [vmem:[#allocation6 + $0x10] sm:$0xf]  ;;  %3449 = vmatpush.msk.msra.mxu0 %vm1305_vm2, %v1297_v14  ;;  %v1331_v18 = vld [vmem:[#allocation6 + $0x8] sm:$0xff]  ;;  %v1330_v21 = vld [vmem:[#allocation6] sm:$0xff]  ;;  %s4974_s1 = sld [smem:[#allocation25_spill]] }
  0xec   : > { %s4651_s29 = sshll.u32 %s4999_s16, 3  ;;  %s1241_s18 = scalar_lea.vmem %s4267_s21, %s4999_s16  ;;  %3451 = vmatpush.msk.msra.mxu1 %vm1305_vm2, %v1332_v15  ;;  %v1362_v16 = vld [vmem:[#allocation7 + $0x10] sm:$0xf]  ;;  %v1361_v19 = vld [vmem:[#allocation7 + $0x8] sm:$0xff]  ;;  %v1360_v22 = vld [vmem:[#allocation7] sm:$0xff]  ;;  %vm1420_vm7 = vcmask 64512  }
  0xed   : > { %s1231_s4 = scalar_lea.vmem %s4247_s5, %s4651_s29  ;;  %3453 = vmatpush.msk.msra.mxu2 %vm1305_vm2, %v1362_v16  ;;  %1323 = vmatpush.msra.mxu0 %v1296_v17  ;;  %v1459_v23 = vld [vmem:[#allocation4 + $0x28] sm:$0xf]  ;;  %v1458_v26 = vld [vmem:[#allocation4 + $0x20] sm:$0xff]  ;;  %v1457_v30 = vld [vmem:[#allocation4 + $0x18] sm:$0xff]  ;;  %s4975_s17 = sld [smem:[#allocation28_spill]]  ;;  %vm1618_vm8 = vcmask 1044480  }
  0xee   : > { %v4655_v0 = vld [vmem:[%s1231_s4] sm:$0xff]  ;;  %1354 = vmatpush.msra.mxu1 %v1331_v18  ;;  %v1492_v24 = vld [vmem:[#allocation6 + $0x28] sm:$0xf]  ;;  %v1491_v27 = vld [vmem:[#allocation6 + $0x20] sm:$0xff]  ;;  %s4976_s27 = sld [smem:[#allocation29_spill]]  ;;  %vm2176_vm12 = vcmask 31744  }
  0xef   : > { %v1258_v1 = vsel %vm1257_vm0, %v4655_v0, 0.0  ;;  %1384 = vmatpush.msra.mxu2 %v1361_v19  ;;  %1324 = vmatpush.msra.mxu0 %v1295_v20  ;;  %v1524_v25 = vld [vmem:[#allocation7 + $0x28] sm:$0xf]  ;;  %v1523_v28 = vld [vmem:[#allocation7 + $0x20] sm:$0xff]  ;;  %v1490_v31 = vld [vmem:[#allocation6 + $0x18] sm:$0xff]  ;;  %s4977_s28 = sld [smem:[#allocation30_spill]] }
  0xf0   : > { %1259 = vadd.xlane.f32.xlu0 %v1258_v1  ;;  %v3787_v3 = vpop.eup %3786  ;;  %1355 = vmatpush.msra.mxu1 %v1330_v21  ;;  %v1522_v33 = vld [vmem:[#allocation7 + $0x18] sm:$0xff]  ;;  %v3745_v41 = vld [vmem:[%s4272_s25] ss:$0 sm:$0xff]  ;;  %v1671_v14 = vld [vmem:[#allocation4 + $0x40] sm:$0xf]  ;;  %s4978_s15 = sld [smem:[#allocation31_spill]] }
  0xf1   : > { %v1262_v4 = vmul.f32 20.0, %v3787_v3  ;;  %vm1266_vm1 = vweird.f32 %v3787_v3  ;;  %1385 = vmatpush.msra.mxu2 %v1360_v22  ;;  %3459 = vmatpush.msk.msrb.mxu0 %vm1305_vm2, %v1459_v23  ;;  %v3746_v43 = vld [vmem:[%s4973_s23] ss:$0 sm:$0xff]  ;;  %s1238_s26 = scalar_lea.vmem %s4974_s1, %s4999_s16  ;;  %v1670_v16 = vld [vmem:[#allocation4 + $0x38] sm:$0xff]  ;;  %v1455_v20 = vld [vmem:[#allocation9] sm:$0x1f] }
  0xf2   : > { %3462 = vmatpush.msk.msrb.mxu1 %vm1305_vm2, %v1492_v24  ;;  %v4699_v63 = vld [vmem:[%s1238_s26] ss:$0 sm:$0xff]  ;;  %s4979_s0 = sld [smem:[#allocation24_spill]] }
  0xf3   : > { %v1263_v5 = vsub.f32 1.0, %v1262_v4  ;;  %3465 = vmatpush.msk.msrb.mxu2 %vm1305_vm2, %v1524_v25  ;;  %1482 = vmatpush.msrb.mxu0 %v1458_v26  ;;  %v3747_v47 = vld [vmem:[%s4975_s17] ss:$0 sm:$0xff]  ;;  %s4980_s3 = sld [smem:[#allocation32_spill]] }
  0xf4   : > { %1515 = vmatpush.msrb.mxu1 %v1491_v27  ;;  %v3748_v48 = vld [vmem:[%s4976_s27] ss:$0 sm:$0xff]  ;;  %v3751_v55 = vld [vmem:[%s4976_s27 + $0x1] ss:$0 sm:$0xff]  ;;  %s4981_s7 = sld [smem:[#allocation33_spill]] }
  0xf5   : > { %v1264_v6 = vmul.f32 %v3787_v3, %v1263_v5  ;;  %1547 = vmatpush.msrb.mxu2 %v1523_v28  ;;  %1483 = vmatpush.msrb.mxu0 %v1457_v30  ;;  %v3749_v54 = vld [vmem:[%s4977_s28] ss:$0 sm:$0xff]  ;;  %v3752_v60 = vld [vmem:[%s4977_s28 + $0x1] ss:$0 sm:$0xff]  ;;  %v1704_v30 = vld [vmem:[#allocation6 + $0x40] sm:$0xf] }
  0xf6   : > { %1516 = vmatpush.msrb.mxu1 %v1490_v31  ;;  %v1669_v18 = vld [vmem:[#allocation4 + $0x30] sm:$0xff]  ;;  %v1703_v31 = vld [vmem:[#allocation6 + $0x38] sm:$0xff]  ;;  %s4982_s4 = sld [smem:[#allocation36_spill]] }
  0xf7   : > { %v1265_v7 = vadd.f32 %v3787_v3, %v1264_v6  ;;  %1548 = vmatpush.msrb.mxu2 %v1522_v33  ;;  %s4983_s23 = sld [smem:[#allocation35_spill]] }
  0xf8   : > { %s1235_s2 = scalar_lea.vmem %s4979_s0, %s4651_s29  ;;  %s4984_s1 = sld [smem:[#allocation37_spill]] }
  0xf9   : > { %v4661_v8 = vsel %vm1266_vm1, %v3787_v3, %v1265_v7  ;;  %s4985_s16 = sld [smem:[#allocation38_spill]] }
  0xfa   : > { %s4988_s26 = sld [smem:[#allocation40_spill]] }
  0xfb   : > { %s4990_s0 = sld [smem:[#allocation43_spill]] }
 0x163   : > { %v1260_v9 = vpop.xlane.xlu0 %1259 }
 0x164   : > { %v1268_v10 = vmul.f32 %v4661_v8, %v1260_v9 }
 0x166   : > { %v1269_v11 = vsub.f32 %v4655_v0, %v1268_v10 }
 0x168   : > { %v1270_v12 = vmul.f32 %v1269_v11, %v1269_v11 }
 0x16a   : > { %v1271_v13 = vsel %vm1257_vm0, %v1270_v12, 0.0  ;;  %v3750_v12 = vld [vmem:[%s4975_s17 + $0x1] ss:$0 sm:$0xff] }
 0x16b   : > { %1272 = vadd.xlane.f32.xlu0 %v1271_v13 }
 0x1de   : > { %v1273_v29 = vpop.xlane.xlu0 %1272 }
 0x1df   : > { %v1274_v32 = vmul.f32 %v1273_v29, %v4661_v8 }
 0x1e1   : > { %v1275_v34 = vadd.f32 1e-12, %v1274_v32  ;;  %v1702_v32 = vld [vmem:[#allocation6 + $0x30] sm:$0xff] }
 0x1e3   : > { %3788 = vrsqrt.f32 %v1275_v34  ;;  %vm1282_vm4 = vweird.f32 %v1275_v34 }
 0x1e9   : > { %v3789_v35 = vpop.eup %3788 }
 0x1ea   : > { %v1277_v36 = vmul.f32 %v3789_v35, %v1275_v34  ;;  %vm1283_vm3 = vweird.f32 %v3789_v35 }
 0x1eb   : > { %vm1284_vm5 = vmor %vm1282_vm4, %vm1283_vm3 }
 0x1ec   : > { %v1278_v37 = vmul.f32 %v3789_v35, %v1277_v36  ;;  %v1614_v36 = vld [vmem:[#allocation9 + $0x8] sm:$0x1f] }
 0x1ee   : > { %v1279_v38 = vmul.f32 0.5, %v1278_v37  ;;  %v1736_v37 = vld [vmem:[#allocation7 + $0x40] sm:$0xf] }
 0x1f0   : > { %v1280_v39 = vsub.f32 1.5, %v1279_v38  ;;  %v1735_v38 = vld [vmem:[#allocation7 + $0x38] sm:$0xff] }
 0x1f2   : > { %v1281_v40 = vmul.f32 %v3789_v35, %v1280_v39  ;;  %v1734_v39 = vld [vmem:[#allocation7 + $0x30] sm:$0xff] }
 0x1f4   : > { %v1285_v42 = vsel %vm1284_vm5, %v3789_v35, %v1281_v40  ;;  %v1857_v40 = vld [vmem:[#allocation4 + $0x58] sm:$0xf] }
 0x1f5   : > { %v1286_v44 = vmul.f32 %v1285_v42, %v1269_v11  ;;  %v1856_v42 = vld [vmem:[#allocation4 + $0x50] sm:$0xff] }
 0x1f7   : > { %v1290_v45 = vmul.f32 %v3745_v41, %v1286_v44  ;;  %v3754_v44 = vld [vmem:[%s4975_s17 + $0x2] ss:$0 sm:$0xff] }
 0x1f9   : > { %v4675_v46 = vadd.f32 %v3746_v43, %v1290_v45  ;;  %v1855_v43 = vld [vmem:[#allocation4 + $0x48] sm:$0xff] }
 0x1fb   : > { %3450 = vmatmul.msk.f32.vlgmr.msra.gmra.mxu0 %vm1257_vm0, %v4675_v46  ;;  %3452 = vmatmul.msk.f32.vlgmr.msra.gmra.mxu1 %vm1257_vm0, %v4675_v46 }
 0x1fc   : > { %3454 = vmatmul.msk.f32.vlgmr.msra.gmra.mxu2 %vm1257_vm0, %v4675_v46  ;;  %3470 = vmatpush.msk.msra.mxu1 %vm1618_vm8, %v1614_v36 }
 0x1fd   : > { %3472 = vmatpush.msk.msra.mxu2 %vm1618_vm8, %v1455_v20 }
 0x203   : > { %3460 = vmatmul.msk.f32.vlgmr.msrb.gmra.mxu0 %vm1257_vm0, %v4675_v46  ;;  %3463 = vmatmul.msk.f32.vlgmr.msrb.gmra.mxu1 %vm1257_vm0, %v4675_v46 }
 0x204   : > { %3466 = vmatmul.msk.f32.vlgmr.msrb.gmra.mxu2 %vm1257_vm0, %v4675_v46  ;;  %3481 = vmatpush.msk.msrb.mxu1 %vm1305_vm2, %v1736_v37 }
 0x206   : > { %1759 = vmatpush.msrb.mxu1 %v1735_v38 }
 0x208   : > { %1760 = vmatpush.msrb.mxu1 %v1734_v39 }
 0x278   : > { %v1326_v49 = vpop.f32.mrf.mxu0  ;;  %v1357_v50 = vpop.f32.mrf.mxu1 }
 0x279   : > { %v1327_v51 = vadd.f32 %v3747_v47, %v1326_v49  ;;  %v1358_v52 = vadd.f32 %v3748_v48, %v1357_v50  ;;  %v3755_v47 = vld [vmem:[%s4976_s27 + $0x2] ss:$0 sm:$0xff] }
 0x27b   : > { %v1329_v53 = vmul.f32 0.4472136, %v1327_v51  ;;  %3455 = vmatpush.xpose.msk.msra.mxu3 %vm1393_vm6, %v1358_v52  ;;  %v1890_v51 = vld [vmem:[#allocation6 + $0x58] sm:$0xf] }
 0x27e   : > { %3456 = vmatmul.msk.f32.vlgmr.msra.gmra.mxu3 %vm1393_vm6, %v1329_v53  ;;  %v1889_v53 = vld [vmem:[#allocation6 + $0x50] sm:$0xff] }
 0x27f   : > { %v1387_v56 = vpop.f32.mrf.mxu2 }
 0x280   : > { %v1388_v57 = vadd.f32 %v3749_v54, %v1387_v56  ;;  %v1518_v58 = vpop.f32.mrf.mxu1  ;;  %v1485_v15 = vpop.f32.mrf.mxu0  ;;  %v1888_v54 = vld [vmem:[#allocation6 + $0x48] sm:$0xff] }
 0x281   : > { %v1519_v59 = vadd.f32 %v3751_v55, %v1518_v58  ;;  %v1486_v17 = vadd.f32 %v3750_v12, %v1485_v15  ;;  %v1826_v55 = vld [vmem:[#allocation9 + $0x10] sm:$0x1f]  ;;  %v1922_v12 = vld [vmem:[#allocation7 + $0x58] sm:$0xf] }
 0x282   : > { %1450 = vmatpush.msrb.mxu3 %v1388_v57 }
 0x283   : > { %v1488_v19 = vmul.f32 0.4472136, %v1486_v17 }
 0x284   : > { %3467 = vmatpush.xpose.msk.msra.mxu3 %vm1393_vm6, %v1519_v59  ;;  %v3756_v59 = vld [vmem:[%s4977_s28 + $0x2] ss:$0 sm:$0xff] }
 0x287   : > { %v1550_v61 = vpop.f32.mrf.mxu2 }
 0x288   : > { %v1551_v62 = vadd.f32 %v3752_v60, %v1550_v61 }
 0x28a   : > { %1608 = vmatpush.msra.mxu0 %v1551_v62 }
 0x28c   : > { %3478 = vmatpush.msk.msrb.mxu0 %vm1305_vm2, %v1704_v30 }
 0x28e   : > { %1727 = vmatpush.msrb.mxu0 %v1703_v31 }
 0x290   : > { %1728 = vmatpush.msrb.mxu0 %v1702_v32 }
 0x301   : > { %v1417_v1 = vpop.f32.mrf.mxu3 }
 0x302   : > { %v1418_v2 = vadd.f32 %v4699_v63, %v1417_v1 }
 0x304   : > { %v1421_v3 = vsel %vm1420_vm7, %v1418_v2, -inf }
 0x305   : > { %1422 = vmax.xlane.f32.xlu1 %v1421_v3  ;;  %v3758_v3 = vld [vmem:[%s4976_s27 + $0x3] ss:$0 sm:$0xff] }
 0x378   : > { %v1423_v4 = vpop.xlane.xlu1 %1422 }
 0x379   : > { %v1424_v5 = vsub.f32 %v1418_v2, %v1423_v4 }
 0x37b   : > { %v1425_v6 = vmul.f32 1.442695, %v1424_v5 }
 0x37d   : > { %3790 = vpow2.f32 %v1425_v6 }
 0x383   : > { %v3791_v7 = vpop.eup %3790 }
 0x384   : > { %v1427_v9 = vsel %vm1420_vm7, %v3791_v7, 0.0 }
 0x385   : > { %1428 = vadd.xlane.f32.xlu1 %v1427_v9 }
 0x3f8   : > { %v1429_v10 = vpop.xlane.xlu1 %1428 }
 0x3f9   : > { %3792 = vrcp.f32 %v1429_v10 }
 0x3ff   : > { %v3793_v11 = vpop.eup %3792 }
 0x400   : > { %v1431_v13 = vmul.f32 %v3793_v11, %v3791_v7 }
 0x402   : > { %3457 = vmatmul.msk.f32.vlgmr.msrb.gmra.mxu3 %vm1420_vm7, %v1431_v13  ;;  %v1921_v13 = vld [vmem:[#allocation7 + $0x50] sm:$0xff] }
 0x403   : > { %3475 = vmatpush.msk.msrb.mxu3 %vm1305_vm2, %v1671_v14  ;;  %v1920_v14 = vld [vmem:[#allocation7 + $0x48] sm:$0xff] }
 0x405   : > { %1694 = vmatpush.msrb.mxu3 %v1670_v16 }
 0x407   : > { %1695 = vmatpush.msrb.mxu3 %v1669_v18  ;;  %v3757_v18 = vld [vmem:[%s4975_s17 + $0x3] ss:$0 sm:$0xff] }
 0x40a   : > { %3468 = vmatmul.msk.f32.vlgmr.msra.gmra.mxu3 %vm1393_vm6, %v1488_v19 }
 0x412   : > { %3476 = vmatmul.msk.f32.vlgmr.msrb.gmra.mxu3 %vm1257_vm0, %v4675_v46 }
 0x485   : > { %v1452_v21 = vpop.f32.mrf.mxu3 }
 0x486   : > { %3473 = vmatmul.msk.f32.vlgmr.msra.gmra.mxu2 %vm1393_vm6, %v1452_v21 }
 0x48d   : > { %v1576_v22 = vpop.f32.mrf.mxu3 }
 0x48e   : > { %v1577_v23 = vadd.f32 %v4699_v63, %v1576_v22  ;;  %v3759_v22 = vld [vmem:[%s4977_s28 + $0x3] ss:$0 sm:$0xff] }
 0x490   : > { %v1579_v24 = vsel %vm1420_vm7, %v1577_v23, -inf }
 0x491   : > { %1580 = vmax.xlane.f32.xlu2 %v1579_v24 }
 0x495   : > { %v1697_v45 = vpop.f32.mrf.mxu3 }
 0x496   : > { %v1698_v48 = vadd.f32 %v3754_v44, %v1697_v45 }
 0x498   : > { %v1700_v52 = vmul.f32 0.4472136, %v1698_v48 }
 0x504   : > { %v1581_v25 = vpop.xlane.xlu2 %1580 }
 0x505   : > { %v1582_v26 = vsub.f32 %v1577_v23, %v1581_v25 }
 0x507   : > { %v1583_v27 = vmul.f32 1.442695, %v1582_v26 }
 0x509   : > { %3794 = vpow2.f32 %v1583_v27  ;;  %v1665_v56 = vpop.f32.mrf.mxu2 }
 0x50f   : > { %v3795_v28 = vpop.eup %3794 }
 0x510   : > { %v1585_v29 = vsel %vm1420_vm7, %v3795_v28, 0.0 }
 0x511   : > { %1586 = vadd.xlane.f32.xlu2 %v1585_v29 }
 0x584   : > { %v1587_v33 = vpop.xlane.xlu2 %1586 }
 0x585   : > { %3796 = vrcp.f32 %v1587_v33 }
 0x58b   : > { %v3797_v34 = vpop.eup %3796 }
 0x58c   : > { %v1589_v35 = vmul.f32 %v3797_v34, %v3795_v28 }
 0x58e   : > { %3469 = vmatmul.msk.f32.vlgmr.msra.gmra.mxu0 %vm1420_vm7, %v1589_v35  ;;  %v2012_v35 = vld [vmem:[#allocation9 + $0x18] sm:$0x1f] }
 0x58f   : > { %3486 = vmatpush.msk.msra.mxu0 %vm1618_vm8, %v1826_v55  ;;  %v2245_v55 = vld [vmem:[#allocation10 + $0x28] sm:$0xf] }
 0x596   : > { %3479 = vmatmul.msk.f32.vlgmr.msrb.gmra.mxu0 %vm1257_vm0, %v4675_v46 }
 0x60b   : > { %v1610_v41 = vpop.f32.mrf.mxu0 }
 0x60c   : > { %3471 = vmatmul.msk.f32.vlgmr.msra.gmra.mxu1 %vm1393_vm6, %v1610_v41  ;;  %v3760_v41 = vld [vmem:[%s4978_s15] ss:$0 sm:$0xff]  ;;  %s4989_s15 = sld [smem:[#allocation42_spill]] }
 0x60d   : > { %3489 = vmatpush.msk.msra.mxu1 %vm1305_vm2, %v1857_v40 }
 0x60f   : > { %1880 = vmatpush.msra.mxu1 %v1856_v42 }
 0x611   : > { %1881 = vmatpush.msra.mxu1 %v1855_v43 }
 0x613   : > { %v1730_v49 = vpop.f32.mrf.mxu0 }
 0x614   : > { %v1731_v50 = vadd.f32 %v3755_v47, %v1730_v49  ;;  %3482 = vmatmul.msk.f32.vlgmr.msrb.gmra.mxu1 %vm1257_vm0, %v4675_v46 }
 0x616   : > { %3483 = vmatpush.xpose.msk.msrb.mxu2 %vm1393_vm6, %v1731_v50 }
 0x619   : > { %3484 = vmatmul.msk.f32.vlgmr.msrb.gmra.mxu2 %vm1393_vm6, %v1700_v52  ;;  %v4767_v52 = vld [vmem:[%s1235_s2] sm:$0xff]  ;;  %s4991_s2 = sld [smem:[#allocation44_spill]] }
 0x61a   : > { %3492 = vmatpush.msk.msra.mxu2 %vm1305_vm2, %v1890_v51  ;;  %v2114_v51 = vld [vmem:[#allocation12 + $0x10] sm:$0xf] }
 0x61c   : > { %1913 = vmatpush.msra.mxu2 %v1889_v53  ;;  %3490 = vmatmul.msk.f32.vlgmr.msra.gmra.mxu1 %vm1257_vm0, %v4675_v46  ;;  %v2112_v53 = vld [vmem:[#allocation12] sm:$0xff] }
 0x61e   : > { %1914 = vmatpush.msra.mxu2 %v1888_v54  ;;  %v2080_v54 = vld [vmem:[#allocation10 + $0x10] sm:$0xf] }
 0x620   : > { %3500 = vmatpush.msk.msrb.mxu2 %vm1618_vm8, %v2012_v35 }
 0x621   : > { %3493 = vmatmul.msk.f32.vlgmr.msra.gmra.mxu2 %vm1257_vm0, %v4675_v46 }
 0x689   : > { %v1639_v57 = vpop.f32.mrf.mxu1 }
 0x68a   : > { %v1666_v58 = vadd.f32 %v1665_v56, %v1639_v57  ;;  %v2079_v56 = vld [vmem:[#allocation10 + $0x8] sm:$0xff]  ;;  %v2244_v57 = vld [vmem:[#allocation10 + $0x20] sm:$0xff] }
 0x691   : > { %v1762_v60 = vpop.f32.mrf.mxu1 }
 0x692   : > { %v1763_v61 = vadd.f32 %v3756_v59, %v1762_v60  ;;  %v2243_v59 = vld [vmem:[#allocation10 + $0x18] sm:$0xff] }
 0x694   : > { %1820 = vmatpush.msra.mxu3 %v1763_v61 }
 0x696   : > { %3495 = vmatpush.msk.msrb.mxu3 %vm1305_vm2, %v1922_v12 }
 0x698   : > { %1945 = vmatpush.msrb.mxu3 %v1921_v13 }
 0x699   : > { %v1883_v19 = vpop.f32.mrf.mxu1 }
 0x69a   : > { %1946 = vmatpush.msrb.mxu3 %v1920_v14  ;;  %v1884_v21 = vadd.f32 %v3757_v18, %v1883_v19  ;;  %v3763_v14 = vld [vmem:[%s4982_s4] ss:$0 sm:$0xff] }
 0x69c   : > { %v1788_v62 = vpop.f32.mrf.mxu2  ;;  %v1886_v23 = vmul.f32 0.4472136, %v1884_v21  ;;  %v1248_v21 = vld [vmem:[%s4620_s9] sm:$0xff] }
 0x69d   : > { %v1789_v1 = vadd.f32 %v4699_v63, %v1788_v62 }
 0x69f   : > { %v1791_v2 = vsel %vm1420_vm7, %v1789_v1, -inf }
 0x6a0   : > { %1792 = vmax.xlane.f32.xlu0 %v1791_v2 }
 0x6a4   : > { %v1916_v4 = vpop.f32.mrf.mxu2 }
 0x6a5   : > { %v1917_v5 = vadd.f32 %v3758_v3, %v1916_v4 }
 0x6a7   : > { %3497 = vmatpush.xpose.msk.msrb.mxu0 %vm1393_vm6, %v1917_v5 }
 0x713   : > { %v1793_v6 = vpop.xlane.xlu0 %1792 }
 0x714   : > { %v1794_v7 = vsub.f32 %v1789_v1, %v1793_v6 }
 0x716   : > { %v1795_v9 = vmul.f32 1.442695, %v1794_v7  ;;  %v3761_v7 = vld [vmem:[%s4980_s3] ss:$0 sm:$0xff]  ;;  %s4992_s3 = sld [smem:[#allocation45_spill]] }
 0x718   : > { %3798 = vpow2.f32 %v1795_v9 }
 0x71e   : > { %v3799_v10 = vpop.eup %3798 }
 0x71f   : > { %v1797_v11 = vsel %vm1420_vm7, %v3799_v10, 0.0 }
 0x720   : > { %1798 = vadd.xlane.f32.xlu1 %v1797_v11  ;;  %v3762_v11 = vld [vmem:[%s4981_s7] ss:$0 sm:$0xff]  ;;  %s4993_s7 = sld [smem:[#allocation46_spill]] }
 0x793   : > { %v1799_v15 = vpop.xlane.xlu1 %1798 }
 0x794   : > { %3800 = vrcp.f32 %v1799_v15 }
 0x79a   : > { %v3801_v16 = vpop.eup %3800 }
 0x79b   : > { %v1801_v17 = vmul.f32 %v3801_v16, %v3799_v10 }
 0x79d   : > { %3485 = vmatmul.msk.f32.vlgmr.msra.gmra.mxu3 %vm1420_vm7, %v1801_v17  ;;  %v3765_v17 = vld [vmem:[%s4983_s23] ss:$0 sm:$0xff] }
 0x79e   : > { %3502 = vmatpush.msk.msra.mxu3 %vm1305_vm2, %v2080_v54  ;;  %v2457_v54 = vld [vmem:[#allocation10 + $0x38] sm:$0xff] }
 0x7a0   : > { %2105 = vmatpush.msra.mxu3 %v2079_v56  ;;  %v2456_v56 = vld [vmem:[#allocation10 + $0x30] sm:$0xff] }
 0x7a5   : > { %3496 = vmatmul.msk.f32.vlgmr.msrb.gmra.mxu3 %vm1257_vm0, %v4675_v46 }
 0x820   : > { %v1822_v20 = vpop.f32.mrf.mxu3 }
 0x821   : > { %3487 = vmatmul.msk.f32.vlgmr.msra.gmra.mxu0 %vm1393_vm6, %v1822_v20 }
 0x822   : > { %3504 = vmatpush.msk.msra.mxu0 %vm1305_vm2, %v2114_v51 }
 0x828   : > { %v1948_v24 = vpop.f32.mrf.mxu3 }
 0x829   : > { %v1949_v25 = vadd.f32 %v3759_v22, %v1948_v24  ;;  %3498 = vmatmul.msk.f32.vlgmr.msrb.gmra.mxu0 %vm1393_vm6, %v1886_v23  ;;  %v2175_v22 = vmul.f32 100.0, %v1248_v21  ;;  %v4790_v23 = vld [vmem:[%s1241_s18] ss:$0 sm:$0xff]  ;;  %s4987_s18 = sld [smem:[#allocation39_spill]] }
 0x82a   : > { %v2523_v21 = vld [vmem:[#allocation13 + $0x40] sm:$0xf] }
 0x82b   : > { %2006 = vmatpush.msrb.mxu1 %v1949_v25 }
 0x89e   : > { %v1850_v26 = vpop.f32.mrf.mxu0 }
 0x89f   : > { %v1853_v27 = vadd.f32 %v1850_v26, %v1666_v58  ;;  %v2078_v58 = vld [vmem:[#allocation10] sm:$0xff] }
 0x8a0   : > { %2106 = vmatpush.msra.mxu3 %v2078_v58  ;;  %v2241_v58 = vld [vmem:[#allocation15] sm:$0xf] }
 0x8a6   : > { %v1974_v28 = vpop.f32.mrf.mxu0 }
 0x8a7   : > { %v1975_v29 = vadd.f32 %v4699_v63, %v1974_v28  ;;  %v2147_v28 = vld [vmem:[#allocation13 + $0x10] sm:$0xf] }
 0x8a8   : > { %3506 = vmatpush.msk.msra.mxu1 %vm1305_vm2, %v2147_v28  ;;  %v2644_v28 = vld [vmem:[#allocation10 + $0x48] sm:$0xff] }
 0x8a9   : > { %v1977_v46 = vsel %vm1420_vm7, %v1975_v29, -inf }
 0x8aa   : > { %1978 = vmax.xlane.f32.xlu2 %v1977_v46  ;;  %v2145_v46 = vld [vmem:[#allocation13] sm:$0xff] }
 0x91d   : > { %v1979_v30 = vpop.xlane.xlu2 %1978 }
 0x91e   : > { %v1980_v31 = vsub.f32 %v1975_v29, %v1979_v30  ;;  %v2146_v29 = vld [vmem:[#allocation13 + $0x8] sm:$0xff]  ;;  %v2278_v30 = vld [vmem:[#allocation12 + $0x28] sm:$0xf] }
 0x91f   : > { %2169 = vmatpush.msra.mxu1 %v2146_v29  ;;  %v3769_v29 = vld [vmem:[%s4983_s23 + $0x2] ss:$0 sm:$0xff] }
 0x920   : > { %v1981_v32 = vmul.f32 1.442695, %v1980_v31  ;;  %v2277_v31 = vld [vmem:[#allocation12 + $0x20] sm:$0xff] }
 0x921   : > { %2170 = vmatpush.msra.mxu1 %v2145_v46 }
 0x922   : > { %3802 = vpow2.f32 %v1981_v32  ;;  %v2276_v32 = vld [vmem:[#allocation12 + $0x18] sm:$0xff] }
 0x928   : > { %v3803_v33 = vpop.eup %3802 }
 0x929   : > { %v1983_v34 = vsel %vm1420_vm7, %v3803_v33, 0.0 }
 0x92a   : > { %1984 = vadd.xlane.f32.xlu0 %v1983_v34 }
 0x99d   : > { %v1985_v36 = vpop.xlane.xlu0 %1984 }
 0x99e   : > { %3804 = vrcp.f32 %v1985_v36 }
 0x9a4   : > { %v3805_v37 = vpop.eup %3804 }
 0x9a5   : > { %v1987_v38 = vmul.f32 %v3805_v37, %v3803_v33 }
 0x9a7   : > { %3499 = vmatmul.msk.f32.vlgmr.msrb.gmra.mxu1 %vm1420_vm7, %v1987_v38  ;;  %v3767_v38 = vld [vmem:[%s4984_s1] ss:$0 sm:$0xff] }
 0x9a8   : > { %3515 = vmatpush.msk.msrb.mxu1 %vm1305_vm2, %v2278_v30  ;;  %v3771_v30 = vld [vmem:[%s4982_s4 + $0x2] ss:$0 sm:$0xff] }
 0x9aa   : > { %2301 = vmatpush.msrb.mxu1 %v2277_v31 }
 0x9ac   : > { %2302 = vmatpush.msrb.mxu1 %v2276_v32 }
 0x9af   : > { %3507 = vmatmul.msk.f32.vlgmr.msra.gmra.mxu1 %vm1257_vm0, %v4767_v52 }
 0x9b7   : > { %3516 = vmatmul.msk.f32.vlgmr.msrb.gmra.mxu1 %vm1257_vm0, %v4767_v52 }
 0xa24   : > { %v2008_v63 = vpop.f32.mrf.mxu1 }
 0xa25   : > { %3501 = vmatmul.msk.f32.vlgmr.msrb.gmra.mxu2 %vm1393_vm6, %v2008_v63  ;;  %vm3135_vm6 = vcmask 261120  }
 0xa2c   : > { %v2172_v63 = vpop.f32.mrf.mxu1 }
 0xaa8   : > { %v2036_v39 = vpop.f32.mrf.mxu2 }
 0xaa9   : > { %v2039_v40 = vadd.f32 %v2036_v39, %v1853_v27  ;;  %v2173_v39 = vadd.f32 %v3767_v38, %v2172_v63  ;;  %v3772_v38 = vld [vmem:[%s4984_s1 + $0x2] ss:$0 sm:$0xff] }
 0xaab   : > { %v2040_v42 = vadd.f32 %v2039_v40, %v4655_v0  ;;  %v2113_v0 = vld [vmem:[#allocation12 + $0x8] sm:$0xff]  ;;  %2236 = vmatpush.msrb.mxu3 %v2173_v39  ;;  %v3768_v40 = vld [vmem:[%s4982_s4 + $0x1] ss:$0 sm:$0xff] }
 0xaac   : > { %2139 = vmatpush.msra.mxu0 %v2113_v0  ;;  %v2458_v0 = vld [vmem:[#allocation10 + $0x40] sm:$0xf] }
 0xaad   : > { %v4757_v43 = vadd.f32 %v3760_v41, %v2040_v42  ;;  %v2304_v41 = vpop.f32.mrf.mxu1 }
 0xaae   : > { %2140 = vmatpush.msra.mxu0 %v2112_v53  ;;  %v2305_v42 = vadd.f32 %v3768_v40, %v2304_v41  ;;  %v1250_v40 = vld [vmem:[%s4620_s9 + $0x10] sm:$0xff] }
 0xaaf   : > { %v2048_v44 = vsel %vm1257_vm0, %v4757_v43, 0.0  ;;  %3505 = vmatmul.msk.f32.vlgmr.msra.gmra.mxu0 %vm1257_vm0, %v4767_v52  ;;  %v2552_v41 = vmul.f32 100.0, %v1250_v40 }
 0xab0   : > { %2049 = vadd.xlane.f32.xlu1 %v2048_v44  ;;  %3512 = vmatpush.msk.msrb.mxu0 %vm1305_vm2, %v2245_v55  ;;  %v2310_v44 = vld [vmem:[#allocation13 + $0x28] sm:$0xf] }
 0xab2   : > { %2268 = vmatpush.msrb.mxu0 %v2244_v57 }
 0xab4   : > { %2269 = vmatpush.msrb.mxu0 %v2243_v59  ;;  %v3770_v59 = vld [vmem:[%s4984_s1 + $0x1] ss:$0 sm:$0xff] }
 0xb23   : > { %v2050_v45 = vpop.xlane.xlu1 %2049 }
 0xb24   : > { %v2051_v47 = vmul.f32 %v2050_v45, %v4661_v8  ;;  %v2309_v45 = vld [vmem:[#allocation13 + $0x20] sm:$0xff] }
 0xb26   : > { %v2052_v48 = vsub.f32 %v4757_v43, %v2051_v47  ;;  %v2308_v47 = vld [vmem:[#allocation13 + $0x18] sm:$0xff] }
 0xb28   : > { %v2053_v49 = vmul.f32 %v2052_v48, %v2052_v48 }
 0xb2a   : > { %v2054_v50 = vsel %vm1257_vm0, %v2053_v49, 0.0 }
 0xb2b   : > { %2055 = vadd.xlane.f32.xlu2 %v2054_v50  ;;  %v3764_v50 = vld [vmem:[%s4983_s23 + $0x1] ss:$0 sm:$0xff] }
 0xb2c   : > { %v2142_v15 = vpop.f32.mrf.mxu0 }
 0xb2d   : > { %v2143_v16 = vadd.f32 %v3763_v14, %v2142_v15  ;;  %v2491_v14 = vld [vmem:[#allocation12 + $0x40] sm:$0xf]  ;;  %v2490_v15 = vld [vmem:[#allocation12 + $0x38] sm:$0xff] }
 0xb2f   : > { %3508 = vmatpush.xpose.msk.msra.mxu2 %vm2176_vm12, %v2143_v16  ;;  %v2489_v16 = vld [vmem:[#allocation12 + $0x30] sm:$0xff] }
 0xb33   : > { %3518 = vmatpush.msk.msrb.mxu2 %vm1305_vm2, %v2310_v44 }
 0xb35   : > { %2333 = vmatpush.msrb.mxu2 %v2309_v45 }
 0xb37   : > { %2334 = vmatpush.msrb.mxu2 %v2308_v47 }
 0xb9e   : > { %v2056_v60 = vpop.xlane.xlu2 %2055 }
 0xb9f   : > { %v2057_v61 = vmul.f32 %v2056_v60, %v4661_v8 }
 0xba1   : > { %v2058_v62 = vadd.f32 1e-12, %v2057_v61 }
 0xba3   : > { %3806 = vrsqrt.f32 %v2058_v62  ;;  %vm2065_vm10 = vweird.f32 %v2058_v62 }
 0xba9   : > { %v3807_v1 = vpop.eup %3806 }
 0xbaa   : > { %v2060_v2 = vmul.f32 %v3807_v1, %v2058_v62  ;;  %vm2066_vm9 = vweird.f32 %v3807_v1 }
 0xbab   : > { %vm2067_vm11 = vmor %vm2065_vm10, %vm2066_vm9 }
 0xbac   : > { %v2061_v3 = vmul.f32 %v3807_v1, %v2060_v2 }
 0xbae   : > { %v2062_v4 = vmul.f32 0.5, %v2061_v3 }
 0xbb0   : > { %v2063_v5 = vsub.f32 1.5, %v2062_v4 }
 0xbb2   : > { %v2064_v6 = vmul.f32 %v3807_v1, %v2063_v5 }
 0xbb4   : > { %v2068_v9 = vsel %vm2067_vm11, %v3807_v1, %v2064_v6  ;;  %v1249_v1 = vld [vmem:[%s4620_s9 + $0x8] sm:$0xff] }
 0xbb5   : > { %v2069_v10 = vmul.f32 %v2068_v9, %v2052_v48  ;;  %v2339_v2 = vmul.f32 100.0, %v1249_v1  ;;  %v2834_v1 = vld [vmem:[#allocation10 + $0x70] sm:$0xf] }
 0xbb7   : > { %v2073_v12 = vmul.f32 %v3761_v7, %v2069_v10 }
 0xbb9   : > { %v4776_v13 = vadd.f32 %v3762_v11, %v2073_v12 }
 0xbbb   : > { %3503 = vmatmul.msk.f32.vlgmr.msra.gmra.mxu3 %vm1257_vm0, %v4776_v13  ;;  %3513 = vmatmul.msk.f32.vlgmr.msrb.gmra.mxu0 %vm1257_vm0, %v4776_v13 }
 0xbbc   : > { %3520 = vmatpush.xpose.msk.msra.mxu3 %vm2176_vm12, %v2305_v42 }
 0xc38   : > { %v2271_v53 = vpop.f32.mrf.mxu0 }
 0xc39   : > { %v2272_v55 = vadd.f32 %v3764_v50, %v2271_v53  ;;  %v2679_v53 = vld [vmem:[#allocation12 + $0x58] sm:$0xf] }
 0xc3b   : > { %v2274_v57 = vmul.f32 0.5, %v2272_v55  ;;  %v2677_v55 = vld [vmem:[#allocation12 + $0x48] sm:$0xff] }
 0xc3e   : > { %v2108_v18 = vpop.f32.mrf.mxu3 }
 0xc3f   : > { %v2109_v19 = vadd.f32 %v3765_v17, %v2108_v18 }
 0xc41   : > { %v2111_v20 = vmul.f32 0.5, %v2109_v19 }
 0xc43   : > { %3509 = vmatmul.msk.f32.vlgmr.msra.gmra.mxu2 %vm2176_vm12, %v2111_v20  ;;  %v2402_v20 = vld [vmem:[#allocation15 + $0x4] sm:$0xf] }
 0xc44   : > { %3525 = vmatpush.msk.msra.mxu2 %vm1305_vm2, %v2241_v58  ;;  %3523 = vmatpush.msk.msra.mxu1 %vm1305_vm2, %v2402_v20  ;;  %v2709_v58 = vld [vmem:[#allocation13 + $0x48] sm:$0xff] }
 0xc46   : > { %3534 = vmatpush.msk.msrb.mxu1 %vm1305_vm2, %v2523_v21 }
 0xc4b   : > { %3519 = vmatmul.msk.f32.vlgmr.msrb.gmra.mxu2 %vm1257_vm0, %v4767_v52 }
 0xcc6   : > { %v2200_v24 = vpop.f32.mrf.mxu2 }
 0xcc7   : > { %v2201_v25 = vadd.f32 %v2200_v24, %v2175_v22  ;;  %v2522_v22 = vld [vmem:[#allocation13 + $0x38] sm:$0xff]  ;;  %v2521_v24 = vld [vmem:[#allocation13 + $0x30] sm:$0xff] }
 0xcc8   : > { %2546 = vmatpush.msrb.mxu1 %v2522_v22 }
 0xcc9   : > { %v2206_v26 = vadd.f32 %v4790_v23, %v2201_v25  ;;  %v2646_v25 = vld [vmem:[#allocation10 + $0x58] sm:$0xf] }
 0xcca   : > { %2547 = vmatpush.msrb.mxu1 %v2521_v24 }
 0xccb   : > { %v2207_v27 = vsel %vm1420_vm7, %v2206_v26, -inf }
 0xccc   : > { %2208 = vmax.xlane.f32.xlu0 %v2207_v27  ;;  %v2645_v27 = vld [vmem:[#allocation10 + $0x50] sm:$0xff] }
 0xcce   : > { %v2336_v60 = vpop.f32.mrf.mxu2 }
 0xccf   : > { %v2337_v61 = vadd.f32 %v3770_v59, %v2336_v60  ;;  %v2615_v59 = vld [vmem:[#allocation15 + $0x8] sm:$0xf] }
 0xcd1   : > { %2396 = vmatpush.msra.mxu0 %v2337_v61 }
 0xcd3   : > { %3531 = vmatpush.msk.msrb.mxu0 %vm1305_vm2, %v2491_v14 }
 0xcd5   : > { %2514 = vmatpush.msrb.mxu0 %v2490_v15 }
 0xcd7   : > { %2515 = vmatpush.msrb.mxu0 %v2489_v16 }
 0xd3f   : > { %v2209_v33 = vpop.xlane.xlu0 %2208 }
 0xd40   : > { %v2210_v34 = vsub.f32 %v2206_v26, %v2209_v33 }
 0xd42   : > { %v2211_v35 = vmul.f32 1.442695, %v2210_v34 }
 0xd44   : > { %3808 = vpow2.f32 %v2211_v35 }
 0xd4a   : > { %v3809_v36 = vpop.eup %3808 }
 0xd4b   : > { %v2213_v37 = vsel %vm1420_vm7, %v3809_v36, 0.0 }
 0xd4c   : > { %2214 = vadd.xlane.f32.xlu1 %v2213_v37 }
 0xdbf   : > { %v2215_v48 = vpop.xlane.xlu1 %2214 }
 0xdc0   : > { %3810 = vrcp.f32 %v2215_v48 }
 0xdc6   : > { %v3811_v49 = vpop.eup %3810 }
 0xdc7   : > { %v2217_v51 = vmul.f32 %v3811_v49, %v3809_v36 }
 0xdc9   : > { %3510 = vmatmul.msk.f32.vlgmr.msrb.gmra.mxu3 %vm1420_vm7, %v2217_v51 }
 0xdca   : > { %3528 = vmatpush.msk.msrb.mxu3 %vm1305_vm2, %v2458_v0 }
 0xdcc   : > { %2481 = vmatpush.msrb.mxu3 %v2457_v54  ;;  %v2678_v54 = vld [vmem:[#allocation12 + $0x50] sm:$0xff] }
 0xdce   : > { %2482 = vmatpush.msrb.mxu3 %v2456_v56  ;;  %v2711_v56 = vld [vmem:[#allocation13 + $0x58] sm:$0xf] }
 0xdd1   : > { %3521 = vmatmul.msk.f32.vlgmr.msra.gmra.mxu3 %vm2176_vm12, %v2274_v57  ;;  %v2710_v57 = vld [vmem:[#allocation13 + $0x50] sm:$0xff] }
 0xdd9   : > { %3529 = vmatmul.msk.f32.vlgmr.msrb.gmra.mxu3 %vm1257_vm0, %v4776_v13 }
 0xe4c   : > { %v2238_v62 = vpop.f32.mrf.mxu3 }
 0xe4d   : > { %3526 = vmatmul.msk.f32.vlgmr.msra.gmra.mxu2 %vm2176_vm12, %v2238_v62 }
 0xe54   : > { %v2363_v3 = vpop.f32.mrf.mxu3 }
 0xe55   : > { %v2364_v4 = vadd.f32 %v2363_v3, %v2339_v2  ;;  %v2833_v2 = vld [vmem:[#allocation10 + $0x68] sm:$0xff]  ;;  %v2832_v3 = vld [vmem:[#allocation10 + $0x60] sm:$0xff] }
 0xe57   : > { %v2366_v5 = vadd.f32 %v4790_v23, %v2364_v4  ;;  %v3774_v4 = vld [vmem:[%s4982_s4 + $0x3] ss:$0 sm:$0xff] }
 0xe59   : > { %v2367_v6 = vsel %vm1420_vm7, %v2366_v5, -inf }
 0xe5a   : > { %2368 = vmax.xlane.f32.xlu2 %v2367_v6 }
 0xe5c   : > { %v2484_v46 = vpop.f32.mrf.mxu3 }
 0xe5d   : > { %v2485_v31 = vadd.f32 %v3769_v29, %v2484_v46  ;;  %v2867_v46 = vld [vmem:[#allocation12 + $0x70] sm:$0xf] }
 0xe5f   : > { %v2487_v34 = vmul.f32 0.5, %v2485_v31  ;;  %v2865_v31 = vld [vmem:[#allocation12 + $0x60] sm:$0xff] }
 0xecd   : > { %v2369_v7 = vpop.xlane.xlu2 %2368 }
 0xece   : > { %v2370_v9 = vsub.f32 %v2366_v5, %v2369_v7  ;;  %v3773_v7 = vld [vmem:[%s4983_s23 + $0x3] ss:$0 sm:$0xff] }
 0xed0   : > { %v2371_v10 = vmul.f32 1.442695, %v2370_v9  ;;  %v2452_v35 = vpop.f32.mrf.mxu2 }
 0xed2   : > { %3812 = vpow2.f32 %v2371_v10 }
 0xed8   : > { %v3813_v11 = vpop.eup %3812 }
 0xed9   : > { %v2373_v12 = vsel %vm1420_vm7, %v3813_v11, 0.0 }
 0xeda   : > { %2374 = vadd.xlane.f32.xlu0 %v2373_v12  ;;  %v3775_v12 = vld [vmem:[%s4984_s1 + $0x3] ss:$0 sm:$0xff] }
 0xf4d   : > { %v2375_v17 = vpop.xlane.xlu0 %2374 }
 0xf4e   : > { %3814 = vrcp.f32 %v2375_v17 }
 0xf54   : > { %v3815_v18 = vpop.eup %3814 }
 0xf55   : > { %v2377_v19 = vmul.f32 %v3815_v18, %v3813_v11  ;;  %v1251_v18 = vld [vmem:[%s4620_s9 + $0x18] sm:$0xff] }
 0xf57   : > { %3522 = vmatmul.msk.f32.vlgmr.msra.gmra.mxu0 %vm1420_vm7, %v2377_v19  ;;  %v2740_v19 = vmul.f32 100.0, %v1251_v18 }
 0xf58   : > { %3539 = vmatpush.msk.msra.mxu0 %vm1305_vm2, %v2615_v59 }
 0xf5f   : > { %3532 = vmatmul.msk.f32.vlgmr.msrb.gmra.mxu0 %vm1257_vm0, %v4767_v52 }
 0xfd4   : > { %v2398_v26 = vpop.f32.mrf.mxu0 }
 0xfd5   : > { %3524 = vmatmul.msk.f32.vlgmr.msra.gmra.mxu1 %vm2176_vm12, %v2398_v26 }
 0xfd6   : > { %3542 = vmatpush.msk.msra.mxu1 %vm1305_vm2, %v2646_v25 }
 0xfd8   : > { %2669 = vmatpush.msra.mxu1 %v2645_v27 }
 0xfda   : > { %2670 = vmatpush.msra.mxu1 %v2644_v28 }
 0xfdc   : > { %v2517_v32 = vpop.f32.mrf.mxu0 }
 0xfdd   : > { %v2518_v33 = vadd.f32 %v3771_v30, %v2517_v32  ;;  %3535 = vmatmul.msk.f32.vlgmr.msrb.gmra.mxu1 %vm1257_vm0, %v4767_v52  ;;  %v2866_v30 = vld [vmem:[#allocation12 + $0x68] sm:$0xff]  ;;  %v2803_v32 = vld [vmem:[#allocation15 + $0xc] sm:$0xf] }
 0xfdf   : > { %3536 = vmatpush.xpose.msk.msrb.mxu2 %vm2176_vm12, %v2518_v33 }
 0xfe2   : > { %3537 = vmatmul.msk.f32.vlgmr.msrb.gmra.mxu2 %vm2176_vm12, %v2487_v34 }
 0xfe3   : > { %3545 = vmatpush.msk.msra.mxu2 %vm1305_vm2, %v2679_v53  ;;  %v2899_v53 = vld [vmem:[#allocation13 + $0x70] sm:$0xf] }
 0xfe5   : > { %3543 = vmatmul.msk.f32.vlgmr.msra.gmra.mxu1 %vm1257_vm0, %v4776_v13  ;;  %2702 = vmatpush.msra.mxu2 %v2678_v54  ;;  %v2898_v54 = vld [vmem:[#allocation13 + $0x68] sm:$0xff] }
 0xfe7   : > { %2703 = vmatpush.msra.mxu2 %v2677_v55  ;;  %v2897_v55 = vld [vmem:[#allocation13 + $0x60] sm:$0xff] }
 0xfe9   : > { %3553 = vmatpush.msk.msrb.mxu2 %vm1305_vm2, %v2803_v32 }
 0xfea   : > { %3546 = vmatmul.msk.f32.vlgmr.msra.gmra.mxu2 %vm1257_vm0, %v4767_v52 }
0x1052   : > { %v2426_v36 = vpop.f32.mrf.mxu1 }
0x1053   : > { %v4836_v37 = vadd.f32 %v2452_v35, %v2426_v36  ;;  %v3777_v36 = vld [vmem:[%s4982_s4 + $0x4] ss:$0 sm:$0xff] }
0x105a   : > { %v2549_v63 = vpop.f32.mrf.mxu1 }
0x105b   : > { %v2550_v39 = vadd.f32 %v3772_v38, %v2549_v63  ;;  %v3776_v63 = vld [vmem:[%s4983_s23 + $0x4] ss:$0 sm:$0xff] }
0x105d   : > { %2609 = vmatpush.msra.mxu3 %v2550_v39 }
0x105f   : > { %3548 = vmatpush.msk.msrb.mxu3 %vm1305_vm2, %v2711_v56 }
0x1061   : > { %2734 = vmatpush.msrb.mxu3 %v2710_v57 }
0x1062   : > { %v2672_v9 = vpop.f32.mrf.mxu1 }
0x1063   : > { %2735 = vmatpush.msrb.mxu3 %v2709_v58  ;;  %v2673_v11 = vadd.f32 %v3773_v7, %v2672_v9  ;;  %v3779_v7 = vld [vmem:[%s4985_s16] ss:$0 sm:$0xff]  ;;  %s1245_s16 = scalar_lea.vmem %s4993_s7, %s4651_s29 }
0x1065   : > { %v2576_v42 = vpop.f32.mrf.mxu2  ;;  %v2675_v14 = vmul.f32 0.5, %v2673_v11 }
0x1066   : > { %v2577_v44 = vadd.f32 %v2576_v42, %v2552_v41 }
0x1068   : > { %v2579_v45 = vadd.f32 %v4790_v23, %v2577_v44 }
0x106a   : > { %v2580_v47 = vsel %vm1420_vm7, %v2579_v45, -inf }
0x106b   : > { %2581 = vmax.xlane.f32.xlu1 %v2580_v47  ;;  %v1252_v47 = vld [vmem:[%s4620_s9 + $0x20] sm:$0xff]  ;;  %s4986_s9 = sld [smem:[#allocation41_spill]] }
0x106d   : > { %v2705_v5 = vpop.f32.mrf.mxu2 }
0x106e   : > { %v2706_v6 = vadd.f32 %v3774_v4, %v2705_v5 }
0x1070   : > { %3550 = vmatpush.xpose.msk.msrb.mxu0 %vm2176_vm12, %v2706_v6 }
0x1071   : > { %v3028_v18 = vld [vmem:[%s4986_s9 + $0x8] sm:$0xff] }
0x10de   : > { %v2582_v48 = vpop.xlane.xlu1 %2581 }
0x10df   : > { %v2583_v49 = vsub.f32 %v2579_v45, %v2582_v48  ;;  %v2928_v48 = vmul.f32 100.0, %v1252_v47 }
0x10e1   : > { %v2584_v50 = vmul.f32 1.442695, %v2583_v49 }
0x10e3   : > { %3816 = vpow2.f32 %v2584_v50 }
0x10e9   : > { %v3817_v51 = vpop.eup %3816 }
0x10ea   : > { %v2586_v0 = vsel %vm1420_vm7, %v3817_v51, 0.0 }
0x10eb   : > { %2587 = vadd.xlane.f32.xlu2 %v2586_v0 }
0x115e   : > { %v2588_v60 = vpop.xlane.xlu2 %2587 }
0x115f   : > { %3818 = vrcp.f32 %v2588_v60  ;;  %v3778_v60 = vld [vmem:[%s4984_s1 + $0x4] ss:$0 sm:$0xff] }
0x1165   : > { %v3819_v61 = vpop.eup %3818 }
0x1166   : > { %v2590_v62 = vmul.f32 %v3819_v61, %v3817_v51 }
0x1168   : > { %3538 = vmatmul.msk.f32.vlgmr.msra.gmra.mxu3 %vm1420_vm7, %v2590_v62 }
0x1169   : > { %3556 = vmatpush.msk.msra.mxu3 %vm1305_vm2, %v2834_v1  ;;  %v2991_v1 = vld [vmem:[#allocation15 + $0x10] sm:$0xf] }
0x116b   : > { %2857 = vmatpush.msra.mxu3 %v2833_v2 }
0x116d   : > { %2858 = vmatpush.msra.mxu3 %v2832_v3 }
0x1170   : > { %3549 = vmatmul.msk.f32.vlgmr.msrb.gmra.mxu3 %vm1257_vm0, %v4767_v52 }
0x1178   : > { %3557 = vmatmul.msk.f32.vlgmr.msra.gmra.mxu3 %vm1257_vm0, %v4776_v13 }
0x11eb   : > { %v2611_v10 = vpop.f32.mrf.mxu3 }
0x11ec   : > { %3540 = vmatmul.msk.f32.vlgmr.msra.gmra.mxu0 %vm2176_vm12, %v2611_v10 }
0x11ed   : > { %3559 = vmatpush.msk.msra.mxu0 %vm1305_vm2, %v2867_v46 }
0x11ef   : > { %2890 = vmatpush.msra.mxu0 %v2866_v30 }
0x11f1   : > { %2891 = vmatpush.msra.mxu0 %v2865_v31  ;;  %v3781_v31 = vld [vmem:[%s4988_s26] ss:$0 sm:$0xff] }
0x11f3   : > { %v2737_v15 = vpop.f32.mrf.mxu3 }
0x11f4   : > { %v2738_v16 = vadd.f32 %v3775_v12, %v2737_v15  ;;  %3551 = vmatmul.msk.f32.vlgmr.msrb.gmra.mxu0 %vm2176_vm12, %v2675_v14 }
0x11f5   : > { %3567 = vmatpush.msk.msrb.mxu0 %vm1305_vm2, %v2991_v1 }
0x11f6   : > { %2797 = vmatpush.msrb.mxu1 %v2738_v16 }
0x11f8   : > { %3562 = vmatpush.msk.msra.mxu1 %vm1305_vm2, %v2899_v53 }
0x11fa   : > { %2922 = vmatpush.msra.mxu1 %v2898_v54 }
0x11fb   : > { %v2860_v39 = vpop.f32.mrf.mxu3 }
0x11fc   : > { %3560 = vmatmul.msk.f32.vlgmr.msra.gmra.mxu0 %vm1257_vm0, %v4767_v52  ;;  %v2861_v41 = vadd.f32 %v3776_v63, %v2860_v39  ;;  %2923 = vmatpush.msra.mxu1 %v2897_v55 }
0x11fe   : > { %v2863_v42 = vmul.f32 0.5, %v2861_v41 }
0x1269   : > { %v2639_v13 = vpop.f32.mrf.mxu0 }
0x126a   : > { %v2642_v17 = vadd.f32 %v2639_v13, %v4836_v37 }
0x1271   : > { %v2764_v20 = vpop.f32.mrf.mxu0 }
0x1272   : > { %v2765_v21 = vadd.f32 %v2764_v20, %v2740_v19 }
0x1274   : > { %v2767_v22 = vadd.f32 %v4790_v23, %v2765_v21 }
0x1276   : > { %v2768_v24 = vsel %vm1420_vm7, %v2767_v22, -inf }
0x1277   : > { %2769 = vmax.xlane.f32.xlu0 %v2768_v24 }
0x1279   : > { %v2893_v37 = vpop.f32.mrf.mxu0 }
0x127a   : > { %v2894_v38 = vadd.f32 %v3777_v36, %v2893_v37 }
0x127c   : > { %3564 = vmatpush.xpose.msk.msra.mxu2 %vm2176_vm12, %v2894_v38 }
0x12ea   : > { %v2770_v25 = vpop.xlane.xlu0 %2769 }
0x12eb   : > { %v2771_v26 = vsub.f32 %v2767_v22, %v2770_v25 }
0x12ed   : > { %v2772_v27 = vmul.f32 1.442695, %v2771_v26 }
0x12ef   : > { %3820 = vpow2.f32 %v2772_v27 }
0x12f5   : > { %v3821_v28 = vpop.eup %3820 }
0x12f6   : > { %v2774_v29 = vsel %vm1420_vm7, %v3821_v28, 0.0 }
0x12f7   : > { %2775 = vadd.xlane.f32.xlu1 %v2774_v29  ;;  %v3780_v29 = vld [vmem:[%s4987_s18] ss:$0 sm:$0xff] }
0x136a   : > { %v2776_v33 = vpop.xlane.xlu1 %2775 }
0x136b   : > { %3822 = vrcp.f32 %v2776_v33 }
0x1371   : > { %v3823_v34 = vpop.eup %3822 }
0x1372   : > { %v2778_v35 = vmul.f32 %v3823_v34, %v3821_v28  ;;  %v3782_v34 = vld [vmem:[%s4989_s15] ss:$0 sm:$0xff] }
0x1374   : > { %3552 = vmatmul.msk.f32.vlgmr.msrb.gmra.mxu1 %vm1420_vm7, %v2778_v35 }
0x137c   : > { %3563 = vmatmul.msk.f32.vlgmr.msra.gmra.mxu1 %vm1257_vm0, %v4767_v52 }
0x13f1   : > { %v2799_v40 = vpop.f32.mrf.mxu1 }
0x13f2   : > { %3554 = vmatmul.msk.f32.vlgmr.msrb.gmra.mxu2 %vm2176_vm12, %v2799_v40 }
0x13f9   : > { %v2925_v61 = vpop.f32.mrf.mxu1 }
0x13fa   : > { %3565 = vmatmul.msk.f32.vlgmr.msra.gmra.mxu2 %vm2176_vm12, %v2863_v42  ;;  %v2926_v62 = vadd.f32 %v3778_v60, %v2925_v61  ;;  %v3034_v42 = vld [vmem:[#allocation16 + $0x18] sm:$0xff] }
0x13fb   : > { %3151 = vmatpush.msrb.mxu2 %v3034_v42 }
0x13fc   : > { %2985 = vmatpush.msrb.mxu3 %v2926_v62 }
0x1475   : > { %v2827_v44 = vpop.f32.mrf.mxu2 }
0x1476   : > { %v2830_v45 = vadd.f32 %v2827_v44, %v2642_v17  ;;  %v3029_v17 = vld [vmem:[%s4986_s9 + $0x10] sm:$0xf] }
0x1477   : > { %3569 = vmatpush.msk.msrb.mxu1 %vm1305_vm2, %v3029_v17 }
0x1479   : > { %3089 = vmatpush.msrb.mxu1 %v3028_v18 }
0x147d   : > { %v2952_v49 = vpop.f32.mrf.mxu2 }
0x147e   : > { %v2953_v50 = vadd.f32 %v2952_v49, %v2928_v48 }
0x1480   : > { %v2955_v51 = vadd.f32 %v4790_v23, %v2953_v50  ;;  %v3032_v50 = vld [vmem:[#allocation16 + $0x8] sm:$0xff] }
0x1482   : > { %v2956_v0 = vsel %vm1420_vm7, %v2955_v51, -inf }
0x1483   : > { %2957 = vmax.xlane.f32.xlu2 %v2956_v0 }
0x14f6   : > { %v2958_v56 = vpop.xlane.xlu2 %2957 }
0x14f7   : > { %v2959_v57 = vsub.f32 %v2955_v51, %v2958_v56  ;;  %v3031_v51 = vld [vmem:[#allocation16] sm:$0xff] }
0x14f9   : > { %v2960_v58 = vmul.f32 1.442695, %v2959_v57 }
0x14fb   : > { %3824 = vpow2.f32 %v2960_v58 }
0x1501   : > { %v3825_v59 = vpop.eup %3824 }
0x1502   : > { %v2962_v23 = vsel %vm1420_vm7, %v3825_v59, 0.0 }
0x1503   : > { %2963 = vadd.xlane.f32.xlu0 %v2962_v23 }
0x1576   : > { %v2964_v2 = vpop.xlane.xlu0 %2963 }
0x1577   : > { %3826 = vrcp.f32 %v2964_v2 }
0x157d   : > { %v3827_v3 = vpop.eup %3826 }
0x157e   : > { %v2966_v52 = vmul.f32 %v3827_v3, %v3825_v59 }
0x1580   : > { %3566 = vmatmul.msk.f32.vlgmr.msrb.gmra.mxu3 %vm1420_vm7, %v2966_v52 }
0x1603   : > { %v2987_v4 = vpop.f32.mrf.mxu3 }
0x1604   : > { %3568 = vmatmul.msk.f32.vlgmr.msrb.gmra.mxu0 %vm2176_vm12, %v2987_v4 }
0x1681   : > { %v3015_v5 = vpop.f32.mrf.mxu0 }
0x1682   : > { %v3018_v6 = vadd.f32 %v3015_v5, %v2830_v45  ;;  %v3033_v45 = vld [vmem:[#allocation16 + $0x10] sm:$0xff] }
0x1683   : > { %3152 = vmatpush.msrb.mxu2 %v3033_v45 }
0x1684   : > { %v3019_v9 = vadd.f32 %v3018_v6, %v4757_v43  ;;  %v3027_v43 = vld [vmem:[%s4986_s9] sm:$0xff] }
0x1685   : > { %3090 = vmatpush.msrb.mxu1 %v3027_v43  ;;  %3153 = vmatpush.msrb.mxu2 %v3032_v50 }
0x1686   : > { %v4888_v10 = vadd.f32 %v3779_v7, %v3019_v9 }
0x1687   : > { %3154 = vmatpush.msrb.mxu2 %v3031_v51 }
0x1688   : > { %v3036_v11 = vsel %vm1257_vm0, %v4888_v10, 0.0 }
0x1689   : > { %3037 = vadd.xlane.f32.xlu1 %v3036_v11 }
0x16fc   : > { %v3038_v12 = vpop.xlane.xlu1 %3037 }
0x16fd   : > { %v3039_v14 = vmul.f32 %v3038_v12, %v4661_v8 }
0x16ff   : > { %v3040_v15 = vsub.f32 %v4888_v10, %v3039_v14 }
0x1701   : > { %v3041_v16 = vmul.f32 %v3040_v15, %v3040_v15 }
0x1703   : > { %v3042_v13 = vsel %vm1257_vm0, %v3041_v16, 0.0 }
0x1704   : > { %3043 = vadd.xlane.f32.xlu2 %v3042_v13 }
0x1777   : > { %v3044_v19 = vpop.xlane.xlu2 %3043 }
0x1778   : > { %v3045_v20 = vmul.f32 %v3044_v19, %v4661_v8 }
0x177a   : > { %v3046_v21 = vadd.f32 1e-12, %v3045_v20 }
0x177c   : > { %3828 = vrsqrt.f32 %v3046_v21  ;;  %vm3053_vm14 = vweird.f32 %v3046_v21 }
0x1782   : > { %v3829_v22 = vpop.eup %3828 }
0x1783   : > { %v3048_v24 = vmul.f32 %v3829_v22, %v3046_v21  ;;  %vm3054_vm13 = vweird.f32 %v3829_v22 }
0x1784   : > { %vm3055_vm15 = vmor %vm3053_vm14, %vm3054_vm13 }
0x1785   : > { %v3049_v25 = vmul.f32 %v3829_v22, %v3048_v24 }
0x1787   : > { %v3050_v26 = vmul.f32 0.5, %v3049_v25 }
0x1789   : > { %v3051_v27 = vsub.f32 1.5, %v3050_v26 }
0x178b   : > { %v3052_v28 = vmul.f32 %v3829_v22, %v3051_v27 }
0x178d   : > { %v3056_v46 = vsel %vm3055_vm15, %v3829_v22, %v3052_v28 }
0x178e   : > { %v3057_v30 = vmul.f32 %v3056_v46, %v3040_v15  ;;  %v3783_v15 = vld [vmem:[%s4990_s0] ss:$0 sm:$0xff] }
0x1790   : > { %v3061_v32 = vmul.f32 %v3780_v29, %v3057_v30 }
0x1792   : > { %v3065_v33 = vadd.f32 %v3781_v31, %v3061_v32  ;;  %v3784_v31 = vld [vmem:[%s4991_s2] ss:$0 sm:$0xff] }
0x1794   : > { %3570 = vmatmul.msk.f32.vlgmr.msrb.gmra.mxu1 %vm1257_vm0, %v3065_v33  ;;  %v3785_v33 = vld [vmem:[%s4992_s3] ss:$0 sm:$0xff] }
0x1811   : > { %v3092_v35 = vpop.f32.mrf.mxu1 }
0x1812   : > { %v3093_v36 = vadd.f32 %v3782_v34, %v3092_v35 }
0x1814   : > { %v3096_v37 = vmul.f32 0.70710677, %v3093_v36  ;;  %v3095_v11 = vmul.f32 0.5, %v3093_v36 }
0x1816   : > { %v3097_v38 = vand.u32 2147483647, %v3096_v37  ;;  %vm3130_vm5 = vcmp.lt.f32.partialorder %v3096_v37, 0.0 }
0x1818   : > { %v3098_v63 = vmul.f32 0.3275911, %v3097_v38  ;;  %v3124_v56 = vsub.f32 0.0, %v3097_v38 }
0x181a   : > { %v3099_v39 = vadd.f32 1.0, %v3098_v63  ;;  %v3125_v59 = vmul.f32 %v3124_v56, %v3097_v38 }
0x181c   : > { %3830 = vrcp.f32 %v3099_v39  ;;  %v3111_v47 = vand.u32 2147483648, %v3099_v39  ;;  %v3109_v49 = vand.u32 2147483647, %v3099_v39  ;;  %vm3105_vm2 = vweird.f32 %v3099_v39 }
0x181d   : > { %v3126_v61 = vmul.f32 1.442695, %v3125_v59 }
0x181e   : > { %v3112_v53 = vor.u32 1.1754944e-38, %v3111_v47  ;;  %vm3110_vm4 = vcmp.eq.f32.partialorder %v3109_v49, 8.507059e+37 }
0x181f   : > { %3832 = vpow2.f32 %v3126_v61 }
0x1822   : > { %v3831_v40 = vpop.eup %3830 }
0x1823   : > { %v3101_v41 = vmul.f32 %v3831_v40, %v3099_v39  ;;  %vm3106_vm1 = vweird.f32 %v3831_v40 }
0x1824   : > { %vm3107_vm3 = vmor %vm3105_vm2, %vm3106_vm1 }
0x1825   : > { %v3102_v44 = vsub.f32 1.0, %v3101_v41  ;;  %v3833_v4 = vpop.eup %3832 }
0x1827   : > { %v3103_v48 = vmul.f32 %v3831_v40, %v3102_v44 }
0x1829   : > { %v3104_v0 = vadd.f32 %v3831_v40, %v3103_v48 }
0x182b   : > { %v3108_v54 = vsel %vm3107_vm3, %v3831_v40, %v3104_v0 }
0x182c   : > { %v3113_v55 = vsel %vm3110_vm4, %v3112_v53, %v3108_v54 }
0x182d   : > { %v3115_v57 = vmul.f32 1.0614054, %v3113_v55 }
0x182f   : > { %v3116_v58 = vadd.f32 -1.4531521, %v3115_v57 }
0x1831   : > { %v3117_v23 = vmul.f32 %v3116_v58, %v3113_v55 }
0x1833   : > { %v3118_v60 = vadd.f32 1.4214138, %v3117_v23 }
0x1835   : > { %v3119_v62 = vmul.f32 %v3118_v60, %v3113_v55 }
0x1837   : > { %v3120_v1 = vadd.f32 -0.28449672, %v3119_v62 }
0x1839   : > { %v3121_v2 = vmul.f32 %v3120_v1, %v3113_v55 }
0x183b   : > { %v3122_v3 = vadd.f32 0.2548296, %v3121_v2 }
0x183d   : > { %v3123_v52 = vmul.f32 %v3122_v3, %v3113_v55 }
0x183f   : > { %v3128_v5 = vmul.f32 %v3833_v4, %v3123_v52 }
0x1841   : > { %v3129_v6 = vsub.f32 1.0, %v3128_v5 }
0x1843   : > { %v3131_v7 = vsub.f32 0.0, %v3129_v6 }
0x1845   : > { %v3132_v9 = vsel %vm3130_vm5, %v3131_v7, %v3129_v6 }
0x1846   : > { %v3133_v12 = vadd.f32 1.0, %v3132_v9 }
0x1848   : > { %v3134_v14 = vmul.f32 %v3133_v12, %v3095_v11 }
0x184a   : > { %3571 = vmatmul.msk.f32.vlgmr.msrb.gmra.mxu2 %vm3135_vm6, %v3134_v14 }
0x18cd   : > { %v3156_v16 = vpop.f32.mrf.mxu2 }
0x18ce   : > { %v3159_v13 = vadd.f32 %v3156_v16, %v4888_v10 }
0x18d0   : > { %v3163_v17 = vadd.f32 %v3783_v15, %v3159_v13 }
0x18d2   : > { %v3166_v18 = vsel %vm1257_vm0, %v3163_v17, 0.0 }
0x18d3   : > { %3167 = vadd.xlane.f32.xlu0 %v3166_v18 }
0x1946   : > { %v3168_v43 = vpop.xlane.xlu0 %3167 }
0x1947   : > { %v3169_v19 = vmul.f32 %v3168_v43, %v4661_v8 }
0x1949   : > { %v3170_v20 = vsub.f32 %v3163_v17, %v3169_v19 }
0x194b   : > { %v3171_v21 = vmul.f32 %v3170_v20, %v3170_v20 }
0x194d   : > { %v3172_v22 = vsel %vm1257_vm0, %v3171_v21, 0.0 }
0x194e   : > { %3173 = vadd.xlane.f32.xlu1 %v3172_v22 }
0x19c1   : > { %v3174_v24 = vpop.xlane.xlu1 %3173 }
0x19c2   : > { %v3175_v25 = vmul.f32 %v3174_v24, %v4661_v8 }
0x19c4   : > { %v3176_v26 = vadd.f32 1e-12, %v3175_v25 }
0x19c6   : > { %3834 = vrsqrt.f32 %v3176_v26  ;;  %vm3183_vm8 = vweird.f32 %v3176_v26 }
0x19cc   : > { %v3835_v10 = vpop.eup %3834 }
0x19cd   : > { %v3178_v27 = vmul.f32 %v3835_v10, %v3176_v26  ;;  %vm3184_vm7 = vweird.f32 %v3835_v10 }
0x19ce   : > { %vm3185_vm9 = vmor %vm3183_vm8, %vm3184_vm7 }
0x19cf   : > { %v3179_v28 = vmul.f32 %v3835_v10, %v3178_v27 }
0x19d1   : > { %v3180_v29 = vmul.f32 0.5, %v3179_v28 }
0x19d3   : > { %v3181_v46 = vsub.f32 1.5, %v3180_v29 }
0x19d5   : > { %v3182_v30 = vmul.f32 %v3835_v10, %v3181_v46 }
0x19d7   : > { %v3186_v32 = vsel %vm3185_vm9, %v3835_v10, %v3182_v30 }
0x19d8   : > { %v3187_v34 = vmul.f32 %v3186_v32, %v3170_v20 }
0x19da   : > { %v3191_v35 = vmul.f32 %v3784_v31, %v3187_v34 }
0x19dc   : > { %v3195_v8 = vadd.f32 %v3785_v33, %v3191_v35 }
0x19de   : > { %3196 = vst.msk [vmem:[%s1245_s16] sm:$0xff] %vm1257_vm0, %v3195_v8 }
0x19df PF: > { %p82_p1 = scmp.ge.s32.totalorder %s4581_s8, 4   ;;  %s4994_s7 = smov %s4182_s10 }
0x19e0   : > { %s4995_s10 = smov %s4186_s11  ;;  %s4996_s11 = smov %s4592_s22 }
0x19e1   : > { %s4997_s15 = smov %s4581_s8  ;;  %84 = sbr.rel (!%p82_p1) target bundleno = 69 (0x45), region = 322 }
0x19e6   :  { %3216 = vsyncpa [#allocation3], 1 }
0x19e7   :  { %3218 = vsyncpa [#allocation3 + $0x1], 1 }
0x19e8   :  { %3219 = vsyncpa [#allocation5], 1 }
0x19e9   :  { %3220 = vsyncpa [#allocation8], 1 }
0x19ea   :  { %3221 = vsyncpa [#allocation11], 1 }
0x19eb   :  { %3222 = vsyncpa [#allocation14], 1 }
0x19ec   :  { %3223 = vsyncpa [#allocation17], 1 }

</bundles_post_ra>
